<compile_context>
chip_gen: v7x
topology: tpu7x:2x2x1
jax: 0.10.0
libtpu: 0.0.40
codegen_flags: <defaults>
</compile_context>

<pallas_src>
import jax
import jax.numpy as jnp
from jax.experimental import pallas as pl
from jax.experimental.pallas import tpu as pltpu

N_CHANNELS = 4                     # the "n" of CNNModel1
IMG = 28                           # fc1 = 26*26*n  =>  28x28 inputs
OUT_HW = IMG - 2                   # 26 (valid 3x3 conv)
NUM_CLASSES = 10
W_PAD = 32                         # width padded 28 -> 32 (sublane-aligned rows)
FLAT_IN = IMG * W_PAD              # 896 flattened padded input pixels per image
ROW_FEAT = N_CHANNELS * W_PAD      # 128: one conv-output row, all channels
FEAT_PAD = OUT_HW * ROW_FEAT       # 3328 padded feature count
KROWS = 3 * W_PAD                  # 96: three input rows feed one output row
CLS_PAD = 16                       # classes padded 10 -> 16 (>= min sublane tile)
TB = 128                           # batch tile on lanes (256 viable on v6e for big B)


def fused_cnn_kernel(x_ref, wc_ref, cb_ref, wT_ref, b_ref, o_ref, act_ref):
    """x_ref : (FLAT_IN, TB) bf16   input, batch on lanes, flat index = h*32 + w
       wc_ref: (ROW_FEAT, KROWS) bf16 lowered 3x3 conv weights (VMEM-resident)
       cb_ref: (ROW_FEAT, 1) f32    conv bias broadcast per (channel, col)
       wT_ref: (CLS_PAD, FEAT_PAD) bf16 rearranged fc weights (VMEM-resident)
       b_ref : (CLS_PAD, 1) f32     fc bias, padded classes = -1e30
       o_ref : (CLS_PAD, TB) f32    log-probs (classes x batch)
       act_ref: VMEM scratch (FEAT_PAD, TB) bf16 activation slab."""
    # ---- 3x3 conv on the MXU: one (128,96)@(96,TB) matmul per output row -----
    for h in range(OUT_HW):
        rows = x_ref[pl.ds(h * W_PAD, KROWS), :]                   # (96, TB) bf16
        conv = jnp.dot(wc_ref[...], rows,
                       preferred_element_type=jnp.float32)         # (128, TB) f32
        # sigmoid on the EUP; dead columns (w >= 26) get sigmoid(bias) but their
        # fc weight rows are exactly zero, so nothing leaks into the logits.
        act_ref[pl.ds(h * ROW_FEAT, ROW_FEAT), :] = jax.nn.sigmoid(
            conv + cb_ref[...]).astype(act_ref.dtype)

    # TODO(synk): Dropout(p=0.5) is identity in eval mode; training-mode RNG mask
    # (pltpu.prng_seed / prng_random_bits) is not implemented.

    # ---- fc + log_softmax: (16, 3328) @ (3328, TB) bf16 -> f32 on the MXU ----
    logits = jnp.dot(wT_ref[...], act_ref[...],
                     preferred_element_type=jnp.float32) + b_ref[...]
    m = jnp.max(logits, axis=0, keepdims=True)
    s = logits - m
    lse = jnp.log(jnp.sum(jnp.exp(s), axis=0, keepdims=True))
    o_ref[...] = s - lse


def cnn_model1_forward(x, conv_w, conv_b, fc_w, fc_b):
    """x: (B,1,28,28); conv_w: (n,3,3) (torch (n,1,3,3) squeezed); conv_b: (n,)
       fc_w: (26*26*n, 10) (torch Linear weight transposed); fc_b: (10,)"""
    B = x.shape[0]
    B_pad = TB * pl.cdiv(B, TB)

    # ---- input: pad batch/W, flatten spatial, put batch on lanes --------------
    # TODO(synk): this pad+reshape+transpose is an extra HBM pass outside the
    # kernel; a producer that emits (feature, batch) layout directly would remove it.
    x_im = x[:, 0, :, :].astype(jnp.float32)                       # (B, 28, 28)
    x_p = jnp.pad(x_im, ((0, B_pad - B), (0, 0), (0, W_PAD - IMG)))
    x_flat = x_p.reshape(B_pad, FLAT_IN).T.astype(jnp.bfloat16)    # (896, B_pad)

    # ---- lowered conv matrix Wc: row = c*32 + w_out, col = ki*32 + w_in -------
    wc4 = jnp.zeros((N_CHANNELS, 3, W_PAD, W_PAD), jnp.float32)    # [c, ki, w_out, w_in]
    wo = jnp.arange(OUT_HW)
    for c in range(N_CHANNELS):
        for ki in range(3):
            for kj in range(3):
                wc4 = wc4.at[c, ki, wo, wo + kj].set(conv_w[c, ki, kj])
    wc = jnp.transpose(wc4, (0, 2, 1, 3)).reshape(ROW_FEAT, KROWS).astype(jnp.bfloat16)

    cb_bcast = jnp.repeat(conv_b.astype(jnp.float32), W_PAD).reshape(ROW_FEAT, 1)

    # ---- fc weights: torch flatten order (c,h,w) -> kernel slab (h, c, w_pad) -
    w_r = fc_w.T.astype(jnp.float32).reshape(NUM_CLASSES, N_CHANNELS, OUT_HW, OUT_HW)
    w_r = jnp.transpose(w_r, (0, 2, 1, 3))                         # (10, 26, n, 26)
    wT = jnp.zeros((CLS_PAD, OUT_HW, N_CHANNELS, W_PAD), jnp.float32)
    wT = wT.at[:NUM_CLASSES, :, :, :OUT_HW].set(w_r)
    wT = wT.reshape(CLS_PAD, FEAT_PAD).astype(jnp.bfloat16)        # (16, 3328)

    b_pad = jnp.full((CLS_PAD, 1), -1e30, jnp.float32)             # stays f32
    b_pad = b_pad.at[:NUM_CLASSES, 0].set(fc_b.astype(jnp.float32))

    out_t = pl.pallas_call(
        fused_cnn_kernel,
        grid=(B_pad // TB,),
        out_shape=jax.ShapeDtypeStruct((CLS_PAD, B_pad), jnp.float32),
        in_specs=[
            pl.BlockSpec((FLAT_IN, TB), lambda i: (0, i)),          # images
            pl.BlockSpec((ROW_FEAT, KROWS), lambda i: (0, 0)),      # conv matrix (resident)
            pl.BlockSpec((ROW_FEAT, 1), lambda i: (0, 0)),          # conv bias
            pl.BlockSpec((CLS_PAD, FEAT_PAD), lambda i: (0, 0)),    # fc W (resident)
            pl.BlockSpec((CLS_PAD, 1), lambda i: (0, 0)),           # fc bias
        ],
        out_specs=pl.BlockSpec((CLS_PAD, TB), lambda i: (0, i)),
        scratch_shapes=[pltpu.VMEM((FEAT_PAD, TB), jnp.bfloat16)],
        compiler_params=pltpu.CompilerParams(
            dimension_semantics=("parallel",)),
    )(x_flat, wc, cb_bcast, wT, b_pad)

    # back to torch layout: (B, 10) log-probabilities
    return out_t[:NUM_CLASSES, :B].T


def reference_forward(x, conv_w, conv_b, fc_w, fc_b):
    """Pure-JAX f32 reference matching the PyTorch module (eval mode)."""
    out = jax.lax.conv_general_dilated(
        x, conv_w[:, None, :, :], window_strides=(1, 1), padding="VALID",
        dimension_numbers=("NCHW", "OIHW", "NCHW"),
        precision=jax.lax.Precision.HIGHEST)
    out = jax.nn.sigmoid(out + conv_b[None, :, None, None])
    out = out.reshape(out.shape[0], -1)
    logits = jnp.dot(out, fc_w, precision=jax.lax.Precision.HIGHEST) + fc_b
    return jax.nn.log_softmax(logits, axis=-1)


if __name__ == "__main__":
    key = jax.random.PRNGKey(0)
    k_x, k_cw, k_cb, k_fw, k_fb = jax.random.split(key, 5)

    B = 2
    feat = N_CHANNELS * OUT_HW * OUT_HW     # 26*26*n = 2704

    x = jax.random.normal(k_x, (B, 1, IMG, IMG), jnp.float32)
    conv_w = 0.1 * jax.random.normal(k_cw, (N_CHANNELS, 3, 3), jnp.float32)
    conv_b = 0.1 * jax.random.normal(k_cb, (N_CHANNELS,), jnp.float32)
    fc_w = 0.02 * jax.random.normal(k_fw, (feat, NUM_CLASSES), jnp.float32)
    fc_b = 0.02 * jax.random.normal(k_fb, (NUM_CLASSES,), jnp.float32)

    out = jax.jit(cnn_model1_forward)(x, conv_w, conv_b, fc_w, fc_b)
    jax.block_until_ready(out)
    assert out.shape == (B, NUM_CLASSES) and out.dtype == jnp.float32

    ref = reference_forward(x, conv_w, conv_b, fc_w, fc_b)
    max_err = float(jnp.max(jnp.abs(out - ref)))
    # bf16 MXU operands (f32 accumulation) => relaxed tolerance vs f32 reference.
    assert jnp.allclose(out, ref, atol=2e-2, rtol=2e-2), max_err
    print("KERNEL_OK")
</pallas_src>

<mosaic_0001>
module attributes {stable_mosaic.version = 11 : i64} {
  func.func @fused_cnn_kernel(%arg0: i32, %arg1: memref<896x128xbf16, #tpu.memory_space<vmem>>, %arg2: memref<128x96xbf16, #tpu.memory_space<vmem>>, %arg3: memref<128x1xf32, #tpu.memory_space<vmem>>, %arg4: memref<16x3328xbf16, #tpu.memory_space<vmem>>, %arg5: memref<16x1xf32, #tpu.memory_space<vmem>>, %arg6: memref<16x128xf32, #tpu.memory_space<vmem>>, %arg7: memref<3328x128xbf16, #tpu.memory_space<vmem>>) attributes {dimension_semantics = [#tpu.dimension_semantics<parallel>], iteration_bounds = array<i64: 1>, scalar_prefetch = 0 : i64, scratch_operands = 1 : i64, tpu.core_type = #tpu.core_type<tc>, window_params = [{transform_indices = @transform_0, window_bounds = array<i64: 896, 128>}, {pipeline_mode = #tpu.pipeline_mode<synchronous>, transform_indices = @transform_1, window_bounds = array<i64: 128, 96>}, {pipeline_mode = #tpu.pipeline_mode<synchronous>, transform_indices = @transform_2, window_bounds = array<i64: 128, 1>}, {pipeline_mode = #tpu.pipeline_mode<synchronous>, transform_indices = @transform_3, window_bounds = array<i64: 16, 3328>}, {pipeline_mode = #tpu.pipeline_mode<synchronous>, transform_indices = @transform_4, window_bounds = array<i64: 16, 1>}, {transform_indices = @transform_5, window_bounds = array<i64: 16, 128>}]} {
    %c0 = arith.constant 0 : index
    %c0_0 = arith.constant 0 : index
    %0 = vector.load %arg1[%c0, %c0_0] : memref<896x128xbf16, #tpu.memory_space<vmem>>, vector<96x128xbf16>
    %c0_1 = arith.constant 0 : index
    %c0_2 = arith.constant 0 : index
    %1 = vector.load %arg2[%c0_1, %c0_2] : memref<128x96xbf16, #tpu.memory_space<vmem>>, vector<128x96xbf16>
    %cst = arith.constant dense<0.000000e+00> : vector<128x128xf32>
    %2 = tpu.matmul %1, %0, %cst {dimension_numbers = #tpu.dot_dimension_numbers<[1], [0], [0], [1], [0, 0, 1, 1], [], []>} : vector<128x96xbf16>, vector<96x128xbf16>, vector<128x128xf32> -> vector<128x128xf32>
    %c0_3 = arith.constant 0 : index
    %c0_4 = arith.constant 0 : index
    %3 = vector.load %arg3[%c0_3, %c0_4] : memref<128x1xf32, #tpu.memory_space<vmem>>, vector<128x1xf32>
    %4 = vector.broadcast %3 : vector<128x1xf32> to vector<128x128xf32>
    %5 = arith.addf %2, %4 : vector<128x128xf32>
    %6 = arith.negf %5 : vector<128x128xf32>
    %7 = math.exp %6 : vector<128x128xf32>
    %cst_5 = arith.constant 1.000000e+00 : f32
    %8 = vector.broadcast %cst_5 : f32 to vector<128x128xf32>
    %9 = arith.addf %8, %7 : vector<128x128xf32>
    %10 = arith.divf %8, %9 : vector<128x128xf32>
    %11 = arith.truncf %10 : vector<128x128xf32> to vector<128x128xbf16>
    %c0_6 = arith.constant 0 : index
    %c0_7 = arith.constant 0 : index
    %12 = vector.load %arg7[%c0_6, %c0_7] : memref<3328x128xbf16, #tpu.memory_space<vmem>>, vector<128x128xbf16>
    tpu.vector_store %arg7[%c0_6, %c0_7], %11 {strides = array<i32>} : memref<3328x128xbf16, #tpu.memory_space<vmem>>, vector<128x128xbf16>,
    %c32 = arith.constant 32 : index
    %c0_8 = arith.constant 0 : index
    %13 = vector.load %arg1[%c32, %c0_8] : memref<896x128xbf16, #tpu.memory_space<vmem>>, vector<96x128xbf16>
    %c0_9 = arith.constant 0 : index
    %c0_10 = arith.constant 0 : index
    %14 = vector.load %arg2[%c0_9, %c0_10] : memref<128x96xbf16, #tpu.memory_space<vmem>>, vector<128x96xbf16>
    %cst_11 = arith.constant dense<0.000000e+00> : vector<128x128xf32>
    %15 = tpu.matmul %14, %13, %cst_11 {dimension_numbers = #tpu.dot_dimension_numbers<[1], [0], [0], [1], [0, 0, 1, 1], [], []>} : vector<128x96xbf16>, vector<96x128xbf16>, vector<128x128xf32> -> vector<128x128xf32>
    %c0_12 = arith.constant 0 : index
    %c0_13 = arith.constant 0 : index
    %16 = vector.load %arg3[%c0_12, %c0_13] : memref<128x1xf32, #tpu.memory_space<vmem>>, vector<128x1xf32>
    %17 = vector.broadcast %16 : vector<128x1xf32> to vector<128x128xf32>
    %18 = arith.addf %15, %17 : vector<128x128xf32>
    %19 = arith.negf %18 : vector<128x128xf32>
    %20 = math.exp %19 : vector<128x128xf32>
    %cst_14 = arith.constant 1.000000e+00 : f32
    %21 = vector.broadcast %cst_14 : f32 to vector<128x128xf32>
    %22 = arith.addf %21, %20 : vector<128x128xf32>
    %23 = arith.divf %21, %22 : vector<128x128xf32>
    %24 = arith.truncf %23 : vector<128x128xf32> to vector<128x128xbf16>
    %c128 = arith.constant 128 : index
    %c0_15 = arith.constant 0 : index
    %25 = vector.load %arg7[%c128, %c0_15] : memref<3328x128xbf16, #tpu.memory_space<vmem>>, vector<128x128xbf16>
    tpu.vector_store %arg7[%c128, %c0_15], %24 {strides = array<i32>} : memref<3328x128xbf16, #tpu.memory_space<vmem>>, vector<128x128xbf16>,
    %c64 = arith.constant 64 : index
    %c0_16 = arith.constant 0 : index
    %26 = vector.load %arg1[%c64, %c0_16] : memref<896x128xbf16, #tpu.memory_space<vmem>>, vector<96x128xbf16>
    %c0_17 = arith.constant 0 : index
    %c0_18 = arith.constant 0 : index
    %27 = vector.load %arg2[%c0_17, %c0_18] : memref<128x96xbf16, #tpu.memory_space<vmem>>, vector<128x96xbf16>
    %cst_19 = arith.constant dense<0.000000e+00> : vector<128x128xf32>
    %28 = tpu.matmul %27, %26, %cst_19 {dimension_numbers = #tpu.dot_dimension_numbers<[1], [0], [0], [1], [0, 0, 1, 1], [], []>} : vector<128x96xbf16>, vector<96x128xbf16>, vector<128x128xf32> -> vector<128x128xf32>
    %c0_20 = arith.constant 0 : index
    %c0_21 = arith.constant 0 : index
    %29 = vector.load %arg3[%c0_20, %c0_21] : memref<128x1xf32, #tpu.memory_space<vmem>>, vector<128x1xf32>
    %30 = vector.broadcast %29 : vector<128x1xf32> to vector<128x128xf32>
    %31 = arith.addf %28, %30 : vector<128x128xf32>
    %32 = arith.negf %31 : vector<128x128xf32>
    %33 = math.exp %32 : vector<128x128xf32>
    %cst_22 = arith.constant 1.000000e+00 : f32
    %34 = vector.broadcast %cst_22 : f32 to vector<128x128xf32>
    %35 = arith.addf %34, %33 : vector<128x128xf32>
    %36 = arith.divf %34, %35 : vector<128x128xf32>
    %37 = arith.truncf %36 : vector<128x128xf32> to vector<128x128xbf16>
    %c256 = arith.constant 256 : index
    %c0_23 = arith.constant 0 : index
    %38 = vector.load %arg7[%c256, %c0_23] : memref<3328x128xbf16, #tpu.memory_space<vmem>>, vector<128x128xbf16>
    tpu.vector_store %arg7[%c256, %c0_23], %37 {strides = array<i32>} : memref<3328x128xbf16, #tpu.memory_space<vmem>>, vector<128x128xbf16>,
    %c96 = arith.constant 96 : index
    %c0_24 = arith.constant 0 : index
    %39 = vector.load %arg1[%c96, %c0_24] : memref<896x128xbf16, #tpu.memory_space<vmem>>, vector<96x128xbf16>
    %c0_25 = arith.constant 0 : index
    %c0_26 = arith.constant 0 : index
    %40 = vector.load %arg2[%c0_25, %c0_26] : memref<128x96xbf16, #tpu.memory_space<vmem>>, vector<128x96xbf16>
    %cst_27 = arith.constant dense<0.000000e+00> : vector<128x128xf32>
    %41 = tpu.matmul %40, %39, %cst_27 {dimension_numbers = #tpu.dot_dimension_numbers<[1], [0], [0], [1], [0, 0, 1, 1], [], []>} : vector<128x96xbf16>, vector<96x128xbf16>, vector<128x128xf32> -> vector<128x128xf32>
    %c0_28 = arith.constant 0 : index
    %c0_29 = arith.constant 0 : index
    %42 = vector.load %arg3[%c0_28, %c0_29] : memref<128x1xf32, #tpu.memory_space<vmem>>, vector<128x1xf32>
    %43 = vector.broadcast %42 : vector<128x1xf32> to vector<128x128xf32>
    %44 = arith.addf %41, %43 : vector<128x128xf32>
    %45 = arith.negf %44 : vector<128x128xf32>
    %46 = math.exp %45 : vector<128x128xf32>
    %cst_30 = arith.constant 1.000000e+00 : f32
    %47 = vector.broadcast %cst_30 : f32 to vector<128x128xf32>
    %48 = arith.addf %47, %46 : vector<128x128xf32>
    %49 = arith.divf %47, %48 : vector<128x128xf32>
    %50 = arith.truncf %49 : vector<128x128xf32> to vector<128x128xbf16>
    %c384 = arith.constant 384 : index
    %c0_31 = arith.constant 0 : index
    %51 = vector.load %arg7[%c384, %c0_31] : memref<3328x128xbf16, #tpu.memory_space<vmem>>, vector<128x128xbf16>
    tpu.vector_store %arg7[%c384, %c0_31], %50 {strides = array<i32>} : memref<3328x128xbf16, #tpu.memory_space<vmem>>, vector<128x128xbf16>,
    %c128_32 = arith.constant 128 : index
    %c0_33 = arith.constant 0 : index
    %52 = vector.load %arg1[%c128_32, %c0_33] : memref<896x128xbf16, #tpu.memory_space<vmem>>, vector<96x128xbf16>
    %c0_34 = arith.constant 0 : index
    %c0_35 = arith.constant 0 : index
    %53 = vector.load %arg2[%c0_34, %c0_35] : memref<128x96xbf16, #tpu.memory_space<vmem>>, vector<128x96xbf16>
    %cst_36 = arith.constant dense<0.000000e+00> : vector<128x128xf32>
    %54 = tpu.matmul %53, %52, %cst_36 {dimension_numbers = #tpu.dot_dimension_numbers<[1], [0], [0], [1], [0, 0, 1, 1], [], []>} : vector<128x96xbf16>, vector<96x128xbf16>, vector<128x128xf32> -> vector<128x128xf32>
    %c0_37 = arith.constant 0 : index
    %c0_38 = arith.constant 0 : index
    %55 = vector.load %arg3[%c0_37, %c0_38] : memref<128x1xf32, #tpu.memory_space<vmem>>, vector<128x1xf32>
    %56 = vector.broadcast %55 : vector<128x1xf32> to vector<128x128xf32>
    %57 = arith.addf %54, %56 : vector<128x128xf32>
    %58 = arith.negf %57 : vector<128x128xf32>
    %59 = math.exp %58 : vector<128x128xf32>
    %cst_39 = arith.constant 1.000000e+00 : f32
    %60 = vector.broadcast %cst_39 : f32 to vector<128x128xf32>
    %61 = arith.addf %60, %59 : vector<128x128xf32>
    %62 = arith.divf %60, %61 : vector<128x128xf32>
    %63 = arith.truncf %62 : vector<128x128xf32> to vector<128x128xbf16>
    %c512 = arith.constant 512 : index
    %c0_40 = arith.constant 0 : index
    %64 = vector.load %arg7[%c512, %c0_40] : memref<3328x128xbf16, #tpu.memory_space<vmem>>, vector<128x128xbf16>
    tpu.vector_store %arg7[%c512, %c0_40], %63 {strides = array<i32>} : memref<3328x128xbf16, #tpu.memory_space<vmem>>, vector<128x128xbf16>,
    %c160 = arith.constant 160 : index
    %c0_41 = arith.constant 0 : index
    %65 = vector.load %arg1[%c160, %c0_41] : memref<896x128xbf16, #tpu.memory_space<vmem>>, vector<96x128xbf16>
    %c0_42 = arith.constant 0 : index
    %c0_43 = arith.constant 0 : index
    %66 = vector.load %arg2[%c0_42, %c0_43] : memref<128x96xbf16, #tpu.memory_space<vmem>>, vector<128x96xbf16>
    %cst_44 = arith.constant dense<0.000000e+00> : vector<128x128xf32>
    %67 = tpu.matmul %66, %65, %cst_44 {dimension_numbers = #tpu.dot_dimension_numbers<[1], [0], [0], [1], [0, 0, 1, 1], [], []>} : vector<128x96xbf16>, vector<96x128xbf16>, vector<128x128xf32> -> vector<128x128xf32>
    %c0_45 = arith.constant 0 : index
    %c0_46 = arith.constant 0 : index
    %68 = vector.load %arg3[%c0_45, %c0_46] : memref<128x1xf32, #tpu.memory_space<vmem>>, vector<128x1xf32>
    %69 = vector.broadcast %68 : vector<128x1xf32> to vector<128x128xf32>
    %70 = arith.addf %67, %69 : vector<128x128xf32>
    %71 = arith.negf %70 : vector<128x128xf32>
    %72 = math.exp %71 : vector<128x128xf32>
    %cst_47 = arith.constant 1.000000e+00 : f32
    %73 = vector.broadcast %cst_47 : f32 to vector<128x128xf32>
    %74 = arith.addf %73, %72 : vector<128x128xf32>
    %75 = arith.divf %73, %74 : vector<128x128xf32>
    %76 = arith.truncf %75 : vector<128x128xf32> to vector<128x128xbf16>
    %c640 = arith.constant 640 : index
    %c0_48 = arith.constant 0 : index
    %77 = vector.load %arg7[%c640, %c0_48] : memref<3328x128xbf16, #tpu.memory_space<vmem>>, vector<128x128xbf16>
    tpu.vector_store %arg7[%c640, %c0_48], %76 {strides = array<i32>} : memref<3328x128xbf16, #tpu.memory_space<vmem>>, vector<128x128xbf16>,
    %c192 = arith.constant 192 : index
    %c0_49 = arith.constant 0 : index
    %78 = vector.load %arg1[%c192, %c0_49] : memref<896x128xbf16, #tpu.memory_space<vmem>>, vector<96x128xbf16>
    %c0_50 = arith.constant 0 : index
    %c0_51 = arith.constant 0 : index
    %79 = vector.load %arg2[%c0_50, %c0_51] : memref<128x96xbf16, #tpu.memory_space<vmem>>, vector<128x96xbf16>
    %cst_52 = arith.constant dense<0.000000e+00> : vector<128x128xf32>
    %80 = tpu.matmul %79, %78, %cst_52 {dimension_numbers = #tpu.dot_dimension_numbers<[1], [0], [0], [1], [0, 0, 1, 1], [], []>} : vector<128x96xbf16>, vector<96x128xbf16>, vector<128x128xf32> -> vector<128x128xf32>
    %c0_53 = arith.constant 0 : index
    %c0_54 = arith.constant 0 : index
    %81 = vector.load %arg3[%c0_53, %c0_54] : memref<128x1xf32, #tpu.memory_space<vmem>>, vector<128x1xf32>
    %82 = vector.broadcast %81 : vector<128x1xf32> to vector<128x128xf32>
    %83 = arith.addf %80, %82 : vector<128x128xf32>
    %84 = arith.negf %83 : vector<128x128xf32>
    %85 = math.exp %84 : vector<128x128xf32>
    %cst_55 = arith.constant 1.000000e+00 : f32
    %86 = vector.broadcast %cst_55 : f32 to vector<128x128xf32>
    %87 = arith.addf %86, %85 : vector<128x128xf32>
    %88 = arith.divf %86, %87 : vector<128x128xf32>
    %89 = arith.truncf %88 : vector<128x128xf32> to vector<128x128xbf16>
    %c768 = arith.constant 768 : index
    %c0_56 = arith.constant 0 : index
    %90 = vector.load %arg7[%c768, %c0_56] : memref<3328x128xbf16, #tpu.memory_space<vmem>>, vector<128x128xbf16>
    tpu.vector_store %arg7[%c768, %c0_56], %89 {strides = array<i32>} : memref<3328x128xbf16, #tpu.memory_space<vmem>>, vector<128x128xbf16>,
    %c224 = arith.constant 224 : index
    %c0_57 = arith.constant 0 : index
    %91 = vector.load %arg1[%c224, %c0_57] : memref<896x128xbf16, #tpu.memory_space<vmem>>, vector<96x128xbf16>
    %c0_58 = arith.constant 0 : index
    %c0_59 = arith.constant 0 : index
    %92 = vector.load %arg2[%c0_58, %c0_59] : memref<128x96xbf16, #tpu.memory_space<vmem>>, vector<128x96xbf16>
    %cst_60 = arith.constant dense<0.000000e+00> : vector<128x128xf32>
    %93 = tpu.matmul %92, %91, %cst_60 {dimension_numbers = #tpu.dot_dimension_numbers<[1], [0], [0], [1], [0, 0, 1, 1], [], []>} : vector<128x96xbf16>, vector<96x128xbf16>, vector<128x128xf32> -> vector<128x128xf32>
    %c0_61 = arith.constant 0 : index
    %c0_62 = arith.constant 0 : index
    %94 = vector.load %arg3[%c0_61, %c0_62] : memref<128x1xf32, #tpu.memory_space<vmem>>, vector<128x1xf32>
    %95 = vector.broadcast %94 : vector<128x1xf32> to vector<128x128xf32>
    %96 = arith.addf %93, %95 : vector<128x128xf32>
    %97 = arith.negf %96 : vector<128x128xf32>
    %98 = math.exp %97 : vector<128x128xf32>
    %cst_63 = arith.constant 1.000000e+00 : f32
    %99 = vector.broadcast %cst_63 : f32 to vector<128x128xf32>
    %100 = arith.addf %99, %98 : vector<128x128xf32>
    %101 = arith.divf %99, %100 : vector<128x128xf32>
    %102 = arith.truncf %101 : vector<128x128xf32> to vector<128x128xbf16>
    %c896 = arith.constant 896 : index
    %c0_64 = arith.constant 0 : index
    %103 = vector.load %arg7[%c896, %c0_64] : memref<3328x128xbf16, #tpu.memory_space<vmem>>, vector<128x128xbf16>
    tpu.vector_store %arg7[%c896, %c0_64], %102 {strides = array<i32>} : memref<3328x128xbf16, #tpu.memory_space<vmem>>, vector<128x128xbf16>,
    %c256_65 = arith.constant 256 : index
    %c0_66 = arith.constant 0 : index
    %104 = vector.load %arg1[%c256_65, %c0_66] : memref<896x128xbf16, #tpu.memory_space<vmem>>, vector<96x128xbf16>
    %c0_67 = arith.constant 0 : index
    %c0_68 = arith.constant 0 : index
    %105 = vector.load %arg2[%c0_67, %c0_68] : memref<128x96xbf16, #tpu.memory_space<vmem>>, vector<128x96xbf16>
    %cst_69 = arith.constant dense<0.000000e+00> : vector<128x128xf32>
    %106 = tpu.matmul %105, %104, %cst_69 {dimension_numbers = #tpu.dot_dimension_numbers<[1], [0], [0], [1], [0, 0, 1, 1], [], []>} : vector<128x96xbf16>, vector<96x128xbf16>, vector<128x128xf32> -> vector<128x128xf32>
    %c0_70 = arith.constant 0 : index
    %c0_71 = arith.constant 0 : index
    %107 = vector.load %arg3[%c0_70, %c0_71] : memref<128x1xf32, #tpu.memory_space<vmem>>, vector<128x1xf32>
    %108 = vector.broadcast %107 : vector<128x1xf32> to vector<128x128xf32>
    %109 = arith.addf %106, %108 : vector<128x128xf32>
    %110 = arith.negf %109 : vector<128x128xf32>
    %111 = math.exp %110 : vector<128x128xf32>
    %cst_72 = arith.constant 1.000000e+00 : f32
    %112 = vector.broadcast %cst_72 : f32 to vector<128x128xf32>
    %113 = arith.addf %112, %111 : vector<128x128xf32>
    %114 = arith.divf %112, %113 : vector<128x128xf32>
    %115 = arith.truncf %114 : vector<128x128xf32> to vector<128x128xbf16>
    %c1024 = arith.constant 1024 : index
    %c0_73 = arith.constant 0 : index
    %116 = vector.load %arg7[%c1024, %c0_73] : memref<3328x128xbf16, #tpu.memory_space<vmem>>, vector<128x128xbf16>
    tpu.vector_store %arg7[%c1024, %c0_73], %115 {strides = array<i32>} : memref<3328x128xbf16, #tpu.memory_space<vmem>>, vector<128x128xbf16>,
    %c288 = arith.constant 288 : index
    %c0_74 = arith.constant 0 : index
    %117 = vector.load %arg1[%c288, %c0_74] : memref<896x128xbf16, #tpu.memory_space<vmem>>, vector<96x128xbf16>
    %c0_75 = arith.constant 0 : index
    %c0_76 = arith.constant 0 : index
    %118 = vector.load %arg2[%c0_75, %c0_76] : memref<128x96xbf16, #tpu.memory_space<vmem>>, vector<128x96xbf16>
    %cst_77 = arith.constant dense<0.000000e+00> : vector<128x128xf32>
    %119 = tpu.matmul %118, %117, %cst_77 {dimension_numbers = #tpu.dot_dimension_numbers<[1], [0], [0], [1], [0, 0, 1, 1], [], []>} : vector<128x96xbf16>, vector<96x128xbf16>, vector<128x128xf32> -> vector<128x128xf32>
    %c0_78 = arith.constant 0 : index
    %c0_79 = arith.constant 0 : index
    %120 = vector.load %arg3[%c0_78, %c0_79] : memref<128x1xf32, #tpu.memory_space<vmem>>, vector<128x1xf32>
    %121 = vector.broadcast %120 : vector<128x1xf32> to vector<128x128xf32>
    %122 = arith.addf %119, %121 : vector<128x128xf32>
    %123 = arith.negf %122 : vector<128x128xf32>
    %124 = math.exp %123 : vector<128x128xf32>
    %cst_80 = arith.constant 1.000000e+00 : f32
    %125 = vector.broadcast %cst_80 : f32 to vector<128x128xf32>
    %126 = arith.addf %125, %124 : vector<128x128xf32>
    %127 = arith.divf %125, %126 : vector<128x128xf32>
    %128 = arith.truncf %127 : vector<128x128xf32> to vector<128x128xbf16>
    %c1152 = arith.constant 1152 : index
    %c0_81 = arith.constant 0 : index
    %129 = vector.load %arg7[%c1152, %c0_81] : memref<3328x128xbf16, #tpu.memory_space<vmem>>, vector<128x128xbf16>
    tpu.vector_store %arg7[%c1152, %c0_81], %128 {strides = array<i32>} : memref<3328x128xbf16, #tpu.memory_space<vmem>>, vector<128x128xbf16>,
    %c320 = arith.constant 320 : index
    %c0_82 = arith.constant 0 : index
    %130 = vector.load %arg1[%c320, %c0_82] : memref<896x128xbf16, #tpu.memory_space<vmem>>, vector<96x128xbf16>
    %c0_83 = arith.constant 0 : index
    %c0_84 = arith.constant 0 : index
    %131 = vector.load %arg2[%c0_83, %c0_84] : memref<128x96xbf16, #tpu.memory_space<vmem>>, vector<128x96xbf16>
    %cst_85 = arith.constant dense<0.000000e+00> : vector<128x128xf32>
    %132 = tpu.matmul %131, %130, %cst_85 {dimension_numbers = #tpu.dot_dimension_numbers<[1], [0], [0], [1], [0, 0, 1, 1], [], []>} : vector<128x96xbf16>, vector<96x128xbf16>, vector<128x128xf32> -> vector<128x128xf32>
    %c0_86 = arith.constant 0 : index
    %c0_87 = arith.constant 0 : index
    %133 = vector.load %arg3[%c0_86, %c0_87] : memref<128x1xf32, #tpu.memory_space<vmem>>, vector<128x1xf32>
    %134 = vector.broadcast %133 : vector<128x1xf32> to vector<128x128xf32>
    %135 = arith.addf %132, %134 : vector<128x128xf32>
    %136 = arith.negf %135 : vector<128x128xf32>
    %137 = math.exp %136 : vector<128x128xf32>
    %cst_88 = arith.constant 1.000000e+00 : f32
    %138 = vector.broadcast %cst_88 : f32 to vector<128x128xf32>
    %139 = arith.addf %138, %137 : vector<128x128xf32>
    %140 = arith.divf %138, %139 : vector<128x128xf32>
    %141 = arith.truncf %140 : vector<128x128xf32> to vector<128x128xbf16>
    %c1280 = arith.constant 1280 : index
    %c0_89 = arith.constant 0 : index
    %142 = vector.load %arg7[%c1280, %c0_89] : memref<3328x128xbf16, #tpu.memory_space<vmem>>, vector<128x128xbf16>
    tpu.vector_store %arg7[%c1280, %c0_89], %141 {strides = array<i32>} : memref<3328x128xbf16, #tpu.memory_space<vmem>>, vector<128x128xbf16>,
    %c352 = arith.constant 352 : index
    %c0_90 = arith.constant 0 : index
    %143 = vector.load %arg1[%c352, %c0_90] : memref<896x128xbf16, #tpu.memory_space<vmem>>, vector<96x128xbf16>
    %c0_91 = arith.constant 0 : index
    %c0_92 = arith.constant 0 : index
    %144 = vector.load %arg2[%c0_91, %c0_92] : memref<128x96xbf16, #tpu.memory_space<vmem>>, vector<128x96xbf16>
    %cst_93 = arith.constant dense<0.000000e+00> : vector<128x128xf32>
    %145 = tpu.matmul %144, %143, %cst_93 {dimension_numbers = #tpu.dot_dimension_numbers<[1], [0], [0], [1], [0, 0, 1, 1], [], []>} : vector<128x96xbf16>, vector<96x128xbf16>, vector<128x128xf32> -> vector<128x128xf32>
    %c0_94 = arith.constant 0 : index
    %c0_95 = arith.constant 0 : index
    %146 = vector.load %arg3[%c0_94, %c0_95] : memref<128x1xf32, #tpu.memory_space<vmem>>, vector<128x1xf32>
    %147 = vector.broadcast %146 : vector<128x1xf32> to vector<128x128xf32>
    %148 = arith.addf %145, %147 : vector<128x128xf32>
    %149 = arith.negf %148 : vector<128x128xf32>
    %150 = math.exp %149 : vector<128x128xf32>
    %cst_96 = arith.constant 1.000000e+00 : f32
    %151 = vector.broadcast %cst_96 : f32 to vector<128x128xf32>
    %152 = arith.addf %151, %150 : vector<128x128xf32>
    %153 = arith.divf %151, %152 : vector<128x128xf32>
    %154 = arith.truncf %153 : vector<128x128xf32> to vector<128x128xbf16>
    %c1408 = arith.constant 1408 : index
    %c0_97 = arith.constant 0 : index
    %155 = vector.load %arg7[%c1408, %c0_97] : memref<3328x128xbf16, #tpu.memory_space<vmem>>, vector<128x128xbf16>
    tpu.vector_store %arg7[%c1408, %c0_97], %154 {strides = array<i32>} : memref<3328x128xbf16, #tpu.memory_space<vmem>>, vector<128x128xbf16>,
    %c384_98 = arith.constant 384 : index
    %c0_99 = arith.constant 0 : index
    %156 = vector.load %arg1[%c384_98, %c0_99] : memref<896x128xbf16, #tpu.memory_space<vmem>>, vector<96x128xbf16>
    %c0_100 = arith.constant 0 : index
    %c0_101 = arith.constant 0 : index
    %157 = vector.load %arg2[%c0_100, %c0_101] : memref<128x96xbf16, #tpu.memory_space<vmem>>, vector<128x96xbf16>
    %cst_102 = arith.constant dense<0.000000e+00> : vector<128x128xf32>
    %158 = tpu.matmul %157, %156, %cst_102 {dimension_numbers = #tpu.dot_dimension_numbers<[1], [0], [0], [1], [0, 0, 1, 1], [], []>} : vector<128x96xbf16>, vector<96x128xbf16>, vector<128x128xf32> -> vector<128x128xf32>
    %c0_103 = arith.constant 0 : index
    %c0_104 = arith.constant 0 : index
    %159 = vector.load %arg3[%c0_103, %c0_104] : memref<128x1xf32, #tpu.memory_space<vmem>>, vector<128x1xf32>
    %160 = vector.broadcast %159 : vector<128x1xf32> to vector<128x128xf32>
    %161 = arith.addf %158, %160 : vector<128x128xf32>
    %162 = arith.negf %161 : vector<128x128xf32>
    %163 = math.exp %162 : vector<128x128xf32>
    %cst_105 = arith.constant 1.000000e+00 : f32
    %164 = vector.broadcast %cst_105 : f32 to vector<128x128xf32>
    %165 = arith.addf %164, %163 : vector<128x128xf32>
    %166 = arith.divf %164, %165 : vector<128x128xf32>
    %167 = arith.truncf %166 : vector<128x128xf32> to vector<128x128xbf16>
    %c1536 = arith.constant 1536 : index
    %c0_106 = arith.constant 0 : index
    %168 = vector.load %arg7[%c1536, %c0_106] : memref<3328x128xbf16, #tpu.memory_space<vmem>>, vector<128x128xbf16>
    tpu.vector_store %arg7[%c1536, %c0_106], %167 {strides = array<i32>} : memref<3328x128xbf16, #tpu.memory_space<vmem>>, vector<128x128xbf16>,
    %c416 = arith.constant 416 : index
    %c0_107 = arith.constant 0 : index
    %169 = vector.load %arg1[%c416, %c0_107] : memref<896x128xbf16, #tpu.memory_space<vmem>>, vector<96x128xbf16>
    %c0_108 = arith.constant 0 : index
    %c0_109 = arith.constant 0 : index
    %170 = vector.load %arg2[%c0_108, %c0_109] : memref<128x96xbf16, #tpu.memory_space<vmem>>, vector<128x96xbf16>
    %cst_110 = arith.constant dense<0.000000e+00> : vector<128x128xf32>
    %171 = tpu.matmul %170, %169, %cst_110 {dimension_numbers = #tpu.dot_dimension_numbers<[1], [0], [0], [1], [0, 0, 1, 1], [], []>} : vector<128x96xbf16>, vector<96x128xbf16>, vector<128x128xf32> -> vector<128x128xf32>
    %c0_111 = arith.constant 0 : index
    %c0_112 = arith.constant 0 : index
    %172 = vector.load %arg3[%c0_111, %c0_112] : memref<128x1xf32, #tpu.memory_space<vmem>>, vector<128x1xf32>
    %173 = vector.broadcast %172 : vector<128x1xf32> to vector<128x128xf32>
    %174 = arith.addf %171, %173 : vector<128x128xf32>
    %175 = arith.negf %174 : vector<128x128xf32>
    %176 = math.exp %175 : vector<128x128xf32>
    %cst_113 = arith.constant 1.000000e+00 : f32
    %177 = vector.broadcast %cst_113 : f32 to vector<128x128xf32>
    %178 = arith.addf %177, %176 : vector<128x128xf32>
    %179 = arith.divf %177, %178 : vector<128x128xf32>
    %180 = arith.truncf %179 : vector<128x128xf32> to vector<128x128xbf16>
    %c1664 = arith.constant 1664 : index
    %c0_114 = arith.constant 0 : index
    %181 = vector.load %arg7[%c1664, %c0_114] : memref<3328x128xbf16, #tpu.memory_space<vmem>>, vector<128x128xbf16>
    tpu.vector_store %arg7[%c1664, %c0_114], %180 {strides = array<i32>} : memref<3328x128xbf16, #tpu.memory_space<vmem>>, vector<128x128xbf16>,
    %c448 = arith.constant 448 : index
    %c0_115 = arith.constant 0 : index
    %182 = vector.load %arg1[%c448, %c0_115] : memref<896x128xbf16, #tpu.memory_space<vmem>>, vector<96x128xbf16>
    %c0_116 = arith.constant 0 : index
    %c0_117 = arith.constant 0 : index
    %183 = vector.load %arg2[%c0_116, %c0_117] : memref<128x96xbf16, #tpu.memory_space<vmem>>, vector<128x96xbf16>
    %cst_118 = arith.constant dense<0.000000e+00> : vector<128x128xf32>
    %184 = tpu.matmul %183, %182, %cst_118 {dimension_numbers = #tpu.dot_dimension_numbers<[1], [0], [0], [1], [0, 0, 1, 1], [], []>} : vector<128x96xbf16>, vector<96x128xbf16>, vector<128x128xf32> -> vector<128x128xf32>
    %c0_119 = arith.constant 0 : index
    %c0_120 = arith.constant 0 : index
    %185 = vector.load %arg3[%c0_119, %c0_120] : memref<128x1xf32, #tpu.memory_space<vmem>>, vector<128x1xf32>
    %186 = vector.broadcast %185 : vector<128x1xf32> to vector<128x128xf32>
    %187 = arith.addf %184, %186 : vector<128x128xf32>
    %188 = arith.negf %187 : vector<128x128xf32>
    %189 = math.exp %188 : vector<128x128xf32>
    %cst_121 = arith.constant 1.000000e+00 : f32
    %190 = vector.broadcast %cst_121 : f32 to vector<128x128xf32>
    %191 = arith.addf %190, %189 : vector<128x128xf32>
    %192 = arith.divf %190, %191 : vector<128x128xf32>
    %193 = arith.truncf %192 : vector<128x128xf32> to vector<128x128xbf16>
    %c1792 = arith.constant 1792 : index
    %c0_122 = arith.constant 0 : index
    %194 = vector.load %arg7[%c1792, %c0_122] : memref<3328x128xbf16, #tpu.memory_space<vmem>>, vector<128x128xbf16>
    tpu.vector_store %arg7[%c1792, %c0_122], %193 {strides = array<i32>} : memref<3328x128xbf16, #tpu.memory_space<vmem>>, vector<128x128xbf16>,
    %c480 = arith.constant 480 : index
    %c0_123 = arith.constant 0 : index
    %195 = vector.load %arg1[%c480, %c0_123] : memref<896x128xbf16, #tpu.memory_space<vmem>>, vector<96x128xbf16>
    %c0_124 = arith.constant 0 : index
    %c0_125 = arith.constant 0 : index
    %196 = vector.load %arg2[%c0_124, %c0_125] : memref<128x96xbf16, #tpu.memory_space<vmem>>, vector<128x96xbf16>
    %cst_126 = arith.constant dense<0.000000e+00> : vector<128x128xf32>
    %197 = tpu.matmul %196, %195, %cst_126 {dimension_numbers = #tpu.dot_dimension_numbers<[1], [0], [0], [1], [0, 0, 1, 1], [], []>} : vector<128x96xbf16>, vector<96x128xbf16>, vector<128x128xf32> -> vector<128x128xf32>
    %c0_127 = arith.constant 0 : index
    %c0_128 = arith.constant 0 : index
    %198 = vector.load %arg3[%c0_127, %c0_128] : memref<128x1xf32, #tpu.memory_space<vmem>>, vector<128x1xf32>
    %199 = vector.broadcast %198 : vector<128x1xf32> to vector<128x128xf32>
    %200 = arith.addf %197, %199 : vector<128x128xf32>
    %201 = arith.negf %200 : vector<128x128xf32>
    %202 = math.exp %201 : vector<128x128xf32>
    %cst_129 = arith.constant 1.000000e+00 : f32
    %203 = vector.broadcast %cst_129 : f32 to vector<128x128xf32>
    %204 = arith.addf %203, %202 : vector<128x128xf32>
    %205 = arith.divf %203, %204 : vector<128x128xf32>
    %206 = arith.truncf %205 : vector<128x128xf32> to vector<128x128xbf16>
    %c1920 = arith.constant 1920 : index
    %c0_130 = arith.constant 0 : index
    %207 = vector.load %arg7[%c1920, %c0_130] : memref<3328x128xbf16, #tpu.memory_space<vmem>>, vector<128x128xbf16>
    tpu.vector_store %arg7[%c1920, %c0_130], %206 {strides = array<i32>} : memref<3328x128xbf16, #tpu.memory_space<vmem>>, vector<128x128xbf16>,
    %c512_131 = arith.constant 512 : index
    %c0_132 = arith.constant 0 : index
    %208 = vector.load %arg1[%c512_131, %c0_132] : memref<896x128xbf16, #tpu.memory_space<vmem>>, vector<96x128xbf16>
    %c0_133 = arith.constant 0 : index
    %c0_134 = arith.constant 0 : index
    %209 = vector.load %arg2[%c0_133, %c0_134] : memref<128x96xbf16, #tpu.memory_space<vmem>>, vector<128x96xbf16>
    %cst_135 = arith.constant dense<0.000000e+00> : vector<128x128xf32>
    %210 = tpu.matmul %209, %208, %cst_135 {dimension_numbers = #tpu.dot_dimension_numbers<[1], [0], [0], [1], [0, 0, 1, 1], [], []>} : vector<128x96xbf16>, vector<96x128xbf16>, vector<128x128xf32> -> vector<128x128xf32>
    %c0_136 = arith.constant 0 : index
    %c0_137 = arith.constant 0 : index
    %211 = vector.load %arg3[%c0_136, %c0_137] : memref<128x1xf32, #tpu.memory_space<vmem>>, vector<128x1xf32>
    %212 = vector.broadcast %211 : vector<128x1xf32> to vector<128x128xf32>
    %213 = arith.addf %210, %212 : vector<128x128xf32>
    %214 = arith.negf %213 : vector<128x128xf32>
    %215 = math.exp %214 : vector<128x128xf32>
    %cst_138 = arith.constant 1.000000e+00 : f32
    %216 = vector.broadcast %cst_138 : f32 to vector<128x128xf32>
    %217 = arith.addf %216, %215 : vector<128x128xf32>
    %218 = arith.divf %216, %217 : vector<128x128xf32>
    %219 = arith.truncf %218 : vector<128x128xf32> to vector<128x128xbf16>
    %c2048 = arith.constant 2048 : index
    %c0_139 = arith.constant 0 : index
    %220 = vector.load %arg7[%c2048, %c0_139] : memref<3328x128xbf16, #tpu.memory_space<vmem>>, vector<128x128xbf16>
    tpu.vector_store %arg7[%c2048, %c0_139], %219 {strides = array<i32>} : memref<3328x128xbf16, #tpu.memory_space<vmem>>, vector<128x128xbf16>,
    %c544 = arith.constant 544 : index
    %c0_140 = arith.constant 0 : index
    %221 = vector.load %arg1[%c544, %c0_140] : memref<896x128xbf16, #tpu.memory_space<vmem>>, vector<96x128xbf16>
    %c0_141 = arith.constant 0 : index
    %c0_142 = arith.constant 0 : index
    %222 = vector.load %arg2[%c0_141, %c0_142] : memref<128x96xbf16, #tpu.memory_space<vmem>>, vector<128x96xbf16>
    %cst_143 = arith.constant dense<0.000000e+00> : vector<128x128xf32>
    %223 = tpu.matmul %222, %221, %cst_143 {dimension_numbers = #tpu.dot_dimension_numbers<[1], [0], [0], [1], [0, 0, 1, 1], [], []>} : vector<128x96xbf16>, vector<96x128xbf16>, vector<128x128xf32> -> vector<128x128xf32>
    %c0_144 = arith.constant 0 : index
    %c0_145 = arith.constant 0 : index
    %224 = vector.load %arg3[%c0_144, %c0_145] : memref<128x1xf32, #tpu.memory_space<vmem>>, vector<128x1xf32>
    %225 = vector.broadcast %224 : vector<128x1xf32> to vector<128x128xf32>
    %226 = arith.addf %223, %225 : vector<128x128xf32>
    %227 = arith.negf %226 : vector<128x128xf32>
    %228 = math.exp %227 : vector<128x128xf32>
    %cst_146 = arith.constant 1.000000e+00 : f32
    %229 = vector.broadcast %cst_146 : f32 to vector<128x128xf32>
    %230 = arith.addf %229, %228 : vector<128x128xf32>
    %231 = arith.divf %229, %230 : vector<128x128xf32>
    %232 = arith.truncf %231 : vector<128x128xf32> to vector<128x128xbf16>
    %c2176 = arith.constant 2176 : index
    %c0_147 = arith.constant 0 : index
    %233 = vector.load %arg7[%c2176, %c0_147] : memref<3328x128xbf16, #tpu.memory_space<vmem>>, vector<128x128xbf16>
    tpu.vector_store %arg7[%c2176, %c0_147], %232 {strides = array<i32>} : memref<3328x128xbf16, #tpu.memory_space<vmem>>, vector<128x128xbf16>,
    %c576 = arith.constant 576 : index
    %c0_148 = arith.constant 0 : index
    %234 = vector.load %arg1[%c576, %c0_148] : memref<896x128xbf16, #tpu.memory_space<vmem>>, vector<96x128xbf16>
    %c0_149 = arith.constant 0 : index
    %c0_150 = arith.constant 0 : index
    %235 = vector.load %arg2[%c0_149, %c0_150] : memref<128x96xbf16, #tpu.memory_space<vmem>>, vector<128x96xbf16>
    %cst_151 = arith.constant dense<0.000000e+00> : vector<128x128xf32>
    %236 = tpu.matmul %235, %234, %cst_151 {dimension_numbers = #tpu.dot_dimension_numbers<[1], [0], [0], [1], [0, 0, 1, 1], [], []>} : vector<128x96xbf16>, vector<96x128xbf16>, vector<128x128xf32> -> vector<128x128xf32>
    %c0_152 = arith.constant 0 : index
    %c0_153 = arith.constant 0 : index
    %237 = vector.load %arg3[%c0_152, %c0_153] : memref<128x1xf32, #tpu.memory_space<vmem>>, vector<128x1xf32>
    %238 = vector.broadcast %237 : vector<128x1xf32> to vector<128x128xf32>
    %239 = arith.addf %236, %238 : vector<128x128xf32>
    %240 = arith.negf %239 : vector<128x128xf32>
    %241 = math.exp %240 : vector<128x128xf32>
    %cst_154 = arith.constant 1.000000e+00 : f32
    %242 = vector.broadcast %cst_154 : f32 to vector<128x128xf32>
    %243 = arith.addf %242, %241 : vector<128x128xf32>
    %244 = arith.divf %242, %243 : vector<128x128xf32>
    %245 = arith.truncf %244 : vector<128x128xf32> to vector<128x128xbf16>
    %c2304 = arith.constant 2304 : index
    %c0_155 = arith.constant 0 : index
    %246 = vector.load %arg7[%c2304, %c0_155] : memref<3328x128xbf16, #tpu.memory_space<vmem>>, vector<128x128xbf16>
    tpu.vector_store %arg7[%c2304, %c0_155], %245 {strides = array<i32>} : memref<3328x128xbf16, #tpu.memory_space<vmem>>, vector<128x128xbf16>,
    %c608 = arith.constant 608 : index
    %c0_156 = arith.constant 0 : index
    %247 = vector.load %arg1[%c608, %c0_156] : memref<896x128xbf16, #tpu.memory_space<vmem>>, vector<96x128xbf16>
    %c0_157 = arith.constant 0 : index
    %c0_158 = arith.constant 0 : index
    %248 = vector.load %arg2[%c0_157, %c0_158] : memref<128x96xbf16, #tpu.memory_space<vmem>>, vector<128x96xbf16>
    %cst_159 = arith.constant dense<0.000000e+00> : vector<128x128xf32>
    %249 = tpu.matmul %248, %247, %cst_159 {dimension_numbers = #tpu.dot_dimension_numbers<[1], [0], [0], [1], [0, 0, 1, 1], [], []>} : vector<128x96xbf16>, vector<96x128xbf16>, vector<128x128xf32> -> vector<128x128xf32>
    %c0_160 = arith.constant 0 : index
    %c0_161 = arith.constant 0 : index
    %250 = vector.load %arg3[%c0_160, %c0_161] : memref<128x1xf32, #tpu.memory_space<vmem>>, vector<128x1xf32>
    %251 = vector.broadcast %250 : vector<128x1xf32> to vector<128x128xf32>
    %252 = arith.addf %249, %251 : vector<128x128xf32>
    %253 = arith.negf %252 : vector<128x128xf32>
    %254 = math.exp %253 : vector<128x128xf32>
    %cst_162 = arith.constant 1.000000e+00 : f32
    %255 = vector.broadcast %cst_162 : f32 to vector<128x128xf32>
    %256 = arith.addf %255, %254 : vector<128x128xf32>
    %257 = arith.divf %255, %256 : vector<128x128xf32>
    %258 = arith.truncf %257 : vector<128x128xf32> to vector<128x128xbf16>
    %c2432 = arith.constant 2432 : index
    %c0_163 = arith.constant 0 : index
    %259 = vector.load %arg7[%c2432, %c0_163] : memref<3328x128xbf16, #tpu.memory_space<vmem>>, vector<128x128xbf16>
    tpu.vector_store %arg7[%c2432, %c0_163], %258 {strides = array<i32>} : memref<3328x128xbf16, #tpu.memory_space<vmem>>, vector<128x128xbf16>,
    %c640_164 = arith.constant 640 : index
    %c0_165 = arith.constant 0 : index
    %260 = vector.load %arg1[%c640_164, %c0_165] : memref<896x128xbf16, #tpu.memory_space<vmem>>, vector<96x128xbf16>
    %c0_166 = arith.constant 0 : index
    %c0_167 = arith.constant 0 : index
    %261 = vector.load %arg2[%c0_166, %c0_167] : memref<128x96xbf16, #tpu.memory_space<vmem>>, vector<128x96xbf16>
    %cst_168 = arith.constant dense<0.000000e+00> : vector<128x128xf32>
    %262 = tpu.matmul %261, %260, %cst_168 {dimension_numbers = #tpu.dot_dimension_numbers<[1], [0], [0], [1], [0, 0, 1, 1], [], []>} : vector<128x96xbf16>, vector<96x128xbf16>, vector<128x128xf32> -> vector<128x128xf32>
    %c0_169 = arith.constant 0 : index
    %c0_170 = arith.constant 0 : index
    %263 = vector.load %arg3[%c0_169, %c0_170] : memref<128x1xf32, #tpu.memory_space<vmem>>, vector<128x1xf32>
    %264 = vector.broadcast %263 : vector<128x1xf32> to vector<128x128xf32>
    %265 = arith.addf %262, %264 : vector<128x128xf32>
    %266 = arith.negf %265 : vector<128x128xf32>
    %267 = math.exp %266 : vector<128x128xf32>
    %cst_171 = arith.constant 1.000000e+00 : f32
    %268 = vector.broadcast %cst_171 : f32 to vector<128x128xf32>
    %269 = arith.addf %268, %267 : vector<128x128xf32>
    %270 = arith.divf %268, %269 : vector<128x128xf32>
    %271 = arith.truncf %270 : vector<128x128xf32> to vector<128x128xbf16>
    %c2560 = arith.constant 2560 : index
    %c0_172 = arith.constant 0 : index
    %272 = vector.load %arg7[%c2560, %c0_172] : memref<3328x128xbf16, #tpu.memory_space<vmem>>, vector<128x128xbf16>
    tpu.vector_store %arg7[%c2560, %c0_172], %271 {strides = array<i32>} : memref<3328x128xbf16, #tpu.memory_space<vmem>>, vector<128x128xbf16>,
    %c672 = arith.constant 672 : index
    %c0_173 = arith.constant 0 : index
    %273 = vector.load %arg1[%c672, %c0_173] : memref<896x128xbf16, #tpu.memory_space<vmem>>, vector<96x128xbf16>
    %c0_174 = arith.constant 0 : index
    %c0_175 = arith.constant 0 : index
    %274 = vector.load %arg2[%c0_174, %c0_175] : memref<128x96xbf16, #tpu.memory_space<vmem>>, vector<128x96xbf16>
    %cst_176 = arith.constant dense<0.000000e+00> : vector<128x128xf32>
    %275 = tpu.matmul %274, %273, %cst_176 {dimension_numbers = #tpu.dot_dimension_numbers<[1], [0], [0], [1], [0, 0, 1, 1], [], []>} : vector<128x96xbf16>, vector<96x128xbf16>, vector<128x128xf32> -> vector<128x128xf32>
    %c0_177 = arith.constant 0 : index
    %c0_178 = arith.constant 0 : index
    %276 = vector.load %arg3[%c0_177, %c0_178] : memref<128x1xf32, #tpu.memory_space<vmem>>, vector<128x1xf32>
    %277 = vector.broadcast %276 : vector<128x1xf32> to vector<128x128xf32>
    %278 = arith.addf %275, %277 : vector<128x128xf32>
    %279 = arith.negf %278 : vector<128x128xf32>
    %280 = math.exp %279 : vector<128x128xf32>
    %cst_179 = arith.constant 1.000000e+00 : f32
    %281 = vector.broadcast %cst_179 : f32 to vector<128x128xf32>
    %282 = arith.addf %281, %280 : vector<128x128xf32>
    %283 = arith.divf %281, %282 : vector<128x128xf32>
    %284 = arith.truncf %283 : vector<128x128xf32> to vector<128x128xbf16>
    %c2688 = arith.constant 2688 : index
    %c0_180 = arith.constant 0 : index
    %285 = vector.load %arg7[%c2688, %c0_180] : memref<3328x128xbf16, #tpu.memory_space<vmem>>, vector<128x128xbf16>
    tpu.vector_store %arg7[%c2688, %c0_180], %284 {strides = array<i32>} : memref<3328x128xbf16, #tpu.memory_space<vmem>>, vector<128x128xbf16>,
    %c704 = arith.constant 704 : index
    %c0_181 = arith.constant 0 : index
    %286 = vector.load %arg1[%c704, %c0_181] : memref<896x128xbf16, #tpu.memory_space<vmem>>, vector<96x128xbf16>
    %c0_182 = arith.constant 0 : index
    %c0_183 = arith.constant 0 : index
    %287 = vector.load %arg2[%c0_182, %c0_183] : memref<128x96xbf16, #tpu.memory_space<vmem>>, vector<128x96xbf16>
    %cst_184 = arith.constant dense<0.000000e+00> : vector<128x128xf32>
    %288 = tpu.matmul %287, %286, %cst_184 {dimension_numbers = #tpu.dot_dimension_numbers<[1], [0], [0], [1], [0, 0, 1, 1], [], []>} : vector<128x96xbf16>, vector<96x128xbf16>, vector<128x128xf32> -> vector<128x128xf32>
    %c0_185 = arith.constant 0 : index
    %c0_186 = arith.constant 0 : index
    %289 = vector.load %arg3[%c0_185, %c0_186] : memref<128x1xf32, #tpu.memory_space<vmem>>, vector<128x1xf32>
    %290 = vector.broadcast %289 : vector<128x1xf32> to vector<128x128xf32>
    %291 = arith.addf %288, %290 : vector<128x128xf32>
    %292 = arith.negf %291 : vector<128x128xf32>
    %293 = math.exp %292 : vector<128x128xf32>
    %cst_187 = arith.constant 1.000000e+00 : f32
    %294 = vector.broadcast %cst_187 : f32 to vector<128x128xf32>
    %295 = arith.addf %294, %293 : vector<128x128xf32>
    %296 = arith.divf %294, %295 : vector<128x128xf32>
    %297 = arith.truncf %296 : vector<128x128xf32> to vector<128x128xbf16>
    %c2816 = arith.constant 2816 : index
    %c0_188 = arith.constant 0 : index
    %298 = vector.load %arg7[%c2816, %c0_188] : memref<3328x128xbf16, #tpu.memory_space<vmem>>, vector<128x128xbf16>
    tpu.vector_store %arg7[%c2816, %c0_188], %297 {strides = array<i32>} : memref<3328x128xbf16, #tpu.memory_space<vmem>>, vector<128x128xbf16>,
    %c736 = arith.constant 736 : index
    %c0_189 = arith.constant 0 : index
    %299 = vector.load %arg1[%c736, %c0_189] : memref<896x128xbf16, #tpu.memory_space<vmem>>, vector<96x128xbf16>
    %c0_190 = arith.constant 0 : index
    %c0_191 = arith.constant 0 : index
    %300 = vector.load %arg2[%c0_190, %c0_191] : memref<128x96xbf16, #tpu.memory_space<vmem>>, vector<128x96xbf16>
    %cst_192 = arith.constant dense<0.000000e+00> : vector<128x128xf32>
    %301 = tpu.matmul %300, %299, %cst_192 {dimension_numbers = #tpu.dot_dimension_numbers<[1], [0], [0], [1], [0, 0, 1, 1], [], []>} : vector<128x96xbf16>, vector<96x128xbf16>, vector<128x128xf32> -> vector<128x128xf32>
    %c0_193 = arith.constant 0 : index
    %c0_194 = arith.constant 0 : index
    %302 = vector.load %arg3[%c0_193, %c0_194] : memref<128x1xf32, #tpu.memory_space<vmem>>, vector<128x1xf32>
    %303 = vector.broadcast %302 : vector<128x1xf32> to vector<128x128xf32>
    %304 = arith.addf %301, %303 : vector<128x128xf32>
    %305 = arith.negf %304 : vector<128x128xf32>
    %306 = math.exp %305 : vector<128x128xf32>
    %cst_195 = arith.constant 1.000000e+00 : f32
    %307 = vector.broadcast %cst_195 : f32 to vector<128x128xf32>
    %308 = arith.addf %307, %306 : vector<128x128xf32>
    %309 = arith.divf %307, %308 : vector<128x128xf32>
    %310 = arith.truncf %309 : vector<128x128xf32> to vector<128x128xbf16>
    %c2944 = arith.constant 2944 : index
    %c0_196 = arith.constant 0 : index
    %311 = vector.load %arg7[%c2944, %c0_196] : memref<3328x128xbf16, #tpu.memory_space<vmem>>, vector<128x128xbf16>
    tpu.vector_store %arg7[%c2944, %c0_196], %310 {strides = array<i32>} : memref<3328x128xbf16, #tpu.memory_space<vmem>>, vector<128x128xbf16>,
    %c768_197 = arith.constant 768 : index
    %c0_198 = arith.constant 0 : index
    %312 = vector.load %arg1[%c768_197, %c0_198] : memref<896x128xbf16, #tpu.memory_space<vmem>>, vector<96x128xbf16>
    %c0_199 = arith.constant 0 : index
    %c0_200 = arith.constant 0 : index
    %313 = vector.load %arg2[%c0_199, %c0_200] : memref<128x96xbf16, #tpu.memory_space<vmem>>, vector<128x96xbf16>
    %cst_201 = arith.constant dense<0.000000e+00> : vector<128x128xf32>
    %314 = tpu.matmul %313, %312, %cst_201 {dimension_numbers = #tpu.dot_dimension_numbers<[1], [0], [0], [1], [0, 0, 1, 1], [], []>} : vector<128x96xbf16>, vector<96x128xbf16>, vector<128x128xf32> -> vector<128x128xf32>
    %c0_202 = arith.constant 0 : index
    %c0_203 = arith.constant 0 : index
    %315 = vector.load %arg3[%c0_202, %c0_203] : memref<128x1xf32, #tpu.memory_space<vmem>>, vector<128x1xf32>
    %316 = vector.broadcast %315 : vector<128x1xf32> to vector<128x128xf32>
    %317 = arith.addf %314, %316 : vector<128x128xf32>
    %318 = arith.negf %317 : vector<128x128xf32>
    %319 = math.exp %318 : vector<128x128xf32>
    %cst_204 = arith.constant 1.000000e+00 : f32
    %320 = vector.broadcast %cst_204 : f32 to vector<128x128xf32>
    %321 = arith.addf %320, %319 : vector<128x128xf32>
    %322 = arith.divf %320, %321 : vector<128x128xf32>
    %323 = arith.truncf %322 : vector<128x128xf32> to vector<128x128xbf16>
    %c3072 = arith.constant 3072 : index
    %c0_205 = arith.constant 0 : index
    %324 = vector.load %arg7[%c3072, %c0_205] : memref<3328x128xbf16, #tpu.memory_space<vmem>>, vector<128x128xbf16>
    tpu.vector_store %arg7[%c3072, %c0_205], %323 {strides = array<i32>} : memref<3328x128xbf16, #tpu.memory_space<vmem>>, vector<128x128xbf16>,
    %c800 = arith.constant 800 : index
    %c0_206 = arith.constant 0 : index
    %325 = vector.load %arg1[%c800, %c0_206] : memref<896x128xbf16, #tpu.memory_space<vmem>>, vector<96x128xbf16>
    %c0_207 = arith.constant 0 : index
    %c0_208 = arith.constant 0 : index
    %326 = vector.load %arg2[%c0_207, %c0_208] : memref<128x96xbf16, #tpu.memory_space<vmem>>, vector<128x96xbf16>
    %cst_209 = arith.constant dense<0.000000e+00> : vector<128x128xf32>
    %327 = tpu.matmul %326, %325, %cst_209 {dimension_numbers = #tpu.dot_dimension_numbers<[1], [0], [0], [1], [0, 0, 1, 1], [], []>} : vector<128x96xbf16>, vector<96x128xbf16>, vector<128x128xf32> -> vector<128x128xf32>
    %c0_210 = arith.constant 0 : index
    %c0_211 = arith.constant 0 : index
    %328 = vector.load %arg3[%c0_210, %c0_211] : memref<128x1xf32, #tpu.memory_space<vmem>>, vector<128x1xf32>
    %329 = vector.broadcast %328 : vector<128x1xf32> to vector<128x128xf32>
    %330 = arith.addf %327, %329 : vector<128x128xf32>
    %331 = arith.negf %330 : vector<128x128xf32>
    %332 = math.exp %331 : vector<128x128xf32>
    %cst_212 = arith.constant 1.000000e+00 : f32
    %333 = vector.broadcast %cst_212 : f32 to vector<128x128xf32>
    %334 = arith.addf %333, %332 : vector<128x128xf32>
    %335 = arith.divf %333, %334 : vector<128x128xf32>
    %336 = arith.truncf %335 : vector<128x128xf32> to vector<128x128xbf16>
    %c3200 = arith.constant 3200 : index
    %c0_213 = arith.constant 0 : index
    %337 = vector.load %arg7[%c3200, %c0_213] : memref<3328x128xbf16, #tpu.memory_space<vmem>>, vector<128x128xbf16>
    tpu.vector_store %arg7[%c3200, %c0_213], %336 {strides = array<i32>} : memref<3328x128xbf16, #tpu.memory_space<vmem>>, vector<128x128xbf16>,
    %c0_214 = arith.constant 0 : index
    %c0_215 = arith.constant 0 : index
    %338 = vector.load %arg4[%c0_214, %c0_215] : memref<16x3328xbf16, #tpu.memory_space<vmem>>, vector<16x3328xbf16>
    %c0_216 = arith.constant 0 : index
    %c0_217 = arith.constant 0 : index
    %339 = vector.load %arg7[%c0_216, %c0_217] : memref<3328x128xbf16, #tpu.memory_space<vmem>>, vector<3328x128xbf16>
    %cst_218 = arith.constant dense<0.000000e+00> : vector<16x128xf32>
    %340 = tpu.matmul %338, %339, %cst_218 {dimension_numbers = #tpu.dot_dimension_numbers<[1], [0], [0], [1], [0, 0, 1, 1], [], []>} : vector<16x3328xbf16>, vector<3328x128xbf16>, vector<16x128xf32> -> vector<16x128xf32>
    %c0_219 = arith.constant 0 : index
    %c0_220 = arith.constant 0 : index
    %341 = vector.load %arg5[%c0_219, %c0_220] : memref<16x1xf32, #tpu.memory_space<vmem>>, vector<16x1xf32>
    %342 = vector.broadcast %341 : vector<16x1xf32> to vector<16x128xf32>
    %343 = arith.addf %340, %342 : vector<16x128xf32>
    %cst_221 = arith.constant dense<0xFF800000> : vector<128xf32>
    %344 = vector.multi_reduction <maximumf>, %343, %cst_221 [0] : vector<16x128xf32> to vector<128xf32>
    %345 = vector.shape_cast %344 : vector<128xf32> to vector<1x128xf32>
    %346 = vector.broadcast %345 : vector<1x128xf32> to vector<16x128xf32>
    %347 = arith.subf %343, %346 : vector<16x128xf32>
    %348 = math.exp %347 : vector<16x128xf32>
    %cst_222 = arith.constant dense<0.000000e+00> : vector<128xf32>
    %349 = vector.multi_reduction <add>, %348, %cst_222 [0] : vector<16x128xf32> to vector<128xf32>
    %350 = vector.shape_cast %349 : vector<128xf32> to vector<1x128xf32>
    %351 = math.log %350 : vector<1x128xf32>
    %352 = vector.broadcast %351 : vector<1x128xf32> to vector<16x128xf32>
    %353 = arith.subf %347, %352 : vector<16x128xf32>
    %c0_223 = arith.constant 0 : index
    %c0_224 = arith.constant 0 : index
    %354 = vector.load %arg6[%c0_223, %c0_224] : memref<16x128xf32, #tpu.memory_space<vmem>>, vector<16x128xf32>
    tpu.vector_store %arg6[%c0_223, %c0_224], %353 {strides = array<i32>} : memref<16x128xf32, #tpu.memory_space<vmem>>, vector<16x128xf32>,
    return
  }
  func.func @transform_0(%arg0: i32) -> (i32, i32) {
    %c0_i32 = arith.constant 0 : i32
    %c0_i32_0 = arith.constant 0 : i32
    return %c0_i32, %arg0 : i32, i32
  }
  func.func @transform_1(%arg0: i32) -> (i32, i32) {
    %c0_i32 = arith.constant 0 : i32
    %c0_i32_0 = arith.constant 0 : i32
    %c0_i32_1 = arith.constant 0 : i32
    return %c0_i32, %c0_i32_0 : i32, i32
  }
  func.func @transform_2(%arg0: i32) -> (i32, i32) {
    %c0_i32 = arith.constant 0 : i32
    %c0_i32_0 = arith.constant 0 : i32
    %c0_i32_1 = arith.constant 0 : i32
    return %c0_i32, %c0_i32_0 : i32, i32
  }
  func.func @transform_3(%arg0: i32) -> (i32, i32) {
    %c0_i32 = arith.constant 0 : i32
    %c0_i32_0 = arith.constant 0 : i32
    %c0_i32_1 = arith.constant 0 : i32
    return %c0_i32, %c0_i32_0 : i32, i32
  }
  func.func @transform_4(%arg0: i32) -> (i32, i32) {
    %c0_i32 = arith.constant 0 : i32
    %c0_i32_0 = arith.constant 0 : i32
    %c0_i32_1 = arith.constant 0 : i32
    return %c0_i32, %c0_i32_0 : i32, i32
  }
  func.func @transform_5(%arg0: i32) -> (i32, i32) {
    %c0_i32 = arith.constant 0 : i32
    %c0_i32_0 = arith.constant 0 : i32
    return %c0_i32, %arg0 : i32, i32
  }
}

</mosaic_0001>

<bundles_post_ra>
// kernel: cnn_model1_forward.1
= control target key start
LH: loop header
LB: loop body
LE: loop exit
PB: predicated region body
PF: predicated region fallthrough
CT: control target
= control target key end

     0   :  { %v16713_v0 = vmov 0   ;;  %vm221_vm0 = vcmask 785408   ;;  %s22862_s2 = inlined_call_operand.vmem [shape: f32[128,1], index: 2, kind: input, shape index: {}]   ;;  %s22863_s0 = inlined_call_operand.vmem [shape: bf16[896,128], index: 0, kind: input, shape index: {}]   ;;  %s22864_s1 = inlined_call_operand.vmem [shape: bf16[128,96], index: 1, kind: input, shape index: {}]   ;;  %s22865_s3 = inlined_call_operand.vmem [shape: bf16[16,3328], index: 3, kind: input, shape index: {}]   ;;  %s22866_s4 = inlined_call_operand.vmem [shape: f32[16,1], index: 4, kind: input, shape index: {}]   ;;  %s22867_s5 = inlined_call_operand.vmem [shape: f32[16,128], index: 5, kind: output, shape index: {}]  }
   0x1   :  { %14625 = vset.pattern.permute.xlu1 %v16713_v0  ;;  %14624 = vset.pattern.permute.xlu0 %v16713_v0  ;;  %v16747_v1 = vld [vmem:[%s22862_s2 + $0x10] sm:$0xff]  ;;  %v16752_v2 = vld [vmem:[%s22862_s2] sm:$0xff]  ;;  %v16762_v4 = vld [vmem:[%s22862_s2 + $0x18] sm:$0xff] }
   0x2   :  { %77 = vperm.xlu1 %14625, %v16747_v1   ;;  %67 = vperm.xlu0 %14624, %v16752_v2   ;;  %v14626_v3 = vld [vmem:[%s22863_s0] sm:$0xff]   ;;  %v16767_v5 = vld [vmem:[%s22862_s2 + $0x8] sm:$0xff]  ;;  %v14628_v9 = vld [vmem:[%s22863_s0 + $0x10] sm:$0xff]  }
   0x3   :  { %13883 = vmatprep.subr.bf16.mxu0 %v14626_v3  ;;  %14611 = vmatprep.subr.bf16.mxu1 %v14626_v3  ;;  %v14627_v6 = vld [vmem:[%s22863_s0 + $0x8] sm:$0xff]   ;;  %v16782_v8 = vld [vmem:[%s22862_s2 + $0x20] sm:$0xff]  ;;  %v16792_v10 = vld [vmem:[%s22862_s2 + $0x38] sm:$0xff] }
   0x4   :  { %13884 = vmatpush3.bf16.msra.mxu0 %v14626_v3  ;;  %14617 = vmatpush3.bf16.msra.mxu1 %v14626_v3  ;;  %v16777_v7 = vld [vmem:[%s22862_s2 + $0x28] sm:$0xff]  ;;  %v16797_v11 = vld [vmem:[%s22862_s2 + $0x30] sm:$0xff]  ;;  %v14629_v12 = vld [vmem:[%s22863_s0 + $0x18] sm:$0xff]  }
   0x5   :  { %13885 = vmatprep.subr.bf16.mxu0 %v14627_v6  ;;  %14612 = vmatprep.subr.bf16.mxu1 %v14627_v6  ;;  %v14632_v13 = vld [vmem:[%s22864_s1] sm:$0xff]   ;;  %v16808_v14 = vld [vmem:[%s22862_s2 + $0x48] sm:$0xff]  ;;  %v14633_v15 = vld [vmem:[%s22864_s1 + $0x30] sm:$0xff]  }
   0x6   :  { %82 = vperm.xlu1 %14625, %v16762_v4   ;;  %72 = vperm.xlu0 %14624, %v16767_v5   ;;  %v16818_v16 = vld [vmem:[%s22862_s2 + $0x40] sm:$0xff]  ;;  %v16828_v18 = vld [vmem:[%s22862_s2 + $0x58] sm:$0xff]  ;;  %v16835_v19 = vld [vmem:[%s22862_s2 + $0x50] sm:$0xff] }
   0x7   :  { %v14630_v17 = vld [vmem:[%s22863_s0 + $0x20] sm:$0xff]   ;;  %13895 = vmatprep.mubr.msk.bf16.mxu0 %vm221_vm0, %v14632_v13  ;;  %13907 = vmatprep.mubr.msk.bf16.mxu1 %vm221_vm0, %v14633_v15  ;;  %v14631_v20 = vld [vmem:[%s22863_s0 + $0x28] sm:$0xff]   ;;  %v14636_v24 = vld [vmem:[%s22863_s0 + $0x10] sm:$0xff]  }
   0x8   :  { %13886 = vmatpush3.bf16.msra.mxu0 %v14627_v6  ;;  %14618 = vmatpush3.bf16.msra.mxu1 %v14627_v6  ;;  %v16843_v21 = vld [vmem:[%s22862_s2 + $0x68] sm:$0xff]  ;;  %v16848_v22 = vld [vmem:[%s22862_s2 + $0x60] sm:$0xff]  ;;  %v14635_v26 = vld [vmem:[%s22864_s1 + $0x38] sm:$0xff]  }
   0x9   :  { %13887 = vmatprep.subr.bf16.mxu0 %v14628_v9  ;;  %14613 = vmatprep.subr.bf16.mxu1 %v14628_v9  ;;  %v14634_v23 = vld [vmem:[%s22864_s1 + $0x8] sm:$0xff]   ;;  %v14637_v25 = vld [vmem:[%s22863_s0 + $0x20] sm:$0xff]   ;;  %v16867_v27 = vld [vmem:[%s22862_s2 + $0x78] sm:$0xff] }
   0xa   :  { %92 = vperm.xlu1 %14625, %v16777_v7   ;;  %87 = vperm.xlu0 %14624, %v16782_v8   ;;  %v16872_v28 = vld [vmem:[%s22862_s2 + $0x70] sm:$0xff]  ;;  %v14638_v29 = vld [vmem:[%s22863_s0 + $0x18] sm:$0xff]   ;;  %v14639_v30 = vld [vmem:[%s22863_s0 + $0x28] sm:$0xff]  }
   0xb   :  { %v14640_v31 = vld [vmem:[%s22864_s1 + $0x10] sm:$0xff]   ;;  %v14642_v32 = vld [vmem:[%s22863_s0 + $0x20] sm:$0xff]   ;;  %v14641_v34 = vld [vmem:[%s22864_s1 + $0x18] sm:$0xff]  }
   0xc   :  { %13888 = vmatpush3.bf16.msra.mxu0 %v14628_v9  ;;  %14619 = vmatpush3.bf16.msra.mxu1 %v14628_v9  ;;  %v14643_v33 = vld [vmem:[%s22863_s0 + $0x30] sm:$0xff]   ;;  %v14652_v35 = vld [vmem:[%s22864_s1] sm:$0xff]   ;;  %v14644_v36 = vld [vmem:[%s22863_s0 + $0x28] sm:$0xff]  }
   0xd   :  { %13889 = vmatprep.subr.bf16.mxu0 %v14629_v12  ;;  %14614 = vmatprep.subr.bf16.mxu1 %v14629_v12  ;;  %v14645_v37 = vld [vmem:[%s22863_s0 + $0x38] sm:$0xff]   ;;  %v14646_v38 = vld [vmem:[%s22864_s1 + $0x20] sm:$0xff]   ;;  %v14648_v39 = vld [vmem:[%s22863_s0 + $0x30] sm:$0xff]  }
   0xe   :  { %102 = vperm.xlu1 %14625, %v16792_v10   ;;  %97 = vperm.xlu0 %14624, %v16797_v11   ;;  %v14649_v40 = vld [vmem:[%s22863_s0 + $0x40] sm:$0xff]   ;;  %v14647_v41 = vld [vmem:[%s22864_s1 + $0x28] sm:$0xff]   ;;  %v14650_v42 = vld [vmem:[%s22863_s0 + $0x38] sm:$0xff]  }
   0xf   :  { %v14651_v43 = vld [vmem:[%s22863_s0 + $0x48] sm:$0xff]   ;;  %v14653_v44 = vld [vmem:[%s22864_s1] sm:$0xff]   ;;  %v14660_v47 = vld [vmem:[%s22863_s0 + $0x30] sm:$0xff]  }
  0x10   :  { %13890 = vmatpush3.bf16.msra.mxu0 %v14629_v12  ;;  %14620 = vmatpush3.bf16.msra.mxu1 %v14629_v12  ;;  %v14654_v45 = vld [vmem:[%s22864_s1 + $0x8] sm:$0xff]   ;;  %v14661_v48 = vld [vmem:[%s22863_s0 + $0x40] sm:$0xff]   ;;  %v14656_v49 = vld [vmem:[%s22864_s1 + $0x10] sm:$0xff]  }
  0x11   :  { %13891 = vmatprep.subr.bf16.mxu0 %v14630_v17  ;;  %14615 = vmatprep.subr.bf16.mxu1 %v14630_v17  ;;  %v14655_v46 = vld [vmem:[%s22864_s1 + $0x8] sm:$0xff]   ;;  %v14657_v50 = vld [vmem:[%s22864_s1 + $0x10] sm:$0xff]   ;;  %v14662_v51 = vld [vmem:[%s22863_s0 + $0x38] sm:$0xff]  }
  0x12   :  { %112 = vperm.xlu1 %14625, %v16808_v14   ;;  %107 = vperm.xlu0 %14624, %v16818_v16   ;;  %v14663_v52 = vld [vmem:[%s22863_s0 + $0x48] sm:$0xff]   ;;  %v14658_v53 = vld [vmem:[%s22864_s1 + $0x18] sm:$0xff]   ;;  %v14664_v55 = vld [vmem:[%s22864_s1 + $0x20] sm:$0xff]  }
  0x13   :  { %v14659_v54 = vld [vmem:[%s22864_s1 + $0x18] sm:$0xff]   ;;  %v14665_v56 = vld [vmem:[%s22864_s1 + $0x20] sm:$0xff]   ;;  %v14669_v58 = vld [vmem:[%s22863_s0 + $0x50] sm:$0xff]  }
  0x14   :  { %13892 = vmatpush3.bf16.msra.mxu0 %v14630_v17  ;;  %14621 = vmatpush3.bf16.msra.mxu1 %v14630_v17  ;;  %v14668_v57 = vld [vmem:[%s22863_s0 + $0x40] sm:$0xff]   ;;  %v14670_v59 = vld [vmem:[%s22863_s0 + $0x48] sm:$0xff]   ;;  %v14671_v60 = vld [vmem:[%s22863_s0 + $0x58] sm:$0xff]  }
  0x15   :  { %13893 = vmatprep.subr.bf16.mxu0 %v14631_v20  ;;  %14616 = vmatprep.subr.bf16.mxu1 %v14631_v20  ;;  %v14666_v61 = vld [vmem:[%s22864_s1 + $0x28] sm:$0xff]   ;;  %v14672_v63 = vld [vmem:[%s22864_s1 + $0x30] sm:$0xff]   ;;  %v14677_v6 = vld [vmem:[%s22863_s0 + $0x60] sm:$0xff]  }
  0x16   :  { %122 = vperm.xlu1 %14625, %v16828_v18   ;;  %117 = vperm.xlu0 %14624, %v16835_v19   ;;  %v14667_v62 = vld [vmem:[%s22864_s1 + $0x28] sm:$0xff]   ;;  %v14673_v0 = vld [vmem:[%s22864_s1 + $0x30] sm:$0xff]   ;;  %v14674_v9 = vld [vmem:[%s22864_s1 + $0x38] sm:$0xff]  }
  0x17   :  { %v14676_v3 = vld [vmem:[%s22863_s0 + $0x50] sm:$0xff]   ;;  %v14678_v12 = vld [vmem:[%s22863_s0 + $0x58] sm:$0xff]   ;;  %v14679_v13 = vld [vmem:[%s22863_s0 + $0x68] sm:$0xff]  }
  0x18   :  { %13894 = vmatpush3.bf16.msra.mxu0 %v14631_v20  ;;  %14622 = vmatpush3.bf16.msra.mxu1 %v14631_v20  ;;  %v14675_v15 = vld [vmem:[%s22864_s1 + $0x38] sm:$0xff]   ;;  %v14680_v17 = vld [vmem:[%s22864_s1] sm:$0xff]  }
  0x19   :  { %13911 = vmatprep.subr.bf16.mxu1 %v14636_v24  ;;  %13939 = vmatprep.subr.bf16.mxu0 %v14637_v25  ;;  %v14681_v20 = vld [vmem:[%s22864_s1] sm:$0xff]  }
  0x1a   :  { %132 = vperm.xlu1 %14625, %v16843_v21   ;;  %127 = vperm.xlu0 %14624, %v16848_v22  }
  0x1b   :  { %13896 = vmatmul.mubr.msk.bf16.vlgmr.msra.gmra.mrb[0].mxu0 %vm221_vm0, %v14634_v23  ;;  %13908 = vmatmul.mubr.msk.bf16.vlgmr.msra.gmra.mrb[0].mxu1 %vm221_vm0, %v14635_v26  ;;  %v14688_v23 = vld [vmem:[%s22863_s0 + $0x50] sm:$0xff]   ;;  %v14683_v26 = vld [vmem:[%s22864_s1 + $0x8] sm:$0xff]  }
  0x1c   :  { %13912 = vmatpush3.bf16.msra.mxu1 %v14636_v24  ;;  %13940 = vmatpush3.bf16.msra.mxu0 %v14637_v25  ;;  %v14689_v24 = vld [vmem:[%s22863_s0 + $0x60] sm:$0xff]   ;;  %v14682_v25 = vld [vmem:[%s22864_s1 + $0x8] sm:$0xff]  }
  0x1d   :  { %13913 = vmatprep.subr.bf16.mxu1 %v14638_v29  ;;  %13941 = vmatprep.subr.bf16.mxu0 %v14639_v30 }
  0x1e   :  { %142 = vperm.xlu1 %14625, %v16867_v27   ;;  %137 = vperm.xlu0 %14624, %v16872_v28  }
  0x1f   :  { %13899 = vmatprep.mubr.msk.bf16.mxu0 %vm221_vm0, %v14640_v31  ;;  %13923 = vmatprep.mubr.msk.bf16.mxu1 %vm221_vm0, %v14652_v35  ;;  %v14690_v31 = vld [vmem:[%s22863_s0 + $0x58] sm:$0xff]   ;;  %v14692_v35 = vld [vmem:[%s22864_s1 + $0x20] sm:$0xff]  }
  0x20   :  { %13914 = vmatpush3.bf16.msra.mxu1 %v14638_v29  ;;  %13942 = vmatpush3.bf16.msra.mxu0 %v14639_v30  ;;  %v14684_v29 = vld [vmem:[%s22864_s1 + $0x10] sm:$0xff]  }
  0x21   :  { %13915 = vmatprep.subr.bf16.mxu1 %v14642_v32  ;;  %13943 = vmatprep.subr.bf16.mxu0 %v14643_v33  ;;  %v14685_v30 = vld [vmem:[%s22864_s1 + $0x10] sm:$0xff]  }
  0x22   :  { %506 = vperm.xlu1 %14625, %v16767_v5   ;;  %501 = vperm.xlu0 %14624, %v16752_v2  }
  0x23   :  { %13900 = vmatmul.mubr.msk.bf16.gmra.mrb[4].mxu0 %vm221_vm0, %v14641_v34  ;;  %v14687_v34 = vld [vmem:[%s22864_s1 + $0x18] sm:$0xff]  }
  0x24   :  { %13916 = vmatpush3.bf16.msra.mxu1 %v14642_v32  ;;  %13944 = vmatpush3.bf16.msra.mxu0 %v14643_v33  ;;  %v14691_v32 = vld [vmem:[%s22863_s0 + $0x68] sm:$0xff]   ;;  %v14686_v33 = vld [vmem:[%s22864_s1 + $0x18] sm:$0xff]  }
  0x25   :  { %13917 = vmatprep.subr.bf16.mxu1 %v14644_v36  ;;  %13945 = vmatprep.subr.bf16.mxu0 %v14645_v37 }
  0x26   :  { %516 = vperm.xlu1 %14625, %v16762_v4   ;;  %511 = vperm.xlu0 %14624, %v16747_v1  }
  0x27   :  { %13903 = vmatprep.mubr.msk.bf16.mxu0 %vm221_vm0, %v14646_v38  ;;  %v14697_v38 = vld [vmem:[%s22863_s0 + $0x70] sm:$0xff]  }
  0x28   :  { %13918 = vmatpush3.bf16.msra.mxu1 %v14644_v36  ;;  %13946 = vmatpush3.bf16.msra.mxu0 %v14645_v37  ;;  %v14693_v36 = vld [vmem:[%s22864_s1 + $0x20] sm:$0xff]  }
  0x29   :  { %13919 = vmatprep.subr.bf16.mxu1 %v14648_v39  ;;  %13947 = vmatprep.subr.bf16.mxu0 %v14649_v40  ;;  %v14696_v37 = vld [vmem:[%s22863_s0 + $0x60] sm:$0xff]  }
  0x2a   :  { %526 = vperm.xlu1 %14625, %v16777_v7   ;;  %521 = vperm.xlu0 %14624, %v16782_v8  }
  0x2b   :  { %13904 = vmatmul.mubr.msk.bf16.gmra.mrb[8].mxu0 %vm221_vm0, %v14647_v41  ;;  %v14694_v41 = vld [vmem:[%s22864_s1 + $0x28] sm:$0xff]  }
  0x2c   :  { %13920 = vmatpush3.bf16.msra.mxu1 %v14648_v39  ;;  %13948 = vmatpush3.bf16.msra.mxu0 %v14649_v40  ;;  %v14698_v39 = vld [vmem:[%s22863_s0 + $0x68] sm:$0xff]   ;;  %v14699_v40 = vld [vmem:[%s22863_s0 + $0x78] sm:$0xff]  }
  0x2d   :  { %13921 = vmatprep.subr.bf16.mxu1 %v14650_v42  ;;  %13949 = vmatprep.subr.bf16.mxu0 %v14651_v43 }
  0x2e   :  { %536 = vperm.xlu1 %14625, %v16792_v10   ;;  %531 = vperm.xlu0 %14624, %v16797_v11  }
  0x2f   :  { %13951 = vmatprep.mubr.msk.bf16.mxu0 %vm221_vm0, %v14653_v44  ;;  %v14701_v44 = vld [vmem:[%s22864_s1 + $0x30] sm:$0xff]  }
  0x30   :  { %13922 = vmatpush3.bf16.msra.mxu1 %v14650_v42  ;;  %13950 = vmatpush3.bf16.msra.mxu0 %v14651_v43  ;;  %v14695_v42 = vld [vmem:[%s22864_s1 + $0x28] sm:$0xff]   ;;  %v14700_v43 = vld [vmem:[%s22864_s1 + $0x30] sm:$0xff]  }
  0x31   :  { %13967 = vmatprep.subr.bf16.mxu1 %v14660_v47  ;;  %13995 = vmatprep.subr.bf16.mxu0 %v14661_v48 }
  0x32   :  { %546 = vperm.xlu1 %14625, %v16808_v14   ;;  %541 = vperm.xlu0 %14624, %v16818_v16  }
  0x33   :  { %13924 = vmatmul.mubr.msk.bf16.vlgmr.msra.gmra.mrb[4].mxu1 %vm221_vm0, %v14654_v45  ;;  %13952 = vmatmul.mubr.msk.bf16.vlgmr.msra.gmra.mrb[12].mxu0 %vm221_vm0, %v14655_v46  ;;  %v14704_v45 = vld [vmem:[%s22863_s0 + $0x70] sm:$0xff]   ;;  %v14706_v46 = vld [vmem:[%s22863_s0 + $0x78] sm:$0xff]  }
  0x34   :  { %13927 = vmatprep.mubr.msk.bf16.mxu1 %vm221_vm0, %v14656_v49  ;;  %13955 = vmatprep.mubr.msk.bf16.mxu0 %vm221_vm0, %v14657_v50  ;;  %v14716_v49 = vld [vmem:[%s22863_s0 + $0x70] sm:$0xff]   ;;  %v14711_v50 = vld [vmem:[%s22864_s1 + $0x8] sm:$0xff]  }
  0x35   :  { %13968 = vmatpush3.bf16.msra.mxu1 %v14660_v47  ;;  %13996 = vmatpush3.bf16.msra.mxu0 %v14661_v48  ;;  %v14707_v47 = vld [vmem:[%s22863_s0 + $0x88] sm:$0xff]   ;;  %v14709_v48 = vld [vmem:[%s22864_s1] sm:$0xff]  }
  0x36   :  { %556 = vperm.xlu1 %14625, %v16828_v18   ;;  %551 = vperm.xlu0 %14624, %v16835_v19  }
  0x37   :  { %13969 = vmatprep.subr.bf16.mxu1 %v14662_v51  ;;  %13997 = vmatprep.subr.bf16.mxu0 %v14663_v52 }
  0x39   :  { %13970 = vmatpush3.bf16.msra.mxu1 %v14662_v51  ;;  %13998 = vmatpush3.bf16.msra.mxu0 %v14663_v52  ;;  %v14712_v51 = vld [vmem:[%s22864_s1 + $0x10] sm:$0xff]   ;;  %v14719_v52 = vld [vmem:[%s22863_s0 + $0x88] sm:$0xff]  }
  0x3a   :  { %566 = vperm.xlu1 %14625, %v16843_v21   ;;  %561 = vperm.xlu0 %14624, %v16848_v22  }
  0x3b   :  { %13928 = vmatmul.mubr.msk.bf16.gmra.mrb[8].mxu1 %vm221_vm0, %v14658_v53  ;;  %13956 = vmatmul.mubr.msk.bf16.gmra.mrb[16].mxu0 %vm221_vm0, %v14659_v54  ;;  %v14720_v53 = vld [vmem:[%s22864_s1 + $0x20] sm:$0xff]   ;;  %v14725_v54 = vld [vmem:[%s22863_s0 + $0x90] sm:$0xff]  }
  0x3c   :  { %13931 = vmatprep.mubr.msk.bf16.mxu1 %vm221_vm0, %v14664_v55  ;;  %13959 = vmatprep.mubr.msk.bf16.mxu0 %vm221_vm0, %v14665_v56  ;;  %v14727_v55 = vld [vmem:[%s22863_s0 + $0x98] sm:$0xff]   ;;  %v17246_v56 = vld [vmem:[%s22862_s2] sm:$0xff] }
  0x3d   :  { %13971 = vmatprep.subr.bf16.mxu1 %v14668_v57  ;;  %13999 = vmatprep.subr.bf16.mxu0 %v14669_v58 }
  0x3e   :  { %576 = vperm.xlu1 %14625, %v16867_v27   ;;  %571 = vperm.xlu0 %14624, %v16872_v28  }
  0x3f   :  { %13972 = vmatpush3.bf16.msra.mxu1 %v14668_v57  ;;  %14000 = vmatpush3.bf16.msra.mxu0 %v14669_v58  ;;  %v14722_v57 = vld [vmem:[%s22864_s1 + $0x28] sm:$0xff]  }
  0x40   :  { %13973 = vmatprep.subr.bf16.mxu1 %v14670_v59  ;;  %14001 = vmatprep.subr.bf16.mxu0 %v14671_v60  ;;  %v14723_v58 = vld [vmem:[%s22864_s1 + $0x28] sm:$0xff]  }
  0x42   :  { %939 = vperm.xlu1 %14625, %v16767_v5   ;;  %934 = vperm.xlu0 %14624, %v16752_v2  }
  0x43   :  { %13932 = vmatmul.mubr.msk.bf16.gmra.mrb[12].mxu1 %vm221_vm0, %v14666_v61  ;;  %13960 = vmatmul.mubr.msk.bf16.gmra.mrb[20].mxu0 %vm221_vm0, %v14667_v62  ;;  %v14728_v61 = vld [vmem:[%s22864_s1 + $0x30] sm:$0xff]  }
  0x44   :  { %13974 = vmatpush3.bf16.msra.mxu1 %v14670_v59  ;;  %14002 = vmatpush3.bf16.msra.mxu0 %v14671_v60  ;;  %v17261_v59 = vld [vmem:[%s22862_s2 + $0x18] sm:$0xff]  ;;  %v17266_v60 = vld [vmem:[%s22862_s2 + $0x10] sm:$0xff] }
  0x45   :  { %13935 = vmatprep.mubr.msk.bf16.mxu1 %vm221_vm0, %v14672_v63  ;;  %13963 = vmatprep.mubr.msk.bf16.mxu0 %vm221_vm0, %v14673_v0  ;;  %v14729_v62 = vld [vmem:[%s22864_s1 + $0x30] sm:$0xff]   ;;  %v14733_v0 = vld [vmem:[%s22863_s0 + $0xa0] sm:$0xff]  }
  0x46   :  { %949 = vperm.xlu1 %14625, %v16762_v4   ;;  %944 = vperm.xlu0 %14624, %v16747_v1   ;;  %v14732_v63 = vld [vmem:[%s22863_s0 + $0x90] sm:$0xff]  }
  0x47   :  { %13975 = vmatprep.subr.bf16.mxu1 %v14676_v3  ;;  %14003 = vmatprep.subr.bf16.mxu0 %v14677_v6 }
  0x48   :  { %13976 = vmatpush3.bf16.msra.mxu1 %v14676_v3  ;;  %14004 = vmatpush3.bf16.msra.mxu0 %v14677_v6 }
  0x49   :  { %13977 = vmatprep.subr.bf16.mxu1 %v14678_v12  ;;  %14005 = vmatprep.subr.bf16.mxu0 %v14679_v13 }
  0x4a   :  { %959 = vperm.xlu1 %14625, %v16777_v7   ;;  %954 = vperm.xlu0 %14624, %v16782_v8  }
  0x4b   :  { %13936 = vmatmul.mubr.msk.bf16.gmra.mrb[16].mxu1 %vm221_vm0, %v14674_v9  ;;  %13964 = vmatmul.mubr.msk.bf16.gmra.mrb[24].mxu0 %vm221_vm0, %v14675_v15  ;;  %v17291_v9 = vld [vmem:[%s22862_s2 + $0x28] sm:$0xff]  ;;  %v14734_v15 = vld [vmem:[%s22863_s0 + $0x98] sm:$0xff]  }
  0x4c   :  { %13978 = vmatpush3.bf16.msra.mxu1 %v14678_v12  ;;  %14006 = vmatpush3.bf16.msra.mxu0 %v14679_v13  ;;  %v17296_v12 = vld [vmem:[%s22862_s2 + $0x20] sm:$0xff]  ;;  %v14730_v13 = vld [vmem:[%s22864_s1 + $0x38] sm:$0xff]  }
  0x4d   :  { %13979 = vmatprep.mubr.msk.bf16.mxu1 %vm221_vm0, %v14680_v17  ;;  %14007 = vmatprep.mubr.msk.bf16.mxu0 %vm221_vm0, %v14681_v20  ;;  %v14735_v17 = vld [vmem:[%s22863_s0 + $0xa8] sm:$0xff]   ;;  %v14731_v20 = vld [vmem:[%s22864_s1 + $0x38] sm:$0xff]  }
  0x4e   :  { %969 = vperm.xlu1 %14625, %v16792_v10   ;;  %964 = vperm.xlu0 %14624, %v16797_v11  }
  0x4f   :  { %14023 = vmatprep.subr.bf16.mxu1 %v14688_v23  ;;  %14051 = vmatprep.subr.bf16.mxu0 %v14689_v24 }
  0x52   :  { %979 = vperm.xlu1 %14625, %v16808_v14   ;;  %974 = vperm.xlu0 %14624, %v16818_v16  }
  0x53   :  { %13980 = vmatmul.mubr.msk.bf16.vlgmr.msra.gmra.mrb[20].mxu1 %vm221_vm0, %v14682_v25  ;;  %14008 = vmatmul.mubr.msk.bf16.vlgmr.msra.gmra.mrb[28].mxu0 %vm221_vm0, %v14683_v26  ;;  %v17321_v25 = vld [vmem:[%s22862_s2 + $0x38] sm:$0xff]  ;;  %v17326_v26 = vld [vmem:[%s22862_s2 + $0x30] sm:$0xff] }
  0x54   :  { %13983 = vmatprep.mubr.msk.bf16.mxu1 %vm221_vm0, %v14684_v29  ;;  %14011 = vmatprep.mubr.msk.bf16.mxu0 %vm221_vm0, %v14685_v30  ;;  %v14736_v29 = vld [vmem:[%s22864_s1] sm:$0xff]  }
  0x55   :  { %14024 = vmatpush3.bf16.msra.mxu1 %v14688_v23  ;;  %14052 = vmatpush3.bf16.msra.mxu0 %v14689_v24  ;;  %v14737_v30 = vld [vmem:[%s22864_s1] sm:$0xff]  }
  0x56   :  { %989 = vperm.xlu1 %14625, %v16828_v18   ;;  %984 = vperm.xlu0 %14624, %v16835_v19  }
  0x57   :  { %14025 = vmatprep.subr.bf16.mxu1 %v14690_v31  ;;  %14053 = vmatprep.subr.bf16.mxu0 %v14691_v32 }
  0x59   :  { %14026 = vmatpush3.bf16.msra.mxu1 %v14690_v31  ;;  %14054 = vmatpush3.bf16.msra.mxu0 %v14691_v32  ;;  %v14744_v31 = vld [vmem:[%s22863_s0 + $0x90] sm:$0xff]   ;;  %v14745_v32 = vld [vmem:[%s22863_s0 + $0xa0] sm:$0xff]  }
  0x5a   :  { %999 = vperm.xlu1 %14625, %v16843_v21   ;;  %994 = vperm.xlu0 %14624, %v16848_v22  }
  0x5b   :  { %13984 = vmatmul.mubr.msk.bf16.gmra.mrb[24].mxu1 %vm221_vm0, %v14686_v33  ;;  %14012 = vmatmul.mubr.msk.bf16.gmra.mrb[32].mxu0 %vm221_vm0, %v14687_v34 }
  0x5c   :  { %13987 = vmatprep.mubr.msk.bf16.mxu1 %vm221_vm0, %v14692_v35  ;;  %14015 = vmatprep.mubr.msk.bf16.mxu0 %vm221_vm0, %v14693_v36  ;;  %v17351_v35 = vld [vmem:[%s22862_s2 + $0x48] sm:$0xff]  ;;  %v17356_v36 = vld [vmem:[%s22862_s2 + $0x40] sm:$0xff] }
  0x5d   :  { %14027 = vmatprep.subr.bf16.mxu1 %v14696_v37  ;;  %14055 = vmatprep.subr.bf16.mxu0 %v14697_v38 }
  0x5e   :  { %1009 = vperm.xlu1 %14625, %v16867_v27   ;;  %1004 = vperm.xlu0 %14624, %v16872_v28  }
  0x5f   :  { %14028 = vmatpush3.bf16.msra.mxu1 %v14696_v37  ;;  %14056 = vmatpush3.bf16.msra.mxu0 %v14697_v38  ;;  %v14738_v37 = vld [vmem:[%s22864_s1 + $0x8] sm:$0xff]  }
  0x60   :  { %14029 = vmatprep.subr.bf16.mxu1 %v14698_v39  ;;  %14057 = vmatprep.subr.bf16.mxu0 %v14699_v40  ;;  %v14739_v38 = vld [vmem:[%s22864_s1 + $0x8] sm:$0xff]  }
  0x62   :  { %1372 = vperm.xlu1 %14625, %v16767_v5   ;;  %1367 = vperm.xlu0 %14624, %v16752_v2   ;;  %v14705_v2 = vld [vmem:[%s22863_s0 + $0x80] sm:$0xff]   ;;  %v14702_v5 = vld [vmem:[%s22864_s1 + $0x38] sm:$0xff]  }
  0x63   :  { %13988 = vmatmul.mubr.msk.bf16.gmra.mrb[28].mxu1 %vm221_vm0, %v14694_v41  ;;  %14016 = vmatmul.mubr.msk.bf16.gmra.mrb[36].mxu0 %vm221_vm0, %v14695_v42  ;;  %v17378_v42 = vld [vmem:[%s22862_s2 + $0x58] sm:$0xff] }
  0x64   :  { %14030 = vmatpush3.bf16.msra.mxu1 %v14698_v39  ;;  %14058 = vmatpush3.bf16.msra.mxu0 %v14699_v40  ;;  %v14740_v39 = vld [vmem:[%s22864_s1 + $0x10] sm:$0xff]  }
  0x65   :  { %13991 = vmatprep.mubr.msk.bf16.mxu1 %vm221_vm0, %v14700_v43  ;;  %14019 = vmatprep.mubr.msk.bf16.mxu0 %vm221_vm0, %v14701_v44  ;;  %v14741_v43 = vld [vmem:[%s22864_s1 + $0x10] sm:$0xff]  }
  0x66   :  { %1382 = vperm.xlu1 %14625, %v16762_v4   ;;  %1377 = vperm.xlu0 %14624, %v16747_v1   ;;  %v14703_v1 = vld [vmem:[%s22864_s1 + $0x38] sm:$0xff]   ;;  %v14708_v4 = vld [vmem:[%s22864_s1] sm:$0xff]   ;;  %v17388_v44 = vld [vmem:[%s22862_s2 + $0x50] sm:$0xff] }
  0x67   :  { %14031 = vmatprep.subr.bf16.mxu1 %v14704_v45  ;;  %14059 = vmatprep.subr.bf16.mxu0 %v14705_v2 }
  0x68   :  { %14032 = vmatpush3.bf16.msra.mxu1 %v14704_v45  ;;  %14060 = vmatpush3.bf16.msra.mxu0 %v14705_v2  ;;  %v14746_v45 = vld [vmem:[%s22863_s0 + $0x98] sm:$0xff]   ;;  %v14747_v2 = vld [vmem:[%s22863_s0 + $0xa8] sm:$0xff]  }
  0x69   :  { %14033 = vmatprep.subr.bf16.mxu1 %v14706_v46  ;;  %14061 = vmatprep.subr.bf16.mxu0 %v14707_v47 }
  0x6a   :  { %1392 = vperm.xlu1 %14625, %v16777_v7   ;;  %1387 = vperm.xlu0 %14624, %v16782_v8   ;;  %v14717_v7 = vld [vmem:[%s22863_s0 + $0x80] sm:$0xff]   ;;  %v14710_v8 = vld [vmem:[%s22864_s1 + $0x8] sm:$0xff]  }
  0x6b   :  { %13992 = vmatmul.mubr.msk.bf16.gmra.mrb[32].mxu1 %vm221_vm0, %v14702_v5  ;;  %14020 = vmatmul.mubr.msk.bf16.gmra.mrb[40].mxu0 %vm221_vm0, %v14703_v1  ;;  %v17410_v1 = vld [vmem:[%s22862_s2 + $0x60] sm:$0xff] }
  0x6c   :  { %14034 = vmatpush3.bf16.msra.mxu1 %v14706_v46  ;;  %14062 = vmatpush3.bf16.msra.mxu0 %v14707_v47  ;;  %v17405_v47 = vld [vmem:[%s22862_s2 + $0x68] sm:$0xff] }
  0x6d   :  { %14035 = vmatprep.mubr.msk.bf16.mxu1 %vm221_vm0, %v14708_v4  ;;  %14063 = vmatprep.mubr.msk.bf16.mxu0 %vm221_vm0, %v14709_v48  ;;  %v14742_v4 = vld [vmem:[%s22864_s1 + $0x18] sm:$0xff]  }
  0x6e   :  { %1402 = vperm.xlu1 %14625, %v16792_v10   ;;  %1397 = vperm.xlu0 %14624, %v16797_v11   ;;  %v14713_v10 = vld [vmem:[%s22864_s1 + $0x10] sm:$0xff]   ;;  %v14718_v11 = vld [vmem:[%s22863_s0 + $0x78] sm:$0xff]  }
  0x6f   :  { %14079 = vmatprep.subr.bf16.mxu1 %v14716_v49  ;;  %14107 = vmatprep.subr.bf16.mxu0 %v14717_v7  ;;  %v14743_v48 = vld [vmem:[%s22864_s1 + $0x18] sm:$0xff]  }
  0x72   :  { %1412 = vperm.xlu1 %14625, %v16808_v14   ;;  %1407 = vperm.xlu0 %14624, %v16818_v16   ;;  %v14714_v14 = vld [vmem:[%s22864_s1 + $0x18] sm:$0xff]  }
  0x73   :  { %14036 = vmatmul.mubr.msk.bf16.vlgmr.msra.gmra.mrb[36].mxu1 %vm221_vm0, %v14710_v8  ;;  %14064 = vmatmul.mubr.msk.bf16.vlgmr.msra.gmra.mrb[44].mxu0 %vm221_vm0, %v14711_v50  ;;  %v14715_v16 = vld [vmem:[%s22864_s1 + $0x18] sm:$0xff]  }
  0x74   :  { %14039 = vmatprep.mubr.msk.bf16.mxu1 %vm221_vm0, %v14712_v51  ;;  %14067 = vmatprep.mubr.msk.bf16.mxu0 %vm221_vm0, %v14713_v10  ;;  %v17432_v50 = vld [vmem:[%s22862_s2 + $0x78] sm:$0xff]  ;;  %v17437_v51 = vld [vmem:[%s22862_s2 + $0x70] sm:$0xff]  ;;  %v14749_v10 = vld [vmem:[%s22864_s1 + $0x20] sm:$0xff]  }
  0x75   :  { %14080 = vmatpush3.bf16.msra.mxu1 %v14716_v49  ;;  %14108 = vmatpush3.bf16.msra.mxu0 %v14717_v7  ;;  %v14748_v49 = vld [vmem:[%s22864_s1 + $0x20] sm:$0xff]  }
  0x76   :  { %1422 = vperm.xlu1 %14625, %v16828_v18   ;;  %1417 = vperm.xlu0 %14624, %v16835_v19   ;;  %v14721_v18 = vld [vmem:[%s22864_s1 + $0x20] sm:$0xff]  }
  0x77   :  { %14081 = vmatprep.subr.bf16.mxu1 %v14718_v11  ;;  %14109 = vmatprep.subr.bf16.mxu0 %v14719_v52  ;;  %v14724_v19 = vld [vmem:[%s22863_s0 + $0x80] sm:$0xff]  }
  0x79   :  { %14082 = vmatpush3.bf16.msra.mxu1 %v14718_v11  ;;  %14110 = vmatpush3.bf16.msra.mxu0 %v14719_v52  ;;  %v14752_v11 = vld [vmem:[%s22863_s0 + $0xa0] sm:$0xff]   ;;  %v14753_v52 = vld [vmem:[%s22863_s0 + $0xb0] sm:$0xff]  }
  0x7a   :  { %1432 = vperm.xlu1 %14625, %v16843_v21   ;;  %1427 = vperm.xlu0 %14624, %v16848_v22   ;;  %v14726_v21 = vld [vmem:[%s22863_s0 + $0x88] sm:$0xff]  }
  0x7b   :  { %14040 = vmatmul.mubr.msk.bf16.gmra.mrb[40].mxu1 %vm221_vm0, %v14714_v14  ;;  %14068 = vmatmul.mubr.msk.bf16.gmra.mrb[48].mxu0 %vm221_vm0, %v14715_v16  ;;  %v17234_v22 = vld [vmem:[%s22862_s2 + $0x8] sm:$0xff] }
  0x7c   :  { %14043 = vmatprep.mubr.msk.bf16.mxu1 %vm221_vm0, %v14720_v53  ;;  %14071 = vmatprep.mubr.msk.bf16.mxu0 %vm221_vm0, %v14721_v18  ;;  %v14754_v14 = vld [vmem:[%s22863_s0 + $0xa8] sm:$0xff]   ;;  %v14755_v18 = vld [vmem:[%s22863_s0 + $0xb8] sm:$0xff]  }
  0x7d   :  { %14083 = vmatprep.subr.bf16.mxu1 %v14724_v19  ;;  %14111 = vmatprep.subr.bf16.mxu0 %v14725_v54 }
  0x7e   :  { %1442 = vperm.xlu1 %14625, %v16867_v27   ;;  %1437 = vperm.xlu0 %14624, %v16872_v28  }
  0x7f   :  { %14084 = vmatpush3.bf16.msra.mxu1 %v14724_v19  ;;  %14112 = vmatpush3.bf16.msra.mxu0 %v14725_v54  ;;  %v14750_v19 = vld [vmem:[%s22864_s1 + $0x28] sm:$0xff]  }
  0x80   :  { %14085 = vmatprep.subr.bf16.mxu1 %v14726_v21  ;;  %14113 = vmatprep.subr.bf16.mxu0 %v14727_v55  ;;  %v14751_v54 = vld [vmem:[%s22864_s1 + $0x28] sm:$0xff]  }
  0x81   :  { %v17254_v27 = vpop.permute.xlu1 %77  ;;  %v17256_v28 = vpop.permute.xlu0 %67 }
  0x82   :  { %1805 = vperm.xlu1 %14625, %v17234_v22   ;;  %1800 = vperm.xlu0 %14624, %v17246_v56  }
  0x83   :  { %14044 = vmatmul.mubr.msk.bf16.gmra.mrb[44].mxu1 %vm221_vm0, %v14722_v57  ;;  %14072 = vmatmul.mubr.msk.bf16.gmra.mrb[52].mxu0 %vm221_vm0, %v14723_v58  ;;  %v14756_v57 = vld [vmem:[%s22864_s1 + $0x30] sm:$0xff]  }
  0x84   :  { %14086 = vmatpush3.bf16.msra.mxu1 %v14726_v21  ;;  %14114 = vmatpush3.bf16.msra.mxu0 %v14727_v55  ;;  %v14757_v58 = vld [vmem:[%s22864_s1 + $0x30] sm:$0xff]  }
  0x85   :  { %v17284_v3 = vpop.permute.xlu1 %82  ;;  %v17286_v6 = vpop.permute.xlu0 %72  ;;  %14047 = vmatprep.mubr.msk.bf16.mxu1 %vm221_vm0, %v14728_v61  ;;  %14075 = vmatprep.mubr.msk.bf16.mxu0 %vm221_vm0, %v14729_v62  ;;  %v14760_v61 = vld [vmem:[%s22863_s0 + $0xb0] sm:$0xff]   ;;  %v14761_v62 = vld [vmem:[%s22863_s0 + $0xc0] sm:$0xff]  }
  0x86   :  { %1815 = vperm.xlu1 %14625, %v17261_v59   ;;  %1810 = vperm.xlu0 %14624, %v17266_v60  }
  0x87   :  { %14087 = vmatprep.subr.bf16.mxu1 %v14732_v63  ;;  %14115 = vmatprep.subr.bf16.mxu0 %v14733_v0 }
  0x88   :  { %14088 = vmatpush3.bf16.msra.mxu1 %v14732_v63  ;;  %14116 = vmatpush3.bf16.msra.mxu0 %v14733_v0 }
  0x89   :  { %v17314_v23 = vpop.permute.xlu1 %92  ;;  %v17316_v24 = vpop.permute.xlu0 %87  ;;  %14089 = vmatprep.subr.bf16.mxu1 %v14734_v15  ;;  %14117 = vmatprep.subr.bf16.mxu0 %v14735_v17 }
  0x8a   :  { %1825 = vperm.xlu1 %14625, %v17291_v9   ;;  %1820 = vperm.xlu0 %14624, %v17296_v12  }
  0x8b   :  { %14048 = vmatmul.mubr.msk.bf16.gmra.mrb[48].mxu1 %vm221_vm0, %v14730_v13  ;;  %14076 = vmatmul.mubr.msk.bf16.gmra.mrb[56].mxu0 %vm221_vm0, %v14731_v20  ;;  %v14758_v13 = vld [vmem:[%s22864_s1 + $0x38] sm:$0xff]  }
  0x8c   :  { %14090 = vmatpush3.bf16.msra.mxu1 %v14734_v15  ;;  %14118 = vmatpush3.bf16.msra.mxu0 %v14735_v17  ;;  %v14762_v15 = vld [vmem:[%s22863_s0 + $0xb8] sm:$0xff]   ;;  %v14763_v17 = vld [vmem:[%s22863_s0 + $0xc8] sm:$0xff]  }
  0x8d   :  { %v17344_v33 = vpop.permute.xlu1 %102  ;;  %v17346_v34 = vpop.permute.xlu0 %97  ;;  %14091 = vmatprep.mubr.msk.bf16.mxu1 %vm221_vm0, %v14736_v29  ;;  %14119 = vmatprep.mubr.msk.bf16.mxu0 %vm221_vm0, %v14737_v30  ;;  %v14759_v20 = vld [vmem:[%s22864_s1 + $0x38] sm:$0xff]  }
  0x8e   :  { %1835 = vperm.xlu1 %14625, %v17321_v25   ;;  %1830 = vperm.xlu0 %14624, %v17326_v26  }
  0x8f   :  { %14135 = vmatprep.subr.bf16.mxu1 %v14744_v31  ;;  %14163 = vmatprep.subr.bf16.mxu0 %v14745_v32 }
  0x91   :  { %v17371_v40 = vpop.permute.xlu1 %112  ;;  %v17373_v41 = vpop.permute.xlu0 %107 }
  0x92   :  { %1845 = vperm.xlu1 %14625, %v17351_v35   ;;  %1840 = vperm.xlu0 %14624, %v17356_v36  }
  0x93   :  { %14092 = vmatmul.mubr.msk.bf16.vlgmr.msra.gmra.mrb[52].mxu1 %vm221_vm0, %v14738_v37  ;;  %14120 = vmatmul.mubr.msk.bf16.vlgmr.msra.gmra.mrb[60].mxu0 %vm221_vm0, %v14739_v38  ;;  %v14772_v37 = vld [vmem:[%s22863_s0 + $0xb0] sm:$0xff]   ;;  %v14773_v38 = vld [vmem:[%s22863_s0 + $0xc0] sm:$0xff]  }
  0x94   :  { %14095 = vmatprep.mubr.msk.bf16.mxu1 %vm221_vm0, %v14740_v39  ;;  %14123 = vmatprep.mubr.msk.bf16.mxu0 %vm221_vm0, %v14741_v43 }
  0x95   :  { %v17398_v5 = vpop.permute.xlu1 %122  ;;  %v17400_v46 = vpop.permute.xlu0 %117  ;;  %14136 = vmatpush3.bf16.msra.mxu1 %v14744_v31  ;;  %14164 = vmatpush3.bf16.msra.mxu0 %v14745_v32  ;;  %v14764_v31 = vld [vmem:[%s22864_s1] sm:$0xff]  }
  0x96   :  { %1855 = vperm.xlu1 %14625, %v17378_v42   ;;  %1850 = vperm.xlu0 %14624, %v17388_v44   ;;  %v14765_v32 = vld [vmem:[%s22864_s1] sm:$0xff]  }
  0x97   :  { %14137 = vmatprep.subr.bf16.mxu1 %v14746_v45  ;;  %14165 = vmatprep.subr.bf16.mxu0 %v14747_v2 }
  0x99   :  { %v17425_v7 = vpop.permute.xlu1 %132  ;;  %v17427_v8 = vpop.permute.xlu0 %127  ;;  %14138 = vmatpush3.bf16.msra.mxu1 %v14746_v45  ;;  %14166 = vmatpush3.bf16.msra.mxu0 %v14747_v2  ;;  %v14766_v45 = vld [vmem:[%s22864_s1 + $0x8] sm:$0xff]  }
  0x9a   :  { %1865 = vperm.xlu1 %14625, %v17405_v47   ;;  %1860 = vperm.xlu0 %14624, %v17410_v1   ;;  %v14767_v2 = vld [vmem:[%s22864_s1 + $0x8] sm:$0xff]  }
  0x9b   :  { %14096 = vmatmul.mubr.msk.bf16.gmra.mrb[56].mxu1 %vm221_vm0, %v14742_v4  ;;  %14124 = vmatmul.mubr.msk.bf16.gmra.mrb[64].mxu0 %vm221_vm0, %v14743_v48  ;;  %v14768_v4 = vld [vmem:[%s22864_s1 + $0x10] sm:$0xff]  }
  0x9c   :  { %14099 = vmatprep.mubr.msk.bf16.mxu1 %vm221_vm0, %v14748_v49  ;;  %14127 = vmatprep.mubr.msk.bf16.mxu0 %vm221_vm0, %v14749_v10  ;;  %v14769_v10 = vld [vmem:[%s22864_s1 + $0x10] sm:$0xff]  }
  0x9d   :  { %v17455_v16 = vpop.permute.xlu1 %142  ;;  %v17457_v53 = vpop.permute.xlu0 %137  ;;  %14139 = vmatprep.subr.bf16.mxu1 %v14752_v11  ;;  %14167 = vmatprep.subr.bf16.mxu0 %v14753_v52 }
  0x9e   :  { %1875 = vperm.xlu1 %14625, %v17432_v50   ;;  %1870 = vperm.xlu0 %14624, %v17437_v51  }
  0x9f   :  { %14140 = vmatpush3.bf16.msra.mxu1 %v14752_v11  ;;  %14168 = vmatpush3.bf16.msra.mxu0 %v14753_v52  ;;  %v14774_v11 = vld [vmem:[%s22863_s0 + $0xb8] sm:$0xff]   ;;  %v14775_v52 = vld [vmem:[%s22863_s0 + $0xc8] sm:$0xff]  }
  0xa0   :  { %14141 = vmatprep.subr.bf16.mxu1 %v14754_v14  ;;  %14169 = vmatprep.subr.bf16.mxu0 %v14755_v18 }
  0xa1   :  { %v17472_v21 = vpop.permute.xlu1 %506  ;;  %v17474_v55 = vpop.permute.xlu0 %501 }
  0xa2   :  { %2238 = vperm.xlu1 %14625, %v17234_v22   ;;  %2233 = vperm.xlu0 %14624, %v17246_v56  }
  0xa3   :  { %14100 = vmatmul.mubr.msk.bf16.gmra.mrb[60].mxu1 %vm221_vm0, %v14750_v19  ;;  %14128 = vmatmul.mubr.msk.bf16.gmra.mrb[68].mxu0 %vm221_vm0, %v14751_v54  ;;  %v14770_v19 = vld [vmem:[%s22864_s1 + $0x18] sm:$0xff]  }
  0xa4   :  { %14142 = vmatpush3.bf16.msra.mxu1 %v14754_v14  ;;  %14170 = vmatpush3.bf16.msra.mxu0 %v14755_v18  ;;  %v14771_v54 = vld [vmem:[%s22864_s1 + $0x18] sm:$0xff]  }
  0xa5   :  { %v17492_v63 = vpop.permute.xlu1 %516  ;;  %v17494_v0 = vpop.permute.xlu0 %511  ;;  %14103 = vmatprep.mubr.msk.bf16.mxu1 %vm221_vm0, %v14756_v57  ;;  %14131 = vmatprep.mubr.msk.bf16.mxu0 %vm221_vm0, %v14757_v58  ;;  %v14776_v57 = vld [vmem:[%s22864_s1 + $0x20] sm:$0xff]  }
  0xa6   :  { %2248 = vperm.xlu1 %14625, %v17261_v59   ;;  %2243 = vperm.xlu0 %14624, %v17266_v60  }
  0xa7   :  { %14143 = vmatprep.subr.bf16.mxu1 %v14760_v61  ;;  %14171 = vmatprep.subr.bf16.mxu0 %v14761_v62 }
  0xa8   :  { %14144 = vmatpush3.bf16.msra.mxu1 %v14760_v61  ;;  %14172 = vmatpush3.bf16.msra.mxu0 %v14761_v62  ;;  %v14777_v62 = vld [vmem:[%s22864_s1 + $0x20] sm:$0xff]  }
  0xa9   :  { %v17512_v29 = vpop.permute.xlu1 %526  ;;  %v17514_v30 = vpop.permute.xlu0 %521  ;;  %14145 = vmatprep.subr.bf16.mxu1 %v14762_v15  ;;  %14173 = vmatprep.subr.bf16.mxu0 %v14763_v17 }
  0xaa   :  { %2258 = vperm.xlu1 %14625, %v17291_v9   ;;  %2253 = vperm.xlu0 %14624, %v17296_v12  }
  0xab   :  { %14104 = vmatmul.mubr.msk.bf16.gmra.mrb[64].mxu1 %vm221_vm0, %v14758_v13  ;;  %14132 = vmatmul.mubr.msk.bf16.gmra.mrb[72].mxu0 %vm221_vm0, %v14759_v20  ;;  %v14780_v13 = vld [vmem:[%s22863_s0 + $0xc0] sm:$0xff]  }
  0xac   :  { %14146 = vmatpush3.bf16.msra.mxu1 %v14762_v15  ;;  %14174 = vmatpush3.bf16.msra.mxu0 %v14763_v17  ;;  %v14781_v15 = vld [vmem:[%s22863_s0 + $0xd0] sm:$0xff]  }
  0xad   :  { %v17532_v39 = vpop.permute.xlu1 %536  ;;  %v17534_v43 = vpop.permute.xlu0 %531  ;;  %14147 = vmatprep.mubr.msk.bf16.mxu1 %vm221_vm0, %v14764_v31  ;;  %14175 = vmatprep.mubr.msk.bf16.mxu0 %vm221_vm0, %v14765_v32  ;;  %v14782_v31 = vld [vmem:[%s22863_s0 + $0xc8] sm:$0xff]   ;;  %v14783_v32 = vld [vmem:[%s22863_s0 + $0xd8] sm:$0xff]  }
  0xae   :  { %2268 = vperm.xlu1 %14625, %v17321_v25   ;;  %2263 = vperm.xlu0 %14624, %v17326_v26  }
  0xaf   :  { %14191 = vmatprep.subr.bf16.mxu1 %v14772_v37  ;;  %14219 = vmatprep.subr.bf16.mxu0 %v14773_v38 }
  0xb1   :  { %v17549_v48 = vpop.permute.xlu1 %546  ;;  %v17551_v49 = vpop.permute.xlu0 %541 }
  0xb2   :  { %22947 = vst [vmem:[#allocation3_spill] sm:$0xff] %v17549_v48  ;;  %2278 = vperm.xlu1 %14625, %v17351_v35   ;;  %2273 = vperm.xlu0 %14624, %v17356_v36  }
  0xb3   :  { %14148 = vmatmul.mubr.msk.bf16.vlgmr.msra.gmra.mrb[68].mxu1 %vm221_vm0, %v14766_v45  ;;  %14176 = vmatmul.mubr.msk.bf16.vlgmr.msra.gmra.mrb[76].mxu0 %vm221_vm0, %v14767_v2 }
  0xb4   :  { %14151 = vmatprep.mubr.msk.bf16.mxu1 %vm221_vm0, %v14768_v4  ;;  %14179 = vmatprep.mubr.msk.bf16.mxu0 %vm221_vm0, %v14769_v10  ;;  %v14784_v4 = vld [vmem:[%s22864_s1 + $0x30] sm:$0xff]  }
  0xb5   :  { %v17566_v14 = vpop.permute.xlu1 %556  ;;  %v17568_v18 = vpop.permute.xlu0 %551  ;;  %14192 = vmatpush3.bf16.msra.mxu1 %v14772_v37  ;;  %14220 = vmatpush3.bf16.msra.mxu0 %v14773_v38  ;;  %v14778_v37 = vld [vmem:[%s22864_s1 + $0x28] sm:$0xff]   ;;  %v14785_v10 = vld [vmem:[%s22864_s1 + $0x30] sm:$0xff]  }
  0xb6   :  { %22948 = vst [vmem:[#allocation4_spill] sm:$0xff] %v17566_v14  ;;  %2288 = vperm.xlu1 %14625, %v17378_v42   ;;  %2283 = vperm.xlu0 %14624, %v17388_v44   ;;  %v14779_v38 = vld [vmem:[%s22864_s1 + $0x28] sm:$0xff]  }
  0xb7   :  { %14193 = vmatprep.subr.bf16.mxu1 %v14774_v11  ;;  %14221 = vmatprep.subr.bf16.mxu0 %v14775_v52 }
  0xb9   :  { %v17583_v58 = vpop.permute.xlu1 %566  ;;  %v17585_v61 = vpop.permute.xlu0 %561  ;;  %14194 = vmatpush3.bf16.msra.mxu1 %v14774_v11  ;;  %14222 = vmatpush3.bf16.msra.mxu0 %v14775_v52  ;;  %v14788_v11 = vld [vmem:[%s22863_s0 + $0xd0] sm:$0xff]  }
  0xba   :  { %22949 = vst [vmem:[#allocation5_spill] sm:$0xff] %v17583_v58  ;;  %22950 = vst [vmem:[#allocation6_spill] sm:$0xff] %v17585_v61  ;;  %2298 = vperm.xlu1 %14625, %v17405_v47   ;;  %2293 = vperm.xlu0 %14624, %v17410_v1  }
  0xbb   :  { %14152 = vmatmul.mubr.msk.bf16.gmra.mrb[72].mxu1 %vm221_vm0, %v14770_v19  ;;  %14180 = vmatmul.mubr.msk.bf16.gmra.mrb[80].mxu0 %vm221_vm0, %v14771_v54  ;;  %v14786_v19 = vld [vmem:[%s22864_s1 + $0x38] sm:$0xff]  }
  0xbc   :  { %14155 = vmatprep.mubr.msk.bf16.mxu1 %vm221_vm0, %v14776_v57  ;;  %14183 = vmatprep.mubr.msk.bf16.mxu0 %vm221_vm0, %v14777_v62  ;;  %v14790_v54 = vld [vmem:[%s22863_s0 + $0xd8] sm:$0xff]   ;;  %v14791_v57 = vld [vmem:[%s22863_s0 + $0xe8] sm:$0xff]  }
  0xbd   :  { %v17600_v17 = vpop.permute.xlu1 %576  ;;  %v17602_v20 = vpop.permute.xlu0 %571  ;;  %14195 = vmatprep.subr.bf16.mxu1 %v14780_v13  ;;  %14223 = vmatprep.subr.bf16.mxu0 %v14781_v15 }
  0xbe   :  { %22951 = vst [vmem:[#allocation7_spill] sm:$0xff] %v17600_v17  ;;  %22952 = vst [vmem:[#allocation8_spill] sm:$0xff] %v17602_v20  ;;  %2308 = vperm.xlu1 %14625, %v17432_v50   ;;  %2303 = vperm.xlu0 %14624, %v17437_v51   ;;  %v14825_v20 = vld [vmem:[%s22864_s1 + $0x10] sm:$0xff]  }
  0xbf   :  { %14196 = vmatpush3.bf16.msra.mxu1 %v14780_v13  ;;  %14224 = vmatpush3.bf16.msra.mxu0 %v14781_v15  ;;  %v14792_v13 = vld [vmem:[%s22864_s1] sm:$0xff]  }
  0xc0   :  { %14197 = vmatprep.subr.bf16.mxu1 %v14782_v31  ;;  %14225 = vmatprep.subr.bf16.mxu0 %v14783_v32  ;;  %v14793_v15 = vld [vmem:[%s22864_s1] sm:$0xff]  }
  0xc1   :  { %v17620_v45 = vpop.permute.xlu1 %939  ;;  %v17622_v2 = vpop.permute.xlu0 %934 }
  0xc2   :  { %2671 = vperm.xlu1 %14625, %v17234_v22   ;;  %2666 = vperm.xlu0 %14624, %v17246_v56   ;;  %v14789_v22 = vld [vmem:[%s22863_s0 + $0xe0] sm:$0xff]  }
  0xc3   :  { %14156 = vmatmul.mubr.msk.bf16.gmra.mrb[76].mxu1 %vm221_vm0, %v14778_v37  ;;  %14184 = vmatmul.mubr.msk.bf16.gmra.mrb[84].mxu0 %vm221_vm0, %v14779_v38  ;;  %v14794_v37 = vld [vmem:[%s22864_s1 + $0x8] sm:$0xff]  }
  0xc4   :  { %14198 = vmatpush3.bf16.msra.mxu1 %v14782_v31  ;;  %14226 = vmatpush3.bf16.msra.mxu0 %v14783_v32  ;;  %v14800_v31 = vld [vmem:[%s22863_s0 + $0xd0] sm:$0xff]   ;;  %v14795_v38 = vld [vmem:[%s22864_s1 + $0x8] sm:$0xff]  }
  0xc5   :  { %v17640_v56 = vpop.permute.xlu1 %949  ;;  %v17642_v52 = vpop.permute.xlu0 %944  ;;  %14159 = vmatprep.mubr.msk.bf16.mxu1 %vm221_vm0, %v14784_v4  ;;  %14187 = vmatprep.mubr.msk.bf16.mxu0 %vm221_vm0, %v14785_v10  ;;  %v14796_v4 = vld [vmem:[%s22864_s1 + $0x10] sm:$0xff]  }
  0xc6   :  { %2681 = vperm.xlu1 %14625, %v17261_v59   ;;  %2676 = vperm.xlu0 %14624, %v17266_v60   ;;  %v14787_v59 = vld [vmem:[%s22864_s1 + $0x38] sm:$0xff]   ;;  %v14797_v10 = vld [vmem:[%s22864_s1 + $0x10] sm:$0xff]  }
  0xc7   :  { %14199 = vmatprep.subr.bf16.mxu1 %v14788_v11  ;;  %14227 = vmatprep.subr.bf16.mxu0 %v14789_v22 }
  0xc8   :  { %14200 = vmatpush3.bf16.msra.mxu1 %v14788_v11  ;;  %14228 = vmatpush3.bf16.msra.mxu0 %v14789_v22  ;;  %v14802_v11 = vld [vmem:[%s22863_s0 + $0xd8] sm:$0xff]   ;;  %v14803_v22 = vld [vmem:[%s22863_s0 + $0xe8] sm:$0xff]  }
  0xc9   :  { %v17660_v60 = vpop.permute.xlu1 %959  ;;  %v17662_v62 = vpop.permute.xlu0 %954  ;;  %14201 = vmatprep.subr.bf16.mxu1 %v14790_v54  ;;  %14229 = vmatprep.subr.bf16.mxu0 %v14791_v57 }
  0xca   :  { %2691 = vperm.xlu1 %14625, %v17291_v9   ;;  %2686 = vperm.xlu0 %14624, %v17296_v12   ;;  %v14801_v9 = vld [vmem:[%s22863_s0 + $0xe0] sm:$0xff]  }
  0xcb   :  { %14160 = vmatmul.mubr.msk.bf16.gmra.mrb[80].mxu1 %vm221_vm0, %v14786_v19  ;;  %14188 = vmatmul.mubr.msk.bf16.gmra.mrb[88].mxu0 %vm221_vm0, %v14787_v59 }
  0xcc   :  { %14202 = vmatpush3.bf16.msra.mxu1 %v14790_v54  ;;  %14230 = vmatpush3.bf16.msra.mxu0 %v14791_v57  ;;  %v14804_v57 = vld [vmem:[%s22864_s1 + $0x20] sm:$0xff]  }
  0xcd   :  { %v17680_v32 = vpop.permute.xlu1 %969  ;;  %v17682_v12 = vpop.permute.xlu0 %964  ;;  %14203 = vmatprep.mubr.msk.bf16.mxu1 %vm221_vm0, %v14792_v13  ;;  %14231 = vmatprep.mubr.msk.bf16.mxu0 %vm221_vm0, %v14793_v15  ;;  %v14808_v13 = vld [vmem:[%s22863_s0 + $0xe0] sm:$0xff]   ;;  %v14809_v15 = vld [vmem:[%s22863_s0 + $0xf0] sm:$0xff]  }
  0xce   :  { %2701 = vperm.xlu1 %14625, %v17321_v25   ;;  %2696 = vperm.xlu0 %14624, %v17326_v26  }
  0xcf   :  { %14247 = vmatprep.subr.bf16.mxu1 %v14800_v31  ;;  %14275 = vmatprep.subr.bf16.mxu0 %v14801_v9 }
  0xd1   :  { %v17697_v25 = vpop.permute.xlu1 %979  ;;  %v17699_v26 = vpop.permute.xlu0 %974 }
  0xd2   :  { %22953 = vst [vmem:[#allocation9_spill] sm:$0xff] %v17697_v25  ;;  %22954 = vst [vmem:[#allocation10_spill] sm:$0xff] %v17699_v26  ;;  %2711 = vperm.xlu1 %14625, %v17351_v35   ;;  %2706 = vperm.xlu0 %14624, %v17356_v36   ;;  %v14798_v35 = vld [vmem:[%s22864_s1 + $0x18] sm:$0xff]  }
  0xd3   :  { %14204 = vmatmul.mubr.msk.bf16.vlgmr.msra.gmra.mrb[84].mxu1 %vm221_vm0, %v14794_v37  ;;  %14232 = vmatmul.mubr.msk.bf16.vlgmr.msra.gmra.mrb[92].mxu0 %vm221_vm0, %v14795_v38  ;;  %v14799_v36 = vld [vmem:[%s22864_s1 + $0x18] sm:$0xff]   ;;  %v17770_v38 = vld [vmem:[%s22862_s2] sm:$0xff] }
  0xd4   :  { %14207 = vmatprep.mubr.msk.bf16.mxu1 %vm221_vm0, %v14796_v4  ;;  %14235 = vmatprep.mubr.msk.bf16.mxu0 %vm221_vm0, %v14797_v10  ;;  %v14811_v37 = vld [vmem:[%s22863_s0 + $0xf8] sm:$0xff]   ;;  %v14806_v4 = vld [vmem:[%s22864_s1 + $0x28] sm:$0xff]  }
  0xd5   :  { %v17714_v19 = vpop.permute.xlu1 %989  ;;  %v17716_v54 = vpop.permute.xlu0 %984  ;;  %14248 = vmatpush3.bf16.msra.mxu1 %v14800_v31  ;;  %14276 = vmatpush3.bf16.msra.mxu0 %v14801_v9  ;;  %v17758_v9 = vld [vmem:[%s22862_s2 + $0x8] sm:$0xff] }
  0xd6   :  { %22955 = vst [vmem:[#allocation11_spill] sm:$0xff] %v17714_v19  ;;  %2721 = vperm.xlu1 %14625, %v17378_v42   ;;  %2716 = vperm.xlu0 %14624, %v17388_v44   ;;  %v14805_v44 = vld [vmem:[%s22864_s1 + $0x20] sm:$0xff]   ;;  %v14807_v10 = vld [vmem:[%s22864_s1 + $0x28] sm:$0xff]  }
  0xd7   :  { %14249 = vmatprep.subr.bf16.mxu1 %v14802_v11  ;;  %14277 = vmatprep.subr.bf16.mxu0 %v14803_v22 }
  0xd9   :  { %v17731_v59 = vpop.permute.xlu1 %999  ;;  %v17733_v42 = vpop.permute.xlu0 %994  ;;  %14250 = vmatpush3.bf16.msra.mxu1 %v14802_v11  ;;  %14278 = vmatpush3.bf16.msra.mxu0 %v14803_v22  ;;  %v17785_v11 = vld [vmem:[%s22862_s2 + $0x18] sm:$0xff]  ;;  %v17790_v22 = vld [vmem:[%s22862_s2 + $0x10] sm:$0xff] }
  0xda   :  { %22956 = vst [vmem:[#allocation12_spill] sm:$0xff] %v17731_v59  ;;  %22957 = vst [vmem:[#allocation13_spill] sm:$0xff] %v17733_v42  ;;  %2731 = vperm.xlu1 %14625, %v17405_v47   ;;  %2726 = vperm.xlu0 %14624, %v17410_v1   ;;  %v14810_v47 = vld [vmem:[%s22863_s0 + $0xe8] sm:$0xff]   ;;  %v14820_v59 = vld [vmem:[%s22864_s1] sm:$0xff]  }
  0xdb   :  { %14208 = vmatmul.mubr.msk.bf16.gmra.mrb[88].mxu1 %vm221_vm0, %v14798_v35  ;;  %14236 = vmatmul.mubr.msk.bf16.gmra.mrb[96].mxu0 %vm221_vm0, %v14799_v36  ;;  %v14812_v35 = vld [vmem:[%s22864_s1 + $0x30] sm:$0xff]  }
  0xdc   :  { %14211 = vmatprep.mubr.msk.bf16.mxu1 %vm221_vm0, %v14804_v57  ;;  %14239 = vmatprep.mubr.msk.bf16.mxu0 %vm221_vm0, %v14805_v44  ;;  %v14813_v36 = vld [vmem:[%s22864_s1 + $0x30] sm:$0xff]   ;;  %v14817_v44 = vld [vmem:[%s22863_s0 + $0x100] sm:$0xff]  }
  0xdd   :  { %v17751_v31 = vpop.permute.xlu1 %1009  ;;  %v17753_v1 = vpop.permute.xlu0 %1004  ;;  %14251 = vmatprep.subr.bf16.mxu1 %v14808_v13  ;;  %14279 = vmatprep.subr.bf16.mxu0 %v14809_v15  ;;  %v14816_v57 = vld [vmem:[%s22863_s0 + $0xf0] sm:$0xff]  }
  0xde   :  { %22958 = vst [vmem:[#allocation14_spill] sm:$0xff] %v17751_v31  ;;  %22959 = vst [vmem:[#allocation15_spill] sm:$0xff] %v17753_v1  ;;  %2741 = vperm.xlu1 %14625, %v17432_v50   ;;  %2736 = vperm.xlu0 %14624, %v17437_v51   ;;  %v17879_v31 = vld [vmem:[%s22862_s2 + $0x48] sm:$0xff]  ;;  %v14824_v1 = vld [vmem:[%s22864_s1 + $0x10] sm:$0xff]  }
  0xdf   :  { %14252 = vmatpush3.bf16.msra.mxu1 %v14808_v13  ;;  %14280 = vmatpush3.bf16.msra.mxu0 %v14809_v15 }
  0xe0   :  { %14253 = vmatprep.subr.bf16.mxu1 %v14810_v47  ;;  %14281 = vmatprep.subr.bf16.mxu0 %v14811_v37 }
  0xe1   :  { %v17778_v50 = vpop.permute.xlu1 %1372  ;;  %v17780_v51 = vpop.permute.xlu0 %1367 }
  0xe2   :  { %22960 = vst [vmem:[#allocation16_spill] sm:$0xff] %v17778_v50  ;;  %22961 = vst [vmem:[#allocation17_spill] sm:$0xff] %v17780_v51  ;;  %3104 = vperm.xlu1 %14625, %v17758_v9   ;;  %3099 = vperm.xlu0 %14624, %v17770_v38   ;;  %v17815_v50 = vld [vmem:[%s22862_s2 + $0x28] sm:$0xff] }
  0xe3   :  { %14212 = vmatmul.mubr.msk.bf16.gmra.mrb[92].mxu1 %vm221_vm0, %v14806_v4  ;;  %14240 = vmatmul.mubr.msk.bf16.gmra.mrb[100].mxu0 %vm221_vm0, %v14807_v10  ;;  %v17820_v4 = vld [vmem:[%s22862_s2 + $0x20] sm:$0xff]  ;;  %v14814_v10 = vld [vmem:[%s22864_s1 + $0x38] sm:$0xff]  }
  0xe4   :  { %14254 = vmatpush3.bf16.msra.mxu1 %v14810_v47  ;;  %14282 = vmatpush3.bf16.msra.mxu0 %v14811_v37  ;;  %v14818_v47 = vld [vmem:[%s22863_s0 + $0xf8] sm:$0xff]   ;;  %v14819_v37 = vld [vmem:[%s22863_s0 + $0x108] sm:$0xff]  }
  0xe5   :  { %v17808_v13 = vpop.permute.xlu1 %1382  ;;  %v17810_v15 = vpop.permute.xlu0 %1377  ;;  %14215 = vmatprep.mubr.msk.bf16.mxu1 %vm221_vm0, %v14812_v35  ;;  %14243 = vmatprep.mubr.msk.bf16.mxu0 %vm221_vm0, %v14813_v36  ;;  %v17845_v35 = vld [vmem:[%s22862_s2 + $0x38] sm:$0xff]  ;;  %v17850_v36 = vld [vmem:[%s22862_s2 + $0x30] sm:$0xff] }
  0xe6   :  { %22962 = vst [vmem:[#allocation18_spill] sm:$0xff] %v17808_v13  ;;  %22963 = vst [vmem:[#allocation19_spill] sm:$0xff] %v17810_v15  ;;  %3114 = vperm.xlu1 %14625, %v17785_v11   ;;  %3109 = vperm.xlu0 %14624, %v17790_v22   ;;  %v14815_v13 = vld [vmem:[%s22864_s1 + $0x38] sm:$0xff]  }
  0xe7   :  { %14255 = vmatprep.subr.bf16.mxu1 %v14816_v57  ;;  %14283 = vmatprep.subr.bf16.mxu0 %v14817_v44 }
  0xe8   :  { %14256 = vmatpush3.bf16.msra.mxu1 %v14816_v57  ;;  %14284 = vmatpush3.bf16.msra.mxu0 %v14817_v44  ;;  %v14821_v57 = vld [vmem:[%s22864_s1] sm:$0xff]   ;;  %v17863_v44 = vld [vmem:[%s22863_s0 + $0xf0] sm:$0xff]  }
  0xe9   :  { %v17838_v51 = vpop.permute.xlu1 %1392  ;;  %v17840_v15 = vpop.permute.xlu0 %1387  ;;  %14257 = vmatprep.subr.bf16.mxu1 %v14818_v47  ;;  %14285 = vmatprep.subr.bf16.mxu0 %v14819_v37 }
  0xea   :  { %22964 = vst [vmem:[#allocation20_spill] sm:$0xff] %v17838_v51  ;;  %22965 = vst [vmem:[#allocation21_spill] sm:$0xff] %v17840_v15  ;;  %3124 = vperm.xlu1 %14625, %v17815_v50   ;;  %3119 = vperm.xlu0 %14624, %v17820_v4   ;;  %v17870_v51 = vld [vmem:[%s22863_s0 + $0x100] sm:$0xff]  }
  0xeb   :  { %14216 = vmatmul.mubr.msk.bf16.gmra.mrb[96].mxu1 %vm221_vm0, %v14814_v10  ;;  %14244 = vmatmul.mubr.msk.bf16.gmra.mrb[104].mxu0 %vm221_vm0, %v14815_v13  ;;  %v17884_v13 = vld [vmem:[%s22862_s2 + $0x40] sm:$0xff]  ;;  %v14822_v10 = vld [vmem:[%s22864_s1 + $0x8] sm:$0xff]  }
  0xec   :  { %14258 = vmatpush3.bf16.msra.mxu1 %v14818_v47  ;;  %14286 = vmatpush3.bf16.msra.mxu0 %v14819_v37  ;;  %v14823_v47 = vld [vmem:[%s22864_s1 + $0x8] sm:$0xff]  }
  0xed   :  { %v17872_v15 = vpop.permute.xlu1 %1402  ;;  %v17874_v58 = vpop.permute.xlu0 %1397  ;;  %14259 = vmatprep.mubr.msk.bf16.mxu1 %vm221_vm0, %v14820_v59  ;;  %14287 = vmatprep.mubr.msk.bf16.mxu0 %vm221_vm0, %v14821_v57 }
  0xee   :  { %22966 = vst [vmem:[#allocation22_spill] sm:$0xff] %v17872_v15  ;;  %22967 = vst [vmem:[#allocation23_spill] sm:$0xff] %v17874_v58  ;;  %3134 = vperm.xlu1 %14625, %v17845_v35   ;;  %3129 = vperm.xlu0 %14624, %v17850_v36   ;;  %v13897_v37 = vpop.f32.mrb[0].mxu0  ;;  %v13909_v15 = vpop.f32.mrb[0].mxu1 }
  0xef   :  { %v289_v58 = vadd.f32 %v13897_v37, %v17254_v27  ;;  %v337_v17 = vadd.f32 %v13909_v15, %v17457_v53  ;;  %v280_v42 = vpop.f32.mrb[1].mxu0  ;;  %v328_v61 = vpop.f32.mrb[1].mxu1  ;;  %14303 = vmatprep.subr.bf16.mxu1 %v17863_v44  ;;  %14331 = vmatprep.subr.bf16.mxu0 %v17870_v51  ;;  %v17915_v15 = vld [vmem:[%s22862_s2 + $0x58] sm:$0xff]  ;;  %v17920_v37 = vld [vmem:[%s22862_s2 + $0x50] sm:$0xff] }
  0xf0   :  { %v281_v59 = vadd.f32 %v280_v42, %v17256_v28  ;;  %v329_v27 = vadd.f32 %v328_v61, %v17427_v8  ;;  %v13898_v19 = vpop.f32.mrb[2].mxu0  ;;  %v13910_v28 = vpop.f32.mrb[2].mxu1  ;;  %v14830_v8 = vld [vmem:[%s22863_s0 + $0xf8] sm:$0xff]  }
  0xf1   :  { %v17908_v57 = vpop.permute.xlu1 %1412  ;;  %v17910_v53 = vpop.permute.xlu0 %1407  ;;  %v12243_v25 = vmul.f32 -1.442695, %v289_v58  ;;  %v12255_v48 = vmul.f32 -1.442695, %v337_v17 }
  0xf2   :  { %22968 = vst [vmem:[#allocation24_spill] sm:$0xff] %v17908_v57  ;;  %22969 = vst [vmem:[#allocation25_spill] sm:$0xff] %v17910_v53  ;;  %3144 = vperm.xlu1 %14625, %v17879_v31   ;;  %3139 = vperm.xlu0 %14624, %v17884_v13   ;;  %v12241_v61 = vmul.f32 -1.442695, %v281_v59  ;;  %v12253_v42 = vmul.f32 -1.442695, %v329_v27  ;;  %v292_v57 = vadd.f32 %v13898_v19, %v17284_v3 }
  0xf3   :  { %v340_v53 = vadd.f32 %v13910_v28, %v17455_v16  ;;  %v283_v14 = vpop.f32.mrb[3].mxu0  ;;  %v331_v26 = vpop.f32.mrb[3].mxu1  ;;  %15029 = vpow2.f32 %v12243_v25  ;;  %14260 = vmatmul.mubr.msk.bf16.vlgmr.msra.gmra.mrb[100].mxu1 %vm221_vm0, %v14822_v10  ;;  %14288 = vmatmul.mubr.msk.bf16.vlgmr.msra.gmra.mrb[108].mxu0 %vm221_vm0, %v14823_v47  ;;  %v14831_v59 = vld [vmem:[%s22863_s0 + $0x108] sm:$0xff]   ;;  %v14826_v25 = vld [vmem:[%s22864_s1 + $0x18] sm:$0xff]  }
  0xf4   :  { %v284_v58 = vadd.f32 %v283_v14, %v17286_v6  ;;  %v332_v17 = vadd.f32 %v331_v26, %v17425_v7  ;;  %15031 = vpow2.f32 %v12255_v48  ;;  %v12244_v27 = vmul.f32 -1.442695, %v292_v57  ;;  %v17943_v6 = vld [vmem:[%s22862_s2 + $0x68] sm:$0xff]  ;;  %v17948_v7 = vld [vmem:[%s22862_s2 + $0x60] sm:$0xff]  ;;  %14263 = vmatprep.mubr.msk.bf16.mxu1 %vm221_vm0, %v14824_v1  ;;  %14291 = vmatprep.mubr.msk.bf16.mxu0 %vm221_vm0, %v14825_v20  ;;  %v14827_v26 = vld [vmem:[%s22864_s1 + $0x18] sm:$0xff]  }
  0xf5   :  { %v12256_v3 = vmul.f32 -1.442695, %v340_v53  ;;  %v17936_v19 = vpop.permute.xlu1 %1422  ;;  %v17938_v16 = vpop.permute.xlu0 %1417  ;;  %15033 = vpow2.f32 %v12241_v61  ;;  %14304 = vmatpush3.bf16.msra.mxu1 %v17863_v44  ;;  %14332 = vmatpush3.bf16.msra.mxu0 %v17870_v51  ;;  %v14832_v20 = vld [vmem:[%s22864_s1 + $0x20] sm:$0xff]   ;;  %v17977_v28 = vld [vmem:[%s22862_s2 + $0x78] sm:$0xff] }
  0xf6   :  { %22970 = vst [vmem:[#allocation26_spill] sm:$0xff] %v17936_v19  ;;  %22971 = vst [vmem:[#allocation27_spill] sm:$0xff] %v17938_v16  ;;  %v12242_v48 = vmul.f32 -1.442695, %v284_v58  ;;  %v12254_v14 = vmul.f32 -1.442695, %v332_v17  ;;  %3154 = vperm.xlu1 %14625, %v17915_v15   ;;  %3149 = vperm.xlu0 %14624, %v17920_v37   ;;  %15035 = vpow2.f32 %v12253_v42 }
  0xf7   :  { %v13901_v10 = vpop.f32.mrb[4].mxu0  ;;  %15037 = vpow2.f32 %v12244_v27  ;;  %14305 = vmatprep.subr.bf16.mxu1 %v14830_v8  ;;  %14333 = vmatprep.subr.bf16.mxu0 %v14831_v59  ;;  %v14833_v57 = vld [vmem:[%s22864_s1 + $0x20] sm:$0xff]   ;;  %v14837_v58 = vld [vmem:[%s22863_s0 + $0x110] sm:$0xff]  }
  0xf8   :  { %v305_v1 = vadd.f32 %v13901_v10, %v17346_v34  ;;  %v296_v47 = vpop.f32.mrb[5].mxu0  ;;  %15039 = vpow2.f32 %v12256_v3  ;;  %v17982_v34 = vld [vmem:[%s22862_s2 + $0x70] sm:$0xff]  ;;  %v14836_v61 = vld [vmem:[%s22863_s0 + $0x100] sm:$0xff]  }
  0xf9   :  { %v297_v53 = vadd.f32 %v296_v47, %v17316_v24  ;;  %v17970_v44 = vpop.permute.xlu1 %1432  ;;  %v17972_v51 = vpop.permute.xlu0 %1427  ;;  %15041 = vpow2.f32 %v12242_v48  ;;  %14306 = vmatpush3.bf16.msra.mxu1 %v14830_v8  ;;  %14334 = vmatpush3.bf16.msra.mxu0 %v14831_v59  ;;  %v17996_v48 = vld [vmem:[%s22863_s0 + $0x108] sm:$0xff]  }
  0xfa   :  { %22972 = vst [vmem:[#allocation28_spill] sm:$0xff] %v17970_v44  ;;  %22973 = vst [vmem:[#allocation29_spill] sm:$0xff] %v17972_v51  ;;  %v12247_v24 = vmul.f32 -1.442695, %v305_v1  ;;  %v13902_v42 = vpop.f32.mrb[6].mxu0  ;;  %3164 = vperm.xlu1 %14625, %v17943_v6   ;;  %3159 = vperm.xlu0 %14624, %v17948_v7   ;;  %15043 = vpow2.f32 %v12254_v14  ;;  %v14839_v14 = vld [vmem:[%s22863_s0 + $0x118] sm:$0xff]  }
  0xfb   :  { %v12245_v17 = vmul.f32 -1.442695, %v297_v53  ;;  %v308_v27 = vadd.f32 %v13902_v42, %v17344_v33  ;;  %v299_v3 = vpop.f32.mrb[7].mxu0  ;;  %14264 = vmatmul.mubr.msk.bf16.gmra.mrb[104].mxu1 %vm221_vm0, %v14826_v25  ;;  %14292 = vmatmul.mubr.msk.bf16.gmra.mrb[112].mxu0 %vm221_vm0, %v14827_v26  ;;  %v14834_v53 = vld [vmem:[%s22864_s1 + $0x28] sm:$0xff]  }
  0xfc   :  { %15045 = vpow2.f32 %v12247_v24  ;;  %v300_v10 = vadd.f32 %v299_v3, %v17314_v23  ;;  %14267 = vmatprep.mubr.msk.bf16.mxu1 %vm221_vm0, %v14832_v20  ;;  %14295 = vmatprep.mubr.msk.bf16.mxu0 %vm221_vm0, %v14833_v57  ;;  %v14835_v20 = vld [vmem:[%s22864_s1 + $0x28] sm:$0xff]  }
  0xfd   :  { %15047 = vpow2.f32 %v12245_v17  ;;  %v12248_v33 = vmul.f32 -1.442695, %v308_v27  ;;  %v18004_v8 = vpop.permute.xlu1 %1442  ;;  %v18006_v59 = vpop.permute.xlu0 %1437  ;;  %14307 = vmatprep.subr.bf16.mxu1 %v14836_v61  ;;  %14335 = vmatprep.subr.bf16.mxu0 %v14837_v58 }
  0xfe   :  { %22974 = vst [vmem:[#allocation30_spill] sm:$0xff] %v18004_v8  ;;  %22975 = vst [vmem:[#allocation31_spill] sm:$0xff] %v18006_v59  ;;  %v15030_v1 = vpop.eup %15029  ;;  %v12246_v23 = vmul.f32 -1.442695, %v300_v10  ;;  %3174 = vperm.xlu1 %14625, %v17977_v28   ;;  %3169 = vperm.xlu0 %14624, %v17982_v34   ;;  %v13905_v47 = vpop.f32.mrb[8].mxu0 }
  0xff   :  { %v15032_v25 = vpop.eup %15031  ;;  %v393_v26 = vadd.f32 1.0, %v15030_v1  ;;  %15049 = vpow2.f32 %v12248_v33  ;;  %v312_v42 = vpop.f32.mrb[9].mxu0  ;;  %14308 = vmatpush3.bf16.msra.mxu1 %v14836_v61  ;;  %14336 = vmatpush3.bf16.msra.mxu0 %v14837_v58  ;;  %v321_v3 = vadd.f32 %v13905_v47, %v17400_v46  ;;  %v14840_v46 = vld [vmem:[%s22864_s1 + $0x30] sm:$0xff]  }
 0x100   :  { %v15034_v57 = vpop.eup %15033  ;;  %v405_v24 = vadd.f32 1.0, %v15032_v25  ;;  %15051 = vpow2.f32 %v12246_v23  ;;  %14309 = vmatprep.subr.bf16.mxu1 %v17996_v48  ;;  %14337 = vmatprep.subr.bf16.mxu0 %v14839_v14  ;;  %v313_v23 = vadd.f32 %v312_v42, %v17373_v41  ;;  %v13906_v25 = vpop.f32.mrb[10].mxu0  ;;  %v14841_v47 = vld [vmem:[%s22864_s1 + $0x30] sm:$0xff]  }
 0x101   :  { %v15036_v17 = vpop.eup %15035  ;;  %15053 = vrcp.f32 %v393_v26  ;;  %v391_v27 = vadd.f32 1.0, %v15034_v57  ;;  %v18019_v10 = vpop.permute.xlu1 %1805  ;;  %v14844_v41 = vld [vmem:[%s22863_s0 + $0x110] sm:$0xff]  }
 0x102   :  { %v18021_v33 = vpop.permute.xlu0 %1800  ;;  %v15038_v1 = vpop.eup %15037  ;;  %15055 = vrcp.f32 %v405_v24  ;;  %v403_v44 = vadd.f32 1.0, %v15036_v17  ;;  %3537 = vperm.xlu1 %14625, %v17758_v9   ;;  %3532 = vperm.xlu0 %14624, %v17770_v38   ;;  %v14845_v38 = vld [vmem:[%s22863_s0 + $0x120] sm:$0xff]   ;;  %v12251_v17 = vmul.f32 -1.442695, %v321_v3  ;;  %v14842_v3 = vld [vmem:[%s22864_s1 + $0x38] sm:$0xff]  }
 0x103   :  { %v15040_v61 = vpop.eup %15039  ;;  %15057 = vrcp.f32 %v391_v27  ;;  %v394_v58 = vadd.f32 1.0, %v15038_v1  ;;  %v315_v26 = vpop.f32.mrb[11].mxu0  ;;  %14268 = vmatmul.mubr.msk.bf16.gmra.mrb[108].mxu1 %vm221_vm0, %v14834_v53  ;;  %14296 = vmatmul.mubr.msk.bf16.gmra.mrb[116].mxu0 %vm221_vm0, %v14835_v20  ;;  %v324_v20 = vadd.f32 %v13906_v25, %v17398_v5  ;;  %v14847_v5 = vld [vmem:[%s22863_s0 + $0x128] sm:$0xff]  }
 0x104   :  { %v15042_v57 = vpop.eup %15041  ;;  %15059 = vrcp.f32 %v403_v44  ;;  %v406_v9 = vadd.f32 1.0, %v15040_v61  ;;  %14310 = vmatpush3.bf16.msra.mxu1 %v17996_v48  ;;  %14338 = vmatpush3.bf16.msra.mxu0 %v14839_v14  ;;  %v18046_v61 = vmul.f32 -1.442695, %v313_v23  ;;  %v14846_v48 = vld [vmem:[%s22863_s0 + $0x118] sm:$0xff]  }
 0x105   :  { %v15044_v24 = vpop.eup %15043  ;;  %15061 = vrcp.f32 %v394_v58  ;;  %v392_v42 = vadd.f32 1.0, %v15042_v57  ;;  %v18041_v27 = vpop.permute.xlu1 %1815  ;;  %14271 = vmatprep.mubr.msk.bf16.mxu1 %vm221_vm0, %v14840_v46  ;;  %14299 = vmatprep.mubr.msk.bf16.mxu0 %vm221_vm0, %v14841_v47 }
 0x106   :  { %v18043_v1 = vpop.permute.xlu0 %1810  ;;  %v15046_v44 = vpop.eup %15045  ;;  %15063 = vrcp.f32 %v406_v9  ;;  %v404_v53 = vadd.f32 1.0, %v15044_v24  ;;  %3547 = vperm.xlu1 %14625, %v17785_v11   ;;  %3542 = vperm.xlu0 %14624, %v17790_v22   ;;  %v316_v22 = vadd.f32 %v315_v26, %v17371_v40  ;;  %v14843_v24 = vld [vmem:[%s22864_s1 + $0x38] sm:$0xff]   ;;  %v12252_v26 = vmul.f32 -1.442695, %v324_v20 }
 0x107   :  { %v15048_v14 = vpop.eup %15047  ;;  %15065 = vrcp.f32 %v392_v42  ;;  %v397_v58 = vadd.f32 1.0, %v15046_v44  ;;  %v13925_v57 = vpop.f32.mrb[4].mxu1  ;;  %14311 = vmatprep.subr.bf16.mxu1 %v14844_v41  ;;  %14339 = vmatprep.subr.bf16.mxu0 %v14845_v38 }
 0x108   :  { %v13953_v23 = vpop.f32.mrb[12].mxu0  ;;  %15067 = vrcp.f32 %v404_v53  ;;  %v395_v11 = vadd.f32 1.0, %v15048_v14  ;;  %v713_v25 = vpop.f32.mrb[5].mxu1  ;;  %v722_v46 = vadd.f32 %v13925_v57, %v17494_v0  ;;  %14312 = vmatpush3.bf16.msra.mxu1 %v14844_v41  ;;  %14340 = vmatpush3.bf16.msra.mxu0 %v14845_v38  ;;  %v14848_v0 = vld [vmem:[%s22864_s1] sm:$0xff]  }
 0x109   :  { %v1146_v9 = vpop.f32.mrb[13].mxu0  ;;  %v15050_v42 = vpop.eup %15049  ;;  %15069 = vrcp.f32 %v397_v58  ;;  %v1155_v14 = vadd.f32 %v13953_v23, %v17642_v52  ;;  %v714_v41 = vadd.f32 %v713_v25, %v17474_v55  ;;  %14313 = vmatprep.subr.bf16.mxu1 %v14846_v48  ;;  %14341 = vmatprep.subr.bf16.mxu0 %v14847_v5  ;;  %v14849_v52 = vld [vmem:[%s22864_s1] sm:$0xff]  }
 0x10a   :  { %v18067_v47 = vpop.permute.xlu1 %1825  ;;  %v18069_v44 = vpop.permute.xlu0 %1820  ;;  %15071 = vrcp.f32 %v395_v11  ;;  %v398_v40 = vadd.f32 1.0, %v15050_v42  ;;  %3557 = vperm.xlu1 %14625, %v17815_v50   ;;  %3552 = vperm.xlu0 %14624, %v17820_v4   ;;  %v1147_v38 = vadd.f32 %v1146_v9, %v17622_v2  ;;  %v18087_v50 = vld [vmem:[%s22863_s0 + $0x110] sm:$0xff]   ;;  %v18092_v4 = vld [vmem:[%s22863_s0 + $0x120] sm:$0xff]   ;;  %v12250_v2 = vmul.f32 -1.442695, %v316_v22 }
 0x10b   :  { %22976 = vst [vmem:[#allocation32_spill] sm:$0xff] %v18067_v47  ;;  %v15052_v53 = vpop.eup %15051  ;;  %v13926_v8 = vpop.f32.mrb[6].mxu1  ;;  %15073 = vpow2.f32 %v12251_v17  ;;  %14272 = vmatmul.mubr.msk.bf16.gmra.mrb[112].mxu1 %vm221_vm0, %v14842_v3  ;;  %14300 = vmatmul.mubr.msk.bf16.gmra.mrb[120].mxu0 %vm221_vm0, %v14843_v24  ;;  %v12281_v9 = vmul.f32 -1.442695, %v722_v46  ;;  %v14850_v3 = vld [vmem:[%s22864_s1 + $0x8] sm:$0xff]  }
 0x10c   :  { %v18077_v58 = vpop.eup %15053  ;;  %v396_v57 = vadd.f32 1.0, %v15052_v53  ;;  %v13954_v20 = vpop.f32.mrb[14].mxu0  ;;  %15075 = vrcp.f32 %v398_v40  ;;  %v725_v17 = vadd.f32 %v13926_v8, %v17492_v63  ;;  %14314 = vmatpush3.bf16.msra.mxu1 %v14846_v48  ;;  %14342 = vmatpush3.bf16.msra.mxu0 %v14847_v5  ;;  %v12319_v63 = vmul.f32 -1.442695, %v1155_v14  ;;  %v14851_v48 = vld [vmem:[%s22864_s1 + $0x8] sm:$0xff]  }
 0x10d   :  { %22977 = vst [vmem:[#allocation33_spill] sm:$0xff] %v18077_v58  ;;  %v18094_v55 = vpop.eup %15055  ;;  %v716_v23 = vpop.f32.mrb[7].mxu1  ;;  %v1158_v8 = vadd.f32 %v13954_v20, %v17640_v56  ;;  %v12279_v22 = vmul.f32 -1.442695, %v714_v41  ;;  %14315 = vmatprep.mubr.msk.bf16.mxu1 %vm221_vm0, %v14848_v0  ;;  %14343 = vmatprep.mubr.msk.bf16.mxu0 %vm221_vm0, %v14849_v52 }
 0x10e   :  { %22978 = vst [vmem:[#allocation34_spill] sm:$0xff] %v18094_v55  ;;  %v1149_v11 = vpop.f32.mrb[15].mxu0  ;;  %v18099_v25 = vpop.eup %15057  ;;  %15077 = vrcp.f32 %v396_v57  ;;  %3567 = vperm.xlu1 %14625, %v17845_v35   ;;  %3562 = vperm.xlu0 %14624, %v17850_v36   ;;  %v717_v24 = vadd.f32 %v716_v23, %v17472_v21  ;;  %v14852_v35 = vld [vmem:[%s22864_s1 + $0x10] sm:$0xff]   ;;  %v12282_v14 = vmul.f32 -1.442695, %v725_v17 }
 0x10f   :  { %22979 = vst [vmem:[#allocation35_spill] sm:$0xff] %v18099_v25  ;;  %v18101_v42 = vpop.permute.xlu1 %1835  ;;  %v18103_v53 = vpop.permute.xlu0 %1830  ;;  %15079 = vpow2.f32 %v18046_v61  ;;  %v12317_v61 = vmul.f32 -1.442695, %v1147_v38  ;;  %v14853_v36 = vld [vmem:[%s22864_s1 + $0x10] sm:$0xff]   ;;  %14359 = vmatprep.subr.bf16.mxu1 %v18087_v50  ;;  %14387 = vmatprep.subr.bf16.mxu0 %v18092_v4  ;;  %v1150_v38 = vadd.f32 %v1149_v11, %v17620_v45  ;;  %v12320_v23 = vmul.f32 -1.442695, %v1158_v8 }
 0x110   :  { %v18105_v40 = vpop.eup %15059  ;;  %15081 = vpow2.f32 %v12252_v26  ;;  %v13929_v56 = vpop.f32.mrb[8].mxu1 }
 0x111   :  { %22980 = vst [vmem:[#allocation36_spill] sm:$0xff] %v18105_v40  ;;  %v18117_v5 = vpop.eup %15061  ;;  %v18120_v46 = vpop.f32.mrb[16].mxu0  ;;  %15083 = vpow2.f32 %v12250_v2  ;;  %v738_v51 = vadd.f32 %v13929_v56, %v17534_v43  ;;  %v14858_v43 = vld [vmem:[%s22863_s0 + $0x118] sm:$0xff]  }
 0x112   :  { %22981 = vst [vmem:[#allocation37_spill] sm:$0xff] %v18117_v5  ;;  %v18130_v26 = vpop.eup %15063  ;;  %v18132_v21 = vpop.f32.mrb[9].mxu1  ;;  %15085 = vpow2.f32 %v12281_v9  ;;  %3577 = vperm.xlu1 %14625, %v17879_v31   ;;  %3572 = vperm.xlu0 %14624, %v17884_v13   ;;  %v12280_v9 = vmul.f32 -1.442695, %v717_v24  ;;  %v14859_v31 = vld [vmem:[%s22863_s0 + $0x128] sm:$0xff]  }
 0x113   :  { %22982 = vst [vmem:[#allocation38_spill] sm:$0xff] %v18130_v26  ;;  %v18134_v57 = vpop.f32.mrb[17].mxu0  ;;  %v18140_v41 = vpop.eup %15065  ;;  %15087 = vpow2.f32 %v12319_v63  ;;  %14316 = vmatmul.mubr.msk.bf16.vlgmr.msra.gmra.mrb[116].mxu1 %vm221_vm0, %v14850_v3  ;;  %14344 = vmatmul.mubr.msk.bf16.vlgmr.msra.gmra.mrb[124].mxu0 %vm221_vm0, %v14851_v48  ;;  %v12285_v45 = vmul.f32 -1.442695, %v738_v51 }
 0x114   :  { %22983 = vst [vmem:[#allocation39_spill] sm:$0xff] %v18140_v41  ;;  %v18143_v20 = vpop.permute.xlu1 %1845  ;;  %v18145_v52 = vpop.permute.xlu0 %1840  ;;  %15089 = vpow2.f32 %v12279_v22  ;;  %v12318_v22 = vmul.f32 -1.442695, %v1150_v38  ;;  %14319 = vmatprep.mubr.msk.bf16.mxu1 %vm221_vm0, %v14852_v35  ;;  %14347 = vmatprep.mubr.msk.bf16.mxu0 %vm221_vm0, %v14853_v36  ;;  %v14854_v36 = vld [vmem:[%s22864_s1 + $0x18] sm:$0xff]  }
 0x115   :  { %22984 = vst [vmem:[#allocation40_spill] sm:$0xff] %v18143_v20  ;;  %22985 = vst [vmem:[#allocation41_spill] sm:$0xff] %v18145_v52  ;;  %v18149_v17 = vpop.eup %15067  ;;  %v18152_v59 = vpop.f32.mrb[10].mxu1  ;;  %15091 = vpow2.f32 %v12317_v61  ;;  %14360 = vmatpush3.bf16.msra.mxu1 %v18087_v50  ;;  %14388 = vmatpush3.bf16.msra.mxu0 %v18092_v4 }
 0x116   :  { %22986 = vst [vmem:[#allocation42_spill] sm:$0xff] %v18149_v17  ;;  %v18154_v0 = vpop.f32.mrb[18].mxu0  ;;  %v18160_v11 = vpop.eup %15069  ;;  %15093 = vpow2.f32 %v12282_v14  ;;  %3587 = vperm.xlu1 %14625, %v17915_v15   ;;  %3582 = vperm.xlu0 %14624, %v17920_v37   ;;  %v14861_v15 = vld [vmem:[%s22864_s1 + $0x20] sm:$0xff]  }
 0x117   :  { %22987 = vst [vmem:[#allocation43_spill] sm:$0xff] %v18160_v11  ;;  %v18162_v2 = vpop.f32.mrb[11].mxu1  ;;  %v18164_v63 = vpop.f32.mrb[19].mxu0  ;;  %15095 = vpow2.f32 %v12320_v23  ;;  %v14855_v23 = vld [vmem:[%s22864_s1 + $0x18] sm:$0xff]   ;;  %14361 = vmatprep.subr.bf16.mxu1 %v14858_v43  ;;  %14389 = vmatprep.subr.bf16.mxu0 %v14859_v31 }
 0x118   :  { %v18169_v8 = vpop.eup %15071  ;;  %v18176_v24 = vpop.permute.xlu1 %1855  ;;  %15097 = vpow2.f32 %v12280_v9 }
 0x119   :  { %22988 = vst [vmem:[#allocation44_spill] sm:$0xff] %v18169_v8  ;;  %v15074_v13 = vpop.eup %15073  ;;  %22989 = vst [vmem:[#allocation45_spill] sm:$0xff] %v18176_v24  ;;  %v18178_v56 = vpop.permute.xlu0 %1850  ;;  %14362 = vmatpush3.bf16.msra.mxu1 %v14858_v43  ;;  %14390 = vmatpush3.bf16.msra.mxu0 %v14859_v31  ;;  %v741_v8 = vadd.f32 %v18152_v59, %v17532_v39  ;;  %v1174_v39 = vadd.f32 %v18154_v0, %v17680_v32  ;;  %v14869_v32 = vld [vmem:[%s22864_s1 + $0x30] sm:$0xff]   ;;  %v18512_v24 = vld [vmem:[%s22862_s2 + $0x58] sm:$0xff] }
 0x11a   :  { %22990 = vst [vmem:[#allocation46_spill] sm:$0xff] %v18178_v56  ;;  %v18184_v61 = vpop.eup %15075  ;;  %v401_v48 = vadd.f32 1.0, %v15074_v13  ;;  %v18190_v38 = vpop.f32.mrb[12].mxu1  ;;  %3597 = vperm.xlu1 %14625, %v17943_v6   ;;  %3592 = vperm.xlu0 %14624, %v17948_v7   ;;  %v1171_v13 = vadd.f32 %v18120_v46, %v17682_v12  ;;  %v14865_v6 = vld [vmem:[%s22863_s0 + $0x130] sm:$0xff]   ;;  %v18243_v12 = vld [vmem:[%s22863_s0 + $0x128] sm:$0xff]  }
 0x11b   :  { %22991 = vst [vmem:[#allocation47_spill] sm:$0xff] %v18184_v61  ;;  %v18188_v14 = vpop.eup %15077  ;;  %v18192_v35 = vpop.f32.mrb[20].mxu0  ;;  %14320 = vmatmul.mubr.msk.bf16.gmra.mrb[120].mxu1 %vm221_vm0, %v14854_v36  ;;  %14348 = vmatmul.mubr.msk.bf16.gmra.mrb[128].mxu0 %vm221_vm0, %v14855_v23  ;;  %v18254_v36 = vld [vmem:[%s22863_s0 + $0x138] sm:$0xff]  }
 0x11c   :  { %22992 = vst [vmem:[#allocation48_spill] sm:$0xff] %v18188_v14  ;;  %v15080_v37 = vpop.eup %15079  ;;  %15099 = vrcp.f32 %v401_v48  ;;  %v18204_v51 = vpop.f32.mrb[13].mxu1  ;;  %v14860_v48 = vld [vmem:[%s22864_s1 + $0x20] sm:$0xff]   ;;  %14351 = vmatprep.mubr.msk.bf16.mxu0 %vm221_vm0, %v14861_v15  ;;  %v12323_v61 = vmul.f32 -1.442695, %v1171_v13  ;;  %14391 = vmatprep.subr.bf16.mxu0 %v14865_v6 }
 0x11d   :  { %v18206_v9 = vpop.f32.mrb[21].mxu0  ;;  %v15082_v3 = vpop.eup %15081  ;;  %v399_v55 = vadd.f32 1.0, %v15080_v37  ;;  %15101 = vpow2.f32 %v12318_v22  ;;  %14323 = vmatprep.mubr.msk.bf16.mxu1 %vm221_vm0, %v14860_v48  ;;  %v18263_v48 = vld [vmem:[%s22862_s2 + $0x8] sm:$0xff]  ;;  %14392 = vmatpush3.bf16.msra.mxu0 %v14865_v6 }
 0x11e   :  { %v18210_v50 = vpop.permute.xlu1 %1865  ;;  %v18212_v4 = vpop.permute.xlu0 %1860  ;;  %v402_v40 = vadd.f32 1.0, %v15082_v3  ;;  %15103 = vpow2.f32 %v12285_v45  ;;  %v14864_v45 = vld [vmem:[%s22863_s0 + $0x120] sm:$0xff]   ;;  %3607 = vperm.xlu1 %14625, %v17977_v28   ;;  %3602 = vperm.xlu0 %14624, %v17982_v34   ;;  %v14862_v28 = vld [vmem:[%s22864_s1 + $0x28] sm:$0xff]  }
 0x11f   :  { %22993 = vst [vmem:[#allocation49_spill] sm:$0xff] %v18210_v50  ;;  %22994 = vst [vmem:[#allocation50_spill] sm:$0xff] %v18212_v4  ;;  %v15084_v26 = vpop.eup %15083  ;;  %v18220_v17 = vpop.f32.mrb[14].mxu1  ;;  %15105 = vrcp.f32 %v399_v55  ;;  %14363 = vmatprep.subr.bf16.mxu1 %v14864_v45  ;;  %14393 = vmatprep.subr.bf16.mxu0 %v18254_v36 }
 0x120   :  { %v15086_v22 = vpop.eup %15085  ;;  %v400_v37 = vadd.f32 1.0, %v15084_v26  ;;  %v18226_v11 = vpop.f32.mrb[22].mxu0  ;;  %15107 = vrcp.f32 %v402_v40  ;;  %14364 = vmatpush3.bf16.msra.mxu1 %v14864_v45 }
 0x121   :  { %v15088_v3 = vpop.eup %15087  ;;  %v826_v7 = vadd.f32 1.0, %v15086_v22  ;;  %v18234_v55 = vpop.f32.mrb[15].mxu1  ;;  %14365 = vmatprep.subr.bf16.mxu1 %v18243_v12  ;;  %14394 = vmatpush3.bf16.msra.mxu0 %v18254_v36  ;;  %v14870_v36 = vld [vmem:[%s22864_s1 + $0x38] sm:$0xff]  }
 0x122   :  { %v18236_v26 = vpop.f32.mrb[23].mxu0  ;;  %v15090_v46 = vpop.eup %15089  ;;  %15109 = vrcp.f32 %v400_v37  ;;  %v1259_v43 = vadd.f32 1.0, %v15088_v3  ;;  %v730_v37 = vadd.f32 %v18132_v21, %v17514_v30  ;;  %v18272_v30 = vld [vmem:[%s22862_s2] sm:$0xff]  ;;  %3970 = vperm.xlu1 %14625, %v18263_v48  }
 0x123   :  { %v18245_v31 = vpop.permute.xlu1 %1875  ;;  %v18247_v40 = vpop.permute.xlu0 %1870  ;;  %15111 = vrcp.f32 %v826_v7  ;;  %v824_v22 = vadd.f32 1.0, %v15090_v46  ;;  %v1163_v7 = vadd.f32 %v18134_v57, %v17662_v62  ;;  %v14863_v62 = vld [vmem:[%s22864_s1 + $0x28] sm:$0xff]   ;;  %3965 = vperm.xlu0 %14624, %v18272_v30   ;;  %14324 = vmatmul.mubr.msk.bf16.gmra.mrb[124].mxu1 %vm221_vm0, %v14862_v28 }
 0x124   :  { %22995 = vst [vmem:[#allocation51_spill] sm:$0xff] %v18245_v31  ;;  %22996 = vst [vmem:[#allocation52_spill] sm:$0xff] %v18247_v40  ;;  %v15092_v23 = vpop.eup %15091  ;;  %15113 = vrcp.f32 %v1259_v43  ;;  %v18267_v46 = vpop.f32.mrb[16].mxu1  ;;  %14352 = vmatmul.mubr.msk.bf16.gmra.mrb[132].mxu0 %vm221_vm0, %v14863_v62  ;;  %14366 = vmatpush3.bf16.msra.mxu1 %v18243_v12  ;;  %v18345_v28 = vld [vmem:[%s22862_s2 + $0x28] sm:$0xff]  ;;  %v14871_v62 = vld [vmem:[%s22864_s1 + $0x38] sm:$0xff]  }
 0x125   :  { %v15094_v15 = vpop.eup %15093  ;;  %v1257_v3 = vadd.f32 1.0, %v15092_v23  ;;  %15115 = vrcp.f32 %v824_v22  ;;  %v18277_v13 = vpop.f32.mrb[24].mxu0  ;;  %v12321_v58 = vmul.f32 -1.442695, %v1163_v7  ;;  %v14873_v7 = vld [vmem:[%s22863_s0 + $0x140] sm:$0xff]   ;;  %14355 = vmatprep.mubr.msk.bf16.mxu0 %vm221_vm0, %v14869_v32 }
 0x126   :  { %v15096_v34 = vpop.eup %15095  ;;  %v827_v21 = vadd.f32 1.0, %v15094_v15  ;;  %v18279_v43 = vpop.f32.mrb[17].mxu1  ;;  %v18293_v15 = vld [vmem:[%s22862_s2 + $0x18] sm:$0xff]  ;;  %14395 = vmatprep.subr.bf16.mxu0 %v14873_v7 }
 0x127   :  { %v15098_v57 = vpop.eup %15097  ;;  %15117 = vrcp.f32 %v1257_v3  ;;  %v1260_v23 = vadd.f32 1.0, %v15096_v34  ;;  %v18286_v14 = vpop.f32.mrb[25].mxu0  ;;  %v18310_v34 = vld [vmem:[%s22862_s2 + $0x10] sm:$0xff]  ;;  %3980 = vperm.xlu1 %14625, %v18293_v15   ;;  %14396 = vmatpush3.bf16.msra.mxu0 %v14873_v7 }
 0x128   :  { %v18288_v22 = vpop.permute.xlu1 %2238  ;;  %v18297_v45 = vpop.eup %15099  ;;  %15119 = vrcp.f32 %v827_v21  ;;  %v825_v6 = vadd.f32 1.0, %v15098_v57  ;;  %v14868_v21 = vld [vmem:[%s22864_s1 + $0x30] sm:$0xff]   ;;  %v12283_v57 = vmul.f32 -1.442695, %v730_v37  ;;  %3975 = vperm.xlu0 %14624, %v18310_v34  }
 0x129   :  { %22997 = vst [vmem:[#allocation53_spill] sm:$0xff] %v18288_v22  ;;  %22998 = vst [vmem:[#allocation54_spill] sm:$0xff] %v18297_v45  ;;  %v18301_v59 = vpop.permute.xlu0 %2233  ;;  %v18303_v3 = vpop.f32.mrb[18].mxu1  ;;  %15121 = vrcp.f32 %v1260_v23  ;;  %v14872_v37 = vld [vmem:[%s22863_s0 + $0x130] sm:$0xff]   ;;  %14327 = vmatprep.mubr.msk.bf16.mxu1 %vm221_vm0, %v14868_v21 }
 0x12a   :  { %22999 = vst [vmem:[#allocation55_spill] sm:$0xff] %v18301_v59  ;;  %v15102_v0 = vpop.eup %15101  ;;  %v18318_v5 = vpop.f32.mrb[26].mxu0  ;;  %15123 = vrcp.f32 %v825_v6  ;;  %v733_v59 = vadd.f32 %v18162_v2, %v17512_v29  ;;  %v1166_v29 = vadd.f32 %v18164_v63, %v17660_v60  ;;  %v12324_v60 = vmul.f32 -1.442695, %v1174_v39  ;;  %v14875_v39 = vld [vmem:[%s22863_s0 + $0x148] sm:$0xff]   ;;  %14367 = vmatprep.subr.bf16.mxu1 %v14872_v37  ;;  %v18422_v7 = vld [vmem:[%s22862_s2 + $0x30] sm:$0xff] }
 0x12b   :  { %v18320_v25 = vpop.f32.mrb[19].mxu1  ;;  %v15104_v41 = vpop.eup %15103  ;;  %v1258_v22 = vadd.f32 1.0, %v15102_v0  ;;  %15125 = vpow2.f32 %v12323_v61  ;;  %v12286_v0 = vmul.f32 -1.442695, %v741_v8  ;;  %v754_v63 = vadd.f32 %v18190_v38, %v17568_v18  ;;  %14368 = vmatpush3.bf16.msra.mxu1 %v14872_v37  ;;  %3990 = vperm.xlu1 %14625, %v18345_v28  }
 0x12c   :  { %v18324_v50 = vpop.f32.mrb[27].mxu0  ;;  %v18334_v23 = vpop.eup %15105  ;;  %v830_v6 = vadd.f32 1.0, %v15104_v41  ;;  %v18350_v41 = vld [vmem:[%s22862_s2 + $0x20] sm:$0xff]  ;;  %v1187_v61 = vadd.f32 %v18192_v35, %v17716_v54  ;;  %v746_v18 = vadd.f32 %v18204_v51, %v17551_v49  ;;  %v14874_v35 = vld [vmem:[%s22863_s0 + $0x138] sm:$0xff]   ;;  %v12284_v51 = vmul.f32 -1.442695, %v733_v59  ;;  %14397 = vmatprep.subr.bf16.mxu0 %v14875_v39  ;;  %14328 = vmatmul.mubr.msk.bf16.gmra.mrb[128].mxu1 %vm221_vm0, %v14870_v36 }
 0x12d   :  { %23000 = vst [vmem:[#allocation56_spill] sm:$0xff] %v18334_v23  ;;  %v18338_v2 = vpop.permute.xlu1 %2248  ;;  %v18352_v8 = vpop.eup %15107  ;;  %15127 = vrcp.f32 %v1258_v22  ;;  %3985 = vperm.xlu0 %14624, %v18350_v41   ;;  %14369 = vmatprep.subr.bf16.mxu1 %v14874_v35 }
 0x12e   :  { %23001 = vst [vmem:[#allocation57_spill] sm:$0xff] %v18338_v2  ;;  %23002 = vst [vmem:[#allocation58_spill] sm:$0xff] %v18352_v8  ;;  %v18358_v12 = vpop.permute.xlu0 %2243  ;;  %v18368_v22 = vpop.eup %15109  ;;  %15129 = vrcp.f32 %v830_v6  ;;  %v23006_v2 = vld [vmem:[#allocation10_spill] sm:$0xff]  ;;  %v12322_v6 = vmul.f32 -1.442695, %v1166_v29  ;;  %v23011_v29 = vld [vmem:[#allocation11_spill] sm:$0xff]  ;;  %14356 = vmatmul.mubr.msk.bf16.gmra.mrb[136].mxu0 %vm221_vm0, %v14871_v62 }
 0x12f   :  { %23003 = vst [vmem:[#allocation59_spill] sm:$0xff] %v18358_v12  ;;  %23004 = vst [vmem:[#allocation60_spill] sm:$0xff] %v18368_v22  ;;  %v18372_v54 = vpop.f32.mrb[20].mxu1  ;;  %v18374_v38 = vpop.f32.mrb[28].mxu0  ;;  %15131 = vpow2.f32 %v12283_v57  ;;  %v1179_v21 = vadd.f32 %v18206_v9, %v23006_v2  ;;  %v23007_v12 = vld [vmem:[#allocation4_spill] sm:$0xff]  ;;  %14370 = vmatpush3.bf16.msra.mxu1 %v14874_v35  ;;  %14398 = vmatpush3.bf16.msra.mxu0 %v14875_v39  ;;  %v18460_v35 = vld [vmem:[%s22862_s2 + $0x40] sm:$0xff] }
 0x130   :  { %v18386_v49 = vpop.eup %15111  ;;  %v757_v32 = vadd.f32 %v18220_v17, %v23007_v12  ;;  %v18392_v31 = vpop.f32.mrb[21].mxu1  ;;  %15133 = vpow2.f32 %v12321_v58  ;;  %v18405_v17 = vld [vmem:[%s22862_s2 + $0x38] sm:$0xff]  ;;  %v12289_v2 = vmul.f32 -1.442695, %v754_v63  ;;  %v12327_v58 = vmul.f32 -1.442695, %v1187_v61 }
 0x131   :  { %23005 = vst [vmem:[#allocation61_spill] sm:$0xff] %v18386_v49  ;;  %v18394_v4 = vpop.f32.mrb[29].mxu0  ;;  %v18396_v40 = vpop.eup %15113  ;;  %15135 = vpow2.f32 %v12286_v0  ;;  %v1190_v12 = vadd.f32 %v18226_v11, %v23011_v29  ;;  %v12287_v0 = vmul.f32 -1.442695, %v746_v18  ;;  %v14876_v61 = vld [vmem:[%s22864_s1] sm:$0xff]   ;;  %4000 = vperm.xlu1 %14625, %v18405_v17   ;;  %3995 = vperm.xlu0 %14624, %v18422_v7   ;;  %v14878_v39 = vld [vmem:[%s22864_s1 + $0x8] sm:$0xff]  }
 0x132   :  { %23008 = vst [vmem:[#allocation10_spill] sm:$0xff] %v18396_v40  ;;  %v18398_v45 = vpop.permute.xlu1 %2258  ;;  %v18400_v57 = vpop.f32.mrb[22].mxu1  ;;  %15137 = vpow2.f32 %v12324_v60  ;;  %v14877_v29 = vld [vmem:[%s22864_s1] sm:$0xff]   ;;  %v12325_v22 = vmul.f32 -1.442695, %v1179_v21  ;;  %14371 = vmatprep.mubr.msk.bf16.mxu1 %vm221_vm0, %v14876_v61  ;;  %v14880_v49 = vld [vmem:[%s22864_s1 + $0x10] sm:$0xff]  }
 0x133   :  { %23009 = vst [vmem:[#allocation4_spill] sm:$0xff] %v18398_v45  ;;  %v18409_v59 = vpop.eup %15115  ;;  %v18413_v8 = vpop.permute.xlu0 %2253  ;;  %15139 = vpow2.f32 %v12284_v51  ;;  %v12290_v60 = vmul.f32 -1.442695, %v757_v32  ;;  %v12328_v36 = vmul.f32 -1.442695, %v1190_v12  ;;  %14399 = vmatprep.mubr.msk.bf16.mxu0 %vm221_vm0, %v14877_v29  ;;  %v14879_v51 = vld [vmem:[%s22864_s1 + $0x8] sm:$0xff]  }
 0x134   :  { %23010 = vst [vmem:[#allocation62_spill] sm:$0xff] %v18409_v59  ;;  %23012 = vst [vmem:[#allocation11_spill] sm:$0xff] %v18413_v8  ;;  %v18415_v37 = vpop.f32.mrb[30].mxu0  ;;  %v18424_v9 = vpop.eup %15117  ;;  %15141 = vpow2.f32 %v12322_v6  ;;  %v18447_v8 = vld [vmem:[%s22862_s2 + $0x48] sm:$0xff]  ;;  %v14881_v29 = vld [vmem:[%s22864_s1 + $0x10] sm:$0xff]   ;;  %14372 = vmatmul.mubr.msk.bf16.vlgmr.msra.gmra.mrb[132].mxu1 %vm221_vm0, %v14878_v39 }
 0x135   :  { %23013 = vst [vmem:[#allocation63_spill] sm:$0xff] %v18424_v9  ;;  %v18426_v63 = vpop.f32.mrb[23].mxu1  ;;  %v18428_v11 = vpop.f32.mrb[31].mxu0  ;;  %15143 = vpow2.f32 %v12289_v2  ;;  %4010 = vperm.xlu1 %14625, %v18447_v8   ;;  %4005 = vperm.xlu0 %14624, %v18460_v35  }
 0x136   :  { %v18436_v23 = vpop.eup %15119  ;;  %v18442_v45 = vpop.permute.xlu1 %2268  ;;  %15145 = vpow2.f32 %v12327_v58  ;;  %14400 = vmatmul.mubr.msk.bf16.vlgmr.msra.gmra.mrb[140].mxu0 %vm221_vm0, %v14879_v51  ;;  %14375 = vmatprep.mubr.msk.bf16.mxu1 %vm221_vm0, %v14880_v49  ;;  %v23027_v51 = vld [vmem:[#allocation9_spill] sm:$0xff] }
 0x137   :  { %23014 = vst [vmem:[#allocation64_spill] sm:$0xff] %v18436_v23  ;;  %v18440_v18 = vpop.eup %15121  ;;  %23016 = vst [vmem:[#allocation66_spill] sm:$0xff] %v18442_v45  ;;  %v18453_v62 = vpop.permute.xlu0 %2263  ;;  %15147 = vpow2.f32 %v12287_v0  ;;  %v14885_v0 = vld [vmem:[%s22863_s0 + $0x140] sm:$0xff]   ;;  %14403 = vmatprep.mubr.msk.bf16.mxu0 %vm221_vm0, %v14881_v29  ;;  %v1182_v39 = vadd.f32 %v18236_v26, %v23027_v51  ;;  %v14882_v29 = vld [vmem:[%s22864_s1 + $0x18] sm:$0xff]  }
 0x138   :  { %23015 = vst [vmem:[#allocation65_spill] sm:$0xff] %v18440_v18  ;;  %v18451_v21 = vpop.eup %15123  ;;  %23018 = vst [vmem:[#allocation68_spill] sm:$0xff] %v18453_v62  ;;  %v18467_v2 = vpop.f32.mrb[24].mxu1  ;;  %15149 = vpow2.f32 %v12325_v22  ;;  %14443 = vmatprep.subr.bf16.mxu0 %v14885_v0 }
 0x139   :  { %23017 = vst [vmem:[#allocation67_spill] sm:$0xff] %v18451_v21  ;;  %v15126_v32 = vpop.eup %15125  ;;  %v18469_v12 = vpop.f32.mrb[32].mxu0  ;;  %4020 = vperm.xlu1 %14625, %v18512_v24   ;;  %14444 = vmatpush3.bf16.msra.mxu0 %v14885_v0 }
 0x13a   :  { %v18481_v58 = vpop.eup %15127  ;;  %v1263_v40 = vadd.f32 1.0, %v15126_v32  ;;  %v18483_v18 = vpop.f32.mrb[25].mxu1  ;;  %v14884_v32 = vld [vmem:[%s22863_s0 + $0x130] sm:$0xff]  }
 0x13b   :  { %23019 = vst [vmem:[#allocation69_spill] sm:$0xff] %v18481_v58  ;;  %v18485_v61 = vpop.f32.mrb[33].mxu0  ;;  %v18490_v23 = vpop.eup %15129  ;;  %14415 = vmatprep.subr.bf16.mxu1 %v14884_v32 }
 0x13c   :  { %23020 = vst [vmem:[#allocation70_spill] sm:$0xff] %v18490_v23  ;;  %v18492_v45 = vpop.permute.xlu1 %2278  ;;  %v18494_v62 = vpop.f32.mrb[26].mxu1  ;;  %15151 = vrcp.f32 %v1263_v40  ;;  %v18517_v40 = vld [vmem:[%s22862_s2 + $0x50] sm:$0xff]  ;;  %14416 = vmatpush3.bf16.msra.mxu1 %v14884_v32 }
 0x13d   :  { %23021 = vst [vmem:[#allocation71_spill] sm:$0xff] %v18492_v45  ;;  %v15132_v6 = vpop.eup %15131  ;;  %v18501_v59 = vpop.permute.xlu0 %2273  ;;  %15153 = vpow2.f32 %v12290_v60  ;;  %4015 = vperm.xlu0 %14624, %v18517_v40   ;;  %14376 = vmatmul.mubr.msk.bf16.gmra.mrb[136].mxu1 %vm221_vm0, %v14882_v29  ;;  %v23045_v29 = vld [vmem:[#allocation13_spill] sm:$0xff] }
 0x13e   :  { %23022 = vst [vmem:[#allocation72_spill] sm:$0xff] %v18501_v59  ;;  %v18503_v21 = vpop.f32.mrb[34].mxu0  ;;  %v15134_v22 = vpop.eup %15133  ;;  %v828_v45 = vadd.f32 1.0, %v15132_v6  ;;  %15155 = vpow2.f32 %v12328_v36 }
 0x13f   :  { %v18507_v20 = vpop.f32.mrb[27].mxu1  ;;  %v15136_v9 = vpop.eup %15135  ;;  %v1261_v6 = vadd.f32 1.0, %v15134_v22  ;;  %v23025_v22 = vld [vmem:[#allocation3_spill] sm:$0xff] }
 0x140   :  { %v18522_v60 = vpop.f32.mrb[35].mxu0  ;;  %v15138_v58 = vpop.eup %15137  ;;  %15157 = vrcp.f32 %v828_v45  ;;  %v831_v59 = vadd.f32 1.0, %v15136_v9  ;;  %v749_v36 = vadd.f32 %v18234_v55, %v23025_v22  ;;  %v18539_v45 = vld [vmem:[%s22862_s2 + $0x68] sm:$0xff]  ;;  %v18548_v55 = vld [vmem:[%s22862_s2 + $0x60] sm:$0xff] }
 0x141   :  { %23023 = vst [vmem:[#allocation73_spill] sm:$0xff] %v18522_v60  ;;  %v18526_v19 = vpop.permute.xlu1 %2288  ;;  %v15140_v52 = vpop.eup %15139  ;;  %15159 = vrcp.f32 %v1261_v6  ;;  %v1264_v56 = vadd.f32 1.0, %v15138_v58  ;;  %v14883_v6 = vld [vmem:[%s22864_s1 + $0x18] sm:$0xff]   ;;  %4030 = vperm.xlu1 %14625, %v18539_v45   ;;  %4025 = vperm.xlu0 %14624, %v18548_v55  }
 0x142   :  { %23024 = vst [vmem:[#allocation74_spill] sm:$0xff] %v18526_v19  ;;  %v18532_v16 = vpop.permute.xlu0 %2283  ;;  %v15142_v49 = vpop.eup %15141  ;;  %15161 = vrcp.f32 %v831_v59  ;;  %v829_v9 = vadd.f32 1.0, %v15140_v52  ;;  %v23029_v59 = vld [vmem:[#allocation8_spill] sm:$0xff]  ;;  %14404 = vmatmul.mubr.msk.bf16.gmra.mrb[144].mxu0 %vm221_vm0, %v14883_v6  ;;  %v1195_v6 = vadd.f32 %v18286_v14, %v23045_v29 }
 0x143   :  { %23026 = vst [vmem:[#allocation3_spill] sm:$0xff] %v18532_v16  ;;  %v18543_v58 = vpop.f32.mrb[28].mxu1  ;;  %v15144_v52 = vpop.eup %15143  ;;  %15163 = vrcp.f32 %v1264_v56  ;;  %v1262_v26 = vadd.f32 1.0, %v15142_v49  ;;  %v770_v22 = vadd.f32 %v18267_v46, %v23029_v59  ;;  %v14886_v16 = vld [vmem:[%s22863_s0 + $0x138] sm:$0xff]   ;;  %v12288_v46 = vmul.f32 -1.442695, %v749_v36 }
 0x144   :  { %23028 = vst [vmem:[#allocation9_spill] sm:$0xff] %v18543_v58  ;;  %v18558_v51 = vpop.f32.mrb[36].mxu0  ;;  %v18560_v19 = vpop.f32.mrb[29].mxu1  ;;  %15165 = vrcp.f32 %v829_v9  ;;  %v834_v60 = vadd.f32 1.0, %v15144_v52  ;;  %v23034_v59 = vld [vmem:[#allocation15_spill] sm:$0xff]  ;;  %v18582_v36 = vld [vmem:[%s22862_s2 + $0x78] sm:$0xff]  ;;  %14417 = vmatprep.subr.bf16.mxu1 %v14886_v16 }
 0x145   :  { %23030 = vst [vmem:[#allocation8_spill] sm:$0xff] %v18558_v51  ;;  %23031 = vst [vmem:[#allocation75_spill] sm:$0xff] %v18560_v19  ;;  %v15146_v58 = vpop.eup %15145  ;;  %v18565_v47 = vpop.f32.mrb[37].mxu0  ;;  %15167 = vrcp.f32 %v1262_v26  ;;  %v1203_v51 = vadd.f32 %v18277_v13, %v23034_v59  ;;  %v18587_v13 = vld [vmem:[%s22862_s2 + $0x70] sm:$0xff]  ;;  %14418 = vmatpush3.bf16.msra.mxu1 %v14886_v16  ;;  %4040 = vperm.xlu1 %14625, %v18582_v36   ;;  %v14889_v16 = vld [vmem:[%s22864_s1 + $0x20] sm:$0xff]  }
 0x146   :  { %23032 = vst [vmem:[#allocation76_spill] sm:$0xff] %v18565_v47  ;;  %v18567_v32 = vpop.permute.xlu1 %2298  ;;  %v15148_v56 = vpop.eup %15147  ;;  %v1267_v49 = vadd.f32 1.0, %v15146_v58  ;;  %15169 = vrcp.f32 %v834_v60  ;;  %v12326_v47 = vmul.f32 -1.442695, %v1182_v39  ;;  %23038 = vst [vmem:[#allocation80_spill] sm:$0xff] %v18582_v36  ;;  %4035 = vperm.xlu0 %14624, %v18587_v13   ;;  %14407 = vmatprep.mubr.msk.bf16.mxu0 %vm221_vm0, %v14889_v16 }
 0x147   :  { %23033 = vst [vmem:[#allocation77_spill] sm:$0xff] %v18567_v32  ;;  %v18571_v19 = vpop.permute.xlu0 %2293  ;;  %v18573_v0 = vpop.f32.mrb[30].mxu1  ;;  %v832_v52 = vadd.f32 1.0, %v15148_v56  ;;  %23039 = vst [vmem:[#allocation81_spill] sm:$0xff] %v18587_v13  ;;  %v12293_v60 = vmul.f32 -1.442695, %v770_v22 }
 0x148   :  { %23035 = vst [vmem:[#allocation15_spill] sm:$0xff] %v18571_v19  ;;  %23036 = vst [vmem:[#allocation78_spill] sm:$0xff] %v18573_v0  ;;  %v15150_v9 = vpop.eup %15149  ;;  %v18577_v32 = vpop.f32.mrb[38].mxu0  ;;  %15171 = vrcp.f32 %v1267_v49  ;;  %v23041_v56 = vld [vmem:[#allocation6_spill] sm:$0xff]  ;;  %v23051_v13 = vld [vmem:[#allocation5_spill] sm:$0xff] }
 0x149   :  { %23037 = vst [vmem:[#allocation79_spill] sm:$0xff] %v18577_v32  ;;  %v18589_v58 = vpop.eup %15151  ;;  %v1265_v26 = vadd.f32 1.0, %v15150_v9  ;;  %v762_v39 = vadd.f32 %v18279_v43, %v23041_v56  ;;  %v18593_v59 = vpop.f32.mrb[31].mxu1  ;;  %v14887_v32 = vld [vmem:[%s22863_s0 + $0x148] sm:$0xff]   ;;  %15173 = vrcp.f32 %v832_v52  ;;  %v14888_v43 = vld [vmem:[%s22864_s1 + $0x20] sm:$0xff]   ;;  %v765_v36 = vadd.f32 %v18320_v25, %v23051_v13  ;;  %4403 = vperm.xlu1 %14625, %v18263_v48  }
 0x14a   :  { %23040 = vst [vmem:[#allocation82_spill] sm:$0xff] %v18589_v58  ;;  %23042 = vst [vmem:[#allocation6_spill] sm:$0xff] %v18593_v59  ;;  %v18595_v19 = vpop.f32.mrb[39].mxu0  ;;  %v15154_v0 = vpop.eup %15153  ;;  %v12331_v56 = vmul.f32 -1.442695, %v1203_v51  ;;  %14445 = vmatprep.subr.bf16.mxu0 %v14887_v32  ;;  %14379 = vmatprep.mubr.msk.bf16.mxu1 %vm221_vm0, %v14888_v43  ;;  %v14890_v25 = vld [vmem:[%s22864_s1 + $0x28] sm:$0xff]  }
 0x14b   :  { %23043 = vst [vmem:[#allocation83_spill] sm:$0xff] %v18595_v19  ;;  %v18602_v49 = vpop.permute.xlu1 %2308  ;;  %v15156_v22 = vpop.eup %15155  ;;  %15175 = vrcp.f32 %v1265_v26  ;;  %v835_v9 = vadd.f32 1.0, %v15154_v0  ;;  %v23048_v26 = vld [vmem:[#allocation7_spill] sm:$0xff]  ;;  %v23049_v0 = vld [vmem:[#allocation14_spill] sm:$0xff]  ;;  %v12291_v59 = vmul.f32 -1.442695, %v762_v39  ;;  %14446 = vmatpush3.bf16.msra.mxu0 %v14887_v32  ;;  %4398 = vperm.xlu0 %14624, %v18272_v30  }
 0x14c   :  { %23044 = vst [vmem:[#allocation84_spill] sm:$0xff] %v18602_v49  ;;  %v18609_v19 = vpop.permute.xlu0 %2303  ;;  %v18616_v52 = vpop.eup %15157  ;;  %v1268_v49 = vadd.f32 1.0, %v15156_v22  ;;  %15177 = vpow2.f32 %v12288_v46  ;;  %v773_v51 = vadd.f32 %v18303_v3, %v23048_v26  ;;  %v1206_v14 = vadd.f32 %v18318_v5, %v23049_v0  ;;  %v23053_v3 = vld [vmem:[#allocation12_spill] sm:$0xff]  ;;  %v23056_v39 = vld [vmem:[#allocation19_spill] sm:$0xff]  ;;  %14380 = vmatmul.mubr.msk.bf16.gmra.mrb[140].mxu1 %vm221_vm0, %v14890_v25  ;;  %v23063_v25 = vld [vmem:[#allocation17_spill] sm:$0xff] }
 0x14d   :  { %23046 = vst [vmem:[#allocation13_spill] sm:$0xff] %v18609_v19  ;;  %23047 = vst [vmem:[#allocation85_spill] sm:$0xff] %v18616_v52  ;;  %v18622_v29 = vpop.f32.mrb[32].mxu1  ;;  %v18625_v19 = vpop.eup %15159  ;;  %15179 = vrcp.f32 %v835_v9  ;;  %v1198_v43 = vadd.f32 %v18324_v50, %v23053_v3  ;;  %v12329_v32 = vmul.f32 -1.442695, %v1195_v6  ;;  %v1588_v16 = vadd.f32 %v18372_v54, %v23056_v39  ;;  %v14891_v50 = vld [vmem:[%s22864_s1 + $0x28] sm:$0xff]   ;;  %4413 = vperm.xlu1 %14625, %v18293_v15  }
 0x14e   :  { %23050 = vst [vmem:[#allocation7_spill] sm:$0xff] %v18625_v19  ;;  %v18629_v22 = vpop.f32.mrb[40].mxu0  ;;  %v18631_v46 = vpop.f32.mrb[33].mxu1  ;;  %15181 = vrcp.f32 %v1268_v49  ;;  %v12294_v6 = vmul.f32 -1.442695, %v773_v51  ;;  %v2021_v39 = vadd.f32 %v18374_v38, %v18043_v1  ;;  %14408 = vmatmul.mubr.msk.bf16.gmra.mrb[148].mxu0 %vm221_vm0, %v14891_v50  ;;  %v1580_v50 = vadd.f32 %v18392_v31, %v23063_v25 }
 0x14f   :  { %v18634_v5 = vpop.eup %15161  ;;  %v18638_v26 = vpop.f32.mrb[41].mxu0  ;;  %15183 = vpow2.f32 %v12326_v47  ;;  %v12332_v54 = vmul.f32 -1.442695, %v1206_v14  ;;  %v12330_v1 = vmul.f32 -1.442695, %v1198_v43  ;;  %4408 = vperm.xlu0 %14624, %v18310_v34   ;;  %v14894_v34 = vld [vmem:[%s22863_s0 + $0x148] sm:$0xff]  }
 0x150   :  { %23052 = vst [vmem:[#allocation14_spill] sm:$0xff] %v18634_v5  ;;  %v18640_v9 = vpop.permute.xlu1 %2671  ;;  %v18645_v13 = vpop.eup %15163  ;;  %15185 = vpow2.f32 %v12293_v60  ;;  %v14892_v60 = vld [vmem:[%s22863_s0 + $0x140] sm:$0xff]   ;;  %v12357_v14 = vmul.f32 -1.442695, %v1588_v16  ;;  %v12395_v23 = vmul.f32 -1.442695, %v2021_v39  ;;  %v2013_v39 = vadd.f32 %v18394_v4, %v18021_v33 }
 0x151   :  { %23054 = vst [vmem:[#allocation5_spill] sm:$0xff] %v18640_v9  ;;  %23055 = vst [vmem:[#allocation12_spill] sm:$0xff] %v18645_v13  ;;  %v18649_v0 = vpop.permute.xlu0 %2666  ;;  %v18651_v49 = vpop.f32.mrb[34].mxu1  ;;  %15187 = vpow2.f32 %v12331_v56  ;;  %14419 = vmatprep.subr.bf16.mxu1 %v14892_v60  ;;  %v12355_v58 = vmul.f32 -1.442695, %v1580_v50  ;;  %v23068_v13 = vld [vmem:[#allocation18_spill] sm:$0xff]  ;;  %4423 = vperm.xlu1 %14625, %v18345_v28  }
 0x152   :  { %23057 = vst [vmem:[#allocation19_spill] sm:$0xff] %v18649_v0  ;;  %23058 = vst [vmem:[#allocation86_spill] sm:$0xff] %v18651_v49  ;;  %v18660_v47 = vpop.eup %15165  ;;  %v18664_v9 = vpop.f32.mrb[42].mxu0  ;;  %v12292_v0 = vmul.f32 -1.442695, %v765_v36  ;;  %15189 = vpow2.f32 %v12291_v59  ;;  %14420 = vmatpush3.bf16.msra.mxu1 %v14892_v60  ;;  %v14895_v33 = vld [vmem:[%s22863_s0 + $0x158] sm:$0xff]  }
 0x153   :  { %23059 = vst [vmem:[#allocation87_spill] sm:$0xff] %v18660_v47  ;;  %v18666_v48 = vpop.f32.mrb[35].mxu1  ;;  %v18668_v30 = vpop.eup %15167  ;;  %15191 = vpow2.f32 %v12329_v32  ;;  %v14893_v32 = vld [vmem:[%s22863_s0 + $0x150] sm:$0xff]   ;;  %14421 = vmatprep.subr.bf16.mxu1 %v14894_v34  ;;  %4418 = vperm.xlu0 %14624, %v18350_v41  }
 0x154   :  { %23060 = vst [vmem:[#allocation88_spill] sm:$0xff] %v18668_v30  ;;  %v18670_v49 = vpop.f32.mrb[43].mxu0  ;;  %v18677_v51 = vpop.eup %15169  ;;  %15193 = vpow2.f32 %v12294_v6  ;;  %14447 = vmatprep.subr.bf16.mxu0 %v14893_v32 }
 0x155   :  { %23061 = vst [vmem:[#allocation89_spill] sm:$0xff] %v18677_v51  ;;  %v18679_v38 = vpop.permute.xlu1 %2681  ;;  %v18683_v36 = vpop.eup %15171  ;;  %15195 = vpow2.f32 %v12332_v54  ;;  %14448 = vmatpush3.bf16.msra.mxu0 %v14893_v32  ;;  %4433 = vperm.xlu1 %14625, %v18405_v17   ;;  %v23091_v51 = vld [vmem:[#allocation46_spill] sm:$0xff] }
 0x156   :  { %23062 = vst [vmem:[#allocation90_spill] sm:$0xff] %v18683_v36  ;;  %v18687_v3 = vpop.permute.xlu0 %2676  ;;  %v18692_v43 = vpop.eup %15173  ;;  %15197 = vpow2.f32 %v12292_v0  ;;  %v1591_v0 = vadd.f32 %v18400_v57, %v23068_v13  ;;  %v2024_v57 = vadd.f32 %v18415_v37, %v18041_v27  ;;  %14449 = vmatprep.subr.bf16.mxu0 %v14895_v33  ;;  %14422 = vmatpush3.bf16.msra.mxu1 %v14894_v34  ;;  %v14898_v27 = vld [vmem:[%s22864_s1 + $0x38] sm:$0xff]   ;;  %v18752_v34 = vmul.f32 -1.442695, %v2013_v39 }
 0x157   :  { %23064 = vst [vmem:[#allocation17_spill] sm:$0xff] %v18692_v43  ;;  %v18698_v31 = vpop.f32.mrb[36].mxu1  ;;  %v18702_v15 = vpop.eup %15175  ;;  %15199 = vpow2.f32 %v12330_v1  ;;  %4428 = vperm.xlu0 %14624, %v18422_v7   ;;  %v2029_v36 = vadd.f32 %v18485_v61, %v18069_v44  ;;  %v14904_v44 = vld [vmem:[%s22864_s1] sm:$0xff]  }
 0x158   :  { %23065 = vst [vmem:[#allocation91_spill] sm:$0xff] %v18702_v15  ;;  %v18704_v25 = vpop.f32.mrb[44].mxu0  ;;  %v18706_v59 = vpop.f32.mrb[37].mxu1  ;;  %15201 = vpow2.f32 %v12357_v14  ;;  %v14897_v14 = vld [vmem:[%s22864_s1 + $0x30] sm:$0xff]   ;;  %v18754_v52 = vmul.f32 -1.442695, %v1591_v0 }
 0x159   :  { %v15178_v6 = vpop.eup %15177  ;;  %v18710_v60 = vpop.f32.mrb[45].mxu0  ;;  %14450 = vmatpush3.bf16.msra.mxu0 %v14895_v33  ;;  %14411 = vmatprep.mubr.msk.bf16.mxu0 %vm221_vm0, %v14897_v14  ;;  %v23070_v33 = vld [vmem:[#allocation16_spill] sm:$0xff] }
 0x15a   :  { %v18715_v16 = vpop.permute.xlu1 %2691  ;;  %v18717_v56 = vpop.eup %15179  ;;  %v833_v54 = vadd.f32 1.0, %v15178_v6  ;;  %v14896_v6 = vld [vmem:[%s22864_s1 + $0x30] sm:$0xff]   ;;  %4443 = vperm.xlu1 %14625, %v18447_v8  }
 0x15b   :  { %23066 = vst [vmem:[#allocation92_spill] sm:$0xff] %v18715_v16  ;;  %23067 = vst [vmem:[#allocation93_spill] sm:$0xff] %v18717_v56  ;;  %v18724_v4 = vpop.permute.xlu0 %2686  ;;  %v18726_v19 = vpop.f32.mrb[38].mxu1  ;;  %14383 = vmatprep.mubr.msk.bf16.mxu1 %vm221_vm0, %v14896_v6  ;;  %v18762_v16 = vmul.f32 -1.442695, %v2024_v57  ;;  %v14901_v57 = vld [vmem:[%s22863_s0 + $0x160] sm:$0xff]   ;;  %4438 = vperm.xlu0 %14624, %v18460_v35  }
 0x15c   :  { %v18732_v1 = vpop.eup %15181  ;;  %v18736_v13 = vpop.f32.mrb[46].mxu0  ;;  %15203 = vrcp.f32 %v833_v54  ;;  %14384 = vmatmul.mubr.msk.bf16.gmra.mrb[144].mxu1 %vm221_vm0, %v14898_v27  ;;  %14451 = vmatprep.subr.bf16.mxu0 %v14901_v57  ;;  %v23092_v56 = vld [vmem:[#allocation8_spill] sm:$0xff] }
 0x15d   :  { %23069 = vst [vmem:[#allocation18_spill] sm:$0xff] %v18732_v1  ;;  %v18739_v50 = vpop.f32.mrb[39].mxu1  ;;  %v15184_v32 = vpop.eup %15183  ;;  %15205 = vpow2.f32 %v12395_v23  ;;  %v14899_v23 = vld [vmem:[%s22864_s1 + $0x38] sm:$0xff]   ;;  %14452 = vmatpush3.bf16.msra.mxu0 %v14901_v57  ;;  %14427 = vmatprep.mubr.msk.bf16.mxu1 %vm221_vm0, %v14904_v44 }
 0x15e   :  { %v18741_v28 = vpop.f32.mrb[47].mxu0  ;;  %v15186_v30 = vpop.eup %15185  ;;  %v1266_v5 = vadd.f32 1.0, %v15184_v32  ;;  %15207 = vpow2.f32 %v12355_v58  ;;  %v14900_v58 = vld [vmem:[%s22863_s0 + $0x150] sm:$0xff]   ;;  %14412 = vmatmul.mubr.msk.bf16.gmra.mrb[152].mxu0 %vm221_vm0, %v14899_v23  ;;  %4453 = vperm.xlu1 %14625, %v18512_v24  }
 0x15f   :  { %v18750_v41 = vpop.permute.xlu1 %2701  ;;  %v15188_v37 = vpop.eup %15187  ;;  %v838_v54 = vadd.f32 1.0, %v15186_v30  ;;  %14423 = vmatprep.subr.bf16.mxu1 %v14900_v58  ;;  %4448 = vperm.xlu0 %14624, %v18517_v40  }
 0x160   :  { %v18760_v6 = vpop.permute.xlu0 %2696  ;;  %v15190_v32 = vpop.eup %15189  ;;  %15209 = vrcp.f32 %v1266_v5  ;;  %v1271_v47 = vadd.f32 1.0, %v15188_v37  ;;  %v1583_v5 = vadd.f32 %v18426_v63, %v23070_v33  ;;  %v2016_v37 = vadd.f32 %v18428_v11, %v18019_v10  ;;  %v23072_v33 = vld [vmem:[#allocation23_spill] sm:$0xff]  ;;  %14424 = vmatpush3.bf16.msra.mxu1 %v14900_v58 }
 0x161   :  { %v15192_v39 = vpop.eup %15191  ;;  %15211 = vrcp.f32 %v838_v54  ;;  %v836_v0 = vadd.f32 1.0, %v15190_v32  ;;  %v18782_v54 = vpop.f32.mrb[40].mxu1  ;;  %v1604_v7 = vadd.f32 %v18467_v2, %v23072_v33  ;;  %v2037_v11 = vadd.f32 %v18469_v12, %v18103_v53  ;;  %v14902_v53 = vld [vmem:[%s22863_s0 + $0x158] sm:$0xff]  }
 0x162   :  { %v15194_v14 = vpop.eup %15193  ;;  %15213 = vrcp.f32 %v1271_v47  ;;  %v1269_v27 = vadd.f32 1.0, %v15192_v39  ;;  %v18788_v17 = vpop.f32.mrb[48].mxu0  ;;  %14425 = vmatprep.subr.bf16.mxu1 %v14902_v53  ;;  %4463 = vperm.xlu1 %14625, %v18539_v45   ;;  %v23086_v45 = vld [vmem:[#allocation32_spill] sm:$0xff] }
 0x163   :  { %v18784_v63 = vpop.permute.xlu1 %2711  ;;  %v15196_v23 = vpop.eup %15195  ;;  %15215 = vrcp.f32 %v836_v0  ;;  %v839_v32 = vadd.f32 1.0, %v15194_v14  ;;  %v18797_v14 = vmul.f32 -1.442695, %v1583_v5  ;;  %v18811_v57 = vmul.f32 -1.442695, %v1604_v7  ;;  %4458 = vperm.xlu0 %14624, %v18548_v55   ;;  %v23095_v55 = vld [vmem:[#allocation25_spill] sm:$0xff] }
 0x164   :  { %23071 = vst [vmem:[#allocation16_spill] sm:$0xff] %v18784_v63  ;;  %v18790_v47 = vpop.permute.xlu0 %2706  ;;  %v15198_v39 = vpop.eup %15197  ;;  %15217 = vrcp.f32 %v1269_v27  ;;  %v1272_v10 = vadd.f32 1.0, %v15196_v23  ;;  %v18802_v23 = vmul.f32 -1.442695, %v2016_v37  ;;  %v14903_v37 = vld [vmem:[%s22863_s0 + $0x168] sm:$0xff]   ;;  %14426 = vmatpush3.bf16.msra.mxu1 %v14902_v53  ;;  %v23103_v63 = vld [vmem:[#allocation26_spill] sm:$0xff] }
 0x165   :  { %23073 = vst [vmem:[#allocation23_spill] sm:$0xff] %v18790_v47  ;;  %v18794_v30 = vpop.f32.mrb[41].mxu1  ;;  %v15200_v0 = vpop.eup %15199  ;;  %15219 = vrcp.f32 %v839_v32  ;;  %v837_v2 = vadd.f32 1.0, %v15198_v39  ;;  %v23076_v32 = vld [vmem:[#allocation21_spill] sm:$0xff]  ;;  %14453 = vmatprep.subr.bf16.mxu0 %v14903_v37  ;;  %v23084_v53 = vld [vmem:[#allocation20_spill] sm:$0xff] }
 0x166   :  { %v18799_v58 = vpop.f32.mrb[49].mxu0  ;;  %v15202_v33 = vpop.eup %15201  ;;  %15221 = vrcp.f32 %v1272_v10  ;;  %v1270_v27 = vadd.f32 1.0, %v15200_v0  ;;  %v1596_v35 = vadd.f32 %v18483_v18, %v23076_v32  ;;  %v18820_v0 = vmul.f32 -1.442695, %v2037_v11  ;;  %14454 = vmatpush3.bf16.msra.mxu0 %v14903_v37 }
 0x167   :  { %v18807_v12 = vpop.permute.xlu1 %2721  ;;  %v18809_v8 = vpop.eup %15203  ;;  %15223 = vrcp.f32 %v837_v2  ;;  %v1692_v5 = vadd.f32 1.0, %v15202_v33  ;;  %v23077_v33 = vld [vmem:[#allocation22_spill] sm:$0xff]  ;;  %v1599_v7 = vadd.f32 %v18507_v20, %v23084_v53 }
 0x168   :  { %23074 = vst [vmem:[#allocation94_spill] sm:$0xff] %v18807_v12  ;;  %23075 = vst [vmem:[#allocation95_spill] sm:$0xff] %v18809_v8  ;;  %v18818_v39 = vpop.permute.xlu0 %2716  ;;  %v15206_v10 = vpop.eup %15205  ;;  %15225 = vrcp.f32 %v1270_v27  ;;  %v1607_v32 = vadd.f32 %v18494_v62, %v23077_v33  ;;  %v2040_v27 = vadd.f32 %v18503_v21, %v18101_v42  ;;  %v14905_v42 = vld [vmem:[%s22864_s1] sm:$0xff]   ;;  %v12359_v37 = vmul.f32 -1.442695, %v1596_v35  ;;  %v14907_v35 = vld [vmem:[%s22864_s1 + $0x8] sm:$0xff]  }
 0x169   :  { %v15208_v18 = vpop.eup %15207  ;;  %15227 = vrcp.f32 %v1692_v5  ;;  %v2125_v2 = vadd.f32 1.0, %v15206_v10  ;;  %v18831_v11 = vpop.f32.mrb[42].mxu1  ;;  %v12397_v10 = vmul.f32 -1.442695, %v2029_v36  ;;  %14455 = vmatprep.mubr.msk.bf16.mxu0 %vm221_vm0, %v14905_v42  ;;  %v14906_v36 = vld [vmem:[%s22864_s1 + $0x8] sm:$0xff]   ;;  %v23087_v42 = vld [vmem:[#allocation73_spill] sm:$0xff] }
 0x16a   :  { %v18833_v1 = vpop.f32.mrb[50].mxu0  ;;  %v18838_v24 = vpop.eup %15209  ;;  %v1690_v61 = vadd.f32 1.0, %v15208_v18  ;;  %15229 = vpow2.f32 %v18752_v34  ;;  %v12400_v44 = vmul.f32 -1.442695, %v2040_v27  ;;  %v23089_v27 = vld [vmem:[#allocation9_spill] sm:$0xff]  ;;  %14428 = vmatmul.mubr.msk.bf16.vlgmr.msra.gmra.mrb[148].mxu1 %vm221_vm0, %v14906_v36  ;;  %14456 = vmatmul.mubr.msk.bf16.vlgmr.msra.gmra.mrb[156].mxu0 %vm221_vm0, %v14907_v35  ;;  %v23099_v36 = vld [vmem:[#allocation80_spill] sm:$0xff] }
 0x16b   :  { %23078 = vst [vmem:[#allocation21_spill] sm:$0xff] %v18838_v24  ;;  %v18841_v62 = vpop.f32.mrb[43].mxu1  ;;  %v18843_v5 = vpop.f32.mrb[51].mxu0  ;;  %15231 = vrcp.f32 %v2125_v2  ;;  %v12362_v2 = vmul.f32 -1.442695, %v1607_v32  ;;  %v23088_v32 = vld [vmem:[#allocation27_spill] sm:$0xff]  ;;  %4473 = vperm.xlu1 %14625, %v23099_v36  }
 0x16c   :  { %v18849_v21 = vpop.eup %15211  ;;  %15233 = vrcp.f32 %v1690_v61  ;;  %v18857_v18 = vpop.permute.xlu1 %2731  ;;  %v1620_v15 = vadd.f32 %v23089_v27, %v23088_v32  ;;  %v23096_v32 = vld [vmem:[#allocation75_spill] sm:$0xff]  ;;  %v23102_v8 = vld [vmem:[#allocation76_spill] sm:$0xff] }
 0x16d   :  { %23079 = vst [vmem:[#allocation22_spill] sm:$0xff] %v18849_v21  ;;  %v18854_v34 = vpop.eup %15213  ;;  %23081 = vst [vmem:[#allocation97_spill] sm:$0xff] %v18857_v18  ;;  %v18859_v33 = vpop.permute.xlu0 %2726  ;;  %15235 = vpow2.f32 %v18754_v52  ;;  %v2032_v52 = vadd.f32 %v23087_v42, %v23086_v45  ;;  %v2053_v18 = vadd.f32 %v23092_v56, %v23091_v51  ;;  %v1612_v27 = vadd.f32 %v23096_v32, %v23095_v55  ;;  %v14908_v51 = vld [vmem:[%s22864_s1 + $0x10] sm:$0xff]  }
 0x16e   :  { %23080 = vst [vmem:[#allocation96_spill] sm:$0xff] %v18854_v34  ;;  %23082 = vst [vmem:[#allocation98_spill] sm:$0xff] %v18859_v33  ;;  %v18862_v40 = vpop.eup %15215  ;;  %15237 = vpow2.f32 %v18762_v16  ;;  %v18880_v24 = vpop.f32.mrb[44].mxu1  ;;  %v14909_v56 = vld [vmem:[%s22864_s1 + $0x10] sm:$0xff]   ;;  %v12360_v55 = vmul.f32 -1.442695, %v1599_v7  ;;  %14431 = vmatprep.mubr.msk.bf16.mxu1 %vm221_vm0, %v14908_v51 }
 0x16f   :  { %23083 = vst [vmem:[#allocation99_spill] sm:$0xff] %v18862_v40  ;;  %v18873_v61 = vpop.eup %15217  ;;  %v18882_v20 = vpop.f32.mrb[52].mxu0  ;;  %15239 = vpow2.f32 %v18797_v14  ;;  %v23101_v32 = vld [vmem:[#allocation41_spill] sm:$0xff]  ;;  %v12398_v36 = vmul.f32 -1.442695, %v2032_v52  ;;  %14459 = vmatprep.mubr.msk.bf16.mxu0 %vm221_vm0, %v14909_v56  ;;  %v14911_v52 = vld [vmem:[%s22864_s1 + $0x18] sm:$0xff]  }
 0x170   :  { %23085 = vst [vmem:[#allocation20_spill] sm:$0xff] %v18873_v61  ;;  %v18885_v53 = vpop.eup %15219  ;;  %v18892_v16 = vpop.f32.mrb[45].mxu1  ;;  %15241 = vpow2.f32 %v18802_v23  ;;  %v2045_v33 = vadd.f32 %v23102_v8, %v23101_v32  ;;  %v18928_v23 = vmul.f32 -1.442695, %v1620_v15  ;;  %v18938_v7 = vmul.f32 -1.442695, %v2053_v18 }
 0x171   :  { %23090 = vst [vmem:[#allocation32_spill] sm:$0xff] %v18885_v53  ;;  %v18894_v45 = vpop.f32.mrb[53].mxu0  ;;  %v18896_v42 = vpop.eup %15221  ;;  %15243 = vpow2.f32 %v18811_v57  ;;  %v14910_v15 = vld [vmem:[%s22863_s0 + $0x160] sm:$0xff]   ;;  %v23110_v53 = vld [vmem:[#allocation45_spill] sm:$0xff] }
 0x172   :  { %23093 = vst [vmem:[#allocation73_spill] sm:$0xff] %v18894_v45  ;;  %23094 = vst [vmem:[#allocation27_spill] sm:$0xff] %v18896_v42  ;;  %v18901_v43 = vpop.f32.mrb[46].mxu1  ;;  %v18903_v14 = vpop.f32.mrb[54].mxu0  ;;  %15245 = vpow2.f32 %v18820_v0  ;;  %v18941_v0 = vmul.f32 -1.442695, %v1612_v27  ;;  %14499 = vmatprep.subr.bf16.mxu0 %v14910_v15  ;;  %14432 = vmatmul.mubr.msk.bf16.gmra.mrb[152].mxu1 %vm221_vm0, %v14911_v52 }
 0x173   :  { %23097 = vst [vmem:[#allocation9_spill] sm:$0xff] %v18901_v43  ;;  %23098 = vst [vmem:[#allocation46_spill] sm:$0xff] %v18903_v14  ;;  %v18914_v35 = vpop.eup %15223  ;;  %v23104_v14 = vld [vmem:[#allocation78_spill] sm:$0xff]  ;;  %v18921_v43 = vpop.f32.mrb[47].mxu1  ;;  %15247 = vpow2.f32 %v12359_v37  ;;  %v23111_v51 = vld [vmem:[#allocation79_spill] sm:$0xff]  ;;  %14500 = vmatpush3.bf16.msra.mxu0 %v14910_v15 }
 0x174   :  { %23100 = vst [vmem:[#allocation8_spill] sm:$0xff] %v18914_v35  ;;  %v1623_v12 = vadd.f32 %v23104_v14, %v23103_v63  ;;  %v18923_v45 = vpop.f32.mrb[55].mxu0  ;;  %v18925_v47 = vpop.eup %15225  ;;  %v23108_v14 = vld [vmem:[#allocation81_spill] sm:$0xff]  ;;  %15249 = vpow2.f32 %v12397_v10  ;;  %v18955_v10 = vmul.f32 -1.442695, %v2045_v33  ;;  %v2056_v40 = vadd.f32 %v23111_v51, %v23110_v53  ;;  %v23117_v33 = vld [vmem:[#allocation83_spill] sm:$0xff] }
 0x175   :  { %23105 = vst [vmem:[#allocation25_spill] sm:$0xff] %v18925_v47  ;;  %v18932_v57 = vpop.permute.xlu1 %2741  ;;  %v18934_v8 = vpop.permute.xlu0 %2736  ;;  %4468 = vperm.xlu0 %14624, %v23108_v14   ;;  %15251 = vpow2.f32 %v12362_v2  ;;  %v14912_v14 = vld [vmem:[%s22864_s1 + $0x18] sm:$0xff]   ;;  %v23114_v2 = vld [vmem:[#allocation24_spill] sm:$0xff]  ;;  %v23119_v52 = vld [vmem:[#allocation31_spill] sm:$0xff] }
 0x176   :  { %23106 = vst [vmem:[#allocation75_spill] sm:$0xff] %v18932_v57  ;;  %v18936_v63 = vpop.eup %15227  ;;  %v18957_v27 = vmul.f32 -1.442695, %v1623_v12  ;;  %15253 = vpow2.f32 %v12400_v44  ;;  %14460 = vmatmul.mubr.msk.bf16.gmra.mrb[160].mxu0 %vm221_vm0, %v14912_v14  ;;  %v14913_v44 = vld [vmem:[%s22863_s0 + $0x150] sm:$0xff]   ;;  %v18979_v53 = vpop.f32.mrb[48].mxu1  ;;  %v1636_v14 = vadd.f32 %v18622_v29, %v23119_v52  ;;  %v14914_v42 = vld [vmem:[%s22863_s0 + $0x168] sm:$0xff]  }
 0x177   :  { %23107 = vst [vmem:[#allocation80_spill] sm:$0xff] %v18936_v63  ;;  %v15230_v32 = vpop.eup %15229  ;;  %14471 = vmatprep.subr.bf16.mxu1 %v14913_v44  ;;  %v18990_v35 = vpop.f32.mrb[49].mxu1  ;;  %v18994_v15 = vmul.f32 -1.442695, %v2056_v40  ;;  %v14915_v29 = vld [vmem:[%s22863_s0 + $0x158] sm:$0xff]   ;;  %14501 = vmatprep.subr.bf16.mxu0 %v14914_v42 }
 0x178   :  { %v18953_v18 = vpop.eup %15231  ;;  %v2123_v56 = vadd.f32 1.0, %v15230_v32  ;;  %v23115_v32 = vld [vmem:[#allocation6_spill] sm:$0xff]  ;;  %23120 = vst [vmem:[#allocation81_spill] sm:$0xff] %v18990_v35  ;;  %14472 = vmatpush3.bf16.msra.mxu1 %v14913_v44  ;;  %v19016_v44 = vld [vmem:[%s22862_s2 + $0x8] sm:$0xff]  ;;  %14502 = vmatpush3.bf16.msra.mxu0 %v14914_v42 }
 0x179   :  { %23109 = vst [vmem:[#allocation41_spill] sm:$0xff] %v18953_v18  ;;  %v18962_v21 = vpop.eup %15233  ;;  %v18966_v37 = vpop.permute.xlu1 %3104  ;;  %v1615_v47 = vadd.f32 %v23115_v32, %v23114_v2  ;;  %14473 = vmatprep.subr.bf16.mxu1 %v14915_v29  ;;  %4836 = vperm.xlu1 %14625, %v19016_v44   ;;  %v14924_v18 = vld [vmem:[%s22864_s1 + $0x30] sm:$0xff]  }
 0x17a   :  { %23112 = vst [vmem:[#allocation76_spill] sm:$0xff] %v18966_v37  ;;  %v18968_v61 = vpop.permute.xlu0 %3099  ;;  %v15236_v12 = vpop.eup %15235  ;;  %15255 = vrcp.f32 %v2123_v56 }
 0x17b   :  { %23113 = vst [vmem:[#allocation26_spill] sm:$0xff] %v18968_v61  ;;  %v15238_v51 = vpop.eup %15237  ;;  %v1693_v37 = vadd.f32 1.0, %v15236_v12  ;;  %15257 = vpow2.f32 %v12360_v55  ;;  %v23116_v61 = vld [vmem:[#allocation40_spill] sm:$0xff]  ;;  %v18983_v56 = vpop.f32.mrb[56].mxu0  ;;  %v19005_v35 = vmul.f32 -1.442695, %v1615_v47 }
 0x17c   :  { %v2048_v34 = vadd.f32 %v23117_v33, %v23116_v61  ;;  %23118 = vst [vmem:[#allocation78_spill] sm:$0xff] %v18983_v56  ;;  %v15240_v2 = vpop.eup %15239  ;;  %v2126_v32 = vadd.f32 1.0, %v15238_v51  ;;  %15259 = vpow2.f32 %v12398_v36  ;;  %v18992_v55 = vpop.f32.mrb[57].mxu0  ;;  %v23122_v33 = vld [vmem:[#allocation52_spill] sm:$0xff]  ;;  %v23128_v47 = vld [vmem:[#allocation50_spill] sm:$0xff]  ;;  %14474 = vmatpush3.bf16.msra.mxu1 %v14915_v29 }
 0x17d   :  { %23121 = vst [vmem:[#allocation45_spill] sm:$0xff] %v18992_v55  ;;  %v15242_v12 = vpop.eup %15241  ;;  %15261 = vrcp.f32 %v1693_v37  ;;  %v1691_v61 = vadd.f32 1.0, %v15240_v2  ;;  %v2069_v36 = vadd.f32 %v18629_v22, %v23122_v33  ;;  %v19001_v51 = vpop.permute.xlu1 %3114  ;;  %v23125_v37 = vld [vmem:[#allocation29_spill] sm:$0xff] }
 0x17e   :  { %23123 = vst [vmem:[#allocation79_spill] sm:$0xff] %v19001_v51  ;;  %v19003_v52 = vpop.permute.xlu0 %3109  ;;  %v15244_v57 = vpop.eup %15243  ;;  %15263 = vrcp.f32 %v2126_v32  ;;  %v2124_v55 = vadd.f32 1.0, %v15242_v12  ;;  %v1628_v40 = vadd.f32 %v18631_v46, %v23125_v37  ;;  %v19018_v32 = vmul.f32 -1.442695, %v2048_v34  ;;  %v19025_v46 = vld [vmem:[%s22862_s2] sm:$0xff]  ;;  %v23131_v34 = vld [vmem:[#allocation30_spill] sm:$0xff] }
 0x17f   :  { %23124 = vst [vmem:[#allocation24_spill] sm:$0xff] %v19003_v52  ;;  %v19009_v2 = vpop.f32.mrb[50].mxu1  ;;  %v19011_v22 = vpop.f32.mrb[58].mxu0  ;;  %15265 = vrcp.f32 %v1691_v61  ;;  %v1696_v51 = vadd.f32 1.0, %v15244_v57  ;;  %v2061_v12 = vadd.f32 %v18638_v26, %v23128_v47  ;;  %v19031_v57 = vmul.f32 -1.442695, %v1636_v14  ;;  %4831 = vperm.xlu0 %14624, %v19025_v46  }
 0x180   :  { %23126 = vst [vmem:[#allocation6_spill] sm:$0xff] %v19009_v2  ;;  %23127 = vst [vmem:[#allocation40_spill] sm:$0xff] %v19011_v22  ;;  %v15246_v33 = vpop.eup %15245  ;;  %v19027_v37 = vpop.f32.mrb[51].mxu1  ;;  %15267 = vrcp.f32 %v2124_v55  ;;  %v23132_v2 = vld [vmem:[#allocation86_spill] sm:$0xff]  ;;  %v14916_v26 = vld [vmem:[%s22864_s1 + $0x20] sm:$0xff]  }
 0x181   :  { %23129 = vst [vmem:[#allocation83_spill] sm:$0xff] %v19027_v37  ;;  %v19029_v52 = vpop.f32.mrb[59].mxu0  ;;  %v15248_v22 = vpop.eup %15247  ;;  %v2129_v61 = vadd.f32 1.0, %v15246_v33  ;;  %v1639_v56 = vadd.f32 %v23132_v2, %v23131_v34  ;;  %15269 = vrcp.f32 %v1696_v51  ;;  %v14917_v14 = vld [vmem:[%s22864_s1 + $0x20] sm:$0xff]   ;;  %v19049_v37 = vmul.f32 -1.442695, %v1628_v40  ;;  %14435 = vmatprep.mubr.msk.bf16.mxu1 %vm221_vm0, %v14916_v26 }
 0x182   :  { %23130 = vst [vmem:[#allocation31_spill] sm:$0xff] %v19029_v52  ;;  %v15250_v42 = vpop.eup %15249  ;;  %v1694_v47 = vadd.f32 1.0, %v15248_v22  ;;  %v19040_v52 = vmul.f32 -1.442695, %v2069_v36  ;;  %v19045_v55 = vpop.permute.xlu1 %3124  ;;  %v14918_v36 = vld [vmem:[%s22863_s0 + $0x170] sm:$0xff]   ;;  %14463 = vmatprep.mubr.msk.bf16.mxu0 %vm221_vm0, %v14917_v14 }
 0x183   :  { %23133 = vst [vmem:[#allocation52_spill] sm:$0xff] %v19045_v55  ;;  %v19047_v2 = vpop.permute.xlu0 %3119  ;;  %v15252_v33 = vpop.eup %15251  ;;  %15271 = vrcp.f32 %v2129_v61  ;;  %v2127_v34 = vadd.f32 1.0, %v15250_v42  ;;  %v19055_v22 = vmul.f32 -1.442695, %v2061_v12  ;;  %v14919_v61 = vld [vmem:[%s22864_s1 + $0x28] sm:$0xff]   ;;  %14503 = vmatprep.subr.bf16.mxu0 %v14918_v36 }
 0x184   :  { %23134 = vst [vmem:[#allocation29_spill] sm:$0xff] %v19047_v2  ;;  %v15254_v29 = vpop.eup %15253  ;;  %15273 = vrcp.f32 %v1694_v47  ;;  %v1697_v51 = vadd.f32 1.0, %v15252_v33  ;;  %v19063_v26 = vmul.f32 -1.442695, %v1639_v56  ;;  %v14920_v47 = vld [vmem:[%s22864_s1 + $0x28] sm:$0xff]   ;;  %14436 = vmatmul.mubr.msk.bf16.gmra.mrb[156].mxu1 %vm221_vm0, %v14919_v61  ;;  %14504 = vmatpush3.bf16.msra.mxu0 %v14918_v36  ;;  %v14921_v2 = vld [vmem:[%s22863_s0 + $0x160] sm:$0xff]  }
 0x185   :  { %v19061_v42 = vpop.eup %15255  ;;  %15275 = vrcp.f32 %v2127_v34  ;;  %v2130_v40 = vadd.f32 1.0, %v15254_v29  ;;  %v23138_v29 = vld [vmem:[#allocation51_spill] sm:$0xff]  ;;  %14464 = vmatmul.mubr.msk.bf16.gmra.mrb[164].mxu0 %vm221_vm0, %v14920_v47  ;;  %v19085_v36 = vld [vmem:[%s22862_s2 + $0x18] sm:$0xff]  ;;  %14475 = vmatprep.subr.bf16.mxu1 %v14921_v2 }
 0x186   :  { %23135 = vst [vmem:[#allocation50_spill] sm:$0xff] %v19061_v42  ;;  %v15258_v33 = vpop.eup %15257  ;;  %15277 = vrcp.f32 %v1697_v51  ;;  %v19069_v12 = vpop.permute.xlu1 %3134  ;;  %v2072_v56 = vadd.f32 %v18664_v9, %v23138_v29  ;;  %v23141_v9 = vld [vmem:[#allocation28_spill] sm:$0xff]  ;;  %4846 = vperm.xlu1 %14625, %v19085_v36   ;;  %14476 = vmatpush3.bf16.msra.mxu1 %v14921_v2 }
 0x187   :  { %23136 = vst [vmem:[#allocation30_spill] sm:$0xff] %v19069_v12  ;;  %v19071_v14 = vpop.permute.xlu0 %3129  ;;  %v15260_v55 = vpop.eup %15259  ;;  %15279 = vrcp.f32 %v2130_v40  ;;  %v1695_v34 = vadd.f32 1.0, %v15258_v33  ;;  %v1631_v47 = vadd.f32 %v18666_v48, %v23141_v9  ;;  %v14922_v48 = vld [vmem:[%s22863_s0 + $0x178] sm:$0xff]   ;;  %14439 = vmatprep.mubr.msk.bf16.mxu1 %vm221_vm0, %v14924_v18 }
 0x188   :  { %23137 = vst [vmem:[#allocation86_spill] sm:$0xff] %v19071_v14  ;;  %v19079_v51 = vpop.eup %15261  ;;  %v2128_v61 = vadd.f32 1.0, %v15260_v55  ;;  %15281 = vpow2.f32 %v18928_v23  ;;  %v19095_v55 = vld [vmem:[%s22862_s2 + $0x10] sm:$0xff]  ;;  %v19097_v23 = vpop.f32.mrb[52].mxu1  ;;  %14505 = vmatprep.subr.bf16.mxu0 %v14922_v48 }
 0x189   :  { %23139 = vst [vmem:[#allocation51_spill] sm:$0xff] %v19079_v51  ;;  %v19087_v40 = vpop.eup %15263  ;;  %15283 = vrcp.f32 %v1695_v34  ;;  %v23142_v34 = vld [vmem:[#allocation49_spill] sm:$0xff]  ;;  %4841 = vperm.xlu0 %14624, %v19095_v55   ;;  %v19109_v9 = vpop.f32.mrb[53].mxu1  ;;  %14506 = vmatpush3.bf16.msra.mxu0 %v14922_v48 }
 0x18a   :  { %23140 = vst [vmem:[#allocation100_spill] sm:$0xff] %v19087_v40  ;;  %v19101_v29 = vpop.eup %15265  ;;  %15285 = vrcp.f32 %v2128_v61  ;;  %v2064_v12 = vadd.f32 %v18670_v49, %v23142_v34  ;;  %v19111_v14 = vpop.permute.xlu1 %3144  ;;  %v19118_v61 = vmul.f32 -1.442695, %v2072_v56  ;;  %v23145_v49 = vld [vmem:[#allocation59_spill] sm:$0xff]  ;;  %v14923_v34 = vld [vmem:[%s22863_s0 + $0x168] sm:$0xff]  }
 0x18b   :  { %23143 = vst [vmem:[#allocation28_spill] sm:$0xff] %v19111_v14  ;;  %v19115_v63 = vpop.eup %15267  ;;  %15287 = vpow2.f32 %v18938_v7  ;;  %v2454_v2 = vadd.f32 %v18698_v31, %v23145_v49  ;;  %v19125_v51 = vpop.f32.mrb[54].mxu1  ;;  %v19130_v14 = vld [vmem:[%s22862_s2 + $0x28] sm:$0xff]  ;;  %v19142_v31 = vld [vmem:[%s22862_s2 + $0x20] sm:$0xff]  ;;  %14477 = vmatprep.subr.bf16.mxu1 %v14923_v34 }
 0x18c   :  { %23144 = vst [vmem:[#allocation49_spill] sm:$0xff] %v19115_v63  ;;  %v19132_v33 = vpop.permute.xlu0 %3139  ;;  %v19136_v56 = vpop.eup %15269  ;;  %15289 = vpow2.f32 %v18941_v0  ;;  %v19154_v0 = vmul.f32 -1.442695, %v1631_v47  ;;  %14478 = vmatpush3.bf16.msra.mxu1 %v14923_v34  ;;  %4856 = vperm.xlu1 %14625, %v19130_v14  }
 0x18d   :  { %23146 = vst [vmem:[#allocation59_spill] sm:$0xff] %v19132_v33  ;;  %23147 = vst [vmem:[#allocation101_spill] sm:$0xff] %v19136_v56  ;;  %v19144_v49 = vpop.f32.mrb[55].mxu1  ;;  %v19151_v7 = vpop.eup %15271  ;;  %15291 = vpow2.f32 %v18955_v10  ;;  %v14925_v33 = vld [vmem:[%s22864_s1 + $0x30] sm:$0xff]   ;;  %v14926_v10 = vld [vmem:[%s22863_s0 + $0x180] sm:$0xff]   ;;  %4851 = vperm.xlu0 %14624, %v19142_v31  }
 0x18e   :  { %23148 = vst [vmem:[#allocation102_spill] sm:$0xff] %v19144_v49  ;;  %23149 = vst [vmem:[#allocation103_spill] sm:$0xff] %v19151_v7  ;;  %v19156_v40 = vpop.eup %15273  ;;  %15293 = vpow2.f32 %v18957_v27  ;;  %v19159_v49 = vmul.f32 -1.442695, %v2064_v12  ;;  %v19168_v47 = vpop.permute.xlu1 %3154  ;;  %v19173_v27 = vmul.f32 -1.442695, %v2454_v2  ;;  %v2887_v12 = vadd.f32 %v18704_v25, %v18687_v3  ;;  %14467 = vmatprep.mubr.msk.bf16.mxu0 %vm221_vm0, %v14925_v33  ;;  %14507 = vmatprep.subr.bf16.mxu0 %v14926_v10 }
 0x18f   :  { %23150 = vst [vmem:[#allocation104_spill] sm:$0xff] %v19156_v40  ;;  %23151 = vst [vmem:[#allocation105_spill] sm:$0xff] %v19168_v47  ;;  %v19170_v48 = vpop.eup %15275  ;;  %15295 = vpow2.f32 %v18994_v15  ;;  %v23155_v47 = vld [vmem:[#allocation55_spill] sm:$0xff]  ;;  %v14927_v3 = vld [vmem:[%s22864_s1 + $0x38] sm:$0xff]   ;;  %v19190_v25 = vpop.f32.mrb[56].mxu1  ;;  %14508 = vmatpush3.bf16.msra.mxu0 %v14926_v10 }
 0x190   :  { %23152 = vst [vmem:[#allocation106_spill] sm:$0xff] %v19170_v48  ;;  %v19179_v34 = vpop.permute.xlu0 %3149  ;;  %v19181_v42 = vpop.eup %15277  ;;  %15297 = vpow2.f32 %v19005_v35  ;;  %v2446_v63 = vadd.f32 %v18706_v59, %v23155_v47  ;;  %v14928_v35 = vld [vmem:[%s22864_s1 + $0x38] sm:$0xff]   ;;  %v23158_v2 = vld [vmem:[#allocation19_spill] sm:$0xff]  ;;  %14440 = vmatmul.mubr.msk.bf16.gmra.mrb[160].mxu1 %vm221_vm0, %v14927_v3  ;;  %v19229_v3 = vld [vmem:[%s22862_s2 + $0x30] sm:$0xff] }
 0x191   :  { %23153 = vst [vmem:[#allocation107_spill] sm:$0xff] %v19179_v34  ;;  %23154 = vst [vmem:[#allocation108_spill] sm:$0xff] %v19181_v42  ;;  %v19192_v15 = vpop.eup %15279  ;;  %15299 = vpow2.f32 %v19018_v32  ;;  %v19198_v18 = vpop.f32.mrb[57].mxu1  ;;  %v2879_v47 = vadd.f32 %v18710_v60, %v23158_v2  ;;  %v14929_v32 = vld [vmem:[%s22863_s0 + $0x170] sm:$0xff]   ;;  %14468 = vmatmul.mubr.msk.bf16.gmra.mrb[168].mxu0 %vm221_vm0, %v14928_v35  ;;  %v19224_v60 = vld [vmem:[%s22862_s2 + $0x38] sm:$0xff]  ;;  %4861 = vperm.xlu0 %14624, %v19229_v3  }
 0x192   :  { %23156 = vst [vmem:[#allocation55_spill] sm:$0xff] %v19192_v15  ;;  %23157 = vst [vmem:[#allocation109_spill] sm:$0xff] %v19198_v18  ;;  %v15282_v33 = vpop.eup %15281  ;;  %15301 = vpow2.f32 %v19031_v57  ;;  %v19209_v34 = vpop.f32.mrb[58].mxu1  ;;  %v19218_v57 = vmul.f32 -1.442695, %v2887_v12  ;;  %v23163_v35 = vld [vmem:[#allocation57_spill] sm:$0xff]  ;;  %14479 = vmatprep.subr.bf16.mxu1 %v14929_v32  ;;  %4866 = vperm.xlu1 %14625, %v19224_v60  }
 0x193   :  { %23159 = vst [vmem:[#allocation19_spill] sm:$0xff] %v19209_v34  ;;  %v19211_v10 = vpop.permute.xlu1 %3164  ;;  %v19215_v59 = vpop.eup %15283  ;;  %v1700_v56 = vadd.f32 1.0, %v15282_v33  ;;  %15303 = vpow2.f32 %v19040_v52  ;;  %v14930_v33 = vld [vmem:[%s22863_s0 + $0x188] sm:$0xff]   ;;  %v19239_v12 = vmul.f32 -1.442695, %v2446_v63  ;;  %v2457_v18 = vadd.f32 %v18726_v19, %v23163_v35  ;;  %14480 = vmatpush3.bf16.msra.mxu1 %v14929_v32  ;;  %v19265_v32 = vld [vmem:[%s22862_s2 + $0x40] sm:$0xff] }
 0x194   :  { %23160 = vst [vmem:[#allocation110_spill] sm:$0xff] %v19211_v10  ;;  %v19234_v2 = vpop.permute.xlu0 %3159  ;;  %v19236_v52 = vpop.eup %15285  ;;  %15305 = vpow2.f32 %v19049_v37  ;;  %v14931_v37 = vld [vmem:[%s22863_s0 + $0x178] sm:$0xff]   ;;  %v19255_v15 = vmul.f32 -1.442695, %v2879_v47  ;;  %14509 = vmatprep.subr.bf16.mxu0 %v14930_v33  ;;  %v14932_v19 = vld [vmem:[%s22864_s1] sm:$0xff]   ;;  %v23172_v34 = vld [vmem:[#allocation5_spill] sm:$0xff] }
 0x195   :  { %23161 = vst [vmem:[#allocation111_spill] sm:$0xff] %v19234_v2  ;;  %23162 = vst [vmem:[#allocation112_spill] sm:$0xff] %v19236_v52  ;;  %v15288_v7 = vpop.eup %15287  ;;  %15307 = vrcp.f32 %v1700_v56  ;;  %v19250_v63 = vpop.f32.mrb[59].mxu1  ;;  %v19260_v56 = vld [vmem:[%s22862_s2 + $0x48] sm:$0xff]  ;;  %14481 = vmatprep.subr.bf16.mxu1 %v14931_v37  ;;  %14510 = vmatpush3.bf16.msra.mxu0 %v14930_v33  ;;  %v14933_v10 = vld [vmem:[%s22864_s1] sm:$0xff]  }
 0x196   :  { %23164 = vst [vmem:[#allocation57_spill] sm:$0xff] %v19250_v63  ;;  %v15290_v35 = vpop.eup %15289  ;;  %v2133_v2 = vadd.f32 1.0, %v15288_v7  ;;  %15309 = vpow2.f32 %v19055_v22  ;;  %v19278_v52 = vmul.f32 -1.442695, %v2457_v18  ;;  %4876 = vperm.xlu1 %14625, %v19260_v56   ;;  %14483 = vmatprep.mubr.msk.bf16.mxu1 %vm221_vm0, %v14932_v19  ;;  %v14936_v19 = vld [vmem:[%s22864_s1 + $0x8] sm:$0xff]  }
 0x197   :  { %v19270_v7 = vpop.permute.xlu1 %3174  ;;  %v15292_v22 = vpop.eup %15291  ;;  %v1698_v47 = vadd.f32 1.0, %v15290_v35  ;;  %15311 = vpow2.f32 %v19063_v26  ;;  %v14934_v26 = vld [vmem:[%s22863_s0 + $0x180] sm:$0xff]   ;;  %14482 = vmatpush3.bf16.msra.mxu1 %v14931_v37  ;;  %4871 = vperm.xlu0 %14624, %v19265_v32  }
 0x198   :  { %23165 = vst [vmem:[#allocation113_spill] sm:$0xff] %v19270_v7  ;;  %v19276_v63 = vpop.permute.xlu0 %3169  ;;  %v15294_v42 = vpop.eup %15293  ;;  %15313 = vrcp.f32 %v2133_v2  ;;  %v2131_v48 = vadd.f32 1.0, %v15292_v22  ;;  %v14935_v2 = vld [vmem:[%s22864_s1 + $0x8] sm:$0xff]   ;;  %14511 = vmatprep.mubr.msk.bf16.mxu0 %vm221_vm0, %v14933_v10  ;;  %14555 = vmatprep.subr.bf16.mxu0 %v14934_v26 }
 0x199   :  { %23166 = vst [vmem:[#allocation114_spill] sm:$0xff] %v19276_v63  ;;  %v15296_v33 = vpop.eup %15295  ;;  %15315 = vrcp.f32 %v1698_v47  ;;  %v1701_v35 = vadd.f32 1.0, %v15294_v42  ;;  %v19298_v47 = vld [vmem:[%s22862_s2 + $0x58] sm:$0xff]  ;;  %14512 = vmatmul.mubr.msk.bf16.vlgmr.msra.gmra.mrb[172].mxu0 %vm221_vm0, %v14936_v19 }
 0x19a   :  { %v15298_v18 = vpop.eup %15297  ;;  %15317 = vrcp.f32 %v2131_v48  ;;  %v2134_v22 = vadd.f32 1.0, %v15296_v33  ;;  %v2890_v33 = vadd.f32 %v18736_v13, %v18679_v38  ;;  %14484 = vmatmul.mubr.msk.bf16.vlgmr.msra.gmra.mrb[164].mxu1 %vm221_vm0, %v14935_v2  ;;  %14556 = vmatpush3.bf16.msra.mxu0 %v14934_v26 }
 0x19b   :  { %v19293_v7 = vpop.permute.xlu1 %3537  ;;  %v15300_v42 = vpop.eup %15299  ;;  %15319 = vrcp.f32 %v1701_v35  ;;  %v1699_v37 = vadd.f32 1.0, %v15298_v18  ;;  %v19309_v35 = vld [vmem:[%s22862_s2 + $0x50] sm:$0xff]  ;;  %4886 = vperm.xlu1 %14625, %v19298_v47  }
 0x19c   :  { %23167 = vst [vmem:[#allocation115_spill] sm:$0xff] %v19293_v7  ;;  %v19300_v63 = vpop.permute.xlu0 %3532  ;;  %v15302_v48 = vpop.eup %15301  ;;  %15321 = vrcp.f32 %v2134_v22  ;;  %v2132_v10 = vadd.f32 1.0, %v15300_v42  ;;  %v14937_v7 = vld [vmem:[%s22863_s0 + $0x188] sm:$0xff]   ;;  %4881 = vperm.xlu0 %14624, %v19309_v35  }
 0x19d   :  { %23168 = vst [vmem:[#allocation116_spill] sm:$0xff] %v19300_v63  ;;  %v19311_v18 = vpop.f32.mrb[60].mxu1  ;;  %v15304_v22 = vpop.eup %15303  ;;  %15323 = vrcp.f32 %v1699_v37  ;;  %v1704_v42 = vadd.f32 1.0, %v15302_v48  ;;  %v23170_v63 = vld [vmem:[#allocation53_spill] sm:$0xff]  ;;  %14557 = vmatprep.subr.bf16.mxu0 %v14937_v7 }
 0x19e   :  { %23169 = vst [vmem:[#allocation117_spill] sm:$0xff] %v19311_v18  ;;  %v2449_v38 = vadd.f32 %v18739_v50, %v23170_v63  ;;  %v19319_v13 = vpop.f32.mrb[61].mxu1  ;;  %v15306_v2 = vpop.eup %15305  ;;  %15325 = vrcp.f32 %v2132_v10  ;;  %v2137_v19 = vadd.f32 1.0, %v15304_v22  ;;  %v2882_v18 = vadd.f32 %v18741_v28, %v23172_v34  ;;  %v19329_v50 = vld [vmem:[%s22862_s2 + $0x68] sm:$0xff]  ;;  %v19338_v28 = vld [vmem:[%s22862_s2 + $0x60] sm:$0xff]  ;;  %14558 = vmatpush3.bf16.msra.mxu0 %v14937_v7  ;;  %v14941_v7 = vld [vmem:[%s22863_s0 + $0x190] sm:$0xff]  }
 0x19f   :  { %23171 = vst [vmem:[#allocation53_spill] sm:$0xff] %v19319_v13  ;;  %v19324_v40 = vpop.f32.mrb[62].mxu1  ;;  %v19331_v63 = vpop.permute.xlu1 %3547  ;;  %15327 = vrcp.f32 %v1704_v42  ;;  %v1702_v37 = vadd.f32 1.0, %v15306_v2  ;;  %v19344_v22 = vmul.f32 -1.442695, %v2890_v33  ;;  %v14939_v42 = vld [vmem:[%s22864_s1 + $0x10] sm:$0xff]   ;;  %4896 = vperm.xlu1 %14625, %v19329_v50   ;;  %14559 = vmatprep.subr.bf16.mxu0 %v14941_v7 }
 0x1a0   :  { %23173 = vst [vmem:[#allocation5_spill] sm:$0xff] %v19324_v40  ;;  %23174 = vst [vmem:[#allocation118_spill] sm:$0xff] %v19331_v63  ;;  %v19333_v26 = vpop.eup %15307  ;;  %v19340_v34 = vpop.f32.mrb[63].mxu1  ;;  %15329 = vrcp.f32 %v2137_v19  ;;  %v14938_v63 = vld [vmem:[%s22864_s1 + $0x10] sm:$0xff]   ;;  %v19352_v13 = vmul.f32 -1.442695, %v2449_v38  ;;  %4891 = vperm.xlu0 %14624, %v19338_v28   ;;  %14515 = vmatprep.mubr.msk.bf16.mxu0 %vm221_vm0, %v14939_v42 }
 0x1a1   :  { %23175 = vst [vmem:[#allocation119_spill] sm:$0xff] %v19333_v26  ;;  %23176 = vst [vmem:[#allocation120_spill] sm:$0xff] %v19340_v34  ;;  %v19342_v48 = vpop.permute.xlu0 %3542  ;;  %v15310_v10 = vpop.eup %15309  ;;  %15331 = vrcp.f32 %v1702_v37  ;;  %v14940_v33 = vld [vmem:[%s22863_s0 + $0x170] sm:$0xff]   ;;  %v19361_v34 = vmul.f32 -1.442695, %v2882_v18  ;;  %14487 = vmatprep.mubr.msk.bf16.mxu1 %vm221_vm0, %v14938_v63  ;;  %v14942_v18 = vld [vmem:[%s22864_s1 + $0x18] sm:$0xff]  }
 0x1a2   :  { %23177 = vst [vmem:[#allocation121_spill] sm:$0xff] %v19342_v48  ;;  %v15312_v2 = vpop.eup %15311  ;;  %v2135_v40 = vadd.f32 1.0, %v15310_v10  ;;  %15333 = vpow2.f32 %v19118_v61  ;;  %14527 = vmatprep.subr.bf16.mxu1 %v14940_v33  ;;  %v19380_v63 = vpop.f32.mrb[60].mxu0  ;;  %14560 = vmatpush3.bf16.msra.mxu0 %v14941_v7  ;;  %v14946_v7 = vld [vmem:[%s22864_s1 + $0x20] sm:$0xff]  }
 0x1a3   :  { %v19358_v19 = vpop.eup %15313  ;;  %v1705_v48 = vadd.f32 1.0, %v15312_v2  ;;  %v19368_v38 = vpop.permute.xlu1 %3557  ;;  %14528 = vmatpush3.bf16.msra.mxu1 %v14940_v33  ;;  %23181 = vst [vmem:[#allocation125_spill] sm:$0xff] %v19380_v63  ;;  %v14944_v63 = vld [vmem:[%s22863_s0 + $0x178] sm:$0xff]  }
 0x1a4   :  { %23178 = vst [vmem:[#allocation122_spill] sm:$0xff] %v19358_v19  ;;  %23179 = vst [vmem:[#allocation123_spill] sm:$0xff] %v19368_v38  ;;  %v19370_v37 = vpop.eup %15315  ;;  %15335 = vrcp.f32 %v2135_v40  ;;  %v23182_v40 = vld [vmem:[#allocation68_spill] sm:$0xff]  ;;  %v2903_v38 = vadd.f32 %v18788_v17, %v18760_v6  ;;  %14488 = vmatmul.mubr.msk.bf16.gmra.mrb[168].mxu1 %vm221_vm0, %v14942_v18  ;;  %v19406_v6 = vld [vmem:[%s22862_s2 + $0x70] sm:$0xff]  ;;  %v19408_v17 = vpop.f32.mrb[61].mxu0  ;;  %14529 = vmatprep.subr.bf16.mxu1 %v14944_v63 }
 0x1a5   :  { %v19373_v10 = vpop.permute.xlu0 %3552  ;;  %v19375_v61 = vpop.eup %15317  ;;  %15337 = vrcp.f32 %v1705_v48  ;;  %v2470_v42 = vadd.f32 %v18782_v54, %v23182_v40  ;;  %v14943_v48 = vld [vmem:[%s22864_s1 + $0x18] sm:$0xff]   ;;  %23183 = vst [vmem:[#allocation68_spill] sm:$0xff] %v19408_v17  ;;  %v23185_v18 = vld [vmem:[#allocation11_spill] sm:$0xff]  ;;  %4901 = vperm.xlu0 %14624, %v19406_v6   ;;  %14491 = vmatprep.mubr.msk.bf16.mxu1 %vm221_vm0, %v14946_v7 }
 0x1a6   :  { %23180 = vst [vmem:[#allocation124_spill] sm:$0xff] %v19373_v10  ;;  %v19382_v2 = vpop.eup %15319  ;;  %15339 = vpow2.f32 %v19154_v0  ;;  %v19392_v10 = vpop.f32.mrb[64].mxu1  ;;  %v19401_v54 = vld [vmem:[%s22862_s2 + $0x78] sm:$0xff]  ;;  %v2462_v40 = vadd.f32 %v18794_v30, %v23185_v18  ;;  %14516 = vmatmul.mubr.msk.bf16.gmra.mrb[176].mxu0 %vm221_vm0, %v14943_v48  ;;  %v2895_v30 = vadd.f32 %v18799_v58, %v18724_v4  ;;  %v12475_v58 = vmul.f32 -1.442695, %v2903_v38 }
 0x1a7   :  { %v19394_v33 = vpop.eup %15321  ;;  %15341 = vpow2.f32 %v19159_v49  ;;  %v19410_v0 = vpop.f32.mrb[65].mxu1  ;;  %4906 = vperm.xlu1 %14625, %v19401_v54   ;;  %v14945_v18 = vld [vmem:[%s22863_s0 + $0x198] sm:$0xff]   ;;  %v12437_v4 = vmul.f32 -1.442695, %v2470_v42  ;;  %14530 = vmatpush3.bf16.msra.mxu1 %v14944_v63 }
 0x1a8   :  { %23184 = vst [vmem:[#allocation126_spill] sm:$0xff] %v19410_v0  ;;  %v19414_v49 = vpop.eup %15323  ;;  %15343 = vpow2.f32 %v19173_v27  ;;  %v19424_v17 = vpop.f32.mrb[62].mxu0  ;;  %v23188_v27 = vld [vmem:[#allocation66_spill] sm:$0xff]  ;;  %14561 = vmatprep.subr.bf16.mxu0 %v14945_v18  ;;  %v19467_v42 = vmul.f32 -1.442695, %v2462_v40 }
 0x1a9   :  { %23186 = vst [vmem:[#allocation11_spill] sm:$0xff] %v19424_v17  ;;  %v19426_v0 = vpop.permute.xlu1 %3567  ;;  %v19430_v26 = vpop.eup %15325  ;;  %15345 = vpow2.f32 %v19218_v57  ;;  %v2473_v48 = vadd.f32 %v18831_v11, %v23188_v27  ;;  %14562 = vmatpush3.bf16.msra.mxu0 %v14945_v18  ;;  %5264 = vperm.xlu0 %14624, %v19025_v46   ;;  %v14949_v46 = vld [vmem:[%s22863_s0 + $0x1a0] sm:$0xff]   ;;  %v23195_v18 = vld [vmem:[#allocation92_spill] sm:$0xff] }
 0x1aa   :  { %23187 = vst [vmem:[#allocation127_spill] sm:$0xff] %v19426_v0  ;;  %v19441_v0 = vpop.f32.mrb[66].mxu1  ;;  %v19443_v17 = vpop.permute.xlu0 %3562  ;;  %15347 = vpow2.f32 %v19239_v12  ;;  %v2906_v12 = vadd.f32 %v18833_v1, %v18750_v41  ;;  %v23194_v1 = vld [vmem:[#allocation4_spill] sm:$0xff]  ;;  %14563 = vmatprep.subr.bf16.mxu0 %v14949_v46 }
 0x1ab   :  { %23189 = vst [vmem:[#allocation66_spill] sm:$0xff] %v19443_v17  ;;  %v19447_v57 = vpop.eup %15327  ;;  %v19450_v11 = vpop.f32.mrb[63].mxu0  ;;  %15349 = vpow2.f32 %v19255_v15  ;;  %5269 = vperm.xlu1 %14625, %v19016_v44   ;;  %v14947_v44 = vld [vmem:[%s22864_s1 + $0x20] sm:$0xff]   ;;  %v2465_v41 = vadd.f32 %v18841_v62, %v23194_v1  ;;  %v14950_v62 = vld [vmem:[%s22864_s1 + $0x28] sm:$0xff]  }
 0x1ac   :  { %v19452_v27 = vpop.f32.mrb[67].mxu1  ;;  %v19454_v19 = vpop.eup %15329  ;;  %15351 = vpow2.f32 %v19278_v52  ;;  %v14948_v52 = vld [vmem:[%s22863_s0 + $0x180] sm:$0xff]   ;;  %14519 = vmatprep.mubr.msk.bf16.mxu0 %vm221_vm0, %v14947_v44  ;;  %14492 = vmatmul.mubr.msk.bf16.gmra.mrb[172].mxu1 %vm221_vm0, %v14950_v62 }
 0x1ad   :  { %23190 = vst [vmem:[#allocation128_spill] sm:$0xff] %v19452_v27  ;;  %v19460_v17 = vpop.f32.mrb[64].mxu0  ;;  %v19464_v38 = vpop.eup %15331  ;;  %15353 = vpow2.f32 %v19344_v22  ;;  %v19473_v27 = vmul.f32 -1.442695, %v2895_v30  ;;  %14531 = vmatprep.subr.bf16.mxu1 %v14948_v52  ;;  %14564 = vmatpush3.bf16.msra.mxu0 %v14949_v46  ;;  %v23199_v62 = vld [vmem:[#allocation3_spill] sm:$0xff] }
 0x1ae   :  { %23191 = vst [vmem:[#allocation129_spill] sm:$0xff] %v19460_v17  ;;  %v19470_v15 = vpop.permute.xlu1 %3577  ;;  %v15334_v63 = vpop.eup %15333  ;;  %v19475_v17 = vmul.f32 -1.442695, %v2473_v48  ;;  %15355 = vpow2.f32 %v19352_v13  ;;  %14532 = vmatpush3.bf16.msra.mxu1 %v14948_v52  ;;  %5274 = vperm.xlu0 %14624, %v19095_v55   ;;  %v2486_v55 = vadd.f32 %v18880_v24, %v23199_v62  ;;  %v2919_v24 = vadd.f32 %v18882_v20, %v18818_v39  ;;  %v14955_v39 = vld [vmem:[%s22864_s1 + $0x30] sm:$0xff]  }
 0x1af   :  { %23192 = vst [vmem:[#allocation130_spill] sm:$0xff] %v19470_v15  ;;  %v19487_v22 = vpop.permute.xlu0 %3572  ;;  %v19489_v40 = vpop.eup %15335  ;;  %v2138_v30 = vadd.f32 1.0, %v15334_v63  ;;  %15357 = vpow2.f32 %v19361_v34  ;;  %v2898_v63 = vadd.f32 %v18843_v5, %v23195_v18  ;;  %v14951_v5 = vld [vmem:[%s22864_s1 + $0x28] sm:$0xff]   ;;  %5279 = vperm.xlu1 %14625, %v19085_v36  }
 0x1b0   :  { %23193 = vst [vmem:[#allocation131_spill] sm:$0xff] %v19487_v22  ;;  %v19497_v7 = vpop.eup %15337  ;;  %v19506_v13 = vpop.f32.mrb[65].mxu0  ;;  %14520 = vmatmul.mubr.msk.bf16.gmra.mrb[180].mxu0 %vm221_vm0, %v14951_v5  ;;  %v14953_v36 = vld [vmem:[%s22863_s0 + $0x1a8] sm:$0xff]  }
 0x1b1   :  { %v15340_v48 = vpop.eup %15339  ;;  %15359 = vrcp.f32 %v2138_v30  ;;  %23196 = vst [vmem:[#allocation4_spill] sm:$0xff] %v19506_v13  ;;  %v19512_v30 = vmul.f32 -1.442695, %v2906_v12  ;;  %14565 = vmatprep.subr.bf16.mxu0 %v14953_v36  ;;  %14523 = vmatprep.mubr.msk.bf16.mxu0 %vm221_vm0, %v14955_v39 }
 0x1b2   :  { %v19508_v1 = vpop.permute.xlu1 %3587  ;;  %v15342_v44 = vpop.eup %15341  ;;  %v1703_v15 = vadd.f32 1.0, %v15340_v48  ;;  %15361 = vpow2.f32 %v12437_v4  ;;  %v14952_v4 = vld [vmem:[%s22863_s0 + $0x188] sm:$0xff]   ;;  %v19531_v48 = vmul.f32 -1.442695, %v2898_v63  ;;  %14566 = vmatpush3.bf16.msra.mxu0 %v14953_v36  ;;  %5284 = vperm.xlu0 %14624, %v19142_v31   ;;  %v19558_v36 = vmul.f32 -1.442695, %v2486_v55 }
 0x1b3   :  { %23197 = vst [vmem:[#allocation92_spill] sm:$0xff] %v19508_v1  ;;  %v19518_v52 = vpop.permute.xlu0 %3582  ;;  %v15344_v18 = vpop.eup %15343  ;;  %v2136_v22 = vadd.f32 1.0, %v15342_v44  ;;  %15363 = vpow2.f32 %v12475_v58  ;;  %v19520_v1 = vmul.f32 -1.442695, %v2465_v41  ;;  %14533 = vmatprep.subr.bf16.mxu1 %v14952_v4  ;;  %5289 = vperm.xlu1 %14625, %v19130_v14  }
 0x1b4   :  { %23198 = vst [vmem:[#allocation132_spill] sm:$0xff] %v19518_v52  ;;  %v15346_v12 = vpop.eup %15345  ;;  %15365 = vrcp.f32 %v1703_v15  ;;  %v2558_v46 = vadd.f32 1.0, %v15344_v18  ;;  %v19535_v44 = vpop.f32.mrb[66].mxu0  ;;  %14534 = vmatpush3.bf16.msra.mxu1 %v14952_v4 }
 0x1b5   :  { %v15348_v58 = vpop.eup %15347  ;;  %15367 = vrcp.f32 %v2136_v22  ;;  %v2991_v41 = vadd.f32 1.0, %v15346_v12  ;;  %23200 = vst [vmem:[#allocation3_spill] sm:$0xff] %v19535_v44  ;;  %v19539_v18 = vpop.f32.mrb[67].mxu0  ;;  %v14954_v12 = vld [vmem:[%s22864_s1 + $0x30] sm:$0xff]  }
 0x1b6   :  { %v19537_v34 = vpop.permute.xlu1 %3597  ;;  %v15350_v15 = vpop.eup %15349  ;;  %15369 = vrcp.f32 %v2558_v46  ;;  %v2556_v5 = vadd.f32 1.0, %v15348_v58  ;;  %23202 = vst [vmem:[#allocation134_spill] sm:$0xff] %v19539_v18  ;;  %v23204_v58 = vld [vmem:[#allocation72_spill] sm:$0xff]  ;;  %14495 = vmatprep.mubr.msk.bf16.mxu1 %vm221_vm0, %v14954_v12  ;;  %v14958_v12 = vld [vmem:[%s22864_s1 + $0x38] sm:$0xff]   ;;  %5294 = vperm.xlu0 %14624, %v19229_v3  }
 0x1b7   :  { %23201 = vst [vmem:[#allocation133_spill] sm:$0xff] %v19537_v34  ;;  %v19541_v52 = vpop.permute.xlu0 %3592  ;;  %v15352_v22 = vpop.eup %15351  ;;  %15371 = vrcp.f32 %v2991_v41  ;;  %v2989_v63 = vadd.f32 1.0, %v15350_v15  ;;  %v2478_v62 = vadd.f32 %v18892_v16, %v23204_v58  ;;  %v23205_v34 = vld [vmem:[#allocation67_spill] sm:$0xff]  ;;  %v14956_v16 = vld [vmem:[%s22863_s0 + $0x190] sm:$0xff]   ;;  %5299 = vperm.xlu1 %14625, %v19224_v60  }
 0x1b8   :  { %23203 = vst [vmem:[#allocation135_spill] sm:$0xff] %v19541_v52  ;;  %v15354_v46 = vpop.eup %15353  ;;  %15373 = vrcp.f32 %v2556_v5  ;;  %v2559_v4 = vadd.f32 1.0, %v15352_v22  ;;  %v23206_v52 = vld [vmem:[#allocation62_spill] sm:$0xff]  ;;  %14535 = vmatprep.subr.bf16.mxu1 %v14956_v16  ;;  %v23210_v58 = vld [vmem:[#allocation23_spill] sm:$0xff]  ;;  %14524 = vmatmul.mubr.msk.bf16.gmra.mrb[184].mxu0 %vm221_vm0, %v14958_v12 }
 0x1b9   :  { %v23207_v41 = vpack.c.bf16 %v23205_v34, %v23206_v52  ;;  %v15356_v20 = vpop.eup %15355  ;;  %15375 = vrcp.f32 %v2989_v63  ;;  %v2992_v14 = vadd.f32 1.0, %v15354_v46  ;;  %v14957_v52 = vld [vmem:[%s22864_s1 + $0x38] sm:$0xff]   ;;  %v19574_v63 = vmul.f32 -1.442695, %v2919_v24  ;;  %v19586_v24 = vpop.f32.mrb[68].mxu0  ;;  %14536 = vmatpush3.bf16.msra.mxu1 %v14956_v16  ;;  %v14961_v16 = vld [vmem:[%s22864_s1] sm:$0xff]  }
 0x1ba   :  { %v19564_v15 = vpop.permute.xlu1 %3607  ;;  %v15358_v34 = vpop.eup %15357  ;;  %15377 = vrcp.f32 %v2559_v4  ;;  %v2557_v31 = vadd.f32 1.0, %v15356_v20  ;;  %v19580_v4 = vmul.f32 -1.442695, %v2478_v62  ;;  %14496 = vmatmul.mubr.msk.bf16.gmra.mrb[176].mxu1 %vm221_vm0, %v14957_v52  ;;  %23212 = vst [vmem:[#allocation62_spill] sm:$0xff] %v19586_v24  ;;  %v14959_v20 = vld [vmem:[%s22863_s0 + $0x198] sm:$0xff]   ;;  %v14962_v24 = vld [vmem:[%s22863_s0 + $0x190] sm:$0xff]   ;;  %5304 = vperm.xlu0 %14624, %v19265_v32  }
 0x1bb   :  { %13597 = vmatprep.subr.bf16.mxu0 %v23207_v41  ;;  %23208 = vst [vmem:[#allocation72_spill] sm:$0xff] %v19564_v15  ;;  %v19570_v5 = vpop.permute.xlu0 %3602  ;;  %v19572_v55 = vpop.eup %15359  ;;  %15379 = vrcp.f32 %v2992_v14  ;;  %v2990_v22 = vadd.f32 1.0, %v15358_v34  ;;  %v23211_v41 = vld [vmem:[#allocation73_spill] sm:$0xff]  ;;  %14537 = vmatprep.subr.bf16.mxu1 %v14959_v20 }
 0x1bc   :  { %23209 = vst [vmem:[#allocation67_spill] sm:$0xff] %v19570_v5  ;;  %v15362_v46 = vpop.eup %15361  ;;  %15381 = vrcp.f32 %v2557_v31  ;;  %v2911_v39 = vadd.f32 %v23211_v41, %v23210_v58  ;;  %v19594_v34 = vpop.f32.mrb[69].mxu0  ;;  %v23215_v58 = vld [vmem:[#allocation74_spill] sm:$0xff]  ;;  %v23216_v41 = vld [vmem:[#allocation9_spill] sm:$0xff]  ;;  %5309 = vperm.xlu1 %14625, %v19260_v56   ;;  %14567 = vmatprep.mubr.msk.bf16.mxu0 %vm221_vm0, %v14961_v16  ;;  %v14963_v56 = vld [vmem:[%s22864_s1 + $0x8] sm:$0xff]  }
 0x1bd   :  { %v15364_v14 = vpop.eup %15363  ;;  %15383 = vrcp.f32 %v2990_v22  ;;  %v2562_v62 = vadd.f32 1.0, %v15362_v46  ;;  %23213 = vst [vmem:[#allocation23_spill] sm:$0xff] %v19594_v34  ;;  %v2489_v5 = vadd.f32 %v23216_v41, %v23215_v58  ;;  %v19603_v60 = vpop.f32.mrb[70].mxu0  ;;  %v14960_v22 = vld [vmem:[%s22864_s1] sm:$0xff]   ;;  %14538 = vmatpush3.bf16.msra.mxu1 %v14959_v20  ;;  %v23276_v34 = vld [vmem:[#allocation17_spill] sm:$0xff] }
 0x1be   :  { %v19596_v31 = vpop.permute.xlu1 %3970  ;;  %v19598_v3 = vpop.eup %15365  ;;  %v2995_v52 = vadd.f32 1.0, %v15364_v14  ;;  %15385 = vpow2.f32 %v19467_v42  ;;  %23217 = vst [vmem:[#allocation74_spill] sm:$0xff] %v19603_v60  ;;  %v23219_v42 = vld [vmem:[#allocation94_spill] sm:$0xff]  ;;  %v23221_v58 = vld [vmem:[#allocation71_spill] sm:$0xff]  ;;  %14539 = vmatprep.mubr.msk.bf16.mxu1 %vm221_vm0, %v14960_v22  ;;  %14583 = vmatprep.subr.bf16.mxu1 %v14962_v24 }
 0x1bf   :  { %23214 = vst [vmem:[#allocation73_spill] sm:$0xff] %v19596_v31  ;;  %v19611_v12 = vpop.permute.xlu0 %3965  ;;  %v19613_v46 = vpop.eup %15367  ;;  %15387 = vrcp.f32 %v2562_v62  ;;  %v23220_v14 = vld [vmem:[#allocation46_spill] sm:$0xff]  ;;  %v2481_v41 = vadd.f32 %v18921_v43, %v23221_v58  ;;  %v12477_v62 = vmul.f32 -1.442695, %v2911_v39  ;;  %v12442_v22 = vmul.f32 -1.442695, %v2489_v5  ;;  %5314 = vperm.xlu0 %14624, %v19309_v35  }
 0x1c0   :  { %23218 = vst [vmem:[#allocation9_spill] sm:$0xff] %v19611_v12  ;;  %v2922_v31 = vadd.f32 %v23220_v14, %v23219_v42  ;;  %v19619_v15 = vpop.f32.mrb[71].mxu0  ;;  %v19627_v60 = vpop.eup %15369  ;;  %15389 = vrcp.f32 %v2995_v52  ;;  %v14964_v58 = vld [vmem:[%s22864_s1 + $0x8] sm:$0xff]   ;;  %5319 = vperm.xlu1 %14625, %v19298_v47  }
 0x1c1   :  { %23222 = vst [vmem:[#allocation94_spill] sm:$0xff] %v19619_v15  ;;  %v19633_v42 = vpop.eup %15371  ;;  %15391 = vpow2.f32 %v19473_v27  ;;  %v19640_v52 = vpop.f32.mrb[72].mxu0  ;;  %v19654_v16 = vmul.f32 -1.442695, %v2481_v41  ;;  %v23229_v5 = vld [vmem:[#allocation16_spill] sm:$0xff]  ;;  %14568 = vmatmul.mubr.msk.bf16.vlgmr.msra.gmra.mrb[188].mxu0 %vm221_vm0, %v14964_v58  ;;  %v23246_v41 = vld [vmem:[#allocation15_spill] sm:$0xff] }
 0x1c2   :  { %23223 = vst [vmem:[#allocation46_spill] sm:$0xff] %v19633_v42  ;;  %23224 = vst [vmem:[#allocation71_spill] sm:$0xff] %v19640_v52  ;;  %v19642_v39 = vpop.permute.xlu1 %3980  ;;  %v19644_v32 = vpop.eup %15373  ;;  %15393 = vpow2.f32 %v19475_v17  ;;  %v19652_v20 = vmul.f32 -1.442695, %v2922_v31  ;;  %v2914_v12 = vadd.f32 %v18923_v45, %v23229_v5  ;;  %14540 = vmatmul.mubr.msk.bf16.vlgmr.msra.gmra.mrb[180].mxu1 %vm221_vm0, %v14963_v56  ;;  %v14966_v45 = vld [vmem:[%s22864_s1 + $0x10] sm:$0xff]   ;;  %v23275_v15 = vld [vmem:[#allocation95_spill] sm:$0xff] }
 0x1c3   :  { %23225 = vst [vmem:[#allocation136_spill] sm:$0xff] %v19642_v39  ;;  %v19647_v14 = vpop.permute.xlu0 %3975  ;;  %v19649_v27 = vpop.eup %15375  ;;  %15395 = vpow2.f32 %v19512_v30  ;;  %v14965_v30 = vld [vmem:[%s22863_s0 + $0x198] sm:$0xff]   ;;  %14584 = vmatpush3.bf16.msra.mxu1 %v14962_v24  ;;  %v23234_v5 = vld [vmem:[#allocation13_spill] sm:$0xff]  ;;  %v23237_v39 = vld [vmem:[#allocation35_spill] sm:$0xff]  ;;  %5324 = vperm.xlu0 %14624, %v19338_v28  }
 0x1c4   :  { %23226 = vst [vmem:[#allocation137_spill] sm:$0xff] %v19647_v14  ;;  %23227 = vst [vmem:[#allocation138_spill] sm:$0xff] %v19649_v27  ;;  %v19660_v43 = vpop.f32.mrb[73].mxu0  ;;  %v19662_v17 = vpop.eup %15377  ;;  %15397 = vpow2.f32 %v19520_v1  ;;  %v23235_v24 = vld [vmem:[#allocation78_spill] sm:$0xff]  ;;  %v23236_v14 = vld [vmem:[#allocation39_spill] sm:$0xff]  ;;  %14585 = vmatprep.subr.bf16.mxu1 %v14965_v30  ;;  %5329 = vperm.xlu1 %14625, %v19329_v50  }
 0x1c5   :  { %23228 = vst [vmem:[#allocation139_spill] sm:$0xff] %v19660_v43  ;;  %v19672_v31 = vpop.f32.mrb[74].mxu0  ;;  %v19674_v47 = vpop.eup %15379  ;;  %15399 = vpow2.f32 %v19531_v48  ;;  %v2502_v48 = vadd.f32 %v18979_v53, %v23234_v5  ;;  %v2935_v58 = vadd.f32 %v23235_v24, %v18934_v8  ;;  %v23238_v52 = vpack.c.bf16 %v23236_v14, %v23237_v39  ;;  %v14967_v8 = vld [vmem:[%s22864_s1 + $0x10] sm:$0xff]   ;;  %14543 = vmatprep.mubr.msk.bf16.mxu1 %vm221_vm0, %v14966_v45  ;;  %v14968_v50 = vld [vmem:[%s22863_s0 + $0x1a0] sm:$0xff]   ;;  %v14970_v28 = vld [vmem:[%s22864_s1 + $0x18] sm:$0xff]  }
 0x1c6   :  { %23230 = vst [vmem:[#allocation16_spill] sm:$0xff] %v19672_v31  ;;  %23231 = vst [vmem:[#allocation140_spill] sm:$0xff] %v19674_v47  ;;  %v19678_v1 = vpop.f32.mrb[75].mxu0  ;;  %v19683_v35 = vpop.permute.xlu1 %3990  ;;  %15401 = vpow2.f32 %v19558_v36  ;;  %v23240_v36 = vld [vmem:[#allocation64_spill] sm:$0xff]  ;;  %v19716_v5 = vmul.f32 -1.442695, %v2914_v12  ;;  %14571 = vmatprep.mubr.msk.bf16.mxu0 %vm221_vm0, %v14967_v8 }
 0x1c7   :  { %23232 = vst [vmem:[#allocation141_spill] sm:$0xff] %v19678_v1  ;;  %23233 = vst [vmem:[#allocation142_spill] sm:$0xff] %v19683_v35  ;;  %v19687_v56 = vpop.eup %15381  ;;  %13598 = vmatpush3.bf16.msra.mxu0 %v23238_v52  ;;  %v19697_v31 = vpop.permute.xlu0 %3985  ;;  %15403 = vpow2.f32 %v19574_v63  ;;  %v23241_v1 = vld [vmem:[#allocation61_spill] sm:$0xff]  ;;  %v14969_v63 = vld [vmem:[%s22864_s1 + $0x18] sm:$0xff]   ;;  %14586 = vmatpush3.bf16.msra.mxu1 %v14965_v30 }
 0x1c8   :  { %23239 = vst [vmem:[#allocation13_spill] sm:$0xff] %v19697_v31  ;;  %v19701_v35 = vpop.eup %15383  ;;  %v23242_v53 = vpack.c.bf16 %v23240_v36, %v23241_v1  ;;  %v19711_v52 = vpop.f32.mrb[68].mxu1  ;;  %15405 = vpow2.f32 %v19580_v4  ;;  %v19738_v36 = vmul.f32 -1.442695, %v2502_v48  ;;  %v23247_v1 = vld [vmem:[#allocation81_spill] sm:$0xff]  ;;  %14587 = vmatprep.subr.bf16.mxu1 %v14968_v50  ;;  %5339 = vperm.xlu1 %14625, %v19401_v54   ;;  %v19766_v54 = vld [vmem:[%s22862_s2 + $0x8] sm:$0xff] }
 0x1c9   :  { %23243 = vst [vmem:[#allocation78_spill] sm:$0xff] %v19711_v52  ;;  %v15386_v14 = vpop.eup %15385  ;;  %15407 = vpow2.f32 %v12477_v62  ;;  %v23248_v62 = vld [vmem:[#allocation37_spill] sm:$0xff]  ;;  %5334 = vperm.xlu0 %14624, %v19406_v6   ;;  %14572 = vmatmul.mubr.msk.bf16.gmra.mrb[192].mxu0 %vm221_vm0, %v14970_v28  ;;  %v23260_v28 = vld [vmem:[#allocation44_spill] sm:$0xff]  ;;  %v23292_v47 = vld [vmem:[#allocation31_spill] sm:$0xff] }
 0x1ca   :  { %13599 = vmatprep.subr.bf16.mxu0 %v23242_v53  ;;  %v19728_v24 = vpop.eup %15387  ;;  %v2560_v4 = vadd.f32 1.0, %v15386_v14  ;;  %v19734_v12 = vpop.permute.xlu1 %4000  ;;  %15409 = vpow2.f32 %v12442_v22  ;;  %v19740_v53 = vmul.f32 -1.442695, %v2935_v58  ;;  %v2494_v14 = vadd.f32 %v23247_v1, %v23246_v41  ;;  %v23249_v30 = vld [vmem:[#allocation33_spill] sm:$0xff]  ;;  %v14971_v41 = vld [vmem:[%s22863_s0 + $0x1a8] sm:$0xff]   ;;  %14544 = vmatmul.mubr.msk.bf16.gmra.mrb[184].mxu1 %vm221_vm0, %v14969_v63  ;;  %v14973_v63 = vld [vmem:[%s22864_s1 + $0x20] sm:$0xff]  }
 0x1cb   :  { %23244 = vst [vmem:[#allocation39_spill] sm:$0xff] %v19734_v12  ;;  %v19736_v45 = vpop.eup %15389  ;;  %v23250_v39 = vpack.c.bf16 %v23248_v62, %v23249_v30  ;;  %v19747_v8 = vpop.permute.xlu0 %3995  ;;  %v23252_v12 = vld [vmem:[#allocation87_spill] sm:$0xff]  ;;  %v23253_v52 = vld [vmem:[#allocation85_spill] sm:$0xff]  ;;  %14588 = vmatpush3.bf16.msra.mxu1 %v14968_v50  ;;  %14575 = vmatprep.mubr.msk.bf16.mxu0 %vm221_vm0, %v14973_v63 }
 0x1cc   :  { %23245 = vst [vmem:[#allocation35_spill] sm:$0xff] %v19736_v45  ;;  %23251 = vst [vmem:[#allocation64_spill] sm:$0xff] %v19747_v8  ;;  %v15392_v31 = vpop.eup %15391  ;;  %15411 = vrcp.f32 %v2560_v4  ;;  %v23254_v43 = vpack.c.bf16 %v23252_v12, %v23253_v52  ;;  %v19753_v22 = vpop.f32.mrb[69].mxu1  ;;  %v19785_v62 = vmul.f32 -1.442695, %v2494_v14  ;;  %14589 = vmatprep.subr.bf16.mxu1 %v14971_v41  ;;  %v14974_v30 = vld [vmem:[%s22863_s0 + $0x1b0] sm:$0xff]   ;;  %5702 = vperm.xlu1 %14625, %v19766_v54  }
 0x1cd   :  { %13600 = vmatpush3.bf16.msra.mxu0 %v23250_v39  ;;  %23255 = vst [vmem:[#allocation61_spill] sm:$0xff] %v19753_v22  ;;  %v15394_v48 = vpop.eup %15393  ;;  %v2993_v58 = vadd.f32 1.0, %v15392_v31  ;;  %15413 = vpow2.f32 %v19652_v20  ;;  %v19761_v39 = vpop.f32.mrb[70].mxu1  ;;  %v14972_v20 = vld [vmem:[%s22864_s1 + $0x20] sm:$0xff]   ;;  %v23266_v14 = vld [vmem:[#allocation70_spill] sm:$0xff] }
 0x1ce   :  { %13601 = vmatprep.subr.bf16.mxu0 %v23254_v43  ;;  %23256 = vst [vmem:[#allocation15_spill] sm:$0xff] %v19761_v39  ;;  %v19771_v43 = vld [vmem:[%s22862_s2] sm:$0xff]  ;;  %v15396_v52 = vpop.eup %15395  ;;  %v2563_v31 = vadd.f32 1.0, %v15394_v48  ;;  %15415 = vpow2.f32 %v19654_v16  ;;  %v19775_v6 = vpop.f32.mrb[71].mxu1  ;;  %v23259_v16 = vld [vmem:[#allocation48_spill] sm:$0xff]  ;;  %14547 = vmatprep.mubr.msk.bf16.mxu1 %vm221_vm0, %v14972_v20 }
 0x1cf   :  { %23257 = vst [vmem:[#allocation81_spill] sm:$0xff] %v19775_v6  ;;  %v19783_v1 = vpop.permute.xlu1 %4010  ;;  %v15398_v4 = vpop.eup %15397  ;;  %15417 = vrcp.f32 %v2993_v58  ;;  %v2996_v12 = vadd.f32 1.0, %v15396_v52  ;;  %v23261_v50 = vpack.c.bf16 %v23259_v16, %v23260_v28  ;;  %v23264_v6 = vld [vmem:[#allocation45_spill] sm:$0xff]  ;;  %v23265_v52 = vld [vmem:[#allocation14_spill] sm:$0xff]  ;;  %5697 = vperm.xlu0 %14624, %v19771_v43   ;;  %14590 = vmatpush3.bf16.msra.mxu1 %v14971_v41 }
 0x1d0   :  { %23258 = vst [vmem:[#allocation37_spill] sm:$0xff] %v19783_v1  ;;  %v19793_v48 = vpop.permute.xlu0 %4005  ;;  %v15400_v8 = vpop.eup %15399  ;;  %15419 = vrcp.f32 %v2563_v31  ;;  %v2561_v39 = vadd.f32 1.0, %v15398_v4  ;;  %v23263_v1 = vld [vmem:[#allocation98_spill] sm:$0xff]  ;;  %v23267_v22 = vpack.c.bf16 %v23265_v52, %v23266_v14  ;;  %v14975_v31 = vld [vmem:[%s22864_s1 + $0x28] sm:$0xff]   ;;  %v23270_v52 = vld [vmem:[#allocation43_spill] sm:$0xff]  ;;  %14591 = vmatprep.subr.bf16.mxu1 %v14974_v30 }
 0x1d1   :  { %13602 = vmatpush3.bf16.msra.mxu0 %v23261_v50  ;;  %23262 = vst [vmem:[#allocation33_spill] sm:$0xff] %v19793_v48  ;;  %v2927_v58 = vadd.f32 %v23264_v6, %v23263_v1  ;;  %v15402_v16 = vpop.eup %15401  ;;  %15421 = vrcp.f32 %v2996_v12  ;;  %v2994_v28 = vadd.f32 1.0, %v15400_v8  ;;  %v14976_v6 = vld [vmem:[%s22864_s1 + $0x28] sm:$0xff]   ;;  %v19813_v8 = vld [vmem:[%s22862_s2 + $0x18] sm:$0xff]  ;;  %v23269_v50 = vld [vmem:[#allocation47_spill] sm:$0xff] }
 0x1d2   :  { %13603 = vmatprep.subr.bf16.mxu0 %v23267_v22  ;;  %v15404_v1 = vpop.eup %15403  ;;  %15423 = vrcp.f32 %v2561_v39  ;;  %v2566_v22 = vadd.f32 1.0, %v15402_v16  ;;  %v23271_v14 = vpack.c.bf16 %v23269_v50, %v23270_v52  ;;  %v19823_v41 = vld [vmem:[%s22862_s2 + $0x10] sm:$0xff]  ;;  %v23277_v50 = vpack.c.bf16 %v23275_v15, %v23276_v34  ;;  %5712 = vperm.xlu1 %14625, %v19813_v8   ;;  %v19835_v52 = vpop.f32.mrb[72].mxu1  ;;  %v23281_v15 = vld [vmem:[#allocation40_spill] sm:$0xff] }
 0x1d3   :  { %v19815_v20 = vpop.permute.xlu1 %4020  ;;  %v15406_v4 = vpop.eup %15405  ;;  %15425 = vrcp.f32 %v2994_v28  ;;  %v2999_v12 = vadd.f32 1.0, %v15404_v1  ;;  %v19827_v48 = vmul.f32 -1.442695, %v2927_v58  ;;  %v23274_v28 = vld [vmem:[#allocation6_spill] sm:$0xff]  ;;  %23278 = vst [vmem:[#allocation48_spill] sm:$0xff] %v19835_v52  ;;  %14548 = vmatmul.mubr.msk.bf16.gmra.mrb[188].mxu1 %vm221_vm0, %v14975_v31  ;;  %5707 = vperm.xlu0 %14624, %v19823_v41   ;;  %v19854_v31 = vld [vmem:[%s22862_s2 + $0x28] sm:$0xff] }
 0x1d4   :  { %23268 = vst [vmem:[#allocation87_spill] sm:$0xff] %v19815_v20  ;;  %v19825_v39 = vpop.permute.xlu0 %4015  ;;  %v15408_v63 = vpop.eup %15407  ;;  %15427 = vrcp.f32 %v2566_v22  ;;  %v2564_v16 = vadd.f32 1.0, %v15406_v4  ;;  %v23273_v20 = vld [vmem:[#allocation84_spill] sm:$0xff]  ;;  %v23280_v4 = vld [vmem:[#allocation75_spill] sm:$0xff]  ;;  %14576 = vmatmul.mubr.msk.bf16.gmra.mrb[196].mxu0 %vm221_vm0, %v14976_v6  ;;  %14592 = vmatpush3.bf16.msra.mxu1 %v14974_v30  ;;  %v23284_v30 = vld [vmem:[#allocation77_spill] sm:$0xff] }
 0x1d5   :  { %13604 = vmatpush3.bf16.msra.mxu0 %v23271_v14  ;;  %23272 = vst [vmem:[#allocation85_spill] sm:$0xff] %v19825_v39  ;;  %v2505_v1 = vadd.f32 %v23274_v28, %v23273_v20  ;;  %v15410_v14 = vpop.eup %15409  ;;  %15429 = vrcp.f32 %v2999_v12  ;;  %v2997_v44 = vadd.f32 1.0, %v15408_v63  ;;  %v19839_v58 = vpop.f32.mrb[73].mxu1  ;;  %v2938_v34 = vadd.f32 %v23281_v15, %v23280_v4  ;;  %v14977_v12 = vld [vmem:[%s22863_s0 + $0x1b8] sm:$0xff]   ;;  %v23286_v4 = vld [vmem:[#allocation60_spill] sm:$0xff] }
 0x1d6   :  { %13605 = vmatprep.subr.bf16.mxu0 %v23277_v50  ;;  %23279 = vst [vmem:[#allocation44_spill] sm:$0xff] %v19839_v58  ;;  %v19841_v22 = vpop.eup %15411  ;;  %15431 = vrcp.f32 %v2564_v16  ;;  %v2567_v20 = vadd.f32 1.0, %v15410_v14  ;;  %v19849_v63 = vpop.f32.mrb[74].mxu1  ;;  %v19859_v16 = vld [vmem:[%s22862_s2 + $0x20] sm:$0xff]  ;;  %v23287_v15 = vld [vmem:[#allocation56_spill] sm:$0xff]  ;;  %14593 = vmatprep.subr.bf16.mxu1 %v14977_v12 }
 0x1d7   :  { %23282 = vst [vmem:[#allocation98_spill] sm:$0xff] %v19849_v63  ;;  %v19861_v28 = vpop.permute.xlu1 %4030  ;;  %v15414_v6 = vpop.eup %15413  ;;  %15433 = vrcp.f32 %v2997_v44  ;;  %v23285_v50 = vld [vmem:[#allocation83_spill] sm:$0xff]  ;;  %v23288_v39 = vpack.c.bf16 %v23286_v4, %v23287_v15  ;;  %v14978_v63 = vld [vmem:[%s22864_s1 + $0x30] sm:$0xff]   ;;  %v12446_v42 = vmul.f32 -1.442695, %v2505_v1  ;;  %5722 = vperm.xlu1 %14625, %v19854_v31   ;;  %5717 = vperm.xlu0 %14624, %v19859_v16  }
 0x1d8   :  { %23283 = vst [vmem:[#allocation45_spill] sm:$0xff] %v19861_v28  ;;  %v2497_v14 = vadd.f32 %v23285_v50, %v23284_v30  ;;  %v19868_v52 = vpop.f32.mrb[75].mxu1  ;;  %v19873_v58 = vpop.permute.xlu0 %4025  ;;  %15435 = vrcp.f32 %v2567_v20  ;;  %v3000_v28 = vadd.f32 1.0, %v15414_v6  ;;  %v23291_v44 = vld [vmem:[#allocation97_spill] sm:$0xff]  ;;  %14594 = vmatpush3.bf16.msra.mxu1 %v14977_v12  ;;  %14551 = vmatprep.mubr.msk.bf16.mxu1 %vm221_vm0, %v14978_v63  ;;  %v23299_v6 = vld [vmem:[#allocation58_spill] sm:$0xff] }
 0x1d9   :  { %13606 = vmatpush3.bf16.msra.mxu0 %v23288_v39  ;;  %23289 = vst [vmem:[#allocation14_spill] sm:$0xff] %v19868_v52  ;;  %23290 = vst [vmem:[#allocation70_spill] sm:$0xff] %v19873_v58  ;;  %v15416_v18 = vpop.eup %15415  ;;  %v2930_v13 = vadd.f32 %v23292_v47, %v23291_v44  ;;  %v23293_v30 = vld [vmem:[#allocation93_spill] sm:$0xff]  ;;  %15437 = vpow2.f32 %v19716_v5  ;;  %v14980_v47 = vld [vmem:[%s22864_s1 + $0x38] sm:$0xff]  }
 0x1da   :  { %v23294_v50 = vld [vmem:[#allocation89_spill] sm:$0xff]  ;;  %v19883_v4 = vpop.eup %15417  ;;  %v2565_v15 = vadd.f32 1.0, %v15416_v18  ;;  %15439 = vrcp.f32 %v3000_v28  ;;  %v12444_v5 = vmul.f32 -1.442695, %v2497_v14  ;;  %v23300_v44 = vld [vmem:[#allocation54_spill] sm:$0xff]  ;;  %v19930_v28 = vpop.f32.mrb[76].mxu1 }
 0x1db   :  { %v23295_v27 = vpack.c.bf16 %v23293_v30, %v23294_v50  ;;  %v14979_v39 = vld [vmem:[%s22864_s1 + $0x30] sm:$0xff]   ;;  %23296 = vst [vmem:[#allocation47_spill] sm:$0xff] %v19883_v4  ;;  %v19891_v1 = vpop.eup %15419  ;;  %v19894_v20 = vpop.permute.xlu1 %4040  ;;  %v23301_v30 = vpack.c.bf16 %v23299_v6, %v23300_v44  ;;  %v23302_v50 = vpack.c.bf16 %v19101_v29, %v18962_v21  ;;  %v19910_v12 = vld [vmem:[%s22862_s2 + $0x38] sm:$0xff]  ;;  %v12482_v21 = vmul.f32 -1.442695, %v2930_v13  ;;  %v23304_v29 = vld [vmem:[#allocation24_spill] sm:$0xff]  ;;  %14552 = vmatmul.mubr.msk.bf16.gmra.mrb[192].mxu1 %vm221_vm0, %v14980_v47 }
 0x1dc   :  { %23297 = vst [vmem:[#allocation43_spill] sm:$0xff] %v19894_v20  ;;  %v19896_v18 = vpop.eup %15421  ;;  %15441 = vrcp.f32 %v2565_v15  ;;  %v19912_v63 = vpop.permute.xlu0 %4035  ;;  %v3320_v15 = vadd.f32 %v19097_v23, %v23304_v29  ;;  %v23305_v6 = vld [vmem:[#allocation8_spill] sm:$0xff]  ;;  %v23306_v44 = vld [vmem:[#allocation99_spill] sm:$0xff]  ;;  %14579 = vmatprep.mubr.msk.bf16.mxu0 %vm221_vm0, %v14979_v39  ;;  %23308 = vst [vmem:[#allocation95_spill] sm:$0xff] %v19930_v28  ;;  %5732 = vperm.xlu1 %14625, %v19910_v12  }
 0x1dd   :  { %13607 = vmatprep.subr.bf16.mxu0 %v23295_v27  ;;  %v12484_v27 = vmul.f32 -1.442695, %v2938_v34  ;;  %23298 = vst [vmem:[#allocation84_spill] sm:$0xff] %v19896_v18  ;;  %13619 = vmatprep.subr.bf16.mxu1 %v23302_v50  ;;  %v14981_v34 = vld [vmem:[%s22864_s1 + $0x38] sm:$0xff]   ;;  %23303 = vst [vmem:[#allocation6_spill] sm:$0xff] %v19912_v63  ;;  %v19916_v14 = vpop.eup %15423  ;;  %15443 = vpow2.f32 %v19738_v36  ;;  %v19928_v50 = vld [vmem:[%s22862_s2 + $0x30] sm:$0xff] }
 0x1de   :  { %13608 = vmatpush3.bf16.msra.mxu0 %v23301_v30  ;;  %v23307_v30 = vpack.c.bf16 %v23305_v6, %v23306_v44  ;;  %v19934_v13 = vpop.eup %15425  ;;  %15445 = vpow2.f32 %v19740_v53  ;;  %v23310_v23 = vld [vmem:[#allocation26_spill] sm:$0xff]  ;;  %v23311_v6 = vld [vmem:[#allocation79_spill] sm:$0xff]  ;;  %v19943_v44 = vpop.f32.mrb[77].mxu1  ;;  %5727 = vperm.xlu0 %14624, %v19928_v50   ;;  %v23323_v28 = vld [vmem:[#allocation32_spill] sm:$0xff] }
 0x1df   :  { %23309 = vst [vmem:[#allocation17_spill] sm:$0xff] %v19934_v13  ;;  %v3312_v29 = vadd.f32 %v19109_v9, %v23310_v23  ;;  %v3323_v39 = vadd.f32 %v19125_v51, %v23311_v6  ;;  %23312 = vst [vmem:[#allocation75_spill] sm:$0xff] %v19943_v44  ;;  %v19950_v53 = vpop.eup %15427  ;;  %15447 = vpow2.f32 %v19785_v62  ;;  %14580 = vmatmul.mubr.msk.bf16.gmra.mrb[200].mxu0 %vm221_vm0, %v14981_v34  ;;  %v19955_v51 = vpop.f32.mrb[78].mxu1  ;;  %v19960_v9 = vld [vmem:[%s22862_s2 + $0x48] sm:$0xff]  ;;  %v23316_v62 = vld [vmem:[#allocation42_spill] sm:$0xff] }
 0x1e0   :  { %13609 = vmatprep.subr.bf16.mxu0 %v23307_v30  ;;  %v14982_v30 = vld [vmem:[%s22864_s1] sm:$0xff]   ;;  %23313 = vst [vmem:[#allocation40_spill] sm:$0xff] %v19955_v51  ;;  %v19962_v47 = vpop.f32.mrb[76].mxu0  ;;  %v19966_v6 = vpop.eup %15429  ;;  %15449 = vpow2.f32 %v19827_v48  ;;  %v23317_v34 = vld [vmem:[#allocation36_spill] sm:$0xff]  ;;  %v23324_v51 = vld [vmem:[#allocation22_spill] sm:$0xff]  ;;  %5742 = vperm.xlu1 %14625, %v19960_v9  }
 0x1e1   :  { %23314 = vst [vmem:[#allocation77_spill] sm:$0xff] %v19962_v47  ;;  %23315 = vst [vmem:[#allocation83_spill] sm:$0xff] %v19966_v6  ;;  %v23318_v36 = vpack.c.bf16 %v23316_v62, %v23317_v34  ;;  %v19972_v63 = vpop.f32.mrb[79].mxu1  ;;  %v19977_v20 = vld [vmem:[%s22862_s2 + $0x40] sm:$0xff]  ;;  %14595 = vmatprep.mubr.msk.bf16.mxu1 %vm221_vm0, %v14982_v30  ;;  %v19983_v47 = vpop.permute.xlu1 %4403  ;;  %15451 = vpow2.f32 %v12446_v42  ;;  %v12509_v62 = vmul.f32 -1.442695, %v3320_v15 }
 0x1e2   :  { %23319 = vst [vmem:[#allocation60_spill] sm:$0xff] %v19972_v63  ;;  %v14985_v23 = vld [vmem:[%s22865_s3 + $0x4] ss:$104 sps:$4 sm:$0xff]   ;;  %23320 = vst [vmem:[#allocation56_spill] sm:$0xff] %v19983_v47  ;;  %v19985_v48 = vpop.eup %15431  ;;  %v23322_v34 = vld [vmem:[#allocation102_spill] sm:$0xff]  ;;  %v23325_v63 = vpack.c.bf16 %v23323_v28, %v23324_v51  ;;  %v19992_v44 = vpop.permute.xlu0 %4398  ;;  %15453 = vpow2.f32 %v12484_v27  ;;  %5737 = vperm.xlu0 %14624, %v19977_v20   ;;  %v23350_v47 = vpack.c.bf16 %v19662_v17, %v19627_v60 }
 0x1e3   :  { %13610 = vmatpush3.bf16.msra.mxu0 %v23318_v36  ;;  %v23321_v36 = vld [vmem:[#allocation76_spill] sm:$0xff]  ;;  %23326 = vst [vmem:[#allocation97_spill] sm:$0xff] %v19992_v44  ;;  %v19994_v30 = vpop.eup %15433  ;;  %v12507_v52 = vmul.f32 -1.442695, %v3312_v29  ;;  %v12510_v45 = vmul.f32 -1.442695, %v3323_v39  ;;  %11688 = vmatprep.mubr.bf16.mxu0 %v14985_v23  ;;  %15455 = vpow2.f32 %v12444_v5 }
 0x1e4   :  { %v3315_v58 = vadd.f32 %v23322_v34, %v23321_v36  ;;  %13611 = vmatprep.subr.bf16.mxu0 %v23325_v63  ;;  %v14986_v42 = vld [vmem:[%s22864_s1 + $0x8] sm:$0xff]   ;;  %v20000_v15 = vpop.f32.mrb[80].mxu1  ;;  %v20002_v36 = vpop.eup %15435  ;;  %v20011_v63 = vld [vmem:[%s22862_s2 + $0x58] sm:$0xff]  ;;  %15457 = vpow2.f32 %v12482_v21 }
 0x1e5   :  { %23327 = vst [vmem:[#allocation31_spill] sm:$0xff] %v20000_v15  ;;  %v14983_v27 = vld [vmem:[%s22865_s3] ss:$104 sps:$4 sm:$0xff]   ;;  %v20013_v28 = vpop.f32.mrb[81].mxu1  ;;  %v15438_v29 = vpop.eup %15437  ;;  %v23329_v39 = vld [vmem:[#allocation38_spill] sm:$0xff]  ;;  %15459 = vpow2.f32 %v12509_v62  ;;  %14596 = vmatmul.mubr.msk.bf16.vlgmr.msra.gmra.mrb[196].mxu1 %vm221_vm0, %v14986_v42  ;;  %5752 = vperm.xlu1 %14625, %v20011_v63   ;;  %v20040_v62 = vld [vmem:[%s22862_s2 + $0x50] sm:$0xff] }
 0x1e6   :  { %23328 = vst [vmem:[#allocation93_spill] sm:$0xff] %v20013_v28  ;;  %v23330_v51 = vld [vmem:[#allocation34_spill] sm:$0xff]  ;;  %v20018_v5 = vpop.f32.mrb[82].mxu1  ;;  %v20020_v34 = vpop.permute.xlu1 %4413  ;;  %v2998_v15 = vadd.f32 1.0, %v15438_v29  ;;  %v12508_v18 = vmul.f32 -1.442695, %v3315_v58  ;;  %v23334_v28 = vpack.c.bf16 %v19687_v56, %v19644_v32  ;;  %15461 = vpow2.f32 %v12507_v52  ;;  %5747 = vperm.xlu0 %14624, %v20040_v62  }
 0x1e7   :  { %v23331_v23 = vpack.c.bf16 %v23329_v39, %v23330_v51  ;;  %23332 = vst [vmem:[#allocation89_spill] sm:$0xff] %v20018_v5  ;;  %23333 = vst [vmem:[#allocation58_spill] sm:$0xff] %v20020_v34  ;;  %v20024_v44 = vpop.eup %15439  ;;  %v20029_v21 = vpop.f32.mrb[83].mxu1  ;;  %v14987_v32 = vld [vmem:[%s22864_s1 + $0x10] sm:$0xff]   ;;  %v23339_v52 = vld [vmem:[#allocation63_spill] sm:$0xff] }
 0x1e8   :  { %23335 = vst [vmem:[#allocation54_spill] sm:$0xff] %v20029_v21  ;;  %v20031_v39 = vpop.permute.xlu0 %4408  ;;  %v20033_v51 = vpop.eup %15441  ;;  %15463 = vrcp.f32 %v2998_v15  ;;  %v20053_v42 = vld [vmem:[%s22862_s2 + $0x68] sm:$0xff]  ;;  %v23343_v15 = vld [vmem:[#allocation50_spill] sm:$0xff]  ;;  %v23345_v5 = vld [vmem:[#allocation51_spill] sm:$0xff]  ;;  %14599 = vmatprep.mubr.msk.bf16.mxu1 %vm221_vm0, %v14987_v32 }
 0x1e9   :  { %13612 = vmatpush3.bf16.msra.mxu0 %v23331_v23  ;;  %23336 = vst [vmem:[#allocation24_spill] sm:$0xff] %v20031_v39  ;;  %v20045_v56 = vpop.f32.mrb[77].mxu0  ;;  %v15444_v58 = vpop.eup %15443  ;;  %15465 = vpow2.f32 %v12510_v45  ;;  %5762 = vperm.xlu1 %14625, %v20053_v42   ;;  %v14988_v60 = vld [vmem:[%s22864_s1 + $0x18] sm:$0xff]   ;;  %v14989_v32 = vld [vmem:[%s22864_s1 + $0x20] sm:$0xff]  }
 0x1ea   :  { %13641 = vmatprep.subr.bf16.mxu0 %v23334_v28  ;;  %23337 = vst [vmem:[#allocation8_spill] sm:$0xff] %v20045_v56  ;;  %v23338_v28 = vld [vmem:[#allocation69_spill] sm:$0xff]  ;;  %v20055_v23 = vpop.f32.mrb[78].mxu0  ;;  %v15446_v39 = vpop.eup %15445  ;;  %v2570_v34 = vadd.f32 1.0, %v15444_v58  ;;  %15467 = vpow2.f32 %v12508_v18 }
 0x1eb   :  { %v23340_v29 = vpack.c.bf16 %v23338_v28, %v23339_v52  ;;  %23341 = vst [vmem:[#allocation99_spill] sm:$0xff] %v20055_v23  ;;  %v23342_v56 = vld [vmem:[#allocation49_spill] sm:$0xff]  ;;  %v23346_v28 = vld [vmem:[#allocation80_spill] sm:$0xff]  ;;  %v20067_v21 = vpop.permute.xlu1 %4423  ;;  %v15448_v4 = vpop.eup %15447  ;;  %v3003_v23 = vadd.f32 1.0, %v15446_v39 }
 0x1ec   :  { %11689 = vmatmul.mubr.bf16.vlgmr.msra.gmra.mrb[204].mxu0 %v14983_v27  ;;  %v23344_v27 = vpack.c.bf16 %v23342_v56, %v23343_v15  ;;  %v23347_v52 = vpack.c.bf16 %v23345_v5, %v23346_v28  ;;  %23349 = vst [vmem:[#allocation79_spill] sm:$0xff] %v20067_v21  ;;  %v20073_v45 = vpop.permute.xlu0 %4418  ;;  %v15450_v56 = vpop.eup %15449  ;;  %15469 = vrcp.f32 %v2570_v34  ;;  %v2568_v58 = vadd.f32 1.0, %v15448_v4  ;;  %v20079_v5 = vld [vmem:[%s22862_s2 + $0x60] sm:$0xff]  ;;  %v23353_v34 = vld [vmem:[#allocation65_spill] sm:$0xff]  ;;  %v23354_v4 = vld [vmem:[#allocation10_spill] sm:$0xff] }
 0x1ed   :  { %13620 = vmatpush3.bf16.msra.mxu1 %v23340_v29  ;;  %v20065_v29 = vpop.f32.mrb[79].mxu0  ;;  %23351 = vst [vmem:[#allocation42_spill] sm:$0xff] %v20073_v45  ;;  %v15452_v18 = vpop.eup %15451  ;;  %15471 = vrcp.f32 %v3003_v23  ;;  %v23355_v39 = vpack.c.bf16 %v23353_v34, %v23354_v4  ;;  %v20093_v15 = vld [vmem:[%s22862_s2 + $0x78] sm:$0xff]  ;;  %v23358_v4 = vld [vmem:[#allocation100_spill] sm:$0xff]  ;;  %5757 = vperm.xlu0 %14624, %v20079_v5  }
 0x1ee   :  { %13642 = vmatpush3.bf16.msra.mxu0 %v23344_v27  ;;  %13621 = vmatprep.subr.bf16.mxu1 %v23347_v52  ;;  %23348 = vst [vmem:[#allocation26_spill] sm:$0xff] %v20065_v29  ;;  %v20085_v17 = vpop.f32.mrb[80].mxu0  ;;  %v15454_v23 = vpop.eup %15453  ;;  %15473 = vrcp.f32 %v2568_v58  ;;  %v2571_v52 = vadd.f32 1.0, %v15452_v18  ;;  %v23361_v21 = vld [vmem:[#allocation104_spill] sm:$0xff]  ;;  %v23365_v58 = vld [vmem:[#allocation29_spill] sm:$0xff] }
 0x1ef   :  { %13643 = vmatprep.subr.bf16.mxu0 %v23350_v47  ;;  %23352 = vst [vmem:[#allocation36_spill] sm:$0xff] %v20085_v17  ;;  %v3001_v47 = vadd.f32 1.0, %v15450_v56  ;;  %v20098_v27 = vpop.f32.mrb[81].mxu0  ;;  %v23357_v56 = vld [vmem:[#allocation86_spill] sm:$0xff]  ;;  %v23362_v45 = vpack.c.bf16 %v19215_v59, %v23361_v21  ;;  %v15456_v13 = vpop.eup %15455  ;;  %v3004_v28 = vadd.f32 1.0, %v15454_v23  ;;  %v23366_v18 = vld [vmem:[#allocation109_spill] sm:$0xff]  ;;  %14600 = vmatmul.mubr.msk.bf16.gmra.mrb[200].mxu1 %vm221_vm0, %v14988_v60 }
 0x1f0   :  { %23356 = vst [vmem:[#allocation76_spill] sm:$0xff] %v20098_v27  ;;  %v3336_v34 = vadd.f32 %v19190_v25, %v23357_v56  ;;  %v20110_v29 = vpop.f32.mrb[82].mxu0  ;;  %v20112_v27 = vpop.permute.xlu1 %4433  ;;  %v3328_v6 = vadd.f32 %v23366_v18, %v23365_v58  ;;  %v23367_v25 = vpack.c.bf16 %v19916_v14, %v19841_v22  ;;  %5772 = vperm.xlu1 %14625, %v20093_v15   ;;  %v23371_v56 = vld [vmem:[#allocation88_spill] sm:$0xff]  ;;  %v23375_v18 = vld [vmem:[#allocation30_spill] sm:$0xff] }
 0x1f1   :  { %13622 = vmatpush3.bf16.msra.mxu1 %v23355_v39  ;;  %v23359_v39 = vld [vmem:[#allocation41_spill] sm:$0xff]  ;;  %23363 = vst [vmem:[#allocation102_spill] sm:$0xff] %v20110_v29  ;;  %23364 = vst [vmem:[#allocation32_spill] sm:$0xff] %v20112_v27  ;;  %15475 = vrcp.f32 %v3001_v47  ;;  %v20122_v59 = vpop.permute.xlu0 %4428  ;;  %v15458_v21 = vpop.eup %15457  ;;  %14603 = vmatprep.mubr.msk.bf16.mxu1 %vm221_vm0, %v14989_v32  ;;  %v23377_v29 = vld [vmem:[#allocation112_spill] sm:$0xff] }
 0x1f2   :  { %v23360_v17 = vpack.c.bf16 %v23358_v4, %v23359_v39  ;;  %13623 = vmatprep.subr.bf16.mxu1 %v23362_v45  ;;  %23369 = vst [vmem:[#allocation38_spill] sm:$0xff] %v20122_v59  ;;  %15477 = vrcp.f32 %v2571_v52  ;;  %v2569_v45 = vadd.f32 1.0, %v15456_v13  ;;  %v20129_v47 = vld [vmem:[%s22862_s2 + $0x70] sm:$0xff]  ;;  %v15460_v14 = vpop.eup %15459  ;;  %v3002_v23 = vadd.f32 1.0, %v15458_v21  ;;  %v23372_v4 = vld [vmem:[#allocation7_spill] sm:$0xff] }
 0x1f3   :  { %15479 = vrcp.f32 %v3004_v28  ;;  %v23373_v39 = vpack.c.bf16 %v23371_v56, %v23372_v4  ;;  %v15462_v60 = vpop.eup %15461  ;;  %v3424_v52 = vadd.f32 1.0, %v15460_v14  ;;  %v12513_v58 = vmul.f32 -1.442695, %v3336_v34  ;;  %v23380_v28 = vld [vmem:[#allocation108_spill] sm:$0xff]  ;;  %v23381_v21 = vld [vmem:[#allocation101_spill] sm:$0xff]  ;;  %5767 = vperm.xlu0 %14624, %v20129_v47  }
 0x1f4   :  { %13644 = vmatpush3.bf16.msra.mxu0 %v23360_v17  ;;  %v20120_v17 = vpop.f32.mrb[83].mxu0  ;;  %15481 = vrcp.f32 %v2569_v45  ;;  %v20149_v32 = vpop.permute.xlu1 %4443  ;;  %v3422_v45 = vadd.f32 1.0, %v15462_v60  ;;  %v12511_v34 = vmul.f32 -1.442695, %v3328_v6  ;;  %v23385_v14 = vld [vmem:[#allocation52_spill] sm:$0xff]  ;;  %6135 = vperm.xlu1 %14625, %v19766_v54  }
 0x1f5   :  { %13645 = vmatprep.subr.bf16.mxu0 %v23367_v25  ;;  %23368 = vst [vmem:[#allocation22_spill] sm:$0xff] %v20120_v17  ;;  %v20131_v22 = vpop.f32.mrb[84].mxu0  ;;  %13624 = vmatpush3.bf16.msra.mxu1 %v23373_v39  ;;  %v23376_v25 = vld [vmem:[#allocation19_spill] sm:$0xff]  ;;  %v23382_v17 = vpack.c.bf16 %v23380_v28, %v23381_v21  ;;  %23384 = vst [vmem:[#allocation49_spill] sm:$0xff] %v20149_v32  ;;  %v20151_v4 = vpop.eup %15463  ;;  %15483 = vrcp.f32 %v3002_v23  ;;  %v23386_v39 = vld [vmem:[#allocation57_spill] sm:$0xff] }
 0x1f6   :  { %23370 = vst [vmem:[#allocation34_spill] sm:$0xff] %v20131_v22  ;;  %v20137_v13 = vpop.f32.mrb[85].mxu0  ;;  %v3339_v59 = vadd.f32 %v23376_v25, %v23375_v18  ;;  %v23378_v22 = vld [vmem:[#allocation106_spill] sm:$0xff]  ;;  %v3331_v18 = vadd.f32 %v23386_v39, %v23385_v14  ;;  %15485 = vrcp.f32 %v3424_v52  ;;  %v23389_v25 = vld [vmem:[#allocation107_spill] sm:$0xff]  ;;  %v23390_v28 = vld [vmem:[#allocation117_spill] sm:$0xff] }
 0x1f7   :  { %23374 = vst [vmem:[#allocation69_spill] sm:$0xff] %v20137_v13  ;;  %v23379_v27 = vpack.c.bf16 %v23377_v29, %v23378_v22  ;;  %13625 = vmatprep.subr.bf16.mxu1 %v23382_v17  ;;  %v20147_v56 = vpop.f32.mrb[86].mxu0  ;;  %v23387_v29 = vpack.c.bf16 %v19891_v1, %v19728_v24  ;;  %v15466_v22 = vpop.eup %15465  ;;  %v3352_v23 = vadd.f32 %v23390_v28, %v23389_v25  ;;  %v14990_v6 = vld [vmem:[%s22864_s1 + $0x28] sm:$0xff]   ;;  %15487 = vrcp.f32 %v3422_v45  ;;  %v23393_v52 = vld [vmem:[#allocation59_spill] sm:$0xff]  ;;  %v23394_v39 = vld [vmem:[#allocation53_spill] sm:$0xff] }
 0x1f8   :  { %23383 = vst [vmem:[#allocation63_spill] sm:$0xff] %v20147_v56  ;;  %v20161_v17 = vpop.f32.mrb[87].mxu0  ;;  %v20171_v24 = vpop.f32.mrb[84].mxu1  ;;  %v3425_v14 = vadd.f32 1.0, %v15466_v22  ;;  %v23395_v25 = vld [vmem:[#allocation12_spill] sm:$0xff]  ;;  %v23396_v28 = vld [vmem:[#allocation82_spill] sm:$0xff]  ;;  %15489 = vpow2.f32 %v12513_v58  ;;  %6130 = vperm.xlu0 %14624, %v19771_v43   ;;  %14604 = vmatmul.mubr.msk.bf16.gmra.mrb[204].mxu1 %vm221_vm0, %v14990_v6 }
 0x1f9   :  { %13646 = vmatpush3.bf16.msra.mxu0 %v23379_v27  ;;  %v20159_v27 = vpop.permute.xlu0 %4438  ;;  %23388 = vst [vmem:[#allocation50_spill] sm:$0xff] %v20161_v17  ;;  %v20169_v60 = vpop.f32.mrb[88].mxu0  ;;  %23392 = vst [vmem:[#allocation80_spill] sm:$0xff] %v20171_v24  ;;  %v23397_v54 = vpack.c.bf16 %v23395_v25, %v23396_v28  ;;  %v14991_v56 = vld [vmem:[%s22864_s1 + $0x30] sm:$0xff]   ;;  %v12514_v45 = vmul.f32 -1.442695, %v3339_v59  ;;  %v23404_v28 = vpack.c.bf16 %v19414_v49, %v19370_v37  ;;  %6145 = vperm.xlu1 %14625, %v19813_v8  }
 0x1fa   :  { %13647 = vmatprep.subr.bf16.mxu0 %v23387_v29  ;;  %23391 = vst [vmem:[#allocation51_spill] sm:$0xff] %v20169_v60  ;;  %v15468_v21 = vpop.eup %15467  ;;  %v3344_v29 = vadd.f32 %v23394_v39, %v23393_v52  ;;  %v20183_v60 = vpop.f32.mrb[89].mxu0  ;;  %v23399_v22 = vld [vmem:[#allocation105_spill] sm:$0xff]  ;;  %v23401_v39 = vld [vmem:[#allocation55_spill] sm:$0xff]  ;;  %15491 = vrcp.f32 %v3425_v14  ;;  %v12512_v58 = vmul.f32 -1.442695, %v3331_v18  ;;  %14607 = vmatprep.mubr.msk.bf16.mxu1 %vm221_vm0, %v14991_v56 }
 0x1fb   :  { %13626 = vmatpush3.bf16.msra.mxu1 %v23397_v54  ;;  %v20185_v24 = vpop.f32.mrb[85].mxu1  ;;  %v20187_v17 = vpop.eup %15469  ;;  %v3423_v1 = vadd.f32 1.0, %v15468_v21  ;;  %v23400_v32 = vld [vmem:[#allocation5_spill] sm:$0xff]  ;;  %v23402_v13 = vld [vmem:[#allocation103_spill] sm:$0xff]  ;;  %v23417_v6 = vld [vmem:[#allocation116_spill] sm:$0xff] }
 0x1fc   :  { %23398 = vst [vmem:[#allocation65_spill] sm:$0xff] %v20185_v24  ;;  %v3355_v52 = vadd.f32 %v23400_v32, %v23399_v22  ;;  %v23403_v25 = vpack.c.bf16 %v23401_v39, %v23402_v13  ;;  %13627 = vmatprep.subr.bf16.mxu1 %v23404_v28  ;;  %v14998_v54 = vld [vmem:[%s22865_s3 + $0x14] ss:$104 sps:$4 sm:$0xff]   ;;  %v20200_v24 = vpop.permute.xlu1 %4453  ;;  %v20202_v21 = vpop.f32.mrb[90].mxu0  ;;  %v23406_v32 = vld [vmem:[#allocation28_spill] sm:$0xff]  ;;  %v23408_v39 = vpack.c.bf16 %v20033_v51, %v19985_v48  ;;  %v23412_v51 = vld [vmem:[#allocation111_spill] sm:$0xff] }
 0x1fd   :  { %23405 = vst [vmem:[#allocation10_spill] sm:$0xff] %v20202_v21  ;;  %v20204_v59 = vpop.eup %15471  ;;  %v23407_v22 = vld [vmem:[#allocation120_spill] sm:$0xff]  ;;  %v20212_v37 = vpop.permute.xlu0 %4448  ;;  %15493 = vrcp.f32 %v3423_v1  ;;  %v12517_v28 = vmul.f32 -1.442695, %v3352_v23  ;;  %v23410_v21 = vld [vmem:[#allocation114_spill] sm:$0xff]  ;;  %6140 = vperm.xlu0 %14624, %v19823_v41   ;;  %6155 = vperm.xlu1 %14625, %v19854_v31  }
 0x1fe   :  { %13648 = vmatpush3.bf16.msra.mxu0 %v23403_v25  ;;  %v3347_v13 = vadd.f32 %v23407_v22, %v23406_v32  ;;  %v20214_v49 = vpop.f32.mrb[91].mxu0  ;;  %v15474_v25 = vpop.eup %15473  ;;  %v3368_v14 = vadd.f32 %v19392_v10, %v23410_v21  ;;  %15495 = vpow2.f32 %v12511_v34  ;;  %v12515_v43 = vmul.f32 -1.442695, %v3344_v29  ;;  %v23413_v32 = vld [vmem:[#allocation126_spill] sm:$0xff]  ;;  %v23418_v21 = vld [vmem:[#allocation68_spill] sm:$0xff]  ;;  %v23420_v29 = vld [vmem:[#allocation119_spill] sm:$0xff]  ;;  %11770 = vmatprep.mubr.bf16.mxu0 %v14998_v54 }
 0x1ff   :  { %13649 = vmatprep.subr.bf16.mxu0 %v23408_v39  ;;  %23409 = vst [vmem:[#allocation86_spill] sm:$0xff] %v20214_v49  ;;  %v20220_v18 = vpop.f32.mrb[86].mxu1  ;;  %v20222_v48 = vpop.eup %15475  ;;  %v3360_v22 = vadd.f32 %v23413_v32, %v23412_v51  ;;  %v23414_v39 = vld [vmem:[#allocation21_spill] sm:$0xff]  ;;  %v23415_v49 = vld [vmem:[#allocation91_spill] sm:$0xff]  ;;  %15497 = vpow2.f32 %v12514_v45  ;;  %v12518_v8 = vmul.f32 -1.442695, %v3355_v52  ;;  %v23419_v34 = vpack.c.bf16 %v19430_v26, %v19375_v61 }
 0x200   :  { %23411 = vst [vmem:[#allocation100_spill] sm:$0xff] %v20220_v18  ;;  %v23416_v1 = vpack.c.bf16 %v23414_v39, %v23415_v49  ;;  %v20230_v10 = vpop.f32.mrb[87].mxu1  ;;  %v20232_v23 = vpop.eup %15477  ;;  %v3745_v18 = vadd.f32 %v23418_v21, %v23417_v6  ;;  %v23421_v51 = vpack.c.bf16 %v19382_v2, %v23420_v29  ;;  %v14992_v56 = vld [vmem:[%s22864_s1 + $0x38] sm:$0xff]   ;;  %15499 = vpow2.f32 %v12512_v58  ;;  %v14995_v54 = vld [vmem:[%s22865_s3 + $0xc] ss:$104 sps:$4 sm:$0xff]  }
 0x201   :  { %v20245_v49 = vpop.f32.mrb[88].mxu1  ;;  %v20247_v32 = vpop.eup %15479  ;;  %v12516_v45 = vmul.f32 -1.442695, %v3347_v13  ;;  %v23423_v52 = vpack.c.bf16 %v20002_v36, %v19950_v53  ;;  %v2611_v26 = vpack.c.bf16 %v20232_v23, %v20187_v17  ;;  %15501 = vpow2.f32 %v12517_v28  ;;  %v23427_v13 = vld [vmem:[#allocation115_spill] sm:$0xff]  ;;  %v23429_v23 = vld [vmem:[#allocation90_spill] sm:$0xff]  ;;  %6150 = vperm.xlu0 %14624, %v19859_v16   ;;  %14608 = vmatmul.mubr.msk.bf16.gmra.mrb[208].mxu1 %vm221_vm0, %v14992_v56  ;;  %v23466_v41 = vld [vmem:[#allocation140_spill] sm:$0xff] }
 0x202   :  { %13628 = vmatpush3.bf16.msra.mxu1 %v23416_v1  ;;  %13650 = vmatpush3.bf16.msra.mxu0 %v23419_v34  ;;  %23422 = vst [vmem:[#allocation41_spill] sm:$0xff] %v20245_v49  ;;  %v20255_v61 = vpop.f32.mrb[89].mxu1  ;;  %v15482_v2 = vpop.eup %15481  ;;  %v12521_v39 = vmul.f32 -1.442695, %v3368_v14  ;;  %v23425_v1 = vld [vmem:[#allocation113_spill] sm:$0xff]  ;;  %15503 = vpow2.f32 %v12515_v43  ;;  %v3748_v28 = vadd.f32 %v19450_v11, %v23427_v13  ;;  %v23428_v14 = vld [vmem:[#allocation18_spill] sm:$0xff]  ;;  %v23442_v56 = vpack.c.bf16 %v19613_v46, %v19489_v40 }
 0x203   :  { %13629 = vmatprep.subr.bf16.mxu1 %v23421_v51  ;;  %13651 = vmatprep.subr.bf16.mxu0 %v23423_v52  ;;  %23424 = vst [vmem:[#allocation104_spill] sm:$0xff] %v20255_v61  ;;  %v3371_v6 = vadd.f32 %v19441_v0, %v23425_v1  ;;  %v20260_v58 = vpop.permute.xlu1 %4463  ;;  %v20262_v53 = vpop.f32.mrb[90].mxu1  ;;  %v12519_v17 = vmul.f32 -1.442695, %v3360_v22  ;;  %v23430_v0 = vpack.c.bf16 %v23428_v14, %v23429_v23  ;;  %15505 = vpow2.f32 %v12518_v8  ;;  %v23432_v22 = vld [vmem:[#allocation122_spill] sm:$0xff]  ;;  %v23438_v23 = vld [vmem:[#allocation25_spill] sm:$0xff] }
 0x204   :  { %23426 = vst [vmem:[#allocation29_spill] sm:$0xff] %v20262_v53  ;;  %v20266_v36 = vpop.eup %15483  ;;  %v2610_v21 = vpack.c.bf16 %v15482_v2, %v15474_v25  ;;  %v20276_v34 = vpop.permute.xlu0 %4458  ;;  %v12545_v43 = vmul.f32 -1.442695, %v3745_v18  ;;  %v23433_v11 = vpack.c.bf16 %v19394_v33, %v23432_v22  ;;  %v23434_v52 = vpack.c.bf16 %v19598_v3, %v19464_v38  ;;  %6165 = vperm.xlu1 %14625, %v19910_v12   ;;  %v23467_v25 = vld [vmem:[#allocation46_spill] sm:$0xff]  ;;  %v23593_v53 = vld [vmem:[#allocation77_spill] sm:$0xff] }
 0x205   :  { %v20278_v29 = vpop.f32.mrb[91].mxu1  ;;  %v20280_v51 = vpop.eup %15485  ;;  %15507 = vpow2.f32 %v12516_v45  ;;  %v12522_v33 = vmul.f32 -1.442695, %v3371_v6  ;;  %v12546_v14 = vmul.f32 -1.442695, %v3748_v28  ;;  %v23439_v45 = vld [vmem:[#allocation20_spill] sm:$0xff]  ;;  %11729 = vmatprep.mubr.bf16.mxu1 %v14995_v54  ;;  %6160 = vperm.xlu0 %14624, %v19928_v50  }
 0x206   :  { %13630 = vmatpush3.bf16.msra.mxu1 %v23430_v0  ;;  %23431 = vst [vmem:[#allocation109_spill] sm:$0xff] %v20278_v29  ;;  %13652 = vmatpush3.bf16.msra.mxu0 %v23433_v11  ;;  %v20290_v2 = vpop.f32.mrb[92].mxu1  ;;  %v15488_v1 = vpop.eup %15487  ;;  %15509 = vpow2.f32 %v12521_v39  ;;  %v23440_v0 = vpack.c.bf16 %v23438_v23, %v23439_v45  ;;  %v23443_v39 = vpack.c.bf16 %v19497_v7, %v19447_v57  ;;  %v14993_v57 = vld [vmem:[%s22865_s3 + $0x8] ss:$104 sps:$4 sm:$0xff]  }
 0x207   :  { %13631 = vmatprep.subr.bf16.mxu1 %v23434_v52  ;;  %23435 = vst [vmem:[#allocation88_spill] sm:$0xff] %v20290_v2  ;;  %13653 = vmatprep.subr.bf16.mxu0 %v2610_v21  ;;  %v20293_v8 = vpop.f32.mrb[93].mxu1  ;;  %v15490_v18 = vpop.eup %15489  ;;  %15511 = vpow2.f32 %v12519_v17  ;;  %v23447_v52 = vld [vmem:[#allocation27_spill] sm:$0xff]  ;;  %v23451_v45 = vpack.c.bf16 %v19572_v55, %v19454_v19  ;;  %v23454_v55 = vld [vmem:[#allocation138_spill] sm:$0xff] }
 0x208   :  { %23436 = vst [vmem:[#allocation7_spill] sm:$0xff] %v20293_v8  ;;  %v20297_v38 = vpop.f32.mrb[94].mxu1  ;;  %v15492_v3 = vpop.eup %15491  ;;  %v3428_v13 = vadd.f32 1.0, %v15490_v18  ;;  %15513 = vpow2.f32 %v12545_v43  ;;  %6175 = vperm.xlu1 %14625, %v19960_v9   ;;  %v23583_v8 = vld [vmem:[#allocation8_spill] sm:$0xff] }
 0x209   :  { %23437 = vst [vmem:[#allocation30_spill] sm:$0xff] %v20297_v38  ;;  %v20302_v16 = vpop.f32.mrb[95].mxu1  ;;  %v15494_v21 = vpop.eup %15493  ;;  %v3471_v6 = vpack.c.bf16 %v15492_v3, %v20280_v51  ;;  %v14996_v3 = vld [vmem:[%s22865_s3 + $0x10] ss:$104 sps:$4 sm:$0xff]   ;;  %6170 = vperm.xlu0 %14624, %v19977_v20  }
 0x20a   :  { %13632 = vmatpush3.bf16.msra.mxu1 %v23440_v0  ;;  %23441 = vst [vmem:[#allocation19_spill] sm:$0xff] %v20302_v16  ;;  %13654 = vmatpush3.bf16.msra.mxu0 %v23442_v56  ;;  %v20311_v17 = vpop.permute.xlu1 %4473  ;;  %v20313_v28 = vpop.f32.mrb[96].mxu1  ;;  %15515 = vrcp.f32 %v3428_v13  ;;  %v3470_v54 = vpack.c.bf16 %v15494_v21, %v15488_v1  ;;  %v23448_v1 = vld [vmem:[#allocation96_spill] sm:$0xff]  ;;  %v23493_v16 = vld [vmem:[#allocation133_spill] sm:$0xff] }
 0x20b   :  { %13633 = vmatprep.subr.bf16.mxu1 %v23443_v39  ;;  %23444 = vst [vmem:[#allocation112_spill] sm:$0xff] %v20313_v28  ;;  %v15496_v22 = vpop.eup %15495  ;;  %13655 = vmatprep.subr.bf16.mxu0 %v2611_v26  ;;  %v20316_v43 = vpop.permute.xlu0 %4468  ;;  %15517 = vpow2.f32 %v12522_v33  ;;  %v23449_v18 = vpack.c.bf16 %v23447_v52, %v23448_v1  ;;  %v23452_v39 = vld [vmem:[#allocation110_spill] sm:$0xff] }
 0x20c   :  { %v20318_v40 = vpop.f32.mrb[97].mxu1  ;;  %v15498_v46 = vpop.eup %15497  ;;  %v3426_v11 = vadd.f32 1.0, %v15496_v22  ;;  %15519 = vpow2.f32 %v12546_v14  ;;  %v23453_v22 = vld [vmem:[#allocation128_spill] sm:$0xff]  ;;  %6185 = vperm.xlu1 %14625, %v20011_v63  }
 0x20d   :  { %23445 = vst [vmem:[#allocation106_spill] sm:$0xff] %v20318_v40  ;;  %v20324_v7 = vpop.f32.mrb[98].mxu1  ;;  %v15500_v51 = vpop.eup %15499  ;;  %v3429_v26 = vadd.f32 1.0, %v15498_v46  ;;  %v3363_v46 = vadd.f32 %v23453_v22, %v23452_v39  ;;  %6180 = vperm.xlu0 %14624, %v20040_v62   ;;  %v23461_v39 = vld [vmem:[#allocation121_spill] sm:$0xff] }
 0x20e   :  { %23446 = vst [vmem:[#allocation108_spill] sm:$0xff] %v20324_v7  ;;  %13634 = vmatpush3.bf16.msra.mxu1 %v23449_v18  ;;  %v20332_v33 = vpop.f32.mrb[99].mxu1  ;;  %v15502_v13 = vpop.eup %15501  ;;  %15521 = vrcp.f32 %v3426_v11  ;;  %v3427_v23 = vadd.f32 1.0, %v15500_v51  ;;  %13656 = vmatpush3.bf16.msra.mxu0 %v23451_v45  ;;  %v23458_v45 = vld [vmem:[#allocation118_spill] sm:$0xff]  ;;  %v23462_v22 = vld [vmem:[#allocation125_spill] sm:$0xff] }
 0x20f   :  { %23450 = vst [vmem:[#allocation101_spill] sm:$0xff] %v20332_v33  ;;  %13663 = vmatprep.subr.bf16.mxu1 %v3470_v54  ;;  %v15504_v0 = vpop.eup %15503  ;;  %15523 = vrcp.f32 %v3429_v26  ;;  %v3432_v14 = vadd.f32 1.0, %v15502_v13  ;;  %v20341_v11 = vpop.permute.xlu1 %4836  ;;  %v23455_v54 = vpack.c.bf16 %v19701_v35, %v23454_v55  ;;  %v15001_v13 = vld [vmem:[%s22865_s3 + $0x1c] ss:$104 sps:$4 sm:$0xff]  }
 0x210   :  { %v15506_v21 = vpop.eup %15505  ;;  %15525 = vrcp.f32 %v3427_v23  ;;  %v3430_v56 = vadd.f32 1.0, %v15504_v0  ;;  %v20346_v26 = vpop.permute.xlu0 %4831  ;;  %v23459_v35 = vld [vmem:[#allocation11_spill] sm:$0xff]  ;;  %6195 = vperm.xlu1 %14625, %v20053_v42   ;;  %v23478_v33 = vld [vmem:[#allocation130_spill] sm:$0xff] }
 0x211   :  { %11730 = vmatmul.mubr.bf16.vlgmr.msra.gmra.mrb[212].mxu1 %v14993_v57  ;;  %v15508_v51 = vpop.eup %15507  ;;  %15527 = vrcp.f32 %v3432_v14  ;;  %v3433_v19 = vadd.f32 1.0, %v15506_v21  ;;  %11771 = vmatmul.mubr.bf16.vlgmr.msra.gmra.mrb[208].mxu0 %v14996_v3  ;;  %v20348_v52 = vpop.f32.mrb[92].mxu0  ;;  %v3756_v0 = vadd.f32 %v23459_v35, %v23458_v45  ;;  %v23465_v45 = vld [vmem:[#allocation4_spill] sm:$0xff] }
 0x212   :  { %13664 = vmatpush3.bf16.msra.mxu1 %v23455_v54  ;;  %23456 = vst [vmem:[#allocation52_spill] sm:$0xff] %v20348_v52  ;;  %v15510_v1 = vpop.eup %15509  ;;  %15529 = vrcp.f32 %v3430_v56  ;;  %v3431_v18 = vadd.f32 1.0, %v15508_v51  ;;  %v20350_v57 = vpop.f32.mrb[93].mxu0  ;;  %v3753_v51 = vadd.f32 %v23462_v22, %v23461_v39  ;;  %11811 = vmatprep.mubr.bf16.mxu1 %v15001_v13  ;;  %v23470_v39 = vld [vmem:[#allocation134_spill] sm:$0xff] }
 0x213   :  { %13665 = vmatprep.subr.bf16.mxu1 %v3471_v6  ;;  %23457 = vst [vmem:[#allocation57_spill] sm:$0xff] %v20350_v57  ;;  %v15512_v23 = vpop.eup %15511  ;;  %15531 = vrcp.f32 %v3433_v19  ;;  %v3436_v3 = vadd.f32 1.0, %v15510_v1  ;;  %v20358_v14 = vpop.f32.mrb[94].mxu0  ;;  %v12520_v6 = vmul.f32 -1.442695, %v3363_v46  ;;  %v23464_v1 = vld [vmem:[#allocation124_spill] sm:$0xff]  ;;  %6190 = vperm.xlu0 %14624, %v20079_v5  }
 0x214   :  { %23460 = vst [vmem:[#allocation107_spill] sm:$0xff] %v20358_v14  ;;  %v15514_v21 = vpop.eup %15513  ;;  %15533 = vrcp.f32 %v3431_v18  ;;  %v3434_v56 = vadd.f32 1.0, %v15512_v23  ;;  %v20363_v55 = vpop.f32.mrb[95].mxu0  ;;  %v3761_v35 = vadd.f32 %v23465_v45, %v23464_v1  ;;  %v23468_v18 = vpack.c.bf16 %v23466_v41, %v23467_v25  ;;  %v23469_v23 = vld [vmem:[#allocation123_spill] sm:$0xff]  ;;  %v23473_v45 = vld [vmem:[#allocation66_spill] sm:$0xff]  ;;  %6205 = vperm.xlu1 %14625, %v20093_v15  }
 0x215   :  { %23463 = vst [vmem:[#allocation117_spill] sm:$0xff] %v20363_v55  ;;  %v20365_v19 = vpop.eup %15515  ;;  %15535 = vrcp.f32 %v3436_v3  ;;  %v3855_v54 = vadd.f32 1.0, %v15514_v21  ;;  %v3764_v22 = vadd.f32 %v23470_v39, %v23469_v23  ;;  %v20374_v52 = vpop.permute.xlu1 %4846  ;;  %v12548_v55 = vmul.f32 -1.442695, %v3756_v0  ;;  %v23471_v3 = vld [vmem:[#allocation127_spill] sm:$0xff] }
 0x216   :  { %13666 = vmatpush3.bf16.msra.mxu1 %v23468_v18  ;;  %v15518_v46 = vpop.eup %15517  ;;  %15537 = vrcp.f32 %v3434_v56  ;;  %v23472_v21 = vld [vmem:[#allocation3_spill] sm:$0xff]  ;;  %v20379_v1 = vpop.permute.xlu0 %4841  ;;  %v12547_v56 = vmul.f32 -1.442695, %v3753_v51  ;;  %v23474_v18 = vld [vmem:[#allocation129_spill] sm:$0xff] }
 0x217   :  { %v15520_v13 = vpop.eup %15519  ;;  %15539 = vrcp.f32 %v3855_v54  ;;  %v3437_v14 = vadd.f32 1.0, %v15518_v46  ;;  %v3772_v57 = vadd.f32 %v23472_v21, %v23471_v3  ;;  %v3769_v23 = vadd.f32 %v23474_v18, %v23473_v45  ;;  %v23475_v0 = vld [vmem:[#allocation131_spill] sm:$0xff]  ;;  %v20386_v3 = vpop.f32.mrb[96].mxu0  ;;  %v23482_v18 = vld [vmem:[#allocation74_spill] sm:$0xff]  ;;  %6200 = vperm.xlu0 %14624, %v20129_v47  }
 0x218   :  { %v15522_v41 = vpop.eup %15521  ;;  %v3856_v25 = vadd.f32 1.0, %v15520_v13  ;;  %15541 = vpow2.f32 %v12520_v6  ;;  %v12549_v54 = vmul.f32 -1.442695, %v3761_v35  ;;  %v23476_v46 = vld [vmem:[#allocation23_spill] sm:$0xff]  ;;  %23477 = vst [vmem:[#allocation59_spill] sm:$0xff] %v20386_v3  ;;  %v23479_v13 = vld [vmem:[#allocation94_spill] sm:$0xff] }
 0x219   :  { %v15524_v39 = vpop.eup %15523  ;;  %15543 = vrcp.f32 %v3437_v14  ;;  %v3777_v28 = vadd.f32 %v23476_v46, %v23475_v0  ;;  %v12550_v7 = vmul.f32 -1.442695, %v3764_v22  ;;  %v3780_v6 = vadd.f32 %v23479_v13, %v23478_v33  ;;  %v20391_v40 = vpop.f32.mrb[97].mxu0  ;;  %v23481_v35 = vld [vmem:[#allocation92_spill] sm:$0xff]  ;;  %v23489_v3 = vld [vmem:[#allocation139_spill] sm:$0xff] }
 0x21a   :  { %v15526_v21 = vpop.eup %15525  ;;  %15545 = vrcp.f32 %v3856_v25  ;;  %v3473_v51 = vpack.c.bf16 %v15524_v39, %v20365_v19  ;;  %23480 = vst [vmem:[#allocation53_spill] sm:$0xff] %v20391_v40  ;;  %v12552_v14 = vmul.f32 -1.442695, %v3772_v57  ;;  %v3788_v2 = vadd.f32 %v23482_v18, %v23481_v35  ;;  %v20398_v46 = vpop.permute.xlu1 %4856  ;;  %v23485_v19 = vld [vmem:[#allocation132_spill] sm:$0xff]  ;;  %v23486_v39 = vld [vmem:[#allocation62_spill] sm:$0xff] }
 0x21b   :  { %v20393_v45 = vpop.eup %15527  ;;  %15547 = vpow2.f32 %v12548_v55  ;;  %v3472_v0 = vpack.c.bf16 %v15526_v21, %v15522_v41  ;;  %23483 = vst [vmem:[#allocation12_spill] sm:$0xff] %v20398_v46  ;;  %v20400_v22 = vpop.f32.mrb[98].mxu0  ;;  %v12551_v33 = vmul.f32 -1.442695, %v3769_v23  ;;  %v3785_v13 = vadd.f32 %v23486_v39, %v23485_v19  ;;  %v16699_v57 = vld [vmem:[%s22862_s2 + $0x8] sm:$0xff]  ;;  %v23488_v23 = vld [vmem:[#allocation135_spill] sm:$0xff] }
 0x21c   :  { %23484 = vst [vmem:[#allocation82_spill] sm:$0xff] %v20400_v22  ;;  %v15530_v25 = vpop.eup %15529  ;;  %15549 = vpow2.f32 %v12547_v56  ;;  %6568 = vperm.xlu1 %14625, %v16699_v57   ;;  %v20407_v55 = vpop.permute.xlu0 %4851  ;;  %v12553_v35 = vmul.f32 -1.442695, %v3777_v28  ;;  %v12554_v56 = vmul.f32 -1.442695, %v3780_v6  ;;  %v3793_v22 = vadd.f32 %v23489_v3, %v23488_v23  ;;  %v23490_v19 = vld [vmem:[#allocation17_spill] sm:$0xff] }
 0x21d   :  { %v20409_v41 = vpop.f32.mrb[99].mxu0  ;;  %v15532_v21 = vpop.eup %15531  ;;  %15551 = vpow2.f32 %v12549_v54  ;;  %13667 = vmatprep.subr.bf16.mxu1 %v3472_v0  ;;  %v23491_v39 = vld [vmem:[#allocation47_spill] sm:$0xff]  ;;  %v23494_v54 = vld [vmem:[#allocation141_spill] sm:$0xff]  ;;  %v16701_v6 = vld [vmem:[%s22862_s2 + $0x18] sm:$0xff] }
 0x21e   :  { %23487 = vst [vmem:[#allocation105_spill] sm:$0xff] %v20409_v41  ;;  %v15534_v18 = vpop.eup %15533  ;;  %15553 = vpow2.f32 %v12550_v7  ;;  %v23492_v40 = vpack.c.bf16 %v23490_v19, %v23491_v39  ;;  %v3475_v57 = vpack.c.bf16 %v15532_v21, %v20393_v45  ;;  %v12556_v41 = vmul.f32 -1.442695, %v3788_v2  ;;  %v16700_v7 = vld [vmem:[%s22862_s2] sm:$0xff]  ;;  %v16702_v39 = vld [vmem:[%s22862_s2 + $0x10] sm:$0xff] }
 0x21f   :  { %v20417_v38 = vpop.eup %15535  ;;  %15555 = vpow2.f32 %v12552_v14  ;;  %v3796_v28 = vadd.f32 %v23494_v54, %v23493_v16  ;;  %v3474_v0 = vpack.c.bf16 %v15534_v18, %v15530_v25  ;;  %6563 = vperm.xlu0 %14624, %v16700_v7   ;;  %v20431_v16 = vpop.permute.xlu1 %4866  ;;  %v12557_v14 = vmul.f32 -1.442695, %v3793_v22  ;;  %v23497_v25 = vld [vmem:[#allocation84_spill] sm:$0xff]  ;;  %v23498_v21 = vld [vmem:[#allocation35_spill] sm:$0xff] }
 0x220   :  { %13668 = vmatpush3.bf16.msra.mxu1 %v23492_v40  ;;  %v20424_v3 = vpop.eup %15537  ;;  %15557 = vpow2.f32 %v12551_v33  ;;  %v12555_v40 = vmul.f32 -1.442695, %v3785_v13  ;;  %6578 = vperm.xlu1 %14625, %v16701_v6   ;;  %23495 = vst [vmem:[#allocation5_spill] sm:$0xff] %v20431_v16  ;;  %v23499_v18 = vpack.c.bf16 %v23497_v25, %v23498_v21  ;;  %v20438_v33 = vpop.permute.xlu0 %4861 }
 0x221   :  { %13669 = vmatprep.subr.bf16.mxu1 %v3473_v51  ;;  %v20429_v2 = vpop.eup %15539  ;;  %15559 = vpow2.f32 %v12553_v35  ;;  %v20433_v51 = vpop.f32.mrb[100].mxu0  ;;  %23500 = vst [vmem:[#allocation103_spill] sm:$0xff] %v20438_v33  ;;  %v12558_v35 = vmul.f32 -1.442695, %v3796_v28  ;;  %v23510_v28 = vld [vmem:[#allocation83_spill] sm:$0xff] }
 0x222   :  { %23496 = vst [vmem:[#allocation55_spill] sm:$0xff] %v20433_v51  ;;  %v15542_v45 = vpop.eup %15541  ;;  %15561 = vpow2.f32 %v12554_v56  ;;  %v20440_v13 = vpop.f32.mrb[101].mxu0  ;;  %v23511_v54 = vpack.c.bf16 %v20024_v44, %v23510_v28  ;;  %v23520_v51 = vld [vmem:[#allocation61_spill] sm:$0xff] }
 0x223   :  { %23501 = vst [vmem:[#allocation28_spill] sm:$0xff] %v20440_v13  ;;  %v20442_v23 = vpop.eup %15543  ;;  %v3435_v19 = vadd.f32 1.0, %v15542_v45  ;;  %15563 = vpow2.f32 %v12556_v41  ;;  %6573 = vperm.xlu0 %14624, %v16702_v39   ;;  %v20447_v22 = vpop.f32.mrb[102].mxu0 }
 0x224   :  { %13670 = vmatpush3.bf16.msra.mxu1 %v23499_v18  ;;  %23502 = vst [vmem:[#allocation120_spill] sm:$0xff] %v20447_v22  ;;  %v20449_v56 = vpop.eup %15545  ;;  %15565 = vpow2.f32 %v12555_v40  ;;  %6588 = vperm.xlu1 %14625, %v19854_v31   ;;  %v20454_v7 = vpop.f32.mrb[103].mxu0  ;;  %v23505_v40 = vpack.c.bf16 %v20151_v4, %v19994_v30  ;;  %v16703_v18 = vld [vmem:[%s22862_s2 + $0x20] sm:$0xff] }
 0x225   :  { %13671 = vmatprep.subr.bf16.mxu1 %v3474_v0  ;;  %23503 = vst [vmem:[#allocation114_spill] sm:$0xff] %v20454_v7  ;;  %v15548_v41 = vpop.eup %15547  ;;  %15567 = vrcp.f32 %v3435_v19  ;;  %v20458_v0 = vpop.permute.xlu1 %4876 }
 0x226   :  { %23504 = vst [vmem:[#allocation111_spill] sm:$0xff] %v20458_v0  ;;  %v15550_v6 = vpop.eup %15549  ;;  %v3858_v45 = vadd.f32 1.0, %v15548_v41  ;;  %15569 = vpow2.f32 %v12557_v14  ;;  %v20463_v31 = vpop.permute.xlu0 %4871 }
 0x227   :  { %23506 = vst [vmem:[#allocation126_spill] sm:$0xff] %v20463_v31  ;;  %v15552_v25 = vpop.eup %15551  ;;  %v3857_v21 = vadd.f32 1.0, %v15550_v6  ;;  %15571 = vpow2.f32 %v12558_v35  ;;  %6583 = vperm.xlu0 %14624, %v16703_v18   ;;  %v20469_v4 = vpop.f32.mrb[104].mxu0  ;;  %v23508_v35 = vld [vmem:[#allocation72_spill] sm:$0xff] }
 0x228   :  { %13672 = vmatpush3.bf16.msra.mxu1 %v23505_v40  ;;  %v15554_v19 = vpop.eup %15553  ;;  %15573 = vrcp.f32 %v3858_v45  ;;  %v3859_v39 = vadd.f32 1.0, %v15552_v25  ;;  %6598 = vperm.xlu1 %14625, %v19910_v12   ;;  %23507 = vst [vmem:[#allocation21_spill] sm:$0xff] %v20469_v4  ;;  %v20478_v45 = vpop.f32.mrb[105].mxu0 }
 0x229   :  { %13673 = vmatprep.subr.bf16.mxu1 %v3475_v57  ;;  %v15556_v14 = vpop.eup %15555  ;;  %15575 = vrcp.f32 %v3857_v21  ;;  %v3860_v30 = vadd.f32 1.0, %v15554_v19  ;;  %v23509_v57 = vld [vmem:[#allocation16_spill] sm:$0xff]  ;;  %v20476_v18 = vpop.permute.xlu1 %4886  ;;  %23513 = vst [vmem:[#allocation116_spill] sm:$0xff] %v20478_v45  ;;  %v23519_v45 = vld [vmem:[#allocation9_spill] sm:$0xff] }
 0x22a   :  { %v15558_v41 = vpop.eup %15557  ;;  %15577 = vrcp.f32 %v3859_v39  ;;  %v3862_v6 = vadd.f32 1.0, %v15556_v14  ;;  %v3804_v40 = vadd.f32 %v23509_v57, %v23508_v35  ;;  %23512 = vst [vmem:[#allocation91_spill] sm:$0xff] %v20476_v18  ;;  %v20481_v21 = vpop.permute.xlu0 %4881  ;;  %v23517_v35 = vld [vmem:[#allocation67_spill] sm:$0xff] }
 0x22b   :  { %v15560_v12 = vpop.eup %15559  ;;  %15579 = vrcp.f32 %v3860_v30  ;;  %v3861_v25 = vadd.f32 1.0, %v15558_v41  ;;  %6593 = vperm.xlu0 %14624, %v19928_v50   ;;  %23514 = vst [vmem:[#allocation68_spill] sm:$0xff] %v20481_v21  ;;  %v20483_v19 = vpop.f32.mrb[106].mxu0  ;;  %v23518_v57 = vld [vmem:[#allocation71_spill] sm:$0xff]  ;;  %v23573_v21 = vld [vmem:[#allocation54_spill] sm:$0xff] }
 0x22c   :  { %13674 = vmatpush3.bf16.msra.mxu1 %v23511_v54  ;;  %23515 = vst [vmem:[#allocation119_spill] sm:$0xff] %v20483_v19  ;;  %v15562_v39 = vpop.eup %15561  ;;  %15581 = vrcp.f32 %v3862_v6  ;;  %v3863_v14 = vadd.f32 1.0, %v15560_v12  ;;  %6608 = vperm.xlu1 %14625, %v19960_v9   ;;  %v20486_v44 = vpop.f32.mrb[107].mxu0  ;;  %v3801_v30 = vadd.f32 %v23518_v57, %v23517_v35  ;;  %v12560_v4 = vmul.f32 -1.442695, %v3804_v40  ;;  %v23522_v12 = vld [vmem:[#allocation73_spill] sm:$0xff] }
 0x22d   :  { %23516 = vst [vmem:[#allocation113_spill] sm:$0xff] %v20486_v44  ;;  %v15564_v54 = vpop.eup %15563  ;;  %15583 = vrcp.f32 %v3861_v25  ;;  %v3864_v28 = vadd.f32 1.0, %v15562_v39  ;;  %v4178_v19 = vadd.f32 %v23520_v51, %v23519_v45  ;;  %v20492_v22 = vpop.permute.xlu1 %4896  ;;  %v23523_v44 = vld [vmem:[#allocation81_spill] sm:$0xff] }
 0x22e   :  { %v15566_v41 = vpop.eup %15565  ;;  %15585 = vrcp.f32 %v3863_v14  ;;  %v3866_v50 = vadd.f32 1.0, %v15564_v54  ;;  %23521 = vst [vmem:[#allocation115_spill] sm:$0xff] %v20492_v22  ;;  %v4181_v7 = vadd.f32 %v23523_v44, %v23522_v12  ;;  %v20497_v25 = vpop.permute.xlu0 %4891  ;;  %v23525_v14 = vld [vmem:[#allocation136_spill] sm:$0xff]  ;;  %v23526_v54 = vld [vmem:[#allocation15_spill] sm:$0xff]  ;;  %v23527_v57 = vld [vmem:[#allocation137_spill] sm:$0xff] }
 0x22f   :  { %v15568_v6 = vpop.eup %15567  ;;  %15587 = vrcp.f32 %v3864_v28  ;;  %v3865_v9 = vadd.f32 1.0, %v15566_v41  ;;  %6603 = vperm.xlu0 %14624, %v19977_v20   ;;  %23524 = vst [vmem:[#allocation18_spill] sm:$0xff] %v20497_v25  ;;  %v4189_v40 = vadd.f32 %v23526_v54, %v23525_v14  ;;  %v12559_v28 = vmul.f32 -1.442695, %v3801_v30  ;;  %v23528_v41 = vld [vmem:[#allocation78_spill] sm:$0xff]  ;;  %v20505_v12 = vpop.f32.mrb[100].mxu1 }
 0x230   :  { %v15570_v39 = vpop.eup %15569  ;;  %15589 = vrcp.f32 %v3866_v50  ;;  %v3476_v35 = vpack.c.bf16 %v15568_v6, %v20424_v3  ;;  %6618 = vperm.xlu1 %14625, %v20011_v63   ;;  %v4186_v44 = vadd.f32 %v23528_v41, %v23527_v57  ;;  %23529 = vst [vmem:[#allocation90_spill] sm:$0xff] %v20505_v12  ;;  %v12583_v50 = vmul.f32 -1.442695, %v4178_v19  ;;  %v23530_v22 = vld [vmem:[#allocation13_spill] sm:$0xff]  ;;  %v23531_v14 = vld [vmem:[#allocation44_spill] sm:$0xff]  ;;  %v20511_v3 = vpop.f32.mrb[101].mxu1 }
 0x231   :  { %v15572_v51 = vpop.eup %15571  ;;  %15591 = vrcp.f32 %v3865_v9  ;;  %v3867_v45 = vadd.f32 1.0, %v15570_v39  ;;  %v4194_v54 = vadd.f32 %v23531_v14, %v23530_v22  ;;  %23532 = vst [vmem:[#allocation122_spill] sm:$0xff] %v20511_v3  ;;  %v12584_v30 = vmul.f32 -1.442695, %v4181_v7  ;;  %v23533_v6 = vld [vmem:[#allocation142_spill] sm:$0xff]  ;;  %v23543_v14 = vld [vmem:[#allocation48_spill] sm:$0xff] }
 0x232   :  { %v20507_v20 = vpop.eup %15573  ;;  %v3868_v13 = vadd.f32 1.0, %v15572_v51  ;;  %15593 = vpow2.f32 %v12560_v4  ;;  %13675 = vmatprep.subr.bf16.mxu1 %v3476_v35  ;;  %v23534_v9 = vld [vmem:[#allocation14_spill] sm:$0xff]  ;;  %v23535_v57 = vpack.c.bf16 %v20266_v36, %v20222_v48  ;;  %v20521_v4 = vpop.f32.mrb[102].mxu1  ;;  %v12586_v22 = vmul.f32 -1.442695, %v4189_v40  ;;  %v23537_v35 = vld [vmem:[#allocation39_spill] sm:$0xff] }
 0x233   :  { %v20513_v63 = vpop.eup %15575  ;;  %15595 = vrcp.f32 %v3867_v45  ;;  %v4197_v39 = vadd.f32 %v23534_v9, %v23533_v6  ;;  %6613 = vperm.xlu0 %14624, %v20040_v62   ;;  %23536 = vst [vmem:[#allocation25_spill] sm:$0xff] %v20521_v4  ;;  %v23538_v51 = vld [vmem:[#allocation98_spill] sm:$0xff]  ;;  %v23539_v45 = vpack.c.bf16 %v20442_v23, %v20417_v38  ;;  %v20533_v48 = vpop.permute.xlu1 %4906  ;;  %v23542_v40 = vld [vmem:[#allocation64_spill] sm:$0xff]  ;;  %v12587_v38 = vmul.f32 -1.442695, %v4194_v54  ;;  %v23545_v23 = vld [vmem:[#allocation33_spill] sm:$0xff] }
 0x234   :  { %13676 = vmatpush3.bf16.msra.mxu1 %v23535_v57  ;;  %v20523_v19 = vpop.eup %15577  ;;  %15597 = vrcp.f32 %v3868_v13  ;;  %v4205_v41 = vadd.f32 %v23538_v51, %v23537_v35  ;;  %6628 = vperm.xlu1 %14625, %v20053_v42   ;;  %23540 = vst [vmem:[#allocation20_spill] sm:$0xff] %v20533_v48  ;;  %v20535_v62 = vpop.f32.mrb[103].mxu1  ;;  %v12585_v13 = vmul.f32 -1.442695, %v4186_v44  ;;  %v4202_v6 = vadd.f32 %v23543_v14, %v23542_v40  ;;  %v23546_v35 = vld [vmem:[#allocation75_spill] sm:$0xff]  ;;  %v23548_v14 = vld [vmem:[#allocation37_spill] sm:$0xff] }
 0x235   :  { %13677 = vmatprep.subr.bf16.mxu1 %v23539_v45  ;;  %23541 = vst [vmem:[#allocation27_spill] sm:$0xff] %v20535_v62  ;;  %v20537_v36 = vpop.eup %15579  ;;  %15599 = vpow2.f32 %v12559_v28  ;;  %v20541_v9 = vpop.permute.xlu0 %4901  ;;  %v4210_v42 = vadd.f32 %v23546_v35, %v23545_v23  ;;  %v14999_v28 = vld [vmem:[%s22865_s3 + $0x18] ss:$104 sps:$4 sm:$0xff]   ;;  %v12588_v45 = vmul.f32 -1.442695, %v4197_v39  ;;  %v23547_v40 = vpack.c.bf16 %v20247_v32, %v20204_v59  ;;  %v23549_v23 = vld [vmem:[#allocation60_spill] sm:$0xff] }
 0x236   :  { %23544 = vst [vmem:[#allocation96_spill] sm:$0xff] %v20541_v9  ;;  %v20543_v57 = vpop.eup %15581  ;;  %15601 = vpow2.f32 %v12583_v50  ;;  %v12590_v54 = vmul.f32 -1.442695, %v4205_v41  ;;  %v4213_v35 = vadd.f32 %v23549_v23, %v23548_v14  ;;  %v12589_v59 = vmul.f32 -1.442695, %v4202_v6  ;;  %v23551_v32 = vld [vmem:[#allocation87_spill] sm:$0xff] }
 0x237   :  { %v20552_v44 = vpop.eup %15583  ;;  %15603 = vpow2.f32 %v12584_v30  ;;  %6623 = vperm.xlu0 %14624, %v20079_v5   ;;  %v20565_v30 = vpop.permute.xlu1 %5269  ;;  %v23552_v5 = vld [vmem:[#allocation40_spill] sm:$0xff]  ;;  %v23572_v25 = vld [vmem:[#allocation45_spill] sm:$0xff] }
 0x238   :  { %13678 = vmatpush3.bf16.msra.mxu1 %v23547_v40  ;;  %v20558_v50 = vpop.eup %15585  ;;  %15605 = vpow2.f32 %v12586_v22  ;;  %6638 = vperm.xlu1 %14625, %v20093_v15   ;;  %23550 = vst [vmem:[#allocation110_spill] sm:$0xff] %v20565_v30  ;;  %v4221_v40 = vadd.f32 %v23552_v5, %v23551_v32  ;;  %v20576_v22 = vld [vmem:[%s22862_s2 + $0x8] sm:$0xff]  ;;  %v20578_v41 = vpop.f32.mrb[104].mxu1  ;;  %v12591_v15 = vmul.f32 -1.442695, %v4210_v42  ;;  %v20597_v42 = vld [vmem:[%s22862_s2] sm:$0xff] }
 0x239   :  { %v20567_v39 = vpop.eup %15587  ;;  %15607 = vpow2.f32 %v12585_v13  ;;  %v20571_v7 = vpop.permute.xlu0 %5264  ;;  %23554 = vst [vmem:[#allocation138_spill] sm:$0xff] %v20578_v41  ;;  %v12592_v51 = vmul.f32 -1.442695, %v4213_v35  ;;  %v23566_v30 = vld [vmem:[#allocation95_spill] sm:$0xff] }
 0x23a   :  { %23553 = vst [vmem:[#allocation128_spill] sm:$0xff] %v20571_v7  ;;  %v20580_v14 = vpop.eup %15589  ;;  %15609 = vpow2.f32 %v12587_v38  ;;  %v20584_v6 = vpop.f32.mrb[105].mxu1  ;;  %v12594_v13 = vmul.f32 -1.442695, %v4221_v40  ;;  %v23570_v7 = vld [vmem:[#allocation93_spill] sm:$0xff] }
 0x23b   :  { %11812 = vmatmul.mubr.bf16.vlgmr.msra.gmra.mrb[216].mxu1 %v14999_v28  ;;  %23555 = vst [vmem:[#allocation118_spill] sm:$0xff] %v20584_v6  ;;  %v20586_v23 = vpop.eup %15591  ;;  %15611 = vpow2.f32 %v12588_v45  ;;  %6633 = vperm.xlu0 %14624, %v20129_v47   ;;  %v20589_v32 = vpop.f32.mrb[106].mxu1 }
 0x23c   :  { %23556 = vst [vmem:[#allocation11_spill] sm:$0xff] %v20589_v32  ;;  %v15594_v5 = vpop.eup %15593  ;;  %15613 = vpow2.f32 %v12590_v54  ;;  %7001 = vperm.xlu1 %14625, %v20576_v22   ;;  %v20599_v28 = vpop.f32.mrb[107].mxu1  ;;  %v20608_v54 = vld [vmem:[%s22862_s2 + $0x18] sm:$0xff] }
 0x23d   :  { %23557 = vst [vmem:[#allocation121_spill] sm:$0xff] %v20599_v28  ;;  %v20601_v45 = vpop.eup %15595  ;;  %v3870_v47 = vadd.f32 1.0, %v15594_v5  ;;  %15615 = vpow2.f32 %v12589_v59  ;;  %v20603_v41 = vpop.permute.xlu1 %5279  ;;  %v20621_v5 = vld [vmem:[%s22862_s2 + $0x10] sm:$0xff] }
 0x23e   :  { %23558 = vst [vmem:[#allocation125_spill] sm:$0xff] %v20603_v41  ;;  %v20610_v35 = vpop.eup %15597  ;;  %15617 = vpow2.f32 %v12591_v15  ;;  %v20612_v38 = vpop.permute.xlu0 %5274 }
 0x23f   :  { %23559 = vst [vmem:[#allocation124_spill] sm:$0xff] %v20612_v38  ;;  %v15600_v32 = vpop.eup %15599  ;;  %15619 = vrcp.f32 %v3870_v47  ;;  %6996 = vperm.xlu0 %14624, %v20597_v42   ;;  %v20626_v47 = vld [vmem:[%s22862_s2 + $0x28] sm:$0xff]  ;;  %v20628_v28 = vpop.f32.mrb[108].mxu1 }
 0x240   :  { %v15602_v59 = vpop.eup %15601  ;;  %v3869_v40 = vadd.f32 1.0, %v15600_v32  ;;  %15621 = vpow2.f32 %v12592_v51  ;;  %7011 = vperm.xlu1 %14625, %v20608_v54   ;;  %23560 = vst [vmem:[#allocation4_spill] sm:$0xff] %v20628_v28  ;;  %v20632_v4 = vpop.f32.mrb[109].mxu1  ;;  %v23565_v28 = vld [vmem:[#allocation85_spill] sm:$0xff] }
 0x241   :  { %v15604_v15 = vpop.eup %15603  ;;  %v4288_v6 = vadd.f32 1.0, %v15602_v59  ;;  %15623 = vpow2.f32 %v12594_v13  ;;  %v20630_v32 = vpop.permute.xlu1 %5289  ;;  %23562 = vst [vmem:[#allocation46_spill] sm:$0xff] %v20632_v4 }
 0x242   :  { %v15606_v12 = vpop.eup %15605  ;;  %15625 = vrcp.f32 %v3869_v40  ;;  %v4289_v51 = vadd.f32 1.0, %v15604_v15  ;;  %23561 = vst [vmem:[#allocation140_spill] sm:$0xff] %v20630_v32  ;;  %v20635_v13 = vpop.permute.xlu0 %5284  ;;  %v4218_v40 = vadd.f32 %v23566_v30, %v23565_v28  ;;  %v20645_v15 = vld [vmem:[%s22862_s2 + $0x20] sm:$0xff] }
 0x243   :  { %v15608_v62 = vpop.eup %15607  ;;  %15627 = vrcp.f32 %v4288_v6  ;;  %v4291_v3 = vadd.f32 1.0, %v15606_v12  ;;  %7006 = vperm.xlu0 %14624, %v20621_v5   ;;  %23563 = vst [vmem:[#allocation123_spill] sm:$0xff] %v20635_v13  ;;  %v20637_v59 = vpop.f32.mrb[110].mxu1  ;;  %v23569_v13 = vld [vmem:[#allocation70_spill] sm:$0xff] }
 0x244   :  { %23564 = vst [vmem:[#allocation134_spill] sm:$0xff] %v20637_v59  ;;  %v15610_v38 = vpop.eup %15609  ;;  %15629 = vrcp.f32 %v4289_v51  ;;  %v4290_v41 = vadd.f32 1.0, %v15608_v62  ;;  %7021 = vperm.xlu1 %14625, %v20626_v47   ;;  %v20647_v12 = vpop.f32.mrb[111].mxu1  ;;  %v20652_v51 = vld [vmem:[%s22862_s2 + $0x38] sm:$0xff]  ;;  %v4226_v9 = vadd.f32 %v23570_v7, %v23569_v13  ;;  %v12593_v48 = vmul.f32 -1.442695, %v4218_v40 }
 0x245   :  { %23567 = vst [vmem:[#allocation127_spill] sm:$0xff] %v20647_v12  ;;  %v15612_v6 = vpop.eup %15611  ;;  %15631 = vrcp.f32 %v4291_v3  ;;  %v4292_v4 = vadd.f32 1.0, %v15610_v38  ;;  %v20654_v28 = vpop.permute.xlu1 %5299  ;;  %v23575_v13 = vld [vmem:[#allocation43_spill] sm:$0xff]  ;;  %v23578_v40 = vld [vmem:[#allocation6_spill] sm:$0xff] }
 0x246   :  { %v15614_v62 = vpop.eup %15613  ;;  %15633 = vrcp.f32 %v4290_v41  ;;  %v4293_v30 = vadd.f32 1.0, %v15612_v6  ;;  %23568 = vst [vmem:[#allocation3_spill] sm:$0xff] %v20654_v28  ;;  %v20659_v3 = vpop.permute.xlu0 %5294  ;;  %v4229_v41 = vadd.f32 %v23573_v21, %v23572_v25 }
 0x247   :  { %v15616_v59 = vpop.eup %15615  ;;  %15635 = vrcp.f32 %v4292_v4  ;;  %v4295_v32 = vadd.f32 1.0, %v15614_v62  ;;  %7016 = vperm.xlu0 %14624, %v20645_v15   ;;  %23571 = vst [vmem:[#allocation66_spill] sm:$0xff] %v20659_v3  ;;  %v20667_v4 = vld [vmem:[%s22862_s2 + $0x30] sm:$0xff]  ;;  %v20678_v21 = vpop.f32.mrb[112].mxu1 }
 0x248   :  { %v15618_v38 = vpop.eup %15617  ;;  %15637 = vrcp.f32 %v4293_v30  ;;  %v4294_v12 = vadd.f32 1.0, %v15616_v59  ;;  %7031 = vperm.xlu1 %14625, %v20652_v51   ;;  %v23576_v62 = vld [vmem:[#allocation89_spill] sm:$0xff]  ;;  %v20676_v59 = vld [vmem:[%s22862_s2 + $0x48] sm:$0xff]  ;;  %23577 = vst [vmem:[#allocation131_spill] sm:$0xff] %v20678_v21  ;;  %v23579_v30 = vld [vmem:[#allocation31_spill] sm:$0xff]  ;;  %v20684_v0 = vpop.f32.mrb[113].mxu1 }
 0x249   :  { %v20669_v6 = vpop.eup %15619  ;;  %15639 = vrcp.f32 %v4295_v32  ;;  %v4296_v7 = vadd.f32 1.0, %v15618_v38  ;;  %v4237_v3 = vadd.f32 %v23576_v62, %v23575_v13  ;;  %v4234_v28 = vadd.f32 %v23579_v30, %v23578_v40  ;;  %v20682_v18 = vpop.permute.xlu1 %5309  ;;  %23581 = vst [vmem:[#allocation130_spill] sm:$0xff] %v20684_v0  ;;  %v23582_v62 = vld [vmem:[#allocation97_spill] sm:$0xff]  ;;  %v23588_v0 = vld [vmem:[#allocation26_spill] sm:$0xff] }
 0x24a   :  { %23574 = vst [vmem:[#allocation129_spill] sm:$0xff] %v20669_v6  ;;  %v15622_v25 = vpop.eup %15621  ;;  %15641 = vrcp.f32 %v4294_v12  ;;  %23580 = vst [vmem:[#allocation23_spill] sm:$0xff] %v20682_v18  ;;  %v12595_v13 = vmul.f32 -1.442695, %v4226_v9  ;;  %v4611_v31 = vadd.f32 %v23583_v8, %v23582_v62  ;;  %v20689_v49 = vpop.permute.xlu0 %5304  ;;  %v12596_v30 = vmul.f32 -1.442695, %v4229_v41 }
 0x24b   :  { %v15624_v32 = vpop.eup %15623  ;;  %15643 = vrcp.f32 %v4296_v7  ;;  %v4297_v38 = vadd.f32 1.0, %v15622_v25  ;;  %7026 = vperm.xlu0 %14624, %v20667_v4   ;;  %23584 = vst [vmem:[#allocation94_spill] sm:$0xff] %v20689_v49  ;;  %v20691_v21 = vpop.f32.mrb[114].mxu1  ;;  %v23587_v18 = vld [vmem:[#allocation56_spill] sm:$0xff]  ;;  %v20701_v8 = vld [vmem:[%s22862_s2 + $0x40] sm:$0xff]  ;;  %v23590_v62 = vld [vmem:[#allocation58_spill] sm:$0xff] }
 0x24c   :  { %23585 = vst [vmem:[#allocation92_spill] sm:$0xff] %v20691_v21  ;;  %v20693_v12 = vpop.eup %15625  ;;  %v4299_v40 = vadd.f32 1.0, %v15624_v32  ;;  %15645 = vpow2.f32 %v12593_v48  ;;  %v4614_v33 = vadd.f32 %v23588_v0, %v23587_v18  ;;  %7041 = vperm.xlu1 %14625, %v20676_v59   ;;  %v20703_v9 = vpop.f32.mrb[115].mxu1  ;;  %v12598_v25 = vmul.f32 -1.442695, %v4237_v3  ;;  %v23591_v21 = vld [vmem:[#allocation99_spill] sm:$0xff] }
 0x24d   :  { %23586 = vst [vmem:[#allocation74_spill] sm:$0xff] %v20693_v12  ;;  %23589 = vst [vmem:[#allocation132_spill] sm:$0xff] %v20703_v9  ;;  %v15628_v7 = vpop.eup %15627  ;;  %15647 = vrcp.f32 %v4297_v38  ;;  %v4622_v32 = vadd.f32 %v23591_v21, %v23590_v62  ;;  %v20712_v0 = vld [vmem:[%s22862_s2 + $0x58] sm:$0xff]  ;;  %v12597_v41 = vmul.f32 -1.442695, %v4234_v28  ;;  %v23592_v49 = vld [vmem:[#allocation24_spill] sm:$0xff]  ;;  %v20716_v16 = vpop.permute.xlu1 %5319 }
 0x24e   :  { %v15630_v18 = vpop.eup %15629  ;;  %15649 = vrcp.f32 %v4299_v40  ;;  %v4619_v9 = vadd.f32 %v23593_v53, %v23592_v49  ;;  %23594 = vst [vmem:[#allocation62_spill] sm:$0xff] %v20716_v16  ;;  %v12621_v38 = vmul.f32 -1.442695, %v4611_v31  ;;  %v23595_v21 = vld [vmem:[#allocation42_spill] sm:$0xff]  ;;  %v23596_v62 = vld [vmem:[#allocation76_spill] sm:$0xff]  ;;  %v20721_v46 = vpop.permute.xlu0 %5314  ;;  %v23598_v28 = vld [vmem:[#allocation79_spill] sm:$0xff] }
 0x24f   :  { %v15632_v3 = vpop.eup %15631  ;;  %15651 = vpow2.f32 %v12595_v13  ;;  %v4627_v29 = vadd.f32 %v23596_v62, %v23595_v21  ;;  %v4336_v48 = vpack.c.bf16 %v15630_v18, %v15628_v7  ;;  %7036 = vperm.xlu0 %14624, %v20701_v8   ;;  %23597 = vst [vmem:[#allocation135_spill] sm:$0xff] %v20721_v46  ;;  %v12622_v40 = vmul.f32 -1.442695, %v4614_v33  ;;  %v23599_v6 = vld [vmem:[#allocation22_spill] sm:$0xff]  ;;  %v20729_v49 = vld [vmem:[%s22862_s2 + $0x50] sm:$0xff]  ;;  %v20736_v33 = vpop.f32.mrb[108].mxu0 }
 0x250   :  { %v15634_v12 = vpop.eup %15633  ;;  %15653 = vpow2.f32 %v12596_v30  ;;  %v4630_v61 = vadd.f32 %v23599_v6, %v23598_v28  ;;  %7051 = vperm.xlu1 %14625, %v20712_v0   ;;  %v12624_v31 = vmul.f32 -1.442695, %v4622_v32  ;;  %v20734_v30 = vld [vmem:[%s22862_s2 + $0x68] sm:$0xff]  ;;  %23600 = vst [vmem:[#allocation139_spill] sm:$0xff] %v20736_v33  ;;  %v12623_v18 = vmul.f32 -1.442695, %v4619_v9 }
 0x251   :  { %v15636_v53 = vpop.eup %15635  ;;  %15655 = vpow2.f32 %v12598_v25  ;;  %13685 = vmatprep.subr.bf16.mxu0 %v4336_v48  ;;  %v4337_v13 = vpack.c.bf16 %v15632_v3, %v15634_v12  ;;  %v15004_v6 = vld [vmem:[%s22865_s3 + $0x24] ss:$104 sps:$4 sm:$0xff]   ;;  %v23602_v62 = vld [vmem:[#allocation102_spill] sm:$0xff]  ;;  %v23603_v12 = vpack.c.bf16 %v20449_v56, %v20429_v2  ;;  %v20746_v32 = vpop.permute.xlu1 %5329  ;;  %v12625_v28 = vmul.f32 -1.442695, %v4627_v29 }
 0x252   :  { %v15638_v7 = vpop.eup %15637  ;;  %15657 = vpow2.f32 %v12597_v41  ;;  %v23601_v21 = vld [vmem:[#allocation32_spill] sm:$0xff]  ;;  %v20748_v48 = vpop.f32.mrb[109].mxu0  ;;  %v23605_v33 = vld [vmem:[#allocation38_spill] sm:$0xff]  ;;  %v12626_v56 = vmul.f32 -1.442695, %v4630_v61  ;;  %v20761_v29 = vld [vmem:[%s22862_s2 + $0x60] sm:$0xff]  ;;  %11852 = vmatprep.mubr.bf16.mxu0 %v15004_v6 }
 0x253   :  { %v4638_v25 = vadd.f32 %v23602_v62, %v23601_v21  ;;  %13686 = vmatpush3.bf16.msra.mxu0 %v23603_v12  ;;  %23604 = vst [vmem:[#allocation17_spill] sm:$0xff] %v20748_v48  ;;  %v15640_v3 = vpop.eup %15639  ;;  %15659 = vpow2.f32 %v12621_v38  ;;  %v23606_v46 = vld [vmem:[#allocation36_spill] sm:$0xff]  ;;  %v4338_v41 = vpack.c.bf16 %v15638_v7, %v15636_v53  ;;  %7046 = vperm.xlu0 %14624, %v20729_v49   ;;  %v20753_v9 = vpop.permute.xlu0 %5324 }
 0x254   :  { %v4635_v16 = vadd.f32 %v23606_v46, %v23605_v33  ;;  %13687 = vmatprep.subr.bf16.mxu0 %v4337_v13  ;;  %v20755_v21 = vpop.f32.mrb[110].mxu0  ;;  %v15642_v2 = vpop.eup %15641  ;;  %15661 = vpow2.f32 %v12622_v40  ;;  %7061 = vperm.xlu1 %14625, %v20734_v30   ;;  %v20768_v13 = vld [vmem:[%s22862_s2 + $0x78] sm:$0xff]  ;;  %v23609_v33 = vpack.c.bf16 %v20507_v20, %v20513_v63  ;;  %v20784_v20 = vld [vmem:[%s22862_s2 + $0x70] sm:$0xff] }
 0x255   :  { %23607 = vst [vmem:[#allocation47_spill] sm:$0xff] %v20755_v21  ;;  %v20763_v46 = vpop.f32.mrb[111].mxu0  ;;  %v15644_v38 = vpop.eup %15643  ;;  %15663 = vpow2.f32 %v12624_v31  ;;  %v4339_v53 = vpack.c.bf16 %v15640_v3, %v15642_v2  ;;  %v12628_v61 = vmul.f32 -1.442695, %v4638_v25 }
 0x256   :  { %23608 = vst [vmem:[#allocation133_spill] sm:$0xff] %v20763_v46  ;;  %v15646_v40 = vpop.eup %15645  ;;  %15665 = vpow2.f32 %v12623_v18  ;;  %v20773_v7 = vpop.permute.xlu1 %5339  ;;  %v12627_v12 = vmul.f32 -1.442695, %v4635_v16 }
 0x257   :  { %13688 = vmatpush3.bf16.msra.mxu0 %v23609_v33  ;;  %v15648_v6 = vpop.eup %15647  ;;  %v4298_v62 = vadd.f32 1.0, %v15646_v40  ;;  %15667 = vpow2.f32 %v12625_v28  ;;  %7056 = vperm.xlu0 %14624, %v20761_v29   ;;  %v20776_v31 = vpop.permute.xlu0 %5334 }
 0x258   :  { %13689 = vmatprep.subr.bf16.mxu0 %v4338_v41  ;;  %v20778_v3 = vpop.eup %15649  ;;  %15669 = vpow2.f32 %v12626_v56  ;;  %v4340_v18 = vpack.c.bf16 %v15648_v6, %v15644_v38  ;;  %7071 = vperm.xlu1 %14625, %v20768_v13   ;;  %v20786_v25 = vpop.f32.mrb[112].mxu0  ;;  %v23611_v41 = vpack.c.bf16 %v20537_v36, %v20523_v19 }
 0x259   :  { %v15652_v63 = vpop.eup %15651  ;;  %15671 = vrcp.f32 %v4298_v62  ;;  %23610 = vst [vmem:[#allocation141_spill] sm:$0xff] %v20786_v25  ;;  %v20793_v56 = vpop.f32.mrb[113].mxu0  ;;  %v23616_v25 = vpack.c.bf16 %v20543_v57, %v20552_v44  ;;  %v23617_v57 = vld [vmem:[#allocation49_spill] sm:$0xff]  ;;  %v23618_v44 = vld [vmem:[#allocation50_spill] sm:$0xff] }
 0x25a   :  { %v15654_v16 = vpop.eup %15653  ;;  %v4300_v28 = vadd.f32 1.0, %v15652_v63  ;;  %15673 = vpow2.f32 %v12628_v61  ;;  %v20791_v2 = vpop.permute.xlu1 %5702  ;;  %23612 = vst [vmem:[#allocation84_spill] sm:$0xff] %v20793_v56 }
 0x25b   :  { %13690 = vmatpush3.bf16.msra.mxu0 %v23611_v41  ;;  %v15656_v38 = vpop.eup %15655  ;;  %v4301_v40 = vadd.f32 1.0, %v15654_v16  ;;  %15675 = vpow2.f32 %v12627_v12  ;;  %7066 = vperm.xlu0 %14624, %v20784_v20   ;;  %v20796_v33 = vpop.permute.xlu0 %5697 }
 0x25c   :  { %13691 = vmatprep.subr.bf16.mxu0 %v4339_v53  ;;  %v20798_v6 = vpop.f32.mrb[114].mxu0  ;;  %v15658_v62 = vpop.eup %15657  ;;  %15677 = vrcp.f32 %v4300_v28  ;;  %v4303_v61 = vadd.f32 1.0, %v15656_v38  ;;  %7434 = vperm.xlu1 %14625, %v20576_v22   ;;  %v23615_v53 = vld [vmem:[#allocation69_spill] sm:$0xff] }
 0x25d   :  { %23613 = vst [vmem:[#allocation35_spill] sm:$0xff] %v20798_v6  ;;  %v20801_v19 = vpop.f32.mrb[115].mxu0  ;;  %v15660_v36 = vpop.eup %15659  ;;  %15679 = vrcp.f32 %v4301_v40  ;;  %v4302_v63 = vadd.f32 1.0, %v15658_v62  ;;  %v4643_v16 = vadd.f32 %v23615_v53, %v20159_v27 }
 0x25e   :  { %23614 = vst [vmem:[#allocation72_spill] sm:$0xff] %v20801_v19  ;;  %v15662_v41 = vpop.eup %15661  ;;  %15681 = vrcp.f32 %v4303_v61  ;;  %v4721_v12 = vadd.f32 1.0, %v15660_v36  ;;  %v20808_v6 = vpop.permute.xlu1 %5712  ;;  %v23620_v19 = vld [vmem:[#allocation63_spill] sm:$0xff] }
 0x25f   :  { %13692 = vmatpush3.bf16.msra.mxu0 %v23616_v25  ;;  %v15664_v28 = vpop.eup %15663  ;;  %15683 = vrcp.f32 %v4302_v63  ;;  %v4722_v38 = vadd.f32 1.0, %v15662_v41  ;;  %7429 = vperm.xlu0 %14624, %v20597_v42   ;;  %v20811_v40 = vpop.permute.xlu0 %5707  ;;  %v4646_v25 = vadd.f32 %v23618_v44, %v23617_v57  ;;  %v12629_v41 = vmul.f32 -1.442695, %v4643_v16  ;;  %v23623_v57 = vld [vmem:[#allocation34_spill] sm:$0xff] }
 0x260   :  { %13693 = vmatprep.subr.bf16.mxu0 %v4340_v18  ;;  %v15666_v62 = vpop.eup %15665  ;;  %15685 = vrcp.f32 %v4721_v12  ;;  %v4724_v61 = vadd.f32 1.0, %v15664_v28  ;;  %7444 = vperm.xlu1 %14625, %v20608_v54   ;;  %v20816_v53 = vpop.f32.mrb[116].mxu0  ;;  %v4654_v56 = vadd.f32 %v23620_v19, %v20200_v24  ;;  %v23621_v12 = vpack.c.bf16 %v20567_v39, %v20558_v50 }
 0x261   :  { %v15668_v27 = vpop.eup %15667  ;;  %15687 = vrcp.f32 %v4722_v38  ;;  %v4723_v36 = vadd.f32 1.0, %v15666_v62  ;;  %23619 = vst [vmem:[#allocation16_spill] sm:$0xff] %v20816_v53  ;;  %v20823_v28 = vpop.f32.mrb[117].mxu0  ;;  %v4651_v44 = vadd.f32 %v23623_v57, %v20212_v37  ;;  %v4659_v24 = vadd.f32 %v20183_v60, %v20276_v34  ;;  %v23627_v60 = vld [vmem:[#allocation10_spill] sm:$0xff] }
 0x262   :  { %v15670_v63 = vpop.eup %15669  ;;  %15689 = vrcp.f32 %v4724_v61  ;;  %v4725_v18 = vadd.f32 1.0, %v15668_v27  ;;  %23622 = vst [vmem:[#allocation83_spill] sm:$0xff] %v20823_v28  ;;  %v20828_v61 = vpop.permute.xlu1 %5722  ;;  %v12632_v28 = vmul.f32 -1.442695, %v4654_v56  ;;  %v4670_v34 = vadd.f32 %v23627_v60, %v20311_v17  ;;  %v23630_v17 = vld [vmem:[#allocation65_spill] sm:$0xff] }
 0x263   :  { %13694 = vmatpush3.bf16.msra.mxu0 %v23621_v12  ;;  %v15672_v38 = vpop.eup %15671  ;;  %15691 = vrcp.f32 %v4723_v36  ;;  %v4726_v62 = vadd.f32 1.0, %v15670_v63  ;;  %7439 = vperm.xlu0 %14624, %v20621_v5   ;;  %v20830_v16 = vpop.permute.xlu0 %5717  ;;  %v12630_v36 = vmul.f32 -1.442695, %v4646_v25  ;;  %v23625_v63 = vld [vmem:[#allocation86_spill] sm:$0xff]  ;;  %v23629_v25 = vpack.c.bf16 %v20580_v14, %v20586_v23 }
 0x264   :  { %v15674_v27 = vpop.eup %15673  ;;  %15693 = vrcp.f32 %v4725_v18  ;;  %v4341_v50 = vpack.c.bf16 %v20778_v3, %v15672_v38  ;;  %7454 = vperm.xlu1 %14625, %v20626_v47   ;;  %v20836_v39 = vpop.f32.mrb[118].mxu0  ;;  %v4662_v12 = vadd.f32 %v23625_v63, %v20260_v58  ;;  %v12631_v38 = vmul.f32 -1.442695, %v4651_v44 }
 0x265   :  { %23624 = vst [vmem:[#allocation67_spill] sm:$0xff] %v20836_v39  ;;  %v15676_v19 = vpop.eup %15675  ;;  %15695 = vrcp.f32 %v4726_v62  ;;  %v4728_v37 = vadd.f32 1.0, %v15674_v27  ;;  %v20840_v57 = vpop.f32.mrb[119].mxu0  ;;  %v23628_v62 = vld [vmem:[#allocation51_spill] sm:$0xff]  ;;  %v12633_v56 = vmul.f32 -1.442695, %v4659_v24  ;;  %v5047_v14 = vadd.f32 %v20230_v10, %v20341_v11 }
 0x266   :  { %23626 = vst [vmem:[#allocation71_spill] sm:$0xff] %v20840_v57  ;;  %v15678_v53 = vpop.eup %15677  ;;  %v4727_v18 = vadd.f32 1.0, %v15676_v19  ;;  %15697 = vpow2.f32 %v12629_v41  ;;  %13695 = vmatprep.subr.bf16.mxu0 %v4341_v50  ;;  %v4667_v27 = vadd.f32 %v23628_v62, %v20316_v43  ;;  %v20850_v58 = vpop.permute.xlu1 %5732  ;;  %v5044_v50 = vadd.f32 %v23630_v17, %v20346_v26  ;;  %v23654_v39 = vld [vmem:[#allocation29_spill] sm:$0xff] }
 0x267   :  { %v15680_v3 = vpop.eup %15679  ;;  %15699 = vrcp.f32 %v4728_v37  ;;  %13696 = vmatpush3.bf16.msra.mxu0 %v23629_v25  ;;  %7449 = vperm.xlu0 %14624, %v20645_v15   ;;  %v20854_v37 = vpop.permute.xlu0 %5727  ;;  %v12634_v44 = vmul.f32 -1.442695, %v4662_v12  ;;  %v12636_v24 = vmul.f32 -1.442695, %v4670_v34  ;;  %v23634_v10 = vpack.c.bf16 %v20610_v35, %v20601_v45  ;;  %v23636_v34 = vld [vmem:[#allocation80_spill] sm:$0xff]  ;;  %v23658_v57 = vld [vmem:[#allocation41_spill] sm:$0xff] }
 0x268   :  { %v15682_v41 = vpop.eup %15681  ;;  %15701 = vrcp.f32 %v4727_v18  ;;  %v4342_v19 = vpack.c.bf16 %v15680_v3, %v15678_v53  ;;  %7464 = vperm.xlu1 %14625, %v20652_v51   ;;  %v20859_v23 = vpop.f32.mrb[120].mxu0  ;;  %v23632_v18 = vld [vmem:[#allocation100_spill] sm:$0xff]  ;;  %v5052_v62 = vadd.f32 %v23636_v34, %v20379_v1  ;;  %v12660_v25 = vmul.f32 -1.442695, %v5047_v14 }
 0x269   :  { %v15684_v43 = vpop.eup %15683  ;;  %15703 = vpow2.f32 %v12630_v36  ;;  %23631 = vst [vmem:[#allocation9_spill] sm:$0xff] %v20859_v23  ;;  %v5055_v26 = vadd.f32 %v23632_v18, %v20374_v52  ;;  %v20865_v60 = vpop.f32.mrb[121].mxu0  ;;  %v12635_v36 = vmul.f32 -1.442695, %v4667_v27  ;;  %v12659_v52 = vmul.f32 -1.442695, %v5044_v50 }
 0x26a   :  { %v20861_v63 = vpop.eup %15685  ;;  %15705 = vpow2.f32 %v12632_v28  ;;  %13697 = vmatprep.subr.bf16.mxu0 %v4342_v19  ;;  %v4343_v53 = vpack.c.bf16 %v15682_v41, %v15684_v43  ;;  %23633 = vst [vmem:[#allocation61_spill] sm:$0xff] %v20865_v60  ;;  %v20873_v11 = vpop.permute.xlu1 %5742  ;;  %v23638_v41 = vld [vmem:[#allocation104_spill] sm:$0xff]  ;;  %v23639_v18 = vld [vmem:[#allocation129_spill] sm:$0xff] }
 0x26b   :  { %v20867_v3 = vpop.eup %15687  ;;  %15707 = vpow2.f32 %v12631_v38  ;;  %13698 = vmatpush3.bf16.msra.mxu0 %v23634_v10  ;;  %7459 = vperm.xlu0 %14624, %v20667_v4   ;;  %v20875_v28 = vpop.f32.mrb[122].mxu0  ;;  %v12662_v1 = vmul.f32 -1.442695, %v5055_v26  ;;  %v15002_v19 = vld [vmem:[%s22865_s3 + $0x20] ss:$104 sps:$4 sm:$0xff]  }
 0x26c   :  { %23635 = vst [vmem:[#allocation73_spill] sm:$0xff] %v20875_v28  ;;  %v20877_v12 = vpop.eup %15689  ;;  %15709 = vpow2.f32 %v12633_v56  ;;  %13699 = vmatprep.subr.bf16.mxu0 %v4343_v53  ;;  %v20883_v27 = vpop.permute.xlu0 %5737  ;;  %7474 = vperm.xlu1 %14625, %v20676_v59   ;;  %v5060_v56 = vadd.f32 %v23638_v41, %v20407_v55  ;;  %v12661_v26 = vmul.f32 -1.442695, %v5052_v62  ;;  %v23648_v23 = vld [vmem:[#allocation12_spill] sm:$0xff] }
 0x26d   :  { %v20886_v45 = vpop.f32.mrb[123].mxu0  ;;  %v20888_v35 = vpop.eup %15691  ;;  %15711 = vpow2.f32 %v12634_v44  ;;  %v23640_v44 = vld [vmem:[#allocation74_spill] sm:$0xff] }
 0x26e   :  { %23637 = vst [vmem:[#allocation81_spill] sm:$0xff] %v20886_v45  ;;  %v20892_v17 = vpop.eup %15693  ;;  %15713 = vpow2.f32 %v12636_v24  ;;  %v23641_v14 = vpack.c.bf16 %v23639_v18, %v23640_v44  ;;  %v20905_v55 = vpop.permute.xlu1 %5752 }
 0x26f   :  { %v20899_v43 = vpop.eup %15695  ;;  %15715 = vpow2.f32 %v12635_v36  ;;  %7469 = vperm.xlu0 %14624, %v20701_v8   ;;  %v12663_v36 = vmul.f32 -1.442695, %v5060_v56  ;;  %v20912_v41 = vpop.f32.mrb[116].mxu1 }
 0x270   :  { %13700 = vmatpush3.bf16.msra.mxu0 %v23641_v14  ;;  %v15698_v24 = vpop.eup %15697  ;;  %15717 = vpow2.f32 %v12659_v52  ;;  %7484 = vperm.xlu1 %14625, %v20712_v0   ;;  %23642 = vst [vmem:[#allocation136_spill] sm:$0xff] %v20912_v41  ;;  %v20916_v44 = vpop.permute.xlu0 %5747 }
 0x271   :  { %v20910_v10 = vpop.eup %15699  ;;  %v4729_v34 = vadd.f32 1.0, %v15698_v24  ;;  %15719 = vpow2.f32 %v12660_v25  ;;  %v20918_v52 = vpop.f32.mrb[117].mxu1 }
 0x272   :  { %v20914_v18 = vpop.eup %15701  ;;  %15721 = vpow2.f32 %v12662_v1  ;;  %23643 = vst [vmem:[#allocation15_spill] sm:$0xff] %v20918_v52  ;;  %v20923_v24 = vpop.permute.xlu1 %5762 }
 0x273   :  { %11853 = vmatmul.mubr.bf16.vlgmr.msra.gmra.mrb[212].mxu0 %v15002_v19  ;;  %v15704_v62 = vpop.eup %15703  ;;  %15723 = vrcp.f32 %v4729_v34  ;;  %7479 = vperm.xlu0 %14624, %v20729_v49   ;;  %23644 = vst [vmem:[#allocation137_spill] sm:$0xff] %v20923_v24  ;;  %v20925_v25 = vpop.f32.mrb[118].mxu1 }
 0x274   :  { %23645 = vst [vmem:[#allocation78_spill] sm:$0xff] %v20925_v25  ;;  %v15706_v56 = vpop.eup %15705  ;;  %v4730_v53 = vadd.f32 1.0, %v15704_v62  ;;  %15725 = vpow2.f32 %v12661_v26  ;;  %7494 = vperm.xlu1 %14625, %v20734_v30   ;;  %v20928_v1 = vpop.f32.mrb[119].mxu1 }
 0x275   :  { %23646 = vst [vmem:[#allocation13_spill] sm:$0xff] %v20928_v1  ;;  %v15708_v19 = vpop.eup %15707  ;;  %v4732_v50 = vadd.f32 1.0, %v15706_v56  ;;  %15727 = vpow2.f32 %v12663_v36  ;;  %v20930_v14 = vpop.permute.xlu0 %5757  ;;  %v23649_v1 = vld [vmem:[#allocation109_spill] sm:$0xff] }
 0x276   :  { %v15710_v34 = vpop.eup %15709  ;;  %15729 = vrcp.f32 %v4730_v53  ;;  %v4731_v38 = vadd.f32 1.0, %v15708_v19  ;;  %v20933_v25 = vpop.permute.xlu1 %5772  ;;  %v5063_v28 = vadd.f32 %v23649_v1, %v23648_v23 }
 0x277   :  { %v15712_v41 = vpop.eup %15711  ;;  %15731 = vrcp.f32 %v4732_v50  ;;  %v4733_v52 = vadd.f32 1.0, %v15710_v34  ;;  %7489 = vperm.xlu0 %14624, %v20761_v29   ;;  %23647 = vst [vmem:[#allocation44_spill] sm:$0xff] %v20933_v25  ;;  %v20938_v56 = vpop.f32.mrb[120].mxu1 }
 0x278   :  { %v15714_v26 = vpop.eup %15713  ;;  %15733 = vrcp.f32 %v4731_v38  ;;  %v4734_v62 = vadd.f32 1.0, %v15712_v41  ;;  %7504 = vperm.xlu1 %14625, %v20768_v13   ;;  %23650 = vst [vmem:[#allocation142_spill] sm:$0xff] %v20938_v56  ;;  %v20942_v45 = vpop.f32.mrb[121].mxu1  ;;  %v23653_v41 = vld [vmem:[#allocation5_spill] sm:$0xff]  ;;  %v23657_v56 = vld [vmem:[#allocation103_spill] sm:$0xff] }
 0x279   :  { %v15716_v36 = vpop.eup %15715  ;;  %15735 = vrcp.f32 %v4733_v52  ;;  %v4736_v53 = vadd.f32 1.0, %v15714_v26  ;;  %v20940_v34 = vpop.permute.xlu0 %5767  ;;  %23652 = vst [vmem:[#allocation39_spill] sm:$0xff] %v20942_v45  ;;  %v5071_v23 = vadd.f32 %v23654_v39, %v23653_v41  ;;  %v5068_v21 = vadd.f32 %v23658_v57, %v23657_v56  ;;  %v23660_v41 = vld [vmem:[#allocation126_spill] sm:$0xff]  ;;  %v23661_v45 = vld [vmem:[#allocation7_spill] sm:$0xff] }
 0x27a   :  { %v15718_v19 = vpop.eup %15717  ;;  %15737 = vrcp.f32 %v4734_v62  ;;  %v4735_v50 = vadd.f32 1.0, %v15716_v36  ;;  %23651 = vst [vmem:[#allocation14_spill] sm:$0xff] %v20940_v34  ;;  %v20947_v1 = vpop.permute.xlu1 %6135  ;;  %v12664_v36 = vmul.f32 -1.442695, %v5063_v28  ;;  %v5076_v46 = vadd.f32 %v23661_v45, %v23660_v41  ;;  %v23665_v56 = vld [vmem:[#allocation91_spill] sm:$0xff]  ;;  %v23668_v41 = vld [vmem:[#allocation68_spill] sm:$0xff] }
 0x27b   :  { %v15720_v60 = vpop.eup %15719  ;;  %15739 = vrcp.f32 %v4736_v53  ;;  %v5154_v38 = vadd.f32 1.0, %v15718_v19  ;;  %7499 = vperm.xlu0 %14624, %v20784_v20   ;;  %23655 = vst [vmem:[#allocation98_spill] sm:$0xff] %v20947_v1  ;;  %v20949_v52 = vpop.f32.mrb[122].mxu1 }
 0x27c   :  { %23656 = vst [vmem:[#allocation64_spill] sm:$0xff] %v20949_v52  ;;  %v15722_v26 = vpop.eup %15721  ;;  %15741 = vrcp.f32 %v4735_v50  ;;  %v5155_v62 = vadd.f32 1.0, %v15720_v60  ;;  %7867 = vperm.xlu1 %14625, %v20576_v22   ;;  %v20954_v53 = vpop.f32.mrb[123].mxu1  ;;  %v23662_v52 = vld [vmem:[#allocation111_spill] sm:$0xff]  ;;  %v12666_v22 = vmul.f32 -1.442695, %v5071_v23 }
 0x27d   :  { %23659 = vst [vmem:[#allocation48_spill] sm:$0xff] %v20954_v53  ;;  %v20956_v19 = vpop.eup %15723  ;;  %15743 = vrcp.f32 %v5154_v38  ;;  %v5157_v39 = vadd.f32 1.0, %v15722_v26  ;;  %v23663_v50 = vld [vmem:[#allocation19_spill] sm:$0xff]  ;;  %v20962_v28 = vpop.permute.xlu0 %6130  ;;  %v23666_v53 = vld [vmem:[#allocation30_spill] sm:$0xff]  ;;  %v12667_v23 = vmul.f32 -1.442695, %v5076_v46 }
 0x27e   :  { %v15726_v1 = vpop.eup %15725  ;;  %15745 = vrcp.f32 %v5155_v62  ;;  %v5079_v60 = vadd.f32 %v23663_v50, %v23662_v52  ;;  %23664 = vst [vmem:[#allocation33_spill] sm:$0xff] %v20962_v28  ;;  %v5087_v34 = vadd.f32 %v23666_v53, %v23665_v56  ;;  %v20967_v38 = vpop.permute.xlu1 %6145  ;;  %v12665_v62 = vmul.f32 -1.442695, %v5068_v21  ;;  %v23669_v52 = vld [vmem:[#allocation88_spill] sm:$0xff]  ;;  %v23671_v53 = vld [vmem:[#allocation106_spill] sm:$0xff] }
 0x27f   :  { %v15728_v48 = vpop.eup %15727  ;;  %15747 = vrcp.f32 %v5157_v39  ;;  %v5156_v57 = vadd.f32 1.0, %v15726_v1  ;;  %7862 = vperm.xlu0 %14624, %v20597_v42   ;;  %23667 = vst [vmem:[#allocation75_spill] sm:$0xff] %v20967_v38  ;;  %v5084_v50 = vadd.f32 %v23669_v52, %v23668_v41  ;;  %v23670_v1 = vld [vmem:[#allocation18_spill] sm:$0xff]  ;;  %v20980_v38 = vpop.f32.mrb[124].mxu1  ;;  %v23674_v41 = vld [vmem:[#allocation101_spill] sm:$0xff] }
 0x280   :  { %v20969_v26 = vpop.eup %15729  ;;  %v5158_v45 = vadd.f32 1.0, %v15728_v48  ;;  %15749 = vpow2.f32 %v12664_v36  ;;  %7877 = vperm.xlu1 %14625, %v20608_v54   ;;  %v5092_v56 = vadd.f32 %v23671_v53, %v23670_v1  ;;  %23672 = vst [vmem:[#allocation37_spill] sm:$0xff] %v20980_v38  ;;  %v12668_v21 = vmul.f32 -1.442695, %v5079_v60  ;;  %v23673_v36 = vld [vmem:[#allocation115_spill] sm:$0xff]  ;;  %v20988_v28 = vpop.f32.mrb[125].mxu1 }
 0x281   :  { %v20974_v39 = vpop.eup %15731  ;;  %15751 = vrcp.f32 %v5156_v57  ;;  %v5095_v52 = vadd.f32 %v23674_v41, %v23673_v36  ;;  %v20986_v54 = vpop.permute.xlu0 %6140  ;;  %23676 = vst [vmem:[#allocation87_spill] sm:$0xff] %v20988_v28  ;;  %v12670_v57 = vmul.f32 -1.442695, %v5087_v34  ;;  %v23677_v1 = vld [vmem:[#allocation20_spill] sm:$0xff]  ;;  %v12669_v41 = vmul.f32 -1.442695, %v5084_v50 }
 0x282   :  { %v20982_v48 = vpop.eup %15733  ;;  %15753 = vrcp.f32 %v5158_v45  ;;  %23675 = vst [vmem:[#allocation60_spill] sm:$0xff] %v20986_v54  ;;  %v23678_v53 = vld [vmem:[#allocation108_spill] sm:$0xff]  ;;  %v20997_v60 = vpop.permute.xlu1 %6155  ;;  %v23685_v50 = vld [vmem:[#allocation57_spill] sm:$0xff] }
 0x283   :  { %v20990_v46 = vpop.eup %15735  ;;  %15755 = vpow2.f32 %v12666_v22  ;;  %v5103_v42 = vadd.f32 %v23678_v53, %v23677_v1  ;;  %7872 = vperm.xlu0 %14624, %v20621_v5   ;;  %23679 = vst [vmem:[#allocation40_spill] sm:$0xff] %v20997_v60  ;;  %v20999_v45 = vpop.f32.mrb[126].mxu1  ;;  %v23681_v28 = vld [vmem:[#allocation96_spill] sm:$0xff]  ;;  %v12671_v53 = vmul.f32 -1.442695, %v5092_v56 }
 0x284   :  { %23680 = vst [vmem:[#allocation85_spill] sm:$0xff] %v20999_v45  ;;  %v21001_v36 = vpop.eup %15737  ;;  %15757 = vpow2.f32 %v12665_v62  ;;  %v23682_v54 = vld [vmem:[#allocation112_spill] sm:$0xff]  ;;  %7887 = vperm.xlu1 %14625, %v20626_v47   ;;  %v21006_v34 = vpop.f32.mrb[127].mxu1  ;;  %v12672_v45 = vmul.f32 -1.442695, %v5095_v52 }
 0x285   :  { %v5100_v22 = vadd.f32 %v23682_v54, %v23681_v28  ;;  %23683 = vst [vmem:[#allocation95_spill] sm:$0xff] %v21006_v34  ;;  %v21008_v1 = vpop.eup %15739  ;;  %15759 = vpow2.f32 %v12667_v23  ;;  %v23684_v62 = vld [vmem:[#allocation128_spill] sm:$0xff]  ;;  %v21016_v25 = vpop.permute.xlu0 %6150  ;;  %v12674_v47 = vmul.f32 -1.442695, %v5103_v42  ;;  %v23686_v54 = vld [vmem:[#allocation110_spill] sm:$0xff]  ;;  %v23687_v34 = vld [vmem:[#allocation117_spill] sm:$0xff] }
 0x286   :  { %v21012_v38 = vpop.eup %15741  ;;  %15761 = vpow2.f32 %v12668_v21  ;;  %v5477_v60 = vadd.f32 %v23685_v50, %v23684_v62  ;;  %v5480_v24 = vadd.f32 %v23687_v34, %v23686_v54  ;;  %v21023_v56 = vpop.permute.xlu1 %6165 }
 0x287   :  { %v15744_v28 = vpop.eup %15743  ;;  %15763 = vpow2.f32 %v12670_v57  ;;  %7882 = vperm.xlu0 %14624, %v20645_v15   ;;  %v12673_v52 = vmul.f32 -1.442695, %v5100_v22  ;;  %v21026_v57 = vpop.f32.mrb[128].mxu1 }
 0x288   :  { %v15746_v21 = vpop.eup %15745  ;;  %15765 = vpow2.f32 %v12669_v41  ;;  %7897 = vperm.xlu1 %14625, %v20652_v51   ;;  %23688 = vst [vmem:[#allocation70_spill] sm:$0xff] %v21026_v57  ;;  %v12697_v34 = vmul.f32 -1.442695, %v5477_v60  ;;  %v21030_v23 = vpop.f32.mrb[129].mxu1  ;;  %v12698_v41 = vmul.f32 -1.442695, %v5480_v24  ;;  %v23691_v60 = vpack.c.bf16 %v20867_v3, %v20861_v63 }
 0x289   :  { %v15748_v62 = vpop.eup %15747  ;;  %15767 = vpow2.f32 %v12671_v53  ;;  %v5202_v50 = vpack.c.bf16 %v15746_v21, %v15744_v28  ;;  %v21028_v54 = vpop.permute.xlu0 %6160  ;;  %23689 = vst [vmem:[#allocation93_spill] sm:$0xff] %v21030_v23 }
 0x28a   :  { %v15750_v42 = vpop.eup %15749  ;;  %15769 = vpow2.f32 %v12672_v45  ;;  %v21033_v51 = vpop.permute.xlu1 %6175 }
 0x28b   :  { %v15752_v15 = vpop.eup %15751  ;;  %v5159_v5 = vadd.f32 1.0, %v15750_v42  ;;  %15771 = vpow2.f32 %v12674_v47  ;;  %13707 = vmatprep.subr.bf16.mxu1 %v5202_v50  ;;  %7892 = vperm.xlu0 %14624, %v20667_v4   ;;  %v21035_v22 = vpop.f32.mrb[130].mxu1 }
 0x28c   :  { %23690 = vst [vmem:[#allocation45_spill] sm:$0xff] %v21035_v22  ;;  %v21037_v53 = vpop.eup %15753  ;;  %15773 = vpow2.f32 %v12673_v52  ;;  %13708 = vmatpush3.bf16.msra.mxu1 %v23691_v60  ;;  %v5203_v45 = vpack.c.bf16 %v15748_v62, %v15752_v15  ;;  %7907 = vperm.xlu1 %14625, %v20676_v59   ;;  %v21043_v28 = vpop.f32.mrb[131].mxu1  ;;  %v23693_v52 = vpack.c.bf16 %v20877_v12, %v20888_v35  ;;  %v23695_v60 = vld [vmem:[#allocation125_spill] sm:$0xff] }
 0x28d   :  { %23692 = vst [vmem:[#allocation54_spill] sm:$0xff] %v21043_v28  ;;  %v15756_v47 = vpop.eup %15755  ;;  %15775 = vrcp.f32 %v5159_v5  ;;  %v21045_v21 = vpop.permute.xlu0 %6170 }
 0x28e   :  { %v15758_v24 = vpop.eup %15757  ;;  %v5161_v4 = vadd.f32 1.0, %v15756_v47  ;;  %15777 = vpow2.f32 %v12697_v34  ;;  %13709 = vmatprep.subr.bf16.mxu1 %v5203_v45  ;;  %v21048_v63 = vpop.permute.xlu1 %6185  ;;  %v23696_v45 = vld [vmem:[#allocation107_spill] sm:$0xff] }
 0x28f   :  { %v15760_v50 = vpop.eup %15759  ;;  %v5160_v42 = vadd.f32 1.0, %v15758_v24  ;;  %15779 = vpow2.f32 %v12698_v41  ;;  %7902 = vperm.xlu0 %14624, %v20701_v8   ;;  %v21054_v34 = vpop.f32.mrb[124].mxu0  ;;  %v15007_v8 = vld [vmem:[%s22865_s3 + $0x2c] ss:$104 sps:$4 sm:$0xff]   ;;  %v5488_v47 = vadd.f32 %v23696_v45, %v23695_v60 }
 0x290   :  { %v15762_v3 = vpop.eup %15761  ;;  %15781 = vrcp.f32 %v5161_v4  ;;  %v5162_v59 = vadd.f32 1.0, %v15760_v50  ;;  %13710 = vmatpush3.bf16.msra.mxu1 %v23693_v52  ;;  %7917 = vperm.xlu1 %14625, %v20712_v0   ;;  %23694 = vst [vmem:[#allocation43_spill] sm:$0xff] %v21054_v34  ;;  %v21063_v12 = vpop.f32.mrb[125].mxu0  ;;  %v23700_v60 = vld [vmem:[#allocation124_spill] sm:$0xff] }
 0x291   :  { %v15764_v5 = vpop.eup %15763  ;;  %15783 = vrcp.f32 %v5160_v42  ;;  %v5163_v62 = vadd.f32 1.0, %v15762_v3  ;;  %v21061_v24 = vpop.permute.xlu0 %6180  ;;  %23697 = vst [vmem:[#allocation89_spill] sm:$0xff] %v21063_v12  ;;  %11893 = vmatprep.mubr.bf16.mxu1 %v15007_v8  ;;  %v12700_v34 = vmul.f32 -1.442695, %v5488_v47  ;;  %v23702_v12 = vld [vmem:[#allocation123_spill] sm:$0xff] }
 0x292   :  { %v15766_v15 = vpop.eup %15765  ;;  %15785 = vrcp.f32 %v5162_v59  ;;  %v5165_v41 = vadd.f32 1.0, %v15764_v5  ;;  %v21066_v4 = vpop.permute.xlu1 %6195  ;;  %v23706_v47 = vld [vmem:[#allocation3_spill] sm:$0xff] }
 0x293   :  { %v15768_v0 = vpop.eup %15767  ;;  %15787 = vrcp.f32 %v5163_v62  ;;  %v5164_v35 = vadd.f32 1.0, %v15766_v15  ;;  %7912 = vperm.xlu0 %14624, %v20729_v49   ;;  %v21068_v50 = vpop.f32.mrb[126].mxu0  ;;  %v23701_v62 = vld [vmem:[#allocation52_spill] sm:$0xff] }
 0x294   :  { %23698 = vst [vmem:[#allocation6_spill] sm:$0xff] %v21068_v50  ;;  %v15770_v42 = vpop.eup %15769  ;;  %15789 = vrcp.f32 %v5165_v41  ;;  %v5166_v3 = vadd.f32 1.0, %v15768_v0  ;;  %7927 = vperm.xlu1 %14625, %v20734_v30   ;;  %v21071_v59 = vpop.f32.mrb[127].mxu0  ;;  %v5485_v15 = vadd.f32 %v23701_v62, %v23700_v60  ;;  %v23703_v50 = vld [vmem:[#allocation53_spill] sm:$0xff]  ;;  %v23704_v0 = vld [vmem:[#allocation140_spill] sm:$0xff]  ;;  %v23708_v62 = vld [vmem:[#allocation66_spill] sm:$0xff] }
 0x295   :  { %23699 = vst [vmem:[#allocation31_spill] sm:$0xff] %v21071_v59  ;;  %v15772_v52 = vpop.eup %15771  ;;  %15791 = vrcp.f32 %v5164_v35  ;;  %v5167_v5 = vadd.f32 1.0, %v15770_v42  ;;  %v5493_v8 = vadd.f32 %v23703_v50, %v23702_v12  ;;  %v21077_v57 = vpop.permute.xlu0 %6190  ;;  %v23705_v59 = vld [vmem:[#allocation105_spill] sm:$0xff] }
 0x296   :  { %v15774_v45 = vpop.eup %15773  ;;  %15793 = vrcp.f32 %v5166_v3  ;;  %v5169_v49 = vadd.f32 1.0, %v15772_v52  ;;  %v5496_v22 = vadd.f32 %v23705_v59, %v23704_v0  ;;  %v21082_v35 = vpop.permute.xlu1 %6205  ;;  %v23707_v52 = vld [vmem:[#allocation82_spill] sm:$0xff] }
 0x297   :  { %v15776_v41 = vpop.eup %15775  ;;  %15795 = vrcp.f32 %v5167_v5  ;;  %v5168_v30 = vadd.f32 1.0, %v15774_v45  ;;  %7922 = vperm.xlu0 %14624, %v20761_v29   ;;  %v5504_v60 = vadd.f32 %v23707_v52, %v23706_v47  ;;  %v12699_v5 = vmul.f32 -1.442695, %v5485_v15  ;;  %v23709_v45 = vld [vmem:[#allocation59_spill] sm:$0xff]  ;;  %v21090_v0 = vpop.f32.mrb[128].mxu0 }
 0x298   :  { %v15778_v42 = vpop.eup %15777  ;;  %15797 = vrcp.f32 %v5169_v49  ;;  %v5204_v3 = vpack.c.bf16 %v15776_v41, %v21037_v53  ;;  %7937 = vperm.xlu1 %14625, %v20768_v13   ;;  %v5501_v59 = vadd.f32 %v23709_v45, %v23708_v62  ;;  %23710 = vst [vmem:[#allocation97_spill] sm:$0xff] %v21090_v0  ;;  %v12701_v49 = vmul.f32 -1.442695, %v5493_v8  ;;  %v23711_v53 = vld [vmem:[#allocation94_spill] sm:$0xff]  ;;  %v23712_v41 = vld [vmem:[#allocation28_spill] sm:$0xff]  ;;  %v21096_v13 = vpop.f32.mrb[129].mxu0 }
 0x299   :  { %v15780_v12 = vpop.eup %15779  ;;  %15799 = vrcp.f32 %v5168_v30  ;;  %v5587_v50 = vadd.f32 1.0, %v15778_v42  ;;  %v5509_v23 = vadd.f32 %v23712_v41, %v23711_v53  ;;  %v21094_v47 = vpop.permute.xlu0 %6200  ;;  %23713 = vst [vmem:[#allocation8_spill] sm:$0xff] %v21096_v13  ;;  %v12702_v15 = vmul.f32 -1.442695, %v5496_v22  ;;  %v23715_v52 = vld [vmem:[#allocation23_spill] sm:$0xff]  ;;  %v23716_v62 = vld [vmem:[#allocation114_spill] sm:$0xff] }
 0x29a   :  { %v15782_v29 = vpop.eup %15781  ;;  %v5588_v28 = vadd.f32 1.0, %v15780_v12  ;;  %15801 = vpow2.f32 %v12700_v34  ;;  %13711 = vmatprep.subr.bf16.mxu1 %v5204_v3  ;;  %v23714_v42 = vpack.c.bf16 %v20899_v43, %v20892_v17  ;;  %v5512_v12 = vadd.f32 %v23716_v62, %v23715_v52  ;;  %v21106_v8 = vpop.f32.mrb[130].mxu0  ;;  %v23718_v41 = vld [vmem:[#allocation62_spill] sm:$0xff]  ;;  %v16704_v17 = vld [vmem:[%s22862_s2 + $0x8] sm:$0xff]  ;;  %v23721_v52 = vld [vmem:[#allocation135_spill] sm:$0xff] }
 0x29b   :  { %v15784_v30 = vpop.eup %15783  ;;  %15803 = vrcp.f32 %v5587_v50  ;;  %7932 = vperm.xlu0 %14624, %v20784_v20   ;;  %v21104_v34 = vpop.permute.xlu1 %6568  ;;  %23717 = vst [vmem:[#allocation56_spill] sm:$0xff] %v21106_v8  ;;  %v12704_v53 = vmul.f32 -1.442695, %v5504_v60  ;;  %v23719_v50 = vld [vmem:[#allocation120_spill] sm:$0xff]  ;;  %v12703_v20 = vmul.f32 -1.442695, %v5501_v59 }
 0x29c   :  { %13712 = vmatpush3.bf16.msra.mxu1 %v23714_v42  ;;  %v15786_v3 = vpop.eup %15785  ;;  %15805 = vrcp.f32 %v5588_v28  ;;  %v5205_v45 = vpack.c.bf16 %v15782_v29, %v15784_v30  ;;  %v5520_v22 = vadd.f32 %v23719_v50, %v23718_v41  ;;  %8300 = vperm.xlu1 %14625, %v16704_v17   ;;  %v21113_v43 = vpop.f32.mrb[131].mxu0  ;;  %v23722_v62 = vld [vmem:[#allocation55_spill] sm:$0xff]  ;;  %v12705_v60 = vmul.f32 -1.442695, %v5509_v23  ;;  %v23723_v29 = vld [vmem:[#allocation116_spill] sm:$0xff] }
 0x29d   :  { %23720 = vst [vmem:[#allocation26_spill] sm:$0xff] %v21113_v43  ;;  %v15788_v42 = vpop.eup %15787  ;;  %15807 = vpow2.f32 %v12699_v5  ;;  %v5517_v0 = vadd.f32 %v23722_v62, %v23721_v52  ;;  %v5525_v30 = vadd.f32 %v23723_v29, %v20753_v9  ;;  %v23724_v17 = vpack.c.bf16 %v20910_v10, %v20914_v18  ;;  %v16705_v59 = vld [vmem:[%s22862_s2] sm:$0xff]  ;;  %v16706_v10 = vld [vmem:[%s22862_s2 + $0x18] sm:$0xff] }
 0x29e   :  { %v15790_v8 = vpop.eup %15789  ;;  %15809 = vpow2.f32 %v12701_v49  ;;  %13713 = vmatprep.subr.bf16.mxu1 %v5205_v45  ;;  %v5206_v28 = vpack.c.bf16 %v15788_v42, %v15786_v3  ;;  %v21119_v41 = vpop.permute.xlu0 %6563  ;;  %v12706_v5 = vmul.f32 -1.442695, %v5512_v12  ;;  %v12708_v3 = vmul.f32 -1.442695, %v5520_v22  ;;  %v23725_v45 = vld [vmem:[#allocation113_spill] sm:$0xff]  ;;  %v23726_v42 = vld [vmem:[#allocation119_spill] sm:$0xff] }
 0x29f   :  { %v15792_v50 = vpop.eup %15791  ;;  %15811 = vpow2.f32 %v12702_v15  ;;  %8295 = vperm.xlu0 %14624, %v16705_v59   ;;  %v21127_v49 = vpop.permute.xlu1 %6578  ;;  %v5528_v15 = vadd.f32 %v23725_v45, %v20746_v32  ;;  %v12707_v12 = vmul.f32 -1.442695, %v5517_v0  ;;  %v5536_v52 = vadd.f32 %v23726_v42, %v20773_v7  ;;  %v16707_v7 = vld [vmem:[%s22862_s2 + $0x10] sm:$0xff] }
 0x2a0   :  { %13714 = vmatpush3.bf16.msra.mxu1 %v23724_v17  ;;  %v15794_v23 = vpop.eup %15793  ;;  %15813 = vpow2.f32 %v12704_v53  ;;  %v5207_v9 = vpack.c.bf16 %v15790_v8, %v15792_v50  ;;  %8310 = vperm.xlu1 %14625, %v16706_v10   ;;  %v9143_v53 = vld [vmem:[%s22862_s2] sm:$0xff]  ;;  %v21139_v8 = vpop.f32.mrb[132].mxu0  ;;  %v12709_v62 = vmul.f32 -1.442695, %v5525_v30  ;;  %v23729_v0 = vpack.c.bf16 %v20969_v26, %v20956_v19 }
 0x2a1   :  { %13715 = vmatprep.subr.bf16.mxu1 %v5206_v28  ;;  %v15796_v18 = vpop.eup %15795  ;;  %15815 = vpow2.f32 %v12703_v20  ;;  %23727 = vst [vmem:[#allocation58_spill] sm:$0xff] %v21139_v8  ;;  %v21143_v29 = vpop.f32.mrb[133].mxu0  ;;  %v12710_v17 = vmul.f32 -1.442695, %v5528_v15  ;;  %v12712_v26 = vmul.f32 -1.442695, %v5536_v52 }
 0x2a2   :  { %v15798_v22 = vpop.eup %15797  ;;  %15817 = vpow2.f32 %v12705_v60  ;;  %v5208_v32 = vpack.c.bf16 %v15796_v18, %v15794_v23  ;;  %v21141_v28 = vpop.permute.xlu0 %6573  ;;  %23728 = vst [vmem:[#allocation99_spill] sm:$0xff] %v21143_v29  ;;  %v16708_v15 = vld [vmem:[%s22862_s2 + $0x20] sm:$0xff] }
 0x2a3   :  { %v15800_v50 = vpop.eup %15799  ;;  %15819 = vpow2.f32 %v12706_v5  ;;  %8305 = vperm.xlu0 %14624, %v16707_v7   ;;  %v21151_v20 = vpop.permute.xlu1 %6588 }
 0x2a4   :  { %13716 = vmatpush3.bf16.msra.mxu1 %v23729_v0  ;;  %v21153_v60 = vpop.f32.mrb[134].mxu0  ;;  %v15802_v30 = vpop.eup %15801  ;;  %15821 = vpow2.f32 %v12708_v3  ;;  %v5209_v59 = vpack.c.bf16 %v15798_v22, %v15800_v50  ;;  %9161 = vperm.xlu1 %14625, %v9143_v53  }
 0x2a5   :  { %23730 = vst [vmem:[#allocation24_spill] sm:$0xff] %v21153_v60  ;;  %13717 = vmatprep.subr.bf16.mxu1 %v5207_v9  ;;  %v21155_v5 = vpop.f32.mrb[135].mxu0  ;;  %v21157_v23 = vpop.eup %15803  ;;  %v5590_v19 = vadd.f32 1.0, %v15802_v30  ;;  %15823 = vpow2.f32 %v12707_v12  ;;  %v23732_v9 = vpack.c.bf16 %v20974_v39, %v20982_v48  ;;  %v21176_v39 = vld [vmem:[%s22862_s2 + $0x8] sm:$0xff] }
 0x2a6   :  { %23731 = vst [vmem:[#allocation77_spill] sm:$0xff] %v21155_v5  ;;  %v21159_v45 = vpop.eup %15805  ;;  %15825 = vpow2.f32 %v12709_v62  ;;  %v21161_v10 = vpop.permute.xlu0 %6583  ;;  %v9145_v62 = vld [vmem:[%s22862_s2 + $0x10] sm:$0xff] }
 0x2a7   :  { %v15808_v18 = vpop.eup %15807  ;;  %15827 = vrcp.f32 %v5590_v19  ;;  %8315 = vperm.xlu0 %14624, %v16708_v15   ;;  %v21171_v12 = vpop.permute.xlu1 %6598  ;;  %v23735_v19 = vpack.c.bf16 %v21001_v36, %v20990_v46 }
 0x2a8   :  { %13718 = vmatpush3.bf16.msra.mxu1 %v23732_v9  ;;  %v15810_v42 = vpop.eup %15809  ;;  %v5589_v52 = vadd.f32 1.0, %v15808_v18  ;;  %15829 = vpow2.f32 %v12710_v17  ;;  %8728 = vperm.xlu1 %14625, %v9143_v53   ;;  %v21181_v50 = vpop.f32.mrb[136].mxu0 }
 0x2a9   :  { %13719 = vmatprep.subr.bf16.mxu1 %v5208_v32  ;;  %v15812_v48 = vpop.eup %15811  ;;  %v5591_v22 = vadd.f32 1.0, %v15810_v42  ;;  %15831 = vpow2.f32 %v12712_v26  ;;  %23733 = vst [vmem:[#allocation42_spill] sm:$0xff] %v21181_v50  ;;  %v21185_v53 = vpop.f32.mrb[137].mxu0  ;;  %v23737_v42 = vld [vmem:[#allocation21_spill] sm:$0xff]  ;;  %v23742_v50 = vld [vmem:[#allocation27_spill] sm:$0xff] }
 0x2aa   :  { %v15814_v0 = vpop.eup %15813  ;;  %15833 = vrcp.f32 %v5589_v52  ;;  %v5592_v7 = vadd.f32 1.0, %v15812_v48  ;;  %v21183_v32 = vpop.permute.xlu0 %6593  ;;  %23734 = vst [vmem:[#allocation76_spill] sm:$0xff] %v21185_v53  ;;  %v5533_v52 = vadd.f32 %v23737_v42, %v20776_v31  ;;  %v23739_v31 = vpack.c.bf16 %v21008_v1, %v21012_v38  ;;  %v23740_v42 = vld [vmem:[#allocation122_spill] sm:$0xff] }
 0x2ab   :  { %v15816_v30 = vpop.eup %15815  ;;  %15835 = vrcp.f32 %v5591_v22  ;;  %v5594_v17 = vadd.f32 1.0, %v15814_v0  ;;  %9166 = vperm.xlu0 %14624, %v21176_v39   ;;  %v21191_v26 = vpop.permute.xlu1 %6608  ;;  %v9146_v38 = vld [vmem:[%s22862_s2 + $0x18] sm:$0xff] }
 0x2ac   :  { %13720 = vmatpush3.bf16.msra.mxu1 %v23735_v19  ;;  %v21193_v18 = vpop.f32.mrb[138].mxu0  ;;  %v15818_v9 = vpop.eup %15817  ;;  %15837 = vrcp.f32 %v5592_v7  ;;  %v5593_v15 = vadd.f32 1.0, %v15816_v30  ;;  %9171 = vperm.xlu1 %14625, %v9145_v62   ;;  %v15005_v7 = vld [vmem:[%s22865_s3 + $0x28] ss:$104 sps:$4 sm:$0xff]   ;;  %v12711_v3 = vmul.f32 -1.442695, %v5533_v52 }
 0x2ad   :  { %23736 = vst [vmem:[#allocation79_spill] sm:$0xff] %v21193_v18  ;;  %13721 = vmatprep.subr.bf16.mxu1 %v5209_v59  ;;  %v21197_v48 = vpop.f32.mrb[139].mxu0  ;;  %v15820_v22 = vpop.eup %15819  ;;  %15839 = vrcp.f32 %v5594_v17  ;;  %v5595_v46 = vadd.f32 1.0, %v15818_v9  ;;  %v5910_v17 = vadd.f32 %v23740_v42, %v20796_v33  ;;  %v5913_v18 = vadd.f32 %v23742_v50, %v20791_v2 }
 0x2ae   :  { %23738 = vst [vmem:[#allocation22_spill] sm:$0xff] %v21197_v48  ;;  %v15822_v36 = vpop.eup %15821  ;;  %15841 = vrcp.f32 %v5593_v15  ;;  %v5596_v0 = vadd.f32 1.0, %v15820_v22  ;;  %v21199_v19 = vpop.permute.xlu0 %6603 }
 0x2af   :  { %v15824_v30 = vpop.eup %15823  ;;  %15843 = vrcp.f32 %v5595_v46  ;;  %v5598_v59 = vadd.f32 1.0, %v15822_v36  ;;  %8733 = vperm.xlu0 %14624, %v21176_v39   ;;  %v21210_v9 = vpop.permute.xlu1 %6618  ;;  %v23743_v46 = vld [vmem:[#allocation25_spill] sm:$0xff]  ;;  %v12735_v42 = vmul.f32 -1.442695, %v5910_v17 }
 0x2b0   :  { %13722 = vmatpush3.bf16.msra.mxu1 %v23739_v31  ;;  %23741 = vst [vmem:[#allocation32_spill] sm:$0xff] %v21210_v9  ;;  %v15826_v15 = vpop.eup %15825  ;;  %15845 = vrcp.f32 %v5596_v0  ;;  %v5597_v22 = vadd.f32 1.0, %v15824_v30  ;;  %8738 = vperm.xlu1 %14625, %v9145_v62   ;;  %v5921_v36 = vadd.f32 %v23743_v46, %v20808_v6  ;;  %v21224_v0 = vld [vmem:[%s22862_s2 + $0x28] sm:$0xff]  ;;  %v21226_v52 = vpop.f32.mrb[132].mxu1  ;;  %v23745_v62 = vld [vmem:[#allocation90_spill] sm:$0xff]  ;;  %v23797_v9 = vld [vmem:[#allocation139_spill] sm:$0xff] }
 0x2b1   :  { %v21217_v1 = vpop.eup %15827  ;;  %15847 = vrcp.f32 %v5598_v59  ;;  %v5599_v33 = vadd.f32 1.0, %v15826_v15  ;;  %23744 = vst [vmem:[#allocation102_spill] sm:$0xff] %v21226_v52  ;;  %v5918_v50 = vadd.f32 %v23745_v62, %v20811_v40  ;;  %v21232_v59 = vpop.f32.mrb[133].mxu1  ;;  %v23748_v15 = vld [vmem:[#allocation118_spill] sm:$0xff]  ;;  %v12736_v62 = vmul.f32 -1.442695, %v5913_v18 }
 0x2b2   :  { %v15830_v2 = vpop.eup %15829  ;;  %15849 = vrcp.f32 %v5597_v22  ;;  %v21230_v30 = vpop.permute.xlu0 %6613  ;;  %23747 = vst [vmem:[#allocation36_spill] sm:$0xff] %v21232_v59  ;;  %v5926_v46 = vadd.f32 %v23748_v15, %v20830_v16  ;;  %v12738_v16 = vmul.f32 -1.442695, %v5921_v36  ;;  %v23756_v36 = vld [vmem:[#allocation46_spill] sm:$0xff] }
 0x2b3   :  { %23746 = vst [vmem:[#allocation38_spill] sm:$0xff] %v21230_v30  ;;  %11894 = vmatmul.mubr.bf16.vlgmr.msra.gmra.mrb[220].mxu1 %v15005_v7  ;;  %v15832_v31 = vpop.eup %15831  ;;  %15851 = vrcp.f32 %v5599_v33  ;;  %v5600_v6 = vadd.f32 1.0, %v15830_v2  ;;  %9176 = vperm.xlu0 %14624, %v9146_v38   ;;  %v21236_v48 = vpop.permute.xlu1 %6628  ;;  %v23751_v7 = vld [vmem:[#allocation121_spill] sm:$0xff]  ;;  %v23753_v2 = vld [vmem:[#allocation11_spill] sm:$0xff]  ;;  %v5942_v53 = vadd.f32 %v23756_v36, %v20883_v27 }
 0x2b4   :  { %23749 = vst [vmem:[#allocation69_spill] sm:$0xff] %v21236_v48  ;;  %v21238_v52 = vpop.f32.mrb[134].mxu1  ;;  %v21240_v22 = vpop.eup %15833  ;;  %v5602_v40 = vadd.f32 1.0, %v15832_v31  ;;  %15853 = vpow2.f32 %v12711_v3  ;;  %v5929_v59 = vadd.f32 %v23751_v7, %v20828_v61  ;;  %8320 = vperm.xlu1 %14625, %v21224_v0   ;;  %v5937_v15 = vadd.f32 %v23753_v2, %v20850_v58  ;;  %v23754_v61 = vld [vmem:[#allocation138_spill] sm:$0xff] }
 0x2b5   :  { %23750 = vst [vmem:[#allocation49_spill] sm:$0xff] %v21238_v52  ;;  %v21245_v33 = vpop.f32.mrb[135].mxu1  ;;  %v21247_v17 = vpop.eup %15835  ;;  %15855 = vrcp.f32 %v5600_v6  ;;  %v12737_v3 = vmul.f32 -1.442695, %v5918_v50  ;;  %v5934_v18 = vadd.f32 %v23754_v61, %v20854_v37  ;;  %v12739_v6 = vmul.f32 -1.442695, %v5926_v46 }
 0x2b6   :  { %23752 = vst [vmem:[#allocation50_spill] sm:$0xff] %v21245_v33  ;;  %v21253_v31 = vpop.eup %15837  ;;  %15857 = vrcp.f32 %v5602_v40  ;;  %v21257_v7 = vpop.permute.xlu0 %6623  ;;  %v12740_v50 = vmul.f32 -1.442695, %v5929_v59  ;;  %v23758_v37 = vld [vmem:[#allocation127_spill] sm:$0xff]  ;;  %v12742_v46 = vmul.f32 -1.442695, %v5937_v15 }
 0x2b7   :  { %23755 = vst [vmem:[#allocation63_spill] sm:$0xff] %v21257_v7  ;;  %v21259_v33 = vpop.eup %15839  ;;  %15859 = vpow2.f32 %v12735_v42  ;;  %8743 = vperm.xlu0 %14624, %v9146_v38   ;;  %v21265_v2 = vpop.permute.xlu1 %6638  ;;  %v5945_v61 = vadd.f32 %v23758_v37, %v20873_v11  ;;  %v9147_v42 = vld [vmem:[%s22862_s2 + $0x20] sm:$0xff]  ;;  %v12741_v59 = vmul.f32 -1.442695, %v5934_v18  ;;  %v23760_v11 = vld [vmem:[#allocation134_spill] sm:$0xff]  ;;  %v23763_v15 = vld [vmem:[#allocation4_spill] sm:$0xff] }
 0x2b8   :  { %23757 = vst [vmem:[#allocation34_spill] sm:$0xff] %v21265_v2  ;;  %v21267_v40 = vpop.eup %15841  ;;  %15861 = vpow2.f32 %v12736_v62  ;;  %9186 = vperm.xlu1 %14625, %v21224_v0   ;;  %v21279_v36 = vpop.f32.mrb[136].mxu1  ;;  %v5953_v37 = vadd.f32 %v23760_v11, %v20905_v55  ;;  %v5950_v38 = vadd.f32 %v23763_v15, %v20916_v44 }
 0x2b9   :  { %v21275_v27 = vpop.eup %15843  ;;  %15863 = vpow2.f32 %v12738_v16  ;;  %23759 = vst [vmem:[#allocation86_spill] sm:$0xff] %v21279_v36  ;;  %v21287_v52 = vpop.f32.mrb[137].mxu1  ;;  %v12743_v16 = vmul.f32 -1.442695, %v5942_v53  ;;  %v12744_v11 = vmul.f32 -1.442695, %v5945_v61 }
 0x2ba   :  { %v21281_v62 = vpop.eup %15845  ;;  %15865 = vpow2.f32 %v12737_v3  ;;  %v21285_v58 = vpop.permute.xlu0 %6633  ;;  %23762 = vst [vmem:[#allocation51_spill] sm:$0xff] %v21287_v52  ;;  %v12746_v36 = vmul.f32 -1.442695, %v5953_v37  ;;  %v12745_v61 = vmul.f32 -1.442695, %v5950_v38 }
 0x2bb   :  { %23761 = vst [vmem:[#allocation10_spill] sm:$0xff] %v21285_v58  ;;  %v21289_v8 = vpop.eup %15847  ;;  %15867 = vpow2.f32 %v12739_v6  ;;  %9181 = vperm.xlu0 %14624, %v9147_v42   ;;  %v21295_v3 = vpop.permute.xlu1 %7001  ;;  %v8284_v6 = vld [vmem:[%s22862_s2 + $0x38] sm:$0xff]  ;;  %v23795_v58 = vld [vmem:[#allocation47_spill] sm:$0xff] }
 0x2bc   :  { %23764 = vst [vmem:[#allocation65_spill] sm:$0xff] %v21295_v3  ;;  %v21297_v18 = vpop.f32.mrb[138].mxu1  ;;  %v21299_v55 = vpop.eup %15849  ;;  %15869 = vpow2.f32 %v12740_v50  ;;  %8753 = vperm.xlu1 %14625, %v21224_v0   ;;  %v23786_v3 = vld [vmem:[#allocation131_spill] sm:$0xff] }
 0x2bd   :  { %23765 = vst [vmem:[#allocation100_spill] sm:$0xff] %v21297_v18  ;;  %v21302_v52 = vpop.f32.mrb[139].mxu1  ;;  %v21304_v53 = vpop.eup %15851  ;;  %15871 = vpow2.f32 %v12742_v46 }
 0x2be   :  { %23766 = vst [vmem:[#allocation80_spill] sm:$0xff] %v21302_v52  ;;  %v15854_v15 = vpop.eup %15853  ;;  %15873 = vpow2.f32 %v12741_v59  ;;  %v21311_v18 = vpop.permute.xlu0 %6996  ;;  %v8283_v59 = vld [vmem:[%s22862_s2 + $0x30] sm:$0xff] }
 0x2bf   :  { %23767 = vst [vmem:[#allocation104_spill] sm:$0xff] %v21311_v18  ;;  %v21313_v50 = vpop.eup %15855  ;;  %v5601_v0 = vadd.f32 1.0, %v15854_v15  ;;  %15875 = vpow2.f32 %v12743_v16  ;;  %8748 = vperm.xlu0 %14624, %v9147_v42   ;;  %v21315_v52 = vpop.permute.xlu1 %7011 }
 0x2c0   :  { %23768 = vst [vmem:[#allocation129_spill] sm:$0xff] %v21315_v52  ;;  %v21317_v46 = vpop.eup %15857  ;;  %15877 = vpow2.f32 %v12744_v11  ;;  %8330 = vperm.xlu1 %14625, %v8284_v6   ;;  %v21324_v60 = vpop.f32.mrb[140].mxu1 }
 0x2c1   :  { %v15860_v37 = vpop.eup %15859  ;;  %15879 = vrcp.f32 %v5601_v0  ;;  %23769 = vst [vmem:[#allocation74_spill] sm:$0xff] %v21324_v60  ;;  %v21328_v15 = vpop.f32.mrb[141].mxu1 }
 0x2c2   :  { %v15862_v16 = vpop.eup %15861  ;;  %v6020_v38 = vadd.f32 1.0, %v15860_v37  ;;  %15881 = vpow2.f32 %v12746_v36  ;;  %v21326_v42 = vpop.permute.xlu0 %7006  ;;  %23771 = vst [vmem:[#allocation109_spill] sm:$0xff] %v21328_v15 }
 0x2c3   :  { %23770 = vst [vmem:[#allocation12_spill] sm:$0xff] %v21326_v42  ;;  %v15864_v11 = vpop.eup %15863  ;;  %v6021_v5 = vadd.f32 1.0, %v15862_v16  ;;  %15883 = vpow2.f32 %v12745_v61  ;;  %8325 = vperm.xlu0 %14624, %v8283_v59   ;;  %v21330_v44 = vpop.permute.xlu1 %7021  ;;  %v23775_v16 = vld [vmem:[#allocation130_spill] sm:$0xff] }
 0x2c4   :  { %23772 = vst [vmem:[#allocation5_spill] sm:$0xff] %v21330_v44  ;;  %v21332_v29 = vpop.f32.mrb[142].mxu1  ;;  %v15866_v43 = vpop.eup %15865  ;;  %15885 = vrcp.f32 %v6020_v38  ;;  %v6023_v0 = vadd.f32 1.0, %v15864_v11  ;;  %9196 = vperm.xlu1 %14625, %v8284_v6   ;;  %v5958_v61 = vadd.f32 %v23775_v16, %v20930_v14  ;;  %v21347_v14 = vld [vmem:[%s22862_s2 + $0x48] sm:$0xff] }
 0x2c5   :  { %23773 = vst [vmem:[#allocation29_spill] sm:$0xff] %v21332_v29  ;;  %v21334_v60 = vpop.f32.mrb[143].mxu1  ;;  %v15868_v37 = vpop.eup %15867  ;;  %15887 = vrcp.f32 %v6021_v5  ;;  %v6022_v36 = vadd.f32 1.0, %v15866_v43 }
 0x2c6   :  { %23774 = vst [vmem:[#allocation103_spill] sm:$0xff] %v21334_v60  ;;  %v15870_v13 = vpop.eup %15869  ;;  %15889 = vrcp.f32 %v6023_v0  ;;  %v6024_v15 = vadd.f32 1.0, %v15868_v37  ;;  %v21338_v42 = vpop.permute.xlu0 %7016  ;;  %v23778_v0 = vld [vmem:[#allocation137_spill] sm:$0xff]  ;;  %v23779_v37 = vld [vmem:[#allocation132_spill] sm:$0xff] }
 0x2c7   :  { %23776 = vst [vmem:[#allocation41_spill] sm:$0xff] %v21338_v42  ;;  %v15872_v44 = vpop.eup %15871  ;;  %15891 = vrcp.f32 %v6022_v36  ;;  %v6025_v29 = vadd.f32 1.0, %v15870_v13  ;;  %9191 = vperm.xlu0 %14624, %v8283_v59   ;;  %v21340_v38 = vpop.permute.xlu1 %7031  ;;  %v5961_v52 = vadd.f32 %v23779_v37, %v23778_v0  ;;  %v23785_v37 = vld [vmem:[#allocation14_spill] sm:$0xff] }
 0x2c8   :  { %23777 = vst [vmem:[#allocation126_spill] sm:$0xff] %v21340_v38  ;;  %v15874_v11 = vpop.eup %15873  ;;  %15893 = vrcp.f32 %v6024_v15  ;;  %v6027_v60 = vadd.f32 1.0, %v15872_v44  ;;  %8763 = vperm.xlu1 %14625, %v8284_v6   ;;  %v21349_v36 = vpop.f32.mrb[144].mxu1  ;;  %v12747_v38 = vmul.f32 -1.442695, %v5958_v61  ;;  %v23781_v15 = vld [vmem:[#allocation44_spill] sm:$0xff]  ;;  %v5966_v18 = vadd.f32 %v23786_v3, %v23785_v37 }
 0x2c9   :  { %v15876_v5 = vpop.eup %15875  ;;  %15895 = vrcp.f32 %v6025_v29  ;;  %v6026_v43 = vadd.f32 1.0, %v15874_v11  ;;  %23780 = vst [vmem:[#allocation7_spill] sm:$0xff] %v21349_v36  ;;  %v23782_v44 = vld [vmem:[#allocation92_spill] sm:$0xff]  ;;  %v21355_v29 = vpop.f32.mrb[145].mxu1  ;;  %v12748_v37 = vmul.f32 -1.442695, %v5961_v52 }
 0x2ca   :  { %v15878_v13 = vpop.eup %15877  ;;  %15897 = vrcp.f32 %v6027_v60  ;;  %v6028_v16 = vadd.f32 1.0, %v15876_v5  ;;  %v5969_v6 = vadd.f32 %v23782_v44, %v23781_v15  ;;  %v21353_v42 = vpop.permute.xlu0 %7026  ;;  %23784 = vst [vmem:[#allocation19_spill] sm:$0xff] %v21355_v29  ;;  %v23789_v5 = vld [vmem:[#allocation33_spill] sm:$0xff]  ;;  %v12749_v30 = vmul.f32 -1.442695, %v5966_v18  ;;  %v23799_v18 = vld [vmem:[#allocation40_spill] sm:$0xff] }
 0x2cb   :  { %23783 = vst [vmem:[#allocation111_spill] sm:$0xff] %v21353_v42  ;;  %v21357_v11 = vpop.eup %15879  ;;  %15899 = vrcp.f32 %v6026_v43  ;;  %v6029_v0 = vadd.f32 1.0, %v15878_v13  ;;  %8758 = vperm.xlu0 %14624, %v8283_v59   ;;  %v21361_v36 = vpop.permute.xlu1 %7041  ;;  %v23790_v15 = vld [vmem:[#allocation17_spill] sm:$0xff]  ;;  %v21373_v43 = vld [vmem:[%s22862_s2 + $0x40] sm:$0xff] }
 0x2cc   :  { %23787 = vst [vmem:[#allocation91_spill] sm:$0xff] %v21361_v36  ;;  %v21363_v60 = vpop.f32.mrb[146].mxu1  ;;  %v15882_v61 = vpop.eup %15881  ;;  %15901 = vrcp.f32 %v6028_v16  ;;  %v6343_v44 = vadd.f32 %v23790_v15, %v23789_v5  ;;  %8340 = vperm.xlu1 %14625, %v21347_v14   ;;  %v23792_v16 = vld [vmem:[#allocation98_spill] sm:$0xff]  ;;  %v12750_v29 = vmul.f32 -1.442695, %v5969_v6  ;;  %v23794_v42 = vld [vmem:[#allocation75_spill] sm:$0xff] }
 0x2cd   :  { %23788 = vst [vmem:[#allocation30_spill] sm:$0xff] %v21363_v60  ;;  %v21375_v3 = vpop.f32.mrb[147].mxu1  ;;  %v15884_v59 = vpop.eup %15883  ;;  %15903 = vrcp.f32 %v6029_v0  ;;  %v6031_v13 = vadd.f32 1.0, %v15882_v61  ;;  %v23793_v60 = vld [vmem:[#allocation133_spill] sm:$0xff]  ;;  %v6354_v2 = vadd.f32 %v23795_v58, %v23794_v42  ;;  %v23798_v6 = vld [vmem:[#allocation84_spill] sm:$0xff] }
 0x2ce   :  { %23791 = vst [vmem:[#allocation68_spill] sm:$0xff] %v21375_v3  ;;  %v6346_v36 = vadd.f32 %v23793_v60, %v23792_v16  ;;  %v15886_v5 = vpop.eup %15885  ;;  %v6030_v15 = vadd.f32 1.0, %v15884_v59  ;;  %15905 = vpow2.f32 %v12747_v38  ;;  %v21381_v48 = vpop.permute.xlu0 %7036  ;;  %v23796_v3 = vld [vmem:[#allocation60_spill] sm:$0xff]  ;;  %v12773_v38 = vmul.f32 -1.442695, %v6343_v44 }
 0x2cf   :  { %v15888_v7 = vpop.eup %15887  ;;  %15907 = vrcp.f32 %v6031_v13  ;;  %v6351_v0 = vadd.f32 %v23797_v9, %v23796_v3  ;;  %8335 = vperm.xlu0 %14624, %v21373_v43   ;;  %v21386_v52 = vpop.permute.xlu1 %7051  ;;  %v6359_v59 = vadd.f32 %v23798_v6, %v21016_v25  ;;  %v23800_v13 = vld [vmem:[#allocation72_spill] sm:$0xff]  ;;  %v15010_v3 = vld [vmem:[%s22865_s3 + $0x34] ss:$104 sps:$4 sm:$0xff]   ;;  %v12776_v44 = vmul.f32 -1.442695, %v6354_v2  ;;  %v23802_v25 = vld [vmem:[#allocation35_spill] sm:$0xff] }
 0x2d0   :  { %v15890_v60 = vpop.eup %15889  ;;  %15909 = vrcp.f32 %v6030_v15  ;;  %v6068_v61 = vpack.c.bf16 %v15888_v7, %v15886_v5  ;;  %9206 = vperm.xlu1 %14625, %v21347_v14   ;;  %v12774_v42 = vmul.f32 -1.442695, %v6346_v36  ;;  %v6362_v16 = vadd.f32 %v23800_v13, %v23799_v18  ;;  %v21393_v9 = vpop.f32.mrb[140].mxu0  ;;  %11934 = vmatprep.mubr.bf16.mxu0 %v15010_v3 }
 0x2d1   :  { %v15892_v58 = vpop.eup %15891  ;;  %15911 = vpow2.f32 %v12748_v37  ;;  %23801 = vst [vmem:[#allocation88_spill] sm:$0xff] %v21393_v9  ;;  %v6370_v5 = vadd.f32 %v23802_v25, %v21023_v56  ;;  %v21402_v36 = vpop.f32.mrb[141].mxu0  ;;  %v23803_v18 = vpack.c.bf16 %v21159_v45, %v21157_v23  ;;  %v12775_v13 = vmul.f32 -1.442695, %v6351_v0  ;;  %v23807_v0 = vld [vmem:[#allocation83_spill] sm:$0xff] }
 0x2d2   :  { %v15894_v15 = vpop.eup %15893  ;;  %15913 = vpow2.f32 %v12750_v29  ;;  %13729 = vmatprep.subr.bf16.mxu0 %v6068_v61  ;;  %v6069_v7 = vpack.c.bf16 %v15890_v60, %v15892_v58  ;;  %v21400_v6 = vpop.permute.xlu0 %7046  ;;  %v12777_v61 = vmul.f32 -1.442695, %v6359_v59  ;;  %v23805_v58 = vld [vmem:[#allocation141_spill] sm:$0xff]  ;;  %v12778_v45 = vmul.f32 -1.442695, %v6362_v16 }
 0x2d3   :  { %v15896_v37 = vpop.eup %15895  ;;  %15915 = vpow2.f32 %v12749_v30  ;;  %13730 = vmatpush3.bf16.msra.mxu0 %v23803_v18  ;;  %9201 = vperm.xlu0 %14624, %v21373_v43   ;;  %v21408_v29 = vpop.permute.xlu1 %7061  ;;  %v6367_v25 = vadd.f32 %v23805_v58, %v21028_v54  ;;  %v6375_v18 = vadd.f32 %v23807_v0, %v21045_v21  ;;  %v23811_v58 = vpack.c.bf16 %v21253_v31, %v21247_v17 }
 0x2d4   :  { %v21410_v60 = vpop.f32.mrb[142].mxu0  ;;  %v15898_v2 = vpop.eup %15897  ;;  %15917 = vpow2.f32 %v12773_v38  ;;  %13731 = vmatprep.subr.bf16.mxu0 %v6069_v7  ;;  %v6070_v56 = vpack.c.bf16 %v15896_v37, %v15894_v15  ;;  %8773 = vperm.xlu1 %14625, %v21347_v14   ;;  %v8288_v38 = vld [vmem:[%s22862_s2 + $0x58] sm:$0xff]  ;;  %v12780_v7 = vmul.f32 -1.442695, %v6370_v5 }
 0x2d5   :  { %23804 = vst [vmem:[#allocation18_spill] sm:$0xff] %v21410_v60  ;;  %v21415_v30 = vpop.f32.mrb[143].mxu0  ;;  %v15900_v23 = vpop.eup %15899  ;;  %15919 = vpow2.f32 %v12774_v42  ;;  %v23808_v42 = vpack.c.bf16 %v21217_v1, %v21240_v22  ;;  %v12779_v3 = vmul.f32 -1.442695, %v6367_v25  ;;  %v12781_v1 = vmul.f32 -1.442695, %v6375_v18 }
 0x2d6   :  { %23806 = vst [vmem:[#allocation106_spill] sm:$0xff] %v21415_v30  ;;  %v15902_v15 = vpop.eup %15901  ;;  %15921 = vpow2.f32 %v12776_v44  ;;  %v6071_v59 = vpack.c.bf16 %v15898_v2, %v15900_v23  ;;  %v21422_v54 = vpop.permute.xlu0 %7056  ;;  %v8287_v44 = vld [vmem:[%s22862_s2 + $0x50] sm:$0xff]  ;;  %v15016_v30 = vld [vmem:[%s22865_s3 + $0x44] ss:$104 sps:$4 sm:$0xff]  }
 0x2d7   :  { %v15904_v14 = vpop.eup %15903  ;;  %15923 = vpow2.f32 %v12775_v13  ;;  %13732 = vmatpush3.bf16.msra.mxu0 %v23808_v42  ;;  %8768 = vperm.xlu0 %14624, %v21373_v43   ;;  %v21428_v21 = vpop.permute.xlu1 %7071 }
 0x2d8   :  { %v15906_v16 = vpop.eup %15905  ;;  %13733 = vmatprep.subr.bf16.mxu0 %v6070_v56  ;;  %15925 = vpow2.f32 %v12777_v61  ;;  %v6072_v37 = vpack.c.bf16 %v15904_v14, %v15902_v15  ;;  %8350 = vperm.xlu1 %14625, %v8288_v38   ;;  %v21435_v22 = vpop.f32.mrb[144].mxu0 }
 0x2d9   :  { %v21433_v5 = vpop.eup %15907  ;;  %v6032_v13 = vadd.f32 1.0, %v15906_v16  ;;  %15927 = vpow2.f32 %v12778_v45  ;;  %23809 = vst [vmem:[#allocation115_spill] sm:$0xff] %v21435_v22  ;;  %v21439_v56 = vpop.f32.mrb[145].mxu0 }
 0x2da   :  { %v15910_v43 = vpop.eup %15909  ;;  %15929 = vpow2.f32 %v12780_v7  ;;  %v21437_v2 = vpop.permute.xlu0 %7066  ;;  %23810 = vst [vmem:[#allocation101_spill] sm:$0xff] %v21439_v56 }
 0x2db   :  { %v15912_v61 = vpop.eup %15911  ;;  %15931 = vrcp.f32 %v6032_v13  ;;  %13734 = vmatpush3.bf16.msra.mxu0 %v23811_v58  ;;  %v6073_v25 = vpack.c.bf16 %v21433_v5, %v15910_v43  ;;  %8345 = vperm.xlu0 %14624, %v8287_v44   ;;  %v21445_v23 = vpop.permute.xlu1 %7434  ;;  %v23814_v13 = vpack.c.bf16 %v21259_v33, %v21267_v40 }
 0x2dc   :  { %v21447_v45 = vpop.f32.mrb[146].mxu0  ;;  %v15914_v0 = vpop.eup %15913  ;;  %v6033_v18 = vadd.f32 1.0, %v15912_v61  ;;  %13735 = vmatprep.subr.bf16.mxu0 %v6071_v59  ;;  %15933 = vpow2.f32 %v12779_v3  ;;  %9216 = vperm.xlu1 %14625, %v8288_v38  }
 0x2dd   :  { %23812 = vst [vmem:[#allocation20_spill] sm:$0xff] %v21447_v45  ;;  %v21449_v15 = vpop.f32.mrb[147].mxu0  ;;  %v15916_v7 = vpop.eup %15915  ;;  %v6035_v14 = vadd.f32 1.0, %v15914_v0  ;;  %15935 = vpow2.f32 %v12781_v1  ;;  %v23815_v1 = vld [vmem:[#allocation71_spill] sm:$0xff] }
 0x2de   :  { %23813 = vst [vmem:[#allocation108_spill] sm:$0xff] %v21449_v15  ;;  %v15918_v42 = vpop.eup %15917  ;;  %15937 = vrcp.f32 %v6033_v18  ;;  %v6034_v17 = vadd.f32 1.0, %v15916_v7  ;;  %v21451_v31 = vpop.permute.xlu0 %7429  ;;  %v6378_v61 = vadd.f32 %v23815_v1, %v21033_v51  ;;  %v21463_v18 = vld [vmem:[%s22862_s2 + $0x68] sm:$0xff] }
 0x2df   :  { %v15920_v16 = vpop.eup %15919  ;;  %15939 = vrcp.f32 %v6035_v14  ;;  %v6453_v5 = vadd.f32 1.0, %v15918_v42  ;;  %13736 = vmatpush3.bf16.msra.mxu0 %v23814_v13  ;;  %9211 = vperm.xlu0 %14624, %v8287_v44   ;;  %v21456_v59 = vpop.permute.xlu1 %7444 }
 0x2e0   :  { %v15922_v3 = vpop.eup %15921  ;;  %15941 = vrcp.f32 %v6034_v17  ;;  %v6454_v43 = vadd.f32 1.0, %v15920_v16  ;;  %13737 = vmatprep.subr.bf16.mxu0 %v6072_v37  ;;  %8783 = vperm.xlu1 %14625, %v8288_v38   ;;  %v21465_v33 = vpop.f32.mrb[148].mxu0  ;;  %v23818_v38 = vpack.c.bf16 %v21281_v62, %v21275_v27  ;;  %v23819_v17 = vld [vmem:[#allocation67_spill] sm:$0xff]  ;;  %v12782_v1 = vmul.f32 -1.442695, %v6378_v61 }
 0x2e1   :  { %v15924_v58 = vpop.eup %15923  ;;  %15943 = vrcp.f32 %v6453_v5  ;;  %v6456_v0 = vadd.f32 1.0, %v15922_v3  ;;  %23816 = vst [vmem:[#allocation96_spill] sm:$0xff] %v21465_v33  ;;  %v21469_v37 = vpop.f32.mrb[149].mxu0  ;;  %v6386_v16 = vadd.f32 %v23819_v17, %v21048_v63  ;;  %v21486_v27 = vld [vmem:[%s22862_s2 + $0x60] sm:$0xff]  ;;  %v23825_v33 = vpack.c.bf16 %v21289_v8, %v21299_v55 }
 0x2e2   :  { %v15926_v40 = vpop.eup %15925  ;;  %15945 = vrcp.f32 %v6454_v43  ;;  %v6455_v7 = vadd.f32 1.0, %v15924_v58  ;;  %v21467_v14 = vpop.permute.xlu0 %7439  ;;  %23817 = vst [vmem:[#allocation112_spill] sm:$0xff] %v21469_v37  ;;  %v23821_v58 = vld [vmem:[#allocation16_spill] sm:$0xff]  ;;  %v23869_v37 = vld [vmem:[#allocation38_spill] sm:$0xff] }
 0x2e3   :  { %v15928_v42 = vpop.eup %15927  ;;  %15947 = vrcp.f32 %v6456_v0  ;;  %v6457_v51 = vadd.f32 1.0, %v15926_v40  ;;  %13738 = vmatpush3.bf16.msra.mxu0 %v23818_v38  ;;  %8778 = vperm.xlu0 %14624, %v8287_v44   ;;  %v21476_v5 = vpop.permute.xlu1 %7454  ;;  %v6383_v0 = vadd.f32 %v23821_v58, %v21061_v24  ;;  %v23823_v40 = vld [vmem:[#allocation61_spill] sm:$0xff]  ;;  %v12784_v58 = vmul.f32 -1.442695, %v6386_v16 }
 0x2e4   :  { %v21478_v13 = vpop.f32.mrb[150].mxu0  ;;  %v15930_v3 = vpop.eup %15929  ;;  %15949 = vrcp.f32 %v6455_v7  ;;  %v6458_v43 = vadd.f32 1.0, %v15928_v42  ;;  %13739 = vmatprep.subr.bf16.mxu0 %v6073_v25  ;;  %8360 = vperm.xlu1 %14625, %v21463_v18   ;;  %v6391_v7 = vadd.f32 %v23823_v40, %v21077_v57  ;;  %v23824_v25 = vld [vmem:[#allocation81_spill] sm:$0xff] }
 0x2e5   :  { %23820 = vst [vmem:[#allocation128_spill] sm:$0xff] %v21478_v13  ;;  %v21488_v63 = vpop.f32.mrb[151].mxu0  ;;  %v15932_v62 = vpop.eup %15931  ;;  %15951 = vrcp.f32 %v6457_v51  ;;  %v6460_v44 = vadd.f32 1.0, %v15930_v3  ;;  %v6394_v24 = vadd.f32 %v23824_v25, %v21066_v4  ;;  %v23826_v51 = vld [vmem:[#allocation73_spill] sm:$0xff]  ;;  %v12783_v4 = vmul.f32 -1.442695, %v6383_v0 }
 0x2e6   :  { %23822 = vst [vmem:[#allocation57_spill] sm:$0xff] %v21488_v63  ;;  %v15934_v61 = vpop.eup %15933  ;;  %15953 = vrcp.f32 %v6458_v43  ;;  %v21494_v42 = vpop.permute.xlu0 %7449  ;;  %v6402_v3 = vadd.f32 %v23826_v51, %v21082_v35  ;;  %v23827_v25 = vld [vmem:[#allocation9_spill] sm:$0xff]  ;;  %v12785_v55 = vmul.f32 -1.442695, %v6391_v7 }
 0x2e7   :  { %v15936_v38 = vpop.eup %15935  ;;  %15955 = vrcp.f32 %v6460_v44  ;;  %v6459_v17 = vadd.f32 1.0, %v15934_v61  ;;  %13740 = vmatpush3.bf16.msra.mxu0 %v23825_v33  ;;  %8355 = vperm.xlu0 %14624, %v21486_v27   ;;  %v21502_v57 = vpop.permute.xlu1 %7464  ;;  %v6399_v44 = vadd.f32 %v23827_v25, %v21094_v47  ;;  %v23828_v33 = vld [vmem:[#allocation15_spill] sm:$0xff]  ;;  %v12786_v13 = vmul.f32 -1.442695, %v6394_v24 }
 0x2e8   :  { %v15938_v43 = vpop.eup %15937  ;;  %v6461_v40 = vadd.f32 1.0, %v15936_v38  ;;  %15957 = vpow2.f32 %v12782_v1  ;;  %9226 = vperm.xlu1 %14625, %v21463_v18   ;;  %v6776_v35 = vadd.f32 %v23828_v33, %v21119_v41  ;;  %v21509_v61 = vpop.f32.mrb[152].mxu0  ;;  %v23830_v1 = vld [vmem:[#allocation13_spill] sm:$0xff]  ;;  %v12788_v7 = vmul.f32 -1.442695, %v6402_v3  ;;  %v23832_v41 = vld [vmem:[#allocation78_spill] sm:$0xff] }
 0x2e9   :  { %v15940_v16 = vpop.eup %15939  ;;  %15959 = vrcp.f32 %v6459_v17  ;;  %v6074_v8 = vpack.c.bf16 %v15938_v43, %v15932_v62  ;;  %23829 = vst [vmem:[#allocation110_spill] sm:$0xff] %v21509_v61  ;;  %v6779_v0 = vadd.f32 %v23830_v1, %v21104_v34  ;;  %v21515_v47 = vpop.f32.mrb[153].mxu0  ;;  %v6787_v17 = vadd.f32 %v23832_v41, %v21127_v49 }
 0x2ea   :  { %v15942_v51 = vpop.eup %15941  ;;  %15961 = vrcp.f32 %v6461_v40  ;;  %v21513_v38 = vpop.permute.xlu0 %7459  ;;  %23831 = vst [vmem:[#allocation117_spill] sm:$0xff] %v21515_v47  ;;  %v23834_v40 = vpack.c.bf16 %v21313_v50, %v21304_v53  ;;  %v8292_v53 = vld [vmem:[%s22862_s2 + $0x78] sm:$0xff] }
 0x2eb   :  { %v21517_v25 = vpop.eup %15943  ;;  %15963 = vpow2.f32 %v12784_v58  ;;  %13741 = vmatprep.subr.bf16.mxu0 %v6074_v8  ;;  %v6075_v62 = vpack.c.bf16 %v15940_v16, %v15942_v51  ;;  %9221 = vperm.xlu0 %14624, %v21486_v27   ;;  %v21522_v43 = vpop.permute.xlu1 %7474  ;;  %v12787_v58 = vmul.f32 -1.442695, %v6399_v44  ;;  %v23835_v16 = vld [vmem:[#allocation136_spill] sm:$0xff]  ;;  %v12811_v51 = vmul.f32 -1.442695, %v6776_v35  ;;  %v23839_v44 = vld [vmem:[#allocation39_spill] sm:$0xff] }
 0x2ec   :  { %v21524_v24 = vpop.f32.mrb[154].mxu0  ;;  %v21526_v34 = vpop.eup %15945  ;;  %15965 = vpow2.f32 %v12783_v4  ;;  %13742 = vmatpush3.bf16.msra.mxu0 %v23834_v40  ;;  %v6784_v3 = vadd.f32 %v23835_v16, %v21141_v28  ;;  %8793 = vperm.xlu1 %14625, %v21463_v18   ;;  %v12812_v18 = vmul.f32 -1.442695, %v6779_v0  ;;  %v6792_v1 = vadd.f32 %v23839_v44, %v21161_v10  ;;  %v23841_v40 = vld [vmem:[#allocation48_spill] sm:$0xff]  ;;  %v15008_v10 = vld [vmem:[%s22865_s3 + $0x30] ss:$104 sps:$4 sm:$0xff]  }
 0x2ed   :  { %23833 = vst [vmem:[#allocation125_spill] sm:$0xff] %v21524_v24  ;;  %v21534_v49 = vpop.f32.mrb[148].mxu1  ;;  %v21536_v8 = vpop.f32.mrb[155].mxu0  ;;  %15967 = vpow2.f32 %v12785_v55  ;;  %13743 = vmatprep.subr.bf16.mxu0 %v6075_v62  ;;  %v12814_v62 = vmul.f32 -1.442695, %v6787_v17  ;;  %v6795_v16 = vadd.f32 %v23841_v40, %v21151_v20 }
 0x2ee   :  { %23836 = vst [vmem:[#allocation107_spill] sm:$0xff] %v21534_v49  ;;  %23837 = vst [vmem:[#allocation124_spill] sm:$0xff] %v21536_v8  ;;  %v21538_v33 = vpop.eup %15947  ;;  %v21545_v50 = vpop.f32.mrb[149].mxu1  ;;  %15969 = vpow2.f32 %v12786_v13  ;;  %v12813_v20 = vmul.f32 -1.442695, %v6784_v3 }
 0x2ef   :  { %23838 = vst [vmem:[#allocation52_spill] sm:$0xff] %v21545_v50  ;;  %v21547_v28 = vpop.eup %15949  ;;  %v21551_v41 = vpop.permute.xlu0 %7469  ;;  %15971 = vpow2.f32 %v12788_v7  ;;  %8788 = vperm.xlu0 %14624, %v21486_v27   ;;  %v23843_v7 = vpack.c.bf16 %v21317_v46, %v21357_v11  ;;  %v8291_v27 = vld [vmem:[%s22862_s2 + $0x70] sm:$0xff]  ;;  %v12815_v46 = vmul.f32 -1.442695, %v6792_v1 }
 0x2f0   :  { %v21553_v55 = vpop.f32.mrb[150].mxu1  ;;  %v21555_v35 = vpop.eup %15951  ;;  %15973 = vpow2.f32 %v12787_v58  ;;  %8370 = vperm.xlu1 %14625, %v8292_v53  }
 0x2f1   :  { %23840 = vst [vmem:[#allocation123_spill] sm:$0xff] %v21553_v55  ;;  %v21562_v13 = vpop.permute.xlu1 %7484  ;;  %v21567_v0 = vpop.f32.mrb[151].mxu1  ;;  %13744 = vmatpush3.bf16.msra.mxu0 %v23843_v7  ;;  %15975 = vpow2.f32 %v12811_v51 }
 0x2f2   :  { %23842 = vst [vmem:[#allocation53_spill] sm:$0xff] %v21567_v0  ;;  %v21569_v44 = vpop.eup %15953  ;;  %v21577_v17 = vpop.f32.mrb[152].mxu1  ;;  %15977 = vpow2.f32 %v12812_v18 }
 0x2f3   :  { %23844 = vst [vmem:[#allocation140_spill] sm:$0xff] %v21577_v17  ;;  %v21579_v40 = vpop.eup %15955  ;;  %v21583_v49 = vpop.f32.mrb[153].mxu1  ;;  %15979 = vpow2.f32 %v12814_v62  ;;  %v12816_v17 = vmul.f32 -1.442695, %v6795_v16  ;;  %8365 = vperm.xlu0 %14624, %v8291_v27  }
 0x2f4   :  { %23845 = vst [vmem:[#allocation105_spill] sm:$0xff] %v21583_v49  ;;  %v15958_v58 = vpop.eup %15957  ;;  %v21585_v11 = vpop.permute.xlu0 %7479  ;;  %11935 = vmatmul.mubr.bf16.vlgmr.msra.gmra.mrb[216].mxu0 %v15008_v10  ;;  %15981 = vpow2.f32 %v12813_v20  ;;  %9236 = vperm.xlu1 %14625, %v8292_v53  }
 0x2f5   :  { %v21587_v3 = vpop.f32.mrb[154].mxu1  ;;  %v21589_v7 = vpop.eup %15959  ;;  %v6462_v55 = vadd.f32 1.0, %v15958_v58  ;;  %12016 = vmatprep.mubr.bf16.mxu0 %v15016_v30 }
 0x2f6   :  { %23846 = vst [vmem:[#allocation3_spill] sm:$0xff] %v21587_v3  ;;  %v21591_v50 = vpop.permute.xlu1 %7494  ;;  %v21593_v51 = vpop.f32.mrb[155].mxu1 }
 0x2f7   :  { %23847 = vst [vmem:[#allocation82_spill] sm:$0xff] %v21593_v51  ;;  %v21595_v4 = vpop.eup %15961  ;;  %v21599_v1 = vpop.f32.mrb[156].mxu1  ;;  %15983 = vrcp.f32 %v6462_v55  ;;  %9231 = vperm.xlu0 %14624, %v8291_v27  }
 0x2f8   :  { %23848 = vst [vmem:[#allocation66_spill] sm:$0xff] %v21599_v1  ;;  %v15964_v3 = vpop.eup %15963  ;;  %v21601_v58 = vpop.f32.mrb[157].mxu1  ;;  %15985 = vpow2.f32 %v12815_v46  ;;  %8803 = vperm.xlu1 %14625, %v8292_v53  }
 0x2f9   :  { %23849 = vst [vmem:[#allocation59_spill] sm:$0xff] %v21601_v58  ;;  %v15966_v62 = vpop.eup %15965  ;;  %v6464_v16 = vadd.f32 1.0, %v15964_v3  ;;  %v21603_v49 = vpop.permute.xlu0 %7489  ;;  %15987 = vpow2.f32 %v12816_v17  ;;  %v23854_v17 = vld [vmem:[#allocation64_spill] sm:$0xff] }
 0x2fa   :  { %v21605_v10 = vpop.f32.mrb[158].mxu1  ;;  %v15968_v51 = vpop.eup %15967  ;;  %v6463_v0 = vadd.f32 1.0, %v15966_v62  ;;  %v6803_v24 = vadd.f32 %v23854_v17, %v21171_v12  ;;  %v23859_v17 = vld [vmem:[#allocation142_spill] sm:$0xff] }
 0x2fb   :  { %23850 = vst [vmem:[#allocation94_spill] sm:$0xff] %v21605_v10  ;;  %v21607_v20 = vpop.permute.xlu1 %7504  ;;  %v21609_v18 = vpop.f32.mrb[159].mxu1  ;;  %15989 = vrcp.f32 %v6464_v16  ;;  %v6465_v55 = vadd.f32 1.0, %v15968_v51  ;;  %8798 = vperm.xlu0 %14624, %v8291_v27  }
 0x2fc   :  { %23851 = vst [vmem:[#allocation28_spill] sm:$0xff] %v21609_v18  ;;  %v15970_v1 = vpop.eup %15969  ;;  %v21611_v58 = vpop.f32.mrb[160].mxu1  ;;  %15991 = vrcp.f32 %v6463_v0  ;;  %10032 = vperm.xlu1 %14625, %v21176_v39  }
 0x2fd   :  { %23852 = vst [vmem:[#allocation23_spill] sm:$0xff] %v21611_v58  ;;  %v15972_v3 = vpop.eup %15971  ;;  %v6466_v46 = vadd.f32 1.0, %v15970_v1  ;;  %v21613_v61 = vpop.f32.mrb[161].mxu1  ;;  %15993 = vrcp.f32 %v6465_v55 }
 0x2fe   :  { %23853 = vst [vmem:[#allocation114_spill] sm:$0xff] %v21613_v61  ;;  %v15974_v10 = vpop.eup %15973  ;;  %v6468_v62 = vadd.f32 1.0, %v15972_v3  ;;  %v21617_v8 = vpop.permute.xlu0 %7499  ;;  %v12818_v61 = vmul.f32 -1.442695, %v6803_v24 }
 0x2ff   :  { %v21619_v18 = vpop.f32.mrb[162].mxu1  ;;  %v15976_v16 = vpop.eup %15975  ;;  %15995 = vrcp.f32 %v6466_v46  ;;  %v6467_v53 = vadd.f32 1.0, %v15974_v10 }
 0x300   :  { %23855 = vst [vmem:[#allocation62_spill] sm:$0xff] %v21619_v18  ;;  %v21621_v51 = vpop.permute.xlu1 %7867  ;;  %v21623_v0 = vpop.f32.mrb[163].mxu1  ;;  %15997 = vrcp.f32 %v6468_v62  ;;  %v6886_v58 = vadd.f32 1.0, %v15976_v16  ;;  %v6800_v18 = vadd.f32 %v23859_v17, %v21183_v32  ;;  %v21643_v32 = vld [vmem:[%s22862_s2] sm:$0xff]  ;;  %9599 = vperm.xlu1 %14625, %v21176_v39   ;;  %v23873_v39 = vld [vmem:[#allocation93_spill] sm:$0xff] }
 0x301   :  { %23856 = vst [vmem:[#allocation120_spill] sm:$0xff] %v21621_v51  ;;  %23857 = vst [vmem:[#allocation135_spill] sm:$0xff] %v21623_v0  ;;  %v15978_v1 = vpop.eup %15977  ;;  %v21626_v55 = vpop.f32.mrb[164].mxu1  ;;  %15999 = vrcp.f32 %v6467_v53  ;;  %v23861_v0 = vld [vmem:[#allocation87_spill] sm:$0xff]  ;;  %10027 = vperm.xlu0 %14624, %v21643_v32  }
 0x302   :  { %23858 = vst [vmem:[#allocation55_spill] sm:$0xff] %v21626_v55  ;;  %v15980_v12 = vpop.eup %15979  ;;  %v6887_v3 = vadd.f32 1.0, %v15978_v1  ;;  %v21630_v46 = vpop.f32.mrb[165].mxu1  ;;  %16001 = vrcp.f32 %v6886_v58  ;;  %v6808_v62 = vadd.f32 %v23861_v0, %v21199_v19  ;;  %v23862_v53 = vld [vmem:[#allocation95_spill] sm:$0xff]  ;;  %v23865_v0 = vld [vmem:[#allocation32_spill] sm:$0xff] }
 0x303   :  { %23860 = vst [vmem:[#allocation116_spill] sm:$0xff] %v21630_v46  ;;  %v15982_v27 = vpop.eup %15981  ;;  %v6889_v10 = vadd.f32 1.0, %v15980_v12  ;;  %v21634_v16 = vpop.permute.xlu0 %7862  ;;  %v6811_v1 = vadd.f32 %v23862_v53, %v21191_v26  ;;  %v23866_v12 = vld [vmem:[#allocation85_spill] sm:$0xff]  ;;  %v12817_v63 = vmul.f32 -1.442695, %v6800_v18  ;;  %v23872_v17 = vld [vmem:[#allocation63_spill] sm:$0xff] }
 0x304   :  { %v21636_v47 = vpop.eup %15983  ;;  %16003 = vrcp.f32 %v6887_v3  ;;  %v6888_v55 = vadd.f32 1.0, %v15982_v27  ;;  %v21646_v24 = vpop.permute.xlu1 %7877  ;;  %v6819_v3 = vadd.f32 %v23866_v12, %v23865_v0  ;;  %v12819_v12 = vmul.f32 -1.442695, %v6808_v62  ;;  %v23875_v18 = vld [vmem:[#allocation69_spill] sm:$0xff] }
 0x305   :  { %23863 = vst [vmem:[#allocation113_spill] sm:$0xff] %v21646_v24  ;;  %v21648_v58 = vpop.f32.mrb[156].mxu0  ;;  %v15986_v19 = vpop.eup %15985  ;;  %16005 = vrcp.f32 %v6889_v10  ;;  %v6824_v15 = vadd.f32 %v23873_v39, %v23872_v17  ;;  %9594 = vperm.xlu0 %14624, %v21643_v32   ;;  %v23879_v17 = vld [vmem:[#allocation34_spill] sm:$0xff] }
 0x306   :  { %23864 = vst [vmem:[#allocation119_spill] sm:$0xff] %v21648_v58  ;;  %v21655_v26 = vpop.f32.mrb[166].mxu1  ;;  %v21657_v27 = vpop.f32.mrb[157].mxu0  ;;  %16007 = vrcp.f32 %v6888_v55  ;;  %v6890_v46 = vadd.f32 1.0, %v15986_v19  ;;  %v23870_v58 = vld [vmem:[#allocation37_spill] sm:$0xff]  ;;  %v23876_v19 = vld [vmem:[#allocation54_spill] sm:$0xff] }
 0x307   :  { %23867 = vst [vmem:[#allocation21_spill] sm:$0xff] %v21655_v26  ;;  %23868 = vst [vmem:[#allocation122_spill] sm:$0xff] %v21657_v27  ;;  %v15988_v53 = vpop.eup %15987  ;;  %v6816_v22 = vadd.f32 %v23870_v58, %v23869_v37  ;;  %v21661_v10 = vpop.f32.mrb[167].mxu1  ;;  %16009 = vpow2.f32 %v12818_v61  ;;  %v12820_v55 = vmul.f32 -1.442695, %v6811_v1  ;;  %v6827_v56 = vadd.f32 %v23876_v19, %v23875_v18  ;;  %v16710_v1 = vld [vmem:[%s22862_s2 + $0x8] sm:$0xff] }
 0x308   :  { %23871 = vst [vmem:[#allocation27_spill] sm:$0xff] %v21661_v10  ;;  %v21663_v45 = vpop.eup %15989  ;;  %v6891_v0 = vadd.f32 1.0, %v15988_v53  ;;  %v21667_v26 = vpop.permute.xlu0 %7872  ;;  %16011 = vrcp.f32 %v6890_v46  ;;  %v12822_v62 = vmul.f32 -1.442695, %v6819_v3  ;;  %v23880_v53 = vld [vmem:[#allocation45_spill] sm:$0xff]  ;;  %10898 = vperm.xlu1 %14625, %v16710_v1   ;;  %v23882_v10 = vld [vmem:[#allocation10_spill] sm:$0xff] }
 0x309   :  { %23874 = vst [vmem:[#allocation25_spill] sm:$0xff] %v21667_v26  ;;  %v21669_v27 = vpop.eup %15991  ;;  %v21674_v37 = vpop.permute.xlu1 %7887  ;;  %v6835_v39 = vadd.f32 %v23880_v53, %v23879_v17  ;;  %v12823_v17 = vmul.f32 -1.442695, %v6824_v15  ;;  %v23884_v53 = vld [vmem:[#allocation104_spill] sm:$0xff]  ;;  %v23885_v46 = vld [vmem:[#allocation89_spill] sm:$0xff]  ;;  %10893 = vperm.xlu0 %14624, %v21643_v32   ;;  %v23891_v24 = vld [vmem:[#allocation6_spill] sm:$0xff] }
 0x30a   :  { %23877 = vst [vmem:[#allocation90_spill] sm:$0xff] %v21674_v37  ;;  %v21676_v58 = vpop.f32.mrb[158].mxu0  ;;  %v21678_v61 = vpop.eup %15993  ;;  %16013 = vrcp.f32 %v6891_v0  ;;  %v23883_v0 = vld [vmem:[#allocation70_spill] sm:$0xff]  ;;  %v7209_v9 = vadd.f32 %v23885_v46, %v23884_v53  ;;  %v23888_v46 = vld [vmem:[#allocation65_spill] sm:$0xff]  ;;  %v23904_v26 = vld [vmem:[#allocation43_spill] sm:$0xff] }
 0x30b   :  { %23878 = vst [vmem:[#allocation118_spill] sm:$0xff] %v21676_v58  ;;  %v21687_v18 = vpop.f32.mrb[159].mxu0  ;;  %v21689_v19 = vpop.eup %15995  ;;  %16015 = vpow2.f32 %v12817_v63  ;;  %v12821_v58 = vmul.f32 -1.442695, %v6816_v22  ;;  %v6832_v3 = vadd.f32 %v23883_v0, %v23882_v10  ;;  %v12824_v63 = vmul.f32 -1.442695, %v6827_v56 }
 0x30c   :  { %23881 = vst [vmem:[#allocation121_spill] sm:$0xff] %v21687_v18  ;;  %v21693_v37 = vpop.eup %15997  ;;  %16017 = vpow2.f32 %v12819_v12  ;;  %v21699_v60 = vpop.permute.xlu0 %7882  ;;  %v15013_v15 = vld [vmem:[%s22865_s3 + $0x3c] ss:$104 sps:$4 sm:$0xff]   ;;  %v12826_v12 = vmul.f32 -1.442695, %v6835_v39  ;;  %10465 = vperm.xlu1 %14625, %v16710_v1  }
 0x30d   :  { %23886 = vst [vmem:[#allocation11_spill] sm:$0xff] %v21699_v60  ;;  %v21701_v18 = vpop.eup %15999  ;;  %16019 = vpow2.f32 %v12820_v55  ;;  %v21704_v22 = vpop.permute.xlu1 %7897  ;;  %v23889_v0 = vld [vmem:[#allocation31_spill] sm:$0xff]  ;;  %v12825_v56 = vmul.f32 -1.442695, %v6832_v3  ;;  %v23890_v60 = vld [vmem:[#allocation129_spill] sm:$0xff]  ;;  %11975 = vmatprep.mubr.bf16.mxu1 %v15013_v15  ;;  %10460 = vperm.xlu0 %14624, %v21643_v32   ;;  %v16711_v3 = vld [vmem:[%s22862_s2 + $0x18] sm:$0xff] }
 0x30e   :  { %23887 = vst [vmem:[#allocation138_spill] sm:$0xff] %v21704_v22  ;;  %v16002_v10 = vpop.eup %16001  ;;  %16021 = vpow2.f32 %v12822_v62  ;;  %v7212_v53 = vadd.f32 %v23889_v0, %v23888_v46  ;;  %v7220_v22 = vadd.f32 %v23891_v24, %v23890_v60  ;;  %v12849_v51 = vmul.f32 -1.442695, %v7209_v9  ;;  %v21729_v15 = vpop.f32.mrb[168].mxu1 }
 0x30f   :  { %v16004_v55 = vpop.eup %16003  ;;  %16023 = vpow2.f32 %v12821_v58  ;;  %23893 = vst [vmem:[#allocation46_spill] sm:$0xff] %v21729_v15 }
 0x310   :  { %v16006_v62 = vpop.eup %16005  ;;  %16025 = vpow2.f32 %v12823_v17  ;;  %v6934_v39 = vpack.c.bf16 %v16004_v55, %v16002_v10  ;;  %v21718_v46 = vpop.permute.xlu0 %7892  ;;  %v12850_v60 = vmul.f32 -1.442695, %v7212_v53  ;;  %10042 = vperm.xlu1 %14625, %v16711_v3   ;;  %v12852_v32 = vmul.f32 -1.442695, %v7220_v22 }
 0x311   :  { %v16008_v0 = vpop.eup %16007  ;;  %16027 = vpow2.f32 %v12824_v63  ;;  %v21721_v58 = vpop.permute.xlu1 %7907  ;;  %v23892_v63 = vpack.c.bf16 %v21526_v34, %v21517_v25 }
 0x312   :  { %v16010_v1 = vpop.eup %16009  ;;  %16029 = vpow2.f32 %v12826_v12  ;;  %13751 = vmatprep.subr.bf16.mxu1 %v6934_v39  ;;  %v6935_v24 = vpack.c.bf16 %v16006_v62, %v16008_v0  ;;  %v21733_v12 = vpop.f32.mrb[169].mxu1 }
 0x313   :  { %v16012_v9 = vpop.eup %16011  ;;  %v6893_v17 = vadd.f32 1.0, %v16010_v1  ;;  %16031 = vpow2.f32 %v12825_v56  ;;  %13752 = vmatpush3.bf16.msra.mxu1 %v23892_v63  ;;  %23894 = vst [vmem:[#allocation127_spill] sm:$0xff] %v21733_v12  ;;  %v16712_v56 = vld [vmem:[%s22862_s2 + $0x10] sm:$0xff]  ;;  %v21740_v34 = vpop.f32.mrb[170].mxu1 }
 0x314   :  { %v16014_v30 = vpop.eup %16013  ;;  %16033 = vpow2.f32 %v12849_v51  ;;  %13753 = vmatprep.subr.bf16.mxu1 %v6935_v24  ;;  %v21731_v10 = vpop.permute.xlu0 %7902  ;;  %10037 = vperm.xlu0 %14624, %v16712_v56   ;;  %23895 = vst [vmem:[#allocation134_spill] sm:$0xff] %v21740_v34  ;;  %v9578_v51 = vld [vmem:[%s22862_s2 + $0x10] sm:$0xff]  ;;  %v23897_v24 = vpack.c.bf16 %v21538_v33, %v21547_v28 }
 0x315   :  { %v16016_v53 = vpop.eup %16015  ;;  %16035 = vrcp.f32 %v6893_v17  ;;  %v6936_v55 = vpack.c.bf16 %v16014_v30, %v16012_v9  ;;  %v21738_v25 = vpop.permute.xlu1 %7917  ;;  %9609 = vperm.xlu1 %14625, %v16711_v3   ;;  %v10878_v9 = vld [vmem:[%s22862_s2 + $0x18] sm:$0xff]  ;;  %v23908_v34 = vld [vmem:[#allocation41_spill] sm:$0xff] }
 0x316   :  { %v16018_v22 = vpop.eup %16017  ;;  %v6892_v62 = vadd.f32 1.0, %v16016_v53  ;;  %16037 = vpow2.f32 %v12850_v60  ;;  %v21745_v39 = vpop.f32.mrb[171].mxu1 }
 0x317   :  { %23896 = vst [vmem:[#allocation4_spill] sm:$0xff] %v21745_v39  ;;  %v16020_v0 = vpop.eup %16019  ;;  %v6894_v1 = vadd.f32 1.0, %v16018_v22  ;;  %16039 = vpow2.f32 %v12852_v32  ;;  %13754 = vmatpush3.bf16.msra.mxu1 %v23897_v24  ;;  %v21753_v17 = vpop.f32.mrb[160].mxu0  ;;  %v23903_v24 = vld [vmem:[#allocation12_spill] sm:$0xff]  ;;  %v23913_v39 = vld [vmem:[#allocation126_spill] sm:$0xff] }
 0x318   :  { %23898 = vst [vmem:[#allocation130_spill] sm:$0xff] %v21753_v17  ;;  %v16022_v60 = vpop.eup %16021  ;;  %16041 = vrcp.f32 %v6892_v62  ;;  %v6895_v3 = vadd.f32 1.0, %v16020_v0  ;;  %13755 = vmatprep.subr.bf16.mxu1 %v6936_v55  ;;  %v21755_v63 = vpop.permute.xlu0 %7912  ;;  %9604 = vperm.xlu0 %14624, %v9578_v51   ;;  %v7217_v62 = vadd.f32 %v23904_v26, %v23903_v24  ;;  %v23909_v26 = vld [vmem:[#allocation8_spill] sm:$0xff] }
 0x319   :  { %23899 = vst [vmem:[#allocation137_spill] sm:$0xff] %v21755_v63  ;;  %v21757_v30 = vpop.f32.mrb[161].mxu0  ;;  %v16024_v53 = vpop.eup %16023  ;;  %16043 = vrcp.f32 %v6894_v1  ;;  %v6897_v32 = vadd.f32 1.0, %v16022_v60  ;;  %10908 = vperm.xlu1 %14625, %v10878_v9   ;;  %v23906_v1 = vpack.c.bf16 %v21569_v44, %v21555_v35  ;;  %v7225_v24 = vadd.f32 %v23909_v26, %v23908_v34  ;;  %v23911_v35 = vld [vmem:[#allocation5_spill] sm:$0xff]  ;;  %v23912_v44 = vld [vmem:[#allocation26_spill] sm:$0xff]  ;;  %v21783_v34 = vld [vmem:[%s22862_s2 + $0x28] sm:$0xff] }
 0x31a   :  { %23900 = vst [vmem:[#allocation132_spill] sm:$0xff] %v21757_v30  ;;  %v21759_v33 = vpop.permute.xlu1 %7927  ;;  %v21761_v28 = vpop.f32.mrb[162].mxu0  ;;  %16045 = vrcp.f32 %v6895_v3  ;;  %v6896_v22 = vadd.f32 1.0, %v16024_v53  ;;  %v12851_v30 = vmul.f32 -1.442695, %v7217_v62 }
 0x31b   :  { %23901 = vst [vmem:[#allocation44_spill] sm:$0xff] %v21759_v33  ;;  %23902 = vst [vmem:[#allocation92_spill] sm:$0xff] %v21761_v28  ;;  %v16026_v56 = vpop.eup %16025  ;;  %v21765_v55 = vpop.f32.mrb[163].mxu0  ;;  %16047 = vrcp.f32 %v6897_v32  ;;  %13756 = vmatpush3.bf16.msra.mxu1 %v23906_v1  ;;  %v7228_v1 = vadd.f32 %v23912_v44, %v23911_v35 }
 0x31c   :  { %23905 = vst [vmem:[#allocation14_spill] sm:$0xff] %v21765_v55  ;;  %v16028_v0 = vpop.eup %16027  ;;  %v6898_v17 = vadd.f32 1.0, %v16026_v56  ;;  %16049 = vrcp.f32 %v6896_v22  ;;  %v21770_v28 = vpop.permute.xlu0 %7922  ;;  %10903 = vperm.xlu0 %14624, %v9578_v51  }
 0x31d   :  { %v16030_v60 = vpop.eup %16029  ;;  %v6899_v15 = vadd.f32 1.0, %v16028_v0  ;;  %23907 = vst [vmem:[#allocation131_spill] sm:$0xff] %v21770_v28  ;;  %10475 = vperm.xlu1 %14625, %v10878_v9   ;;  %v12854_v33 = vmul.f32 -1.442695, %v7228_v1  ;;  %v23920_v28 = vld [vmem:[#allocation77_spill] sm:$0xff]  ;;  %v23922_v1 = vld [vmem:[#allocation58_spill] sm:$0xff] }
 0x31e   :  { %v16032_v3 = vpop.eup %16031  ;;  %16051 = vrcp.f32 %v6898_v17  ;;  %v6901_v53 = vadd.f32 1.0, %v16030_v60  ;;  %v21774_v55 = vpop.permute.xlu1 %7937  ;;  %v23914_v17 = vld [vmem:[#allocation56_spill] sm:$0xff] }
 0x31f   :  { %23910 = vst [vmem:[#allocation33_spill] sm:$0xff] %v21774_v55  ;;  %v16034_v32 = vpop.eup %16033  ;;  %16053 = vrcp.f32 %v6899_v15  ;;  %v6900_v56 = vadd.f32 1.0, %v16032_v3  ;;  %v7236_v60 = vadd.f32 %v23914_v17, %v23913_v39  ;;  %v23915_v15 = vld [vmem:[#allocation111_spill] sm:$0xff]  ;;  %v23916_v3 = vld [vmem:[#allocation97_spill] sm:$0xff] }
 0x320   :  { %v16036_v22 = vpop.eup %16035  ;;  %16055 = vrcp.f32 %v6901_v53  ;;  %v7319_v0 = vadd.f32 1.0, %v16034_v32  ;;  %v7233_v62 = vadd.f32 %v23916_v3, %v23915_v15  ;;  %v21787_v12 = vpop.permute.xlu0 %7932  ;;  %v12853_v53 = vmul.f32 -1.442695, %v7225_v24  ;;  %v23917_v32 = vld [vmem:[#allocation99_spill] sm:$0xff]  ;;  %10470 = vperm.xlu0 %14624, %v9578_v51  }
 0x321   :  { %v16038_v26 = vpop.eup %16037  ;;  %16057 = vrcp.f32 %v6900_v56  ;;  %v7241_v44 = vadd.f32 %v23917_v32, %v21381_v48  ;;  %v23919_v56 = vld [vmem:[#allocation91_spill] sm:$0xff]  ;;  %10052 = vperm.xlu1 %14625, %v21783_v34   ;;  %v12856_v51 = vmul.f32 -1.442695, %v7236_v60 }
 0x322   :  { %v16040_v35 = vpop.eup %16039  ;;  %16059 = vrcp.f32 %v7319_v0  ;;  %v7320_v9 = vadd.f32 1.0, %v16038_v26  ;;  %v21791_v39 = vpop.permute.xlu1 %8300  ;;  %v7244_v63 = vadd.f32 %v23920_v28, %v23919_v56  ;;  %v21799_v0 = vld [vmem:[%s22862_s2 + $0x20] sm:$0xff]  ;;  %v23921_v26 = vld [vmem:[#allocation24_spill] sm:$0xff]  ;;  %v7249_v28 = vadd.f32 %v23922_v1, %v21400_v6 }
 0x323   :  { %23918 = vst [vmem:[#allocation17_spill] sm:$0xff] %v21791_v39  ;;  %v16042_v17 = vpop.eup %16041  ;;  %v7322_v55 = vadd.f32 1.0, %v16040_v35  ;;  %16061 = vpow2.f32 %v12851_v30  ;;  %v7252_v15 = vadd.f32 %v23921_v26, %v21386_v52  ;;  %v12855_v30 = vmul.f32 -1.442695, %v7233_v62  ;;  %v23925_v62 = vld [vmem:[#allocation22_spill] sm:$0xff] }
 0x324   :  { %v16044_v24 = vpop.eup %16043  ;;  %16063 = vrcp.f32 %v7320_v9  ;;  %v6937_v48 = vpack.c.bf16 %v16036_v22, %v16042_v17  ;;  %v21805_v35 = vpop.permute.xlu0 %8295  ;;  %v12857_v39 = vmul.f32 -1.442695, %v7241_v44  ;;  %v23923_v9 = vld [vmem:[#allocation76_spill] sm:$0xff]  ;;  %10047 = vperm.xlu0 %14624, %v21799_v0   ;;  %v12858_v6 = vmul.f32 -1.442695, %v7244_v63 }
 0x325   :  { %v16046_v3 = vpop.eup %16045  ;;  %16065 = vrcp.f32 %v7322_v55  ;;  %v7257_v22 = vadd.f32 %v23923_v9, %v21422_v54  ;;  %v23924_v55 = vpack.c.bf16 %v21579_v40, %v21589_v7  ;;  %9619 = vperm.xlu1 %14625, %v21783_v34   ;;  %v12860_v17 = vmul.f32 -1.442695, %v7252_v15 }
 0x326   :  { %v16048_v32 = vpop.eup %16047  ;;  %16067 = vpow2.f32 %v12853_v53  ;;  %13757 = vmatprep.subr.bf16.mxu1 %v6937_v48  ;;  %v6938_v56 = vpack.c.bf16 %v16046_v3, %v16044_v24  ;;  %v21810_v60 = vpop.permute.xlu1 %8310  ;;  %v7260_v53 = vadd.f32 %v23925_v62, %v21408_v29  ;;  %v12859_v48 = vmul.f32 -1.442695, %v7249_v28  ;;  %v23927_v29 = vld [vmem:[#allocation42_spill] sm:$0xff] }
 0x327   :  { %v16050_v52 = vpop.eup %16049  ;;  %16069 = vpow2.f32 %v12854_v33  ;;  %13758 = vmatpush3.bf16.msra.mxu1 %v23924_v55  ;;  %v23926_v33 = vld [vmem:[#allocation79_spill] sm:$0xff]  ;;  %v12861_v63 = vmul.f32 -1.442695, %v7257_v22  ;;  %v7265_v1 = vadd.f32 %v23927_v29, %v21437_v2 }
 0x328   :  { %v16052_v44 = vpop.eup %16051  ;;  %16071 = vpow2.f32 %v12856_v51  ;;  %13759 = vmatprep.subr.bf16.mxu1 %v6938_v56  ;;  %v6939_v54 = vpack.c.bf16 %v16048_v32, %v16050_v52  ;;  %v7268_v26 = vadd.f32 %v23926_v33, %v21428_v21  ;;  %v21820_v3 = vpop.permute.xlu0 %8305  ;;  %9614 = vperm.xlu0 %14624, %v21799_v0   ;;  %v12862_v21 = vmul.f32 -1.442695, %v7260_v53 }
 0x329   :  { %v16054_v24 = vpop.eup %16053  ;;  %16073 = vpow2.f32 %v12855_v30  ;;  %v23928_v30 = vpack.c.bf16 %v21636_v47, %v21595_v4  ;;  %10918 = vperm.xlu1 %14625, %v21783_v34   ;;  %v21833_v32 = vpop.f32.mrb[172].mxu1  ;;  %v12863_v4 = vmul.f32 -1.442695, %v7265_v1  ;;  %v23932_v53 = vpack.c.bf16 %v21663_v45, %v21669_v27 }
 0x32a   :  { %v16056_v40 = vpop.eup %16055  ;;  %16075 = vpow2.f32 %v12857_v39  ;;  %v6940_v7 = vpack.c.bf16 %v16054_v24, %v16052_v44  ;;  %v21825_v51 = vpop.permute.xlu1 %9161  ;;  %23929 = vst [vmem:[#allocation98_spill] sm:$0xff] %v21833_v32  ;;  %v12864_v56 = vmul.f32 -1.442695, %v7268_v26  ;;  %v21859_v24 = vld [vmem:[%s22862_s2 + $0x38] sm:$0xff] }
 0x32b   :  { %v16058_v15 = vpop.eup %16057  ;;  %16077 = vpow2.f32 %v12858_v6  ;;  %13760 = vmatpush3.bf16.msra.mxu1 %v23928_v30  ;;  %v21837_v22 = vpop.f32.mrb[173].mxu1  ;;  %v21879_v30 = vld [vmem:[%s22862_s2 + $0x30] sm:$0xff] }
 0x32c   :  { %v21831_v28 = vpop.eup %16059  ;;  %13761 = vmatprep.subr.bf16.mxu1 %v6939_v54  ;;  %16079 = vpow2.f32 %v12860_v17  ;;  %v6941_v39 = vpack.c.bf16 %v16056_v40, %v16058_v15  ;;  %v21835_v9 = vpop.permute.xlu0 %8315  ;;  %23930 = vst [vmem:[#allocation133_spill] sm:$0xff] %v21837_v22  ;;  %10913 = vperm.xlu0 %14624, %v21799_v0   ;;  %v23937_v15 = vpack.c.bf16 %v21689_v19, %v21678_v61 }
 0x32d   :  { %v16062_v2 = vpop.eup %16061  ;;  %16081 = vpow2.f32 %v12859_v48  ;;  %v21844_v6 = vpop.f32.mrb[174].mxu1  ;;  %10485 = vperm.xlu1 %14625, %v21783_v34  }
 0x32e   :  { %v21839_v52 = vpop.eup %16063  ;;  %v7321_v47 = vadd.f32 1.0, %v16062_v2  ;;  %16083 = vpow2.f32 %v12861_v63  ;;  %v21842_v55 = vpop.permute.xlu1 %8728  ;;  %23931 = vst [vmem:[#allocation75_spill] sm:$0xff] %v21844_v6 }
 0x32f   :  { %v21846_v62 = vpop.eup %16065  ;;  %13762 = vmatpush3.bf16.msra.mxu1 %v23932_v53  ;;  %16085 = vpow2.f32 %v12862_v21  ;;  %v21854_v54 = vpop.f32.mrb[175].mxu1 }
 0x330   :  { %23933 = vst [vmem:[#allocation47_spill] sm:$0xff] %v21854_v54  ;;  %v16068_v17 = vpop.eup %16067  ;;  %16087 = vrcp.f32 %v7321_v47  ;;  %13763 = vmatprep.subr.bf16.mxu1 %v6940_v7  ;;  %v21861_v48 = vpop.f32.mrb[164].mxu0  ;;  %10480 = vperm.xlu0 %14624, %v21799_v0  }
 0x331   :  { %23934 = vst [vmem:[#allocation60_spill] sm:$0xff] %v21861_v48  ;;  %v16070_v45 = vpop.eup %16069  ;;  %v7323_v27 = vadd.f32 1.0, %v16068_v17  ;;  %16089 = vpow2.f32 %v12864_v56  ;;  %v21863_v33 = vpop.permute.xlu0 %9166  ;;  %10062 = vperm.xlu1 %14625, %v21859_v24  }
 0x332   :  { %v21865_v26 = vpop.f32.mrb[165].mxu0  ;;  %v16072_v34 = vpop.eup %16071  ;;  %v7324_v40 = vadd.f32 1.0, %v16070_v45  ;;  %16091 = vpow2.f32 %v12863_v4  ;;  %v23939_v4 = vld [vmem:[#allocation36_spill] sm:$0xff] }
 0x333   :  { %23935 = vst [vmem:[#allocation139_spill] sm:$0xff] %v21865_v26  ;;  %v21868_v7 = vpop.permute.xlu1 %9171  ;;  %v21870_v63 = vpop.f32.mrb[166].mxu0  ;;  %16093 = vrcp.f32 %v7323_v27  ;;  %v7326_v1 = vadd.f32 1.0, %v16072_v34  ;;  %13764 = vmatpush3.bf16.msra.mxu1 %v23937_v15  ;;  %v7642_v61 = vadd.f32 %v23939_v4, %v21451_v31  ;;  %v15011_v27 = vld [vmem:[%s22865_s3 + $0x38] ss:$104 sps:$4 sm:$0xff]   ;;  %v23942_v4 = vld [vmem:[#allocation49_spill] sm:$0xff] }
 0x334   :  { %23936 = vst [vmem:[#allocation84_spill] sm:$0xff] %v21870_v63  ;;  %v16074_v29 = vpop.eup %16073  ;;  %v21881_v21 = vpop.f32.mrb[167].mxu0  ;;  %16095 = vrcp.f32 %v7324_v40  ;;  %13765 = vmatprep.subr.bf16.mxu1 %v6941_v39  ;;  %10057 = vperm.xlu0 %14624, %v21879_v30   ;;  %v23940_v40 = vpack.c.bf16 %v21693_v37, %v21701_v18  ;;  %v23943_v18 = vld [vmem:[#allocation102_spill] sm:$0xff] }
 0x335   :  { %23938 = vst [vmem:[#allocation40_spill] sm:$0xff] %v21881_v21  ;;  %v16076_v0 = vpop.eup %16075  ;;  %v7325_v2 = vadd.f32 1.0, %v16074_v29  ;;  %16097 = vrcp.f32 %v7326_v1  ;;  %v21885_v19 = vpop.permute.xlu0 %8733  ;;  %9629 = vperm.xlu1 %14625, %v21859_v24   ;;  %v23941_v1 = vld [vmem:[#allocation50_spill] sm:$0xff] }
 0x336   :  { %v16078_v56 = vpop.eup %16077  ;;  %v7327_v47 = vadd.f32 1.0, %v16076_v0  ;;  %v7645_v15 = vadd.f32 %v23941_v1, %v21445_v23 }
 0x337   :  { %v16080_v53 = vpop.eup %16079  ;;  %16099 = vrcp.f32 %v7325_v2  ;;  %v7328_v17 = vadd.f32 1.0, %v16078_v56  ;;  %v21888_v45 = vpop.permute.xlu1 %8738  ;;  %13766 = vmatpush3.bf16.msra.mxu1 %v23940_v40  ;;  %v12887_v56 = vmul.f32 -1.442695, %v7642_v61  ;;  %v23944_v61 = vld [vmem:[#allocation51_spill] sm:$0xff] }
 0x338   :  { %v16082_v39 = vpop.eup %16081  ;;  %16101 = vrcp.f32 %v7327_v47  ;;  %v7330_v34 = vadd.f32 1.0, %v16080_v53  ;;  %v7653_v47 = vadd.f32 %v23942_v4, %v21456_v59  ;;  %9624 = vperm.xlu0 %14624, %v21879_v30   ;;  %v23946_v4 = vld [vmem:[#allocation100_spill] sm:$0xff] }
 0x339   :  { %v16084_v31 = vpop.eup %16083  ;;  %16103 = vrcp.f32 %v7328_v17  ;;  %v7329_v29 = vadd.f32 1.0, %v16082_v39  ;;  %v21901_v53 = vpop.permute.xlu0 %9176  ;;  %v7650_v17 = vadd.f32 %v23943_v18, %v21467_v14  ;;  %10928 = vperm.xlu1 %14625, %v21859_v24   ;;  %v23945_v14 = vld [vmem:[#allocation80_spill] sm:$0xff] }
 0x33a   :  { %v16086_v0 = vpop.eup %16085  ;;  %16105 = vrcp.f32 %v7330_v34  ;;  %v7331_v2 = vadd.f32 1.0, %v16084_v31  ;;  %11976 = vmatmul.mubr.bf16.vlgmr.msra.gmra.mrb[224].mxu1 %v15011_v27  ;;  %v7658_v34 = vadd.f32 %v23944_v61, %v21494_v42  ;;  %v7661_v1 = vadd.f32 %v23945_v14, %v21476_v5 }
 0x33b   :  { %v21903_v44 = vpop.eup %16087  ;;  %16107 = vrcp.f32 %v7329_v29  ;;  %v7332_v37 = vadd.f32 1.0, %v16086_v0  ;;  %v21908_v23 = vpop.permute.xlu1 %8320  ;;  %v12888_v29 = vmul.f32 -1.442695, %v7645_v15  ;;  %v7669_v42 = vadd.f32 %v23946_v4, %v21502_v57  ;;  %v23950_v4 = vld [vmem:[#allocation29_spill] sm:$0xff] }
 0x33c   :  { %v16090_v39 = vpop.eup %16089  ;;  %16109 = vrcp.f32 %v7331_v2  ;;  %v12890_v2 = vmul.f32 -1.442695, %v7653_v47  ;;  %v12889_v59 = vmul.f32 -1.442695, %v7650_v17  ;;  %10923 = vperm.xlu0 %14624, %v21879_v30   ;;  %v23948_v47 = vld [vmem:[#allocation109_spill] sm:$0xff] }
 0x33d   :  { %v16092_v40 = vpop.eup %16091  ;;  %16111 = vrcp.f32 %v7332_v37  ;;  %v7334_v31 = vadd.f32 1.0, %v16090_v39  ;;  %v21921_v18 = vpop.permute.xlu0 %8743  ;;  %v23947_v37 = vld [vmem:[#allocation86_spill] sm:$0xff]  ;;  %v7674_v57 = vadd.f32 %v23948_v47, %v21551_v41  ;;  %10495 = vperm.xlu1 %14625, %v21859_v24   ;;  %v12894_v41 = vmul.f32 -1.442695, %v7669_v42 }
 0x33e   :  { %v21917_v27 = vpop.eup %16093  ;;  %v7333_v0 = vadd.f32 1.0, %v16092_v40  ;;  %16113 = vpow2.f32 %v12887_v56  ;;  %v7666_v15 = vadd.f32 %v23947_v37, %v21513_v38  ;;  %v12891_v56 = vmul.f32 -1.442695, %v7658_v34  ;;  %v23952_v42 = vld [vmem:[#allocation74_spill] sm:$0xff]  ;;  %v21975_v24 = vpop.f32.mrb[176].mxu1 }
 0x33f   :  { %v21923_v61 = vpop.eup %16095  ;;  %16115 = vrcp.f32 %v7334_v31  ;;  %v21928_v5 = vpop.permute.xlu1 %9186  ;;  %v12892_v38 = vmul.f32 -1.442695, %v7661_v1  ;;  %v23949_v31 = vld [vmem:[#allocation103_spill] sm:$0xff]  ;;  %v7685_v37 = vadd.f32 %v23950_v4, %v21562_v13  ;;  %v7682_v13 = vadd.f32 %v23952_v42, %v21585_v11  ;;  %23954 = vst [vmem:[#allocation35_spill] sm:$0xff] %v21975_v24 }
 0x340   :  { %v21930_v39 = vpop.eup %16097  ;;  %16117 = vrcp.f32 %v7333_v0  ;;  %v7677_v14 = vadd.f32 %v23949_v31, %v21522_v43  ;;  %v21944_v0 = vld [vmem:[%s22862_s2 + $0x48] sm:$0xff]  ;;  %v12893_v43 = vmul.f32 -1.442695, %v7666_v15  ;;  %10490 = vperm.xlu0 %14624, %v21879_v30   ;;  %v21983_v48 = vpop.f32.mrb[177].mxu1 }
 0x341   :  { %v21937_v17 = vpop.eup %16099  ;;  %16119 = vpow2.f32 %v12888_v29  ;;  %v21952_v29 = vpop.permute.xlu0 %9181  ;;  %10072 = vperm.xlu1 %14625, %v21944_v0   ;;  %v12898_v42 = vmul.f32 -1.442695, %v7685_v37  ;;  %23955 = vst [vmem:[#allocation141_spill] sm:$0xff] %v21983_v48 }
 0x342   :  { %v21946_v34 = vpop.eup %16101  ;;  %16121 = vpow2.f32 %v12890_v2  ;;  %v12895_v2 = vmul.f32 -1.442695, %v7674_v57  ;;  %v12896_v15 = vmul.f32 -1.442695, %v7677_v14  ;;  %v21999_v48 = vpop.f32.mrb[168].mxu0 }
 0x343   :  { %v21954_v1 = vpop.eup %16103  ;;  %16123 = vpow2.f32 %v12889_v59  ;;  %v21957_v47 = vpop.permute.xlu1 %8753  ;;  %v21969_v59 = vld [vmem:[%s22862_s2 + $0x40] sm:$0xff]  ;;  %23959 = vst [vmem:[#allocation16_spill] sm:$0xff] %v21999_v48 }
 0x344   :  { %23951 = vst [vmem:[#allocation72_spill] sm:$0xff] %v21957_v47  ;;  %v21959_v31 = vpop.eup %16105  ;;  %16125 = vpow2.f32 %v12891_v56  ;;  %v23953_v56 = vld [vmem:[#allocation19_spill] sm:$0xff]  ;;  %10067 = vperm.xlu0 %14624, %v21969_v59  }
 0x345   :  { %v21971_v30 = vpop.eup %16107  ;;  %16127 = vpow2.f32 %v12892_v38  ;;  %v7690_v57 = vadd.f32 %v23953_v56, %v21603_v49  ;;  %v21981_v40 = vpop.permute.xlu0 %8748  ;;  %9639 = vperm.xlu1 %14625, %v21944_v0  }
 0x346   :  { %v21977_v11 = vpop.eup %16109  ;;  %16129 = vpow2.f32 %v12894_v41  ;;  %v21990_v49 = vpop.f32.mrb[178].mxu1  ;;  %v12897_v41 = vmul.f32 -1.442695, %v7682_v13 }
 0x347   :  { %v21985_v63 = vpop.eup %16111  ;;  %16131 = vpow2.f32 %v12893_v43  ;;  %v21988_v38 = vpop.permute.xlu1 %8330  ;;  %23957 = vst [vmem:[#allocation71_spill] sm:$0xff] %v21990_v49  ;;  %v12899_v43 = vmul.f32 -1.442695, %v7690_v57 }
 0x348   :  { %23956 = vst [vmem:[#allocation83_spill] sm:$0xff] %v21988_v38  ;;  %v16114_v14 = vpop.eup %16113  ;;  %16133 = vpow2.f32 %v12895_v2  ;;  %v21995_v56 = vpop.f32.mrb[179].mxu1  ;;  %9634 = vperm.xlu0 %14624, %v21969_v59  }
 0x349   :  { %23958 = vst [vmem:[#allocation67_spill] sm:$0xff] %v21995_v56  ;;  %v21997_v4 = vpop.eup %16115  ;;  %v7752_v24 = vadd.f32 1.0, %v16114_v14  ;;  %16135 = vpow2.f32 %v12896_v15  ;;  %v22003_v49 = vpop.permute.xlu0 %8325  ;;  %10938 = vperm.xlu1 %14625, %v21944_v0  }
 0x34a   :  { %v22001_v32 = vpop.eup %16117  ;;  %16137 = vpow2.f32 %v12898_v42  ;;  %23960 = vst [vmem:[#allocation61_spill] sm:$0xff] %v22003_v49  ;;  %v22005_v2 = vpop.f32.mrb[169].mxu0  ;;  %v23991_v49 = vld [vmem:[#allocation101_spill] sm:$0xff] }
 0x34b   :  { %23961 = vst [vmem:[#allocation81_spill] sm:$0xff] %v22005_v2  ;;  %v16120_v13 = vpop.eup %16119  ;;  %16139 = vrcp.f32 %v7752_v24  ;;  %v22010_v56 = vpop.permute.xlu1 %9196 }
 0x34c   :  { %23962 = vst [vmem:[#allocation73_spill] sm:$0xff] %v22010_v56  ;;  %v22012_v15 = vpop.f32.mrb[170].mxu0  ;;  %v16122_v57 = vpop.eup %16121  ;;  %v7753_v14 = vadd.f32 1.0, %v16120_v13  ;;  %16141 = vpow2.f32 %v12897_v41  ;;  %10933 = vperm.xlu0 %14624, %v21969_v59   ;;  %v23983_v56 = vld [vmem:[#allocation18_spill] sm:$0xff] }
 0x34d   :  { %23963 = vst [vmem:[#allocation9_spill] sm:$0xff] %v22012_v15  ;;  %v22015_v42 = vpop.f32.mrb[171].mxu0  ;;  %v16124_v48 = vpop.eup %16123  ;;  %v7755_v2 = vadd.f32 1.0, %v16122_v57  ;;  %16143 = vpow2.f32 %v12899_v43  ;;  %10505 = vperm.xlu1 %14625, %v21944_v0  }
 0x34e   :  { %23964 = vst [vmem:[#allocation15_spill] sm:$0xff] %v22015_v42  ;;  %v16126_v24 = vpop.eup %16125  ;;  %16145 = vrcp.f32 %v7753_v14  ;;  %v7754_v6 = vadd.f32 1.0, %v16124_v48  ;;  %v22017_v37 = vpop.permute.xlu0 %9191  ;;  %v23967_v42 = vld [vmem:[#allocation68_spill] sm:$0xff] }
 0x34f   :  { %23965 = vst [vmem:[#allocation13_spill] sm:$0xff] %v22017_v37  ;;  %v16128_v21 = vpop.eup %16127  ;;  %16147 = vrcp.f32 %v7755_v2  ;;  %v7756_v26 = vadd.f32 1.0, %v16126_v24  ;;  %v22020_v15 = vpop.permute.xlu1 %8763  ;;  %v7693_v54 = vadd.f32 %v23967_v42, %v21591_v50  ;;  %v22028_v2 = vld [vmem:[%s22862_s2 + $0x58] sm:$0xff]  ;;  %v23982_v37 = vld [vmem:[#allocation113_spill] sm:$0xff] }
 0x350   :  { %23966 = vst [vmem:[#allocation78_spill] sm:$0xff] %v22020_v15  ;;  %v16130_v41 = vpop.eup %16129  ;;  %16149 = vrcp.f32 %v7754_v6  ;;  %v7757_v13 = vadd.f32 1.0, %v16128_v21  ;;  %v22030_v57 = vpop.f32.mrb[180].mxu1  ;;  %10500 = vperm.xlu0 %14624, %v21969_v59  }
 0x351   :  { %v16132_v43 = vpop.eup %16131  ;;  %16151 = vrcp.f32 %v7756_v26  ;;  %v7759_v48 = vadd.f32 1.0, %v16130_v41  ;;  %23968 = vst [vmem:[#allocation136_spill] sm:$0xff] %v22030_v57  ;;  %v22034_v21 = vpop.f32.mrb[181].mxu1  ;;  %v23971_v26 = vld [vmem:[#allocation30_spill] sm:$0xff]  ;;  %10082 = vperm.xlu1 %14625, %v22028_v2  }
 0x352   :  { %v16134_v14 = vpop.eup %16133  ;;  %16153 = vrcp.f32 %v7757_v13  ;;  %v7758_v24 = vadd.f32 1.0, %v16132_v43  ;;  %v22032_v6 = vpop.permute.xlu0 %8758  ;;  %23970 = vst [vmem:[#allocation48_spill] sm:$0xff] %v22034_v21  ;;  %v7701_v42 = vadd.f32 %v23971_v26, %v21607_v20  ;;  %v12900_v43 = vmul.f32 -1.442695, %v7693_v54  ;;  %v23979_v26 = vld [vmem:[#allocation106_spill] sm:$0xff] }
 0x353   :  { %23969 = vst [vmem:[#allocation39_spill] sm:$0xff] %v22032_v6  ;;  %v16136_v50 = vpop.eup %16135  ;;  %16155 = vrcp.f32 %v7759_v48  ;;  %v7760_v0 = vadd.f32 1.0, %v16134_v14  ;;  %v22039_v41 = vpop.permute.xlu1 %8340  ;;  %v23974_v6 = vld [vmem:[#allocation7_spill] sm:$0xff]  ;;  %v22049_v48 = vld [vmem:[%s22862_s2 + $0x50] sm:$0xff] }
 0x354   :  { %23972 = vst [vmem:[#allocation64_spill] sm:$0xff] %v22039_v41  ;;  %v22041_v22 = vpop.f32.mrb[182].mxu1  ;;  %v16138_v57 = vpop.eup %16137  ;;  %16157 = vrcp.f32 %v7758_v24  ;;  %v7761_v13 = vadd.f32 1.0, %v16136_v50  ;;  %v7698_v15 = vadd.f32 %v23974_v6, %v21617_v8  ;;  %v8075_v24 = vadd.f32 %v21402_v36, %v21634_v16  ;;  %v23978_v6 = vld [vmem:[#allocation120_spill] sm:$0xff]  ;;  %10077 = vperm.xlu0 %14624, %v22049_v48  }
 0x355   :  { %23973 = vst [vmem:[#allocation142_spill] sm:$0xff] %v22041_v22  ;;  %v22051_v20 = vpop.f32.mrb[183].mxu1  ;;  %v16140_v59 = vpop.eup %16139  ;;  %16159 = vrcp.f32 %v7760_v0  ;;  %v7763_v14 = vadd.f32 1.0, %v16138_v57  ;;  %v8078_v22 = vadd.f32 %v23979_v26, %v23978_v6  ;;  %v12902_v57 = vmul.f32 -1.442695, %v7701_v42  ;;  %v23986_v26 = vld [vmem:[#allocation25_spill] sm:$0xff]  ;;  %9649 = vperm.xlu1 %14625, %v22028_v2  }
 0x356   :  { %23975 = vst [vmem:[#allocation87_spill] sm:$0xff] %v22051_v20  ;;  %v22055_v50 = vpop.f32.mrb[172].mxu0  ;;  %v22057_v54 = vpop.f32.mrb[184].mxu1  ;;  %16161 = vrcp.f32 %v7761_v13  ;;  %v8086_v36 = vadd.f32 %v23983_v56, %v23982_v37  ;;  %v12901_v6 = vmul.f32 -1.442695, %v7698_v15 }
 0x357   :  { %23976 = vst [vmem:[#allocation95_spill] sm:$0xff] %v22055_v50  ;;  %23977 = vst [vmem:[#allocation32_spill] sm:$0xff] %v22057_v54  ;;  %v16142_v8 = vpop.eup %16141  ;;  %v22061_v21 = vpop.permute.xlu0 %8335  ;;  %16163 = vrcp.f32 %v7763_v14 }
 0x358   :  { %23980 = vst [vmem:[#allocation85_spill] sm:$0xff] %v22061_v21  ;;  %v22063_v41 = vpop.f32.mrb[173].mxu0  ;;  %v16144_v20 = vpop.eup %16143  ;;  %v7762_v0 = vadd.f32 1.0, %v16142_v8  ;;  %16165 = vpow2.f32 %v12900_v43  ;;  %v23987_v21 = vld [vmem:[#allocation88_spill] sm:$0xff]  ;;  %v12925_v8 = vmul.f32 -1.442695, %v8075_v24  ;;  %9644 = vperm.xlu0 %14624, %v22049_v48  }
 0x359   :  { %23981 = vst [vmem:[#allocation38_spill] sm:$0xff] %v22063_v41  ;;  %v22068_v16 = vpop.permute.xlu1 %9206  ;;  %v22070_v54 = vpop.f32.mrb[185].mxu1  ;;  %v7764_v50 = vadd.f32 1.0, %v16144_v20  ;;  %v8083_v41 = vadd.f32 %v23987_v21, %v23986_v26  ;;  %v12926_v21 = vmul.f32 -1.442695, %v8078_v22  ;;  %v23993_v20 = vld [vmem:[#allocation90_spill] sm:$0xff]  ;;  %10948 = vperm.xlu1 %14625, %v22028_v2  }
 0x35a   :  { %23984 = vst [vmem:[#allocation37_spill] sm:$0xff] %v22068_v16  ;;  %23985 = vst [vmem:[#allocation63_spill] sm:$0xff] %v22070_v54  ;;  %v16146_v13 = vpop.eup %16145  ;;  %v22075_v14 = vpop.f32.mrb[174].mxu0  ;;  %16167 = vrcp.f32 %v7762_v0  ;;  %v23990_v16 = vld [vmem:[#allocation11_spill] sm:$0xff]  ;;  %v23994_v26 = vld [vmem:[#allocation108_spill] sm:$0xff] }
 0x35b   :  { %23988 = vst [vmem:[#allocation93_spill] sm:$0xff] %v22075_v14  ;;  %v22077_v42 = vpop.f32.mrb[186].mxu1  ;;  %v16148_v37 = vpop.eup %16147  ;;  %v7800_v56 = vpack.c.bf16 %v16146_v13, %v16140_v59  ;;  %v8091_v54 = vadd.f32 %v23991_v49, %v23990_v16  ;;  %16169 = vrcp.f32 %v7764_v50  ;;  %v8094_v47 = vadd.f32 %v23994_v26, %v23993_v20  ;;  %v23996_v49 = vld [vmem:[#allocation138_spill] sm:$0xff]  ;;  %v23997_v16 = vld [vmem:[#allocation20_spill] sm:$0xff] }
 0x35c   :  { %23989 = vst [vmem:[#allocation69_spill] sm:$0xff] %v22077_v42  ;;  %v22081_v38 = vpop.f32.mrb[175].mxu0  ;;  %v22083_v43 = vpop.f32.mrb[187].mxu1  ;;  %16171 = vpow2.f32 %v12902_v57  ;;  %v12928_v24 = vmul.f32 -1.442695, %v8086_v36  ;;  %v8102_v13 = vadd.f32 %v23997_v16, %v23996_v49  ;;  %v23999_v20 = vpack.c.bf16 %v21839_v52, %v21831_v28  ;;  %v24000_v57 = vld [vmem:[#allocation115_spill] sm:$0xff]  ;;  %10943 = vperm.xlu0 %14624, %v22049_v48  }
 0x35d   :  { %23992 = vst [vmem:[#allocation54_spill] sm:$0xff] %v22083_v43  ;;  %v16150_v15 = vpop.eup %16149  ;;  %v22087_v14 = vpop.permute.xlu0 %9201  ;;  %13773 = vmatprep.subr.bf16.mxu0 %v7800_v56  ;;  %16173 = vpow2.f32 %v12901_v6  ;;  %v12927_v26 = vmul.f32 -1.442695, %v8083_v41  ;;  %v12929_v16 = vmul.f32 -1.442695, %v8091_v54  ;;  %v24007_v54 = vld [vmem:[#allocation57_spill] sm:$0xff]  ;;  %10515 = vperm.xlu1 %14625, %v22028_v2  }
 0x35e   :  { %v22089_v42 = vpop.f32.mrb[176].mxu0  ;;  %v16152_v0 = vpop.eup %16151  ;;  %v7801_v59 = vpack.c.bf16 %v16148_v37, %v16150_v15  ;;  %13774 = vmatpush3.bf16.msra.mxu0 %v23999_v20  ;;  %v8099_v37 = vadd.f32 %v24000_v57, %v21718_v46  ;;  %16175 = vpow2.f32 %v12925_v8  ;;  %v12930_v52 = vmul.f32 -1.442695, %v8094_v47  ;;  %v24005_v46 = vld [vmem:[#allocation112_spill] sm:$0xff] }
 0x35f   :  { %23995 = vst [vmem:[#allocation34_spill] sm:$0xff] %v22089_v42  ;;  %v22094_v43 = vpop.permute.xlu1 %8773  ;;  %v22096_v22 = vpop.f32.mrb[188].mxu1  ;;  %16177 = vpow2.f32 %v12926_v21  ;;  %v8107_v41 = vadd.f32 %v24005_v46, %v21731_v10  ;;  %v24009_v10 = vpack.c.bf16 %v21846_v62, %v21903_v44 }
 0x360   :  { %23998 = vst [vmem:[#allocation45_spill] sm:$0xff] %v22096_v22  ;;  %v16154_v50 = vpop.eup %16153  ;;  %v22104_v36 = vpop.f32.mrb[177].mxu0  ;;  %13775 = vmatprep.subr.bf16.mxu0 %v7801_v59  ;;  %16179 = vpow2.f32 %v12928_v24  ;;  %v8110_v59 = vadd.f32 %v24007_v54, %v21721_v58  ;;  %v12931_v46 = vmul.f32 -1.442695, %v8099_v37  ;;  %10510 = vperm.xlu0 %14624, %v22049_v48   ;;  %v22169_v48 = vld [vmem:[%s22862_s2 + $0x60] sm:$0xff] }
 0x361   :  { %24001 = vst [vmem:[#allocation10_spill] sm:$0xff] %v22104_v36  ;;  %v22106_v56 = vpop.f32.mrb[189].mxu1  ;;  %v16156_v15 = vpop.eup %16155  ;;  %v7802_v49 = vpack.c.bf16 %v16154_v50, %v16152_v0  ;;  %v12932_v0 = vmul.f32 -1.442695, %v8102_v13  ;;  %16181 = vpow2.f32 %v12927_v26  ;;  %v22141_v26 = vld [vmem:[%s22862_s2 + $0x68] sm:$0xff] }
 0x362   :  { %24002 = vst [vmem:[#allocation70_spill] sm:$0xff] %v22106_v56  ;;  %v22108_v6 = vpop.f32.mrb[178].mxu0  ;;  %v22110_v22 = vpop.f32.mrb[190].mxu1  ;;  %13776 = vmatpush3.bf16.msra.mxu0 %v24009_v10  ;;  %16183 = vpow2.f32 %v12929_v16  ;;  %v12933_v37 = vmul.f32 -1.442695, %v8107_v41  ;;  %10092 = vperm.xlu1 %14625, %v22141_v26  }
 0x363   :  { %24003 = vst [vmem:[#allocation104_spill] sm:$0xff] %v22108_v6  ;;  %24004 = vst [vmem:[#allocation89_spill] sm:$0xff] %v22110_v22  ;;  %v16158_v28 = vpop.eup %16157  ;;  %v22114_v20 = vpop.permute.xlu0 %8768  ;;  %13777 = vmatprep.subr.bf16.mxu0 %v7802_v49  ;;  %16185 = vpow2.f32 %v12930_v52  ;;  %v24016_v52 = vpack.c.bf16 %v21923_v61, %v21917_v27  ;;  %v24036_v6 = vld [vmem:[#allocation131_spill] sm:$0xff] }
 0x364   :  { %v22116_v57 = vpop.f32.mrb[179].mxu0  ;;  %v22118_v56 = vpop.eup %16159  ;;  %v7803_v8 = vpack.c.bf16 %v16156_v15, %v16158_v28  ;;  %16187 = vpow2.f32 %v12932_v0  ;;  %10087 = vperm.xlu0 %14624, %v22169_v48  }
 0x365   :  { %24006 = vst [vmem:[#allocation65_spill] sm:$0xff] %v22116_v57  ;;  %v22123_v50 = vpop.permute.xlu1 %8350  ;;  %v22125_v47 = vpop.f32.mrb[191].mxu1  ;;  %16189 = vpow2.f32 %v12931_v46 }
 0x366   :  { %24008 = vst [vmem:[#allocation31_spill] sm:$0xff] %v22125_v47  ;;  %v16162_v21 = vpop.eup %16161  ;;  %v22131_v24 = vpop.f32.mrb[180].mxu0  ;;  %13778 = vmatpush3.bf16.msra.mxu0 %v24016_v52  ;;  %9659 = vperm.xlu1 %14625, %v22141_v26  }
 0x367   :  { %24010 = vst [vmem:[#allocation129_spill] sm:$0xff] %v22131_v24  ;;  %v22133_v13 = vpop.f32.mrb[192].mxu1  ;;  %v22135_v58 = vpop.eup %16163  ;;  %v7804_v15 = vpack.c.bf16 %v16162_v21, %v22118_v56  ;;  %v12934_v56 = vmul.f32 -1.442695, %v8110_v59  ;;  %13779 = vmatprep.subr.bf16.mxu0 %v7803_v8 }
 0x368   :  { %24011 = vst [vmem:[#allocation6_spill] sm:$0xff] %v22133_v13  ;;  %v22143_v62 = vpop.f32.mrb[181].mxu0  ;;  %v22145_v44 = vpop.f32.mrb[193].mxu1  ;;  %9654 = vperm.xlu0 %14624, %v22169_v48  }
 0x369   :  { %24012 = vst [vmem:[#allocation12_spill] sm:$0xff] %v22143_v62  ;;  %24013 = vst [vmem:[#allocation43_spill] sm:$0xff] %v22145_v44  ;;  %v16166_v2 = vpop.eup %16165  ;;  %v22147_v28 = vpop.permute.xlu0 %8345 }
 0x36a   :  { %v22149_v54 = vpop.f32.mrb[182].mxu0  ;;  %v22151_v49 = vpop.eup %16167  ;;  %v7765_v16 = vadd.f32 1.0, %v16166_v2  ;;  %10958 = vperm.xlu1 %14625, %v22141_v26  }
 0x36b   :  { %24014 = vst [vmem:[#allocation41_spill] sm:$0xff] %v22149_v54  ;;  %v22154_v21 = vpop.permute.xlu1 %9216  ;;  %v22156_v10 = vpop.f32.mrb[194].mxu1  ;;  %v7805_v41 = vpack.c.bf16 %v22135_v58, %v22151_v49 }
 0x36c   :  { %24015 = vst [vmem:[#allocation8_spill] sm:$0xff] %v22156_v10  ;;  %v22158_v13 = vpop.eup %16169  ;;  %v22171_v0 = vpop.f32.mrb[183].mxu0  ;;  %16191 = vrcp.f32 %v7765_v16  ;;  %10953 = vperm.xlu0 %14624, %v22169_v48  }
 0x36d   :  { %24017 = vst [vmem:[#allocation5_spill] sm:$0xff] %v22171_v0  ;;  %v22173_v59 = vpop.f32.mrb[195].mxu1  ;;  %v16172_v2 = vpop.eup %16171  ;;  %16193 = vpow2.f32 %v12933_v37 }
 0x36e   :  { %24018 = vst [vmem:[#allocation26_spill] sm:$0xff] %v22173_v59  ;;  %v22175_v27 = vpop.f32.mrb[184].mxu0  ;;  %v22177_v61 = vpop.f32.mrb[196].mxu1  ;;  %v7767_v58 = vadd.f32 1.0, %v16172_v2  ;;  %16195 = vpow2.f32 %v12934_v56  ;;  %v24023_v2 = vpack.c.bf16 %v21930_v39, %v21937_v17  ;;  %v24028_v39 = vld [vmem:[#allocation128_spill] sm:$0xff]  ;;  %10525 = vperm.xlu1 %14625, %v22141_v26   ;;  %v24044_v26 = vld [vmem:[#allocation17_spill] sm:$0xff] }
 0x36f   :  { %24019 = vst [vmem:[#allocation126_spill] sm:$0xff] %v22175_v27  ;;  %24020 = vst [vmem:[#allocation56_spill] sm:$0xff] %v22177_v61  ;;  %v16174_v46 = vpop.eup %16173  ;;  %v22179_v49 = vpop.permute.xlu0 %9211  ;;  %v8118_v17 = vadd.f32 %v24028_v39, %v21738_v25 }
 0x370   :  { %v22181_v52 = vpop.f32.mrb[185].mxu0  ;;  %v16176_v10 = vpop.eup %16175  ;;  %v7766_v44 = vadd.f32 1.0, %v16174_v46  ;;  %16197 = vrcp.f32 %v7767_v58  ;;  %13780 = vmatpush3.bf16.msra.mxu0 %v24023_v2  ;;  %10520 = vperm.xlu0 %14624, %v22169_v48  }
 0x371   :  { %24021 = vst [vmem:[#allocation111_spill] sm:$0xff] %v22181_v52  ;;  %v22184_v59 = vpop.permute.xlu1 %8783  ;;  %v22186_v16 = vpop.f32.mrb[197].mxu1  ;;  %v8185_v27 = vadd.f32 1.0, %v16176_v10  ;;  %13781 = vmatprep.subr.bf16.mxu0 %v7804_v15 }
 0x372   :  { %24022 = vst [vmem:[#allocation97_spill] sm:$0xff] %v22186_v16  ;;  %v16178_v8 = vpop.eup %16177  ;;  %v22192_v37 = vpop.f32.mrb[186].mxu0  ;;  %16199 = vrcp.f32 %v7766_v44  ;;  %v24082_v16 = vld [vmem:[#allocation61_spill] sm:$0xff] }
 0x373   :  { %24024 = vst [vmem:[#allocation99_spill] sm:$0xff] %v22192_v37  ;;  %v22194_v52 = vpop.f32.mrb[198].mxu1  ;;  %v16180_v56 = vpop.eup %16179  ;;  %v8186_v46 = vadd.f32 1.0, %v16178_v8  ;;  %16201 = vrcp.f32 %v8185_v27 }
 0x374   :  { %24025 = vst [vmem:[#allocation91_spill] sm:$0xff] %v22194_v52  ;;  %v22196_v24 = vpop.f32.mrb[187].mxu0  ;;  %v22198_v54 = vpop.f32.mrb[199].mxu1  ;;  %v8188_v10 = vadd.f32 1.0, %v16180_v56  ;;  %v24031_v56 = vpack.c.bf16 %v21954_v1, %v21946_v34  ;;  %v24037_v34 = vld [vmem:[#allocation117_spill] sm:$0xff] }
 0x375   :  { %24026 = vst [vmem:[#allocation77_spill] sm:$0xff] %v22196_v24  ;;  %24027 = vst [vmem:[#allocation24_spill] sm:$0xff] %v22198_v54  ;;  %v16182_v58 = vpop.eup %16181  ;;  %v22202_v2 = vpop.permute.xlu0 %8778  ;;  %16203 = vrcp.f32 %v8186_v46  ;;  %v24034_v24 = vld [vmem:[#allocation96_spill] sm:$0xff]  ;;  %v8123_v1 = vadd.f32 %v24037_v34, %v24036_v6 }
 0x376   :  { %v22204_v22 = vpop.f32.mrb[188].mxu0  ;;  %v16184_v37 = vpop.eup %16183  ;;  %v8187_v62 = vadd.f32 1.0, %v16182_v58  ;;  %16205 = vrcp.f32 %v8188_v10  ;;  %13782 = vmatpush3.bf16.msra.mxu0 %v24031_v56  ;;  %v24033_v58 = vld [vmem:[#allocation137_spill] sm:$0xff]  ;;  %v12936_v10 = vmul.f32 -1.442695, %v8118_v17  ;;  %v24040_v17 = vpack.c.bf16 %v21959_v31, %v21971_v30  ;;  %v22245_v31 = vld [vmem:[%s22862_s2 + $0x78] sm:$0xff] }
 0x377   :  { %24029 = vst [vmem:[#allocation58_spill] sm:$0xff] %v22204_v22  ;;  %v22207_v15 = vpop.permute.xlu1 %8360  ;;  %v22209_v44 = vpop.f32.mrb[189].mxu0  ;;  %v8189_v27 = vadd.f32 1.0, %v16184_v37  ;;  %13783 = vmatprep.subr.bf16.mxu0 %v7805_v41  ;;  %v8115_v0 = vadd.f32 %v24034_v24, %v24033_v58  ;;  %10102 = vperm.xlu1 %14625, %v22245_v31  }
 0x378   :  { %24030 = vst [vmem:[#allocation76_spill] sm:$0xff] %v22209_v44  ;;  %v16186_v8 = vpop.eup %16185  ;;  %v22215_v25 = vpop.f32.mrb[190].mxu0  ;;  %16207 = vrcp.f32 %v8187_v62  ;;  %v24038_v62 = vld [vmem:[#allocation44_spill] sm:$0xff] }
 0x379   :  { %24032 = vst [vmem:[#allocation22_spill] sm:$0xff] %v22215_v25  ;;  %v16188_v39 = vpop.eup %16187  ;;  %v8190_v46 = vadd.f32 1.0, %v16186_v8  ;;  %v22219_v47 = vpop.f32.mrb[191].mxu0  ;;  %16209 = vrcp.f32 %v8189_v27  ;;  %v24039_v8 = vld [vmem:[#allocation124_spill] sm:$0xff]  ;;  %v24041_v27 = vld [vmem:[#allocation33_spill] sm:$0xff] }
 0x37a   :  { %24035 = vst [vmem:[#allocation79_spill] sm:$0xff] %v22219_v47  ;;  %v16190_v42 = vpop.eup %16189  ;;  %v8192_v37 = vadd.f32 1.0, %v16188_v39  ;;  %v22223_v56 = vpop.permute.xlu0 %8355  ;;  %v8126_v41 = vadd.f32 %v24039_v8, %v24038_v62  ;;  %13784 = vmatpush3.bf16.msra.mxu0 %v24040_v17  ;;  %v24042_v39 = vld [vmem:[#allocation125_spill] sm:$0xff]  ;;  %v12935_v8 = vmul.f32 -1.442695, %v8115_v0 }
 0x37b   :  { %v16192_v36 = vpop.eup %16191  ;;  %16211 = vrcp.f32 %v8190_v46  ;;  %v8191_v57 = vadd.f32 1.0, %v16190_v42  ;;  %v22228_v24 = vpop.permute.xlu1 %9226  ;;  %v8134_v34 = vadd.f32 %v24042_v39, %v24041_v27  ;;  %v15019_v42 = vld [vmem:[%s22865_s3 + $0x4c] ss:$104 sps:$4 sm:$0xff]   ;;  %9669 = vperm.xlu1 %14625, %v22245_v31  }
 0x37c   :  { %v16194_v58 = vpop.eup %16193  ;;  %16213 = vrcp.f32 %v8192_v37  ;;  %v7806_v6 = vpack.c.bf16 %v16192_v36, %v22158_v13  ;;  %v24043_v37 = vld [vmem:[#allocation110_spill] sm:$0xff]  ;;  %v12937_v13 = vmul.f32 -1.442695, %v8123_v1  ;;  %v24045_v17 = vld [vmem:[#allocation53_spill] sm:$0xff]  ;;  %12057 = vmatprep.mubr.bf16.mxu1 %v15019_v42  ;;  %v12938_v0 = vmul.f32 -1.442695, %v8126_v41 }
 0x37d   :  { %v16196_v46 = vpop.eup %16195  ;;  %16215 = vrcp.f32 %v8191_v57  ;;  %v8193_v62 = vadd.f32 1.0, %v16194_v58  ;;  %v8131_v22 = vadd.f32 %v24043_v37, %v21787_v12  ;;  %v8511_v27 = vadd.f32 %v24045_v17, %v24044_v26  ;;  %v24046_v12 = vld [vmem:[#allocation52_spill] sm:$0xff]  ;;  %v24048_v42 = vld [vmem:[#allocation123_spill] sm:$0xff] }
 0x37e   :  { %v16198_v30 = vpop.eup %16197  ;;  %v8194_v36 = vadd.f32 1.0, %v16196_v46  ;;  %16217 = vpow2.f32 %v12936_v10  ;;  %13785 = vmatprep.subr.bf16.mxu0 %v7806_v6  ;;  %v22249_v39 = vpop.permute.xlu0 %9221  ;;  %v8508_v58 = vadd.f32 %v24046_v12, %v21805_v35  ;;  %v24047_v10 = vpack.c.bf16 %v21985_v63, %v21977_v11  ;;  %v22267_v35 = vld [vmem:[%s22862_s2 + $0x70] sm:$0xff]  ;;  %v24052_v12 = vld [vmem:[#allocation116_spill] sm:$0xff] }
 0x37f   :  { %v16200_v57 = vpop.eup %16199  ;;  %16219 = vrcp.f32 %v8193_v62  ;;  %v22254_v37 = vpop.permute.xlu1 %8793  ;;  %v12940_v6 = vmul.f32 -1.442695, %v8134_v34  ;;  %v8519_v62 = vadd.f32 %v24048_v42, %v21810_v60  ;;  %v12939_v41 = vmul.f32 -1.442695, %v8131_v22  ;;  %v24050_v60 = vld [vmem:[#allocation105_spill] sm:$0xff]  ;;  %10097 = vperm.xlu0 %14624, %v22267_v35   ;;  %10968 = vperm.xlu1 %14625, %v22245_v31  }
 0x380   :  { %v22256_v46 = vpop.eup %16201  ;;  %16221 = vrcp.f32 %v8194_v36  ;;  %13786 = vmatpush3.bf16.msra.mxu0 %v24047_v10  ;;  %v7807_v1 = vpack.c.bf16 %v16198_v30, %v16200_v57  ;;  %v24049_v36 = vld [vmem:[#allocation107_spill] sm:$0xff]  ;;  %v12964_v34 = vmul.f32 -1.442695, %v8511_v27  ;;  %v8524_v30 = vadd.f32 %v24050_v60, %v21835_v9  ;;  %v15022_v10 = vld [vmem:[%s22865_s3 + $0x54] ss:$104 sps:$4 sm:$0xff]  }
 0x381   :  { %v22269_v48 = vpop.eup %16203  ;;  %16223 = vpow2.f32 %v12935_v8  ;;  %v8516_v63 = vadd.f32 %v24049_v36, %v21820_v3  ;;  %v12963_v22 = vmul.f32 -1.442695, %v8508_v58  ;;  %v15014_v3 = vld [vmem:[%s22865_s3 + $0x40] ss:$104 sps:$4 sm:$0xff]   ;;  %v24051_v9 = vpack.c.bf16 %v21997_v4, %v22001_v32  ;;  %v24053_v32 = vld [vmem:[#allocation122_spill] sm:$0xff] }
 0x382   :  { %v22273_v11 = vpop.eup %16205  ;;  %16225 = vpow2.f32 %v12937_v13  ;;  %13787 = vmatprep.subr.bf16.mxu0 %v7807_v1  ;;  %v22279_v17 = vpop.permute.xlu0 %8788  ;;  %v12966_v27 = vmul.f32 -1.442695, %v8519_v62  ;;  %v8941_v4 = vadd.f32 %v24053_v32, %v21842_v55 }
 0x383   :  { %v22281_v57 = vpop.eup %16207  ;;  %16227 = vpow2.f32 %v12938_v0  ;;  %v22287_v8 = vpop.permute.xlu1 %8370  ;;  %v9374_v0 = vadd.f32 %v24052_v12, %v21825_v51  ;;  %v12967_v51 = vmul.f32 -1.442695, %v8524_v30  ;;  %9664 = vperm.xlu0 %14624, %v22267_v35   ;;  %10535 = vperm.xlu1 %14625, %v22245_v31  }
 0x384   :  { %v22289_v13 = vpop.eup %16209  ;;  %16229 = vpow2.f32 %v12940_v6  ;;  %13788 = vmatpush3.bf16.msra.mxu0 %v24051_v9  ;;  %v12965_v6 = vmul.f32 -1.442695, %v8516_v63  ;;  %v13001_v12 = vmul.f32 -1.442695, %v8941_v4 }
 0x385   :  { %v22302_v1 = vpop.eup %16211  ;;  %16231 = vpow2.f32 %v12939_v41  ;;  %v13039_v55 = vmul.f32 -1.442695, %v9374_v0 }
 0x386   :  { %v22306_v42 = vpop.eup %16213  ;;  %16233 = vpow2.f32 %v12964_v34  ;;  %v22310_v36 = vpop.permute.xlu0 %8365 }
 0x387   :  { %v22312_v60 = vpop.eup %16215  ;;  %16235 = vpow2.f32 %v12963_v22  ;;  %12017 = vmatmul.mubr.bf16.vlgmr.msra.gmra.mrb[220].mxu0 %v15014_v3  ;;  %v22315_v41 = vpop.permute.xlu1 %9236  ;;  %10963 = vperm.xlu0 %14624, %v22267_v35  }
 0x388   :  { %v16218_v63 = vpop.eup %16217  ;;  %16237 = vpow2.f32 %v12966_v27  ;;  %12098 = vmatprep.mubr.bf16.mxu0 %v15022_v10 }
 0x389   :  { %v22320_v30 = vpop.eup %16219  ;;  %v8196_v9 = vadd.f32 1.0, %v16218_v63  ;;  %16239 = vpow2.f32 %v12965_v6  ;;  %v22335_v63 = vpop.f32.mrb[200].mxu1 }
 0x38a   :  { %v22322_v22 = vpop.eup %16221  ;;  %16241 = vpow2.f32 %v12967_v51  ;;  %v22324_v3 = vpop.permute.xlu0 %9231  ;;  %v11515_v51 = vld [vmem:[%s22866_s4 + $0x8] sm:$0xff]  ;;  %24054 = vst [vmem:[#allocation42_spill] sm:$0xff] %v22335_v63  ;;  %v24057_v63 = vld [vmem:[#allocation27_spill] sm:$0xff] }
 0x38b   :  { %v16224_v32 = vpop.eup %16223  ;;  %16243 = vrcp.f32 %v8196_v9  ;;  %v22329_v0 = vpop.permute.xlu1 %8803  ;;  %10530 = vperm.xlu0 %14624, %v22267_v35   ;;  %11523 = vperm.xlu1 %14625, %v11515_v51  }
 0x38c   :  { %v16226_v10 = vpop.eup %16225  ;;  %v8195_v34 = vadd.f32 1.0, %v16224_v32  ;;  %16245 = vpow2.f32 %v13039_v55  ;;  %v22339_v58 = vpop.f32.mrb[201].mxu1 }
 0x38d   :  { %v16228_v6 = vpop.eup %16227  ;;  %v8197_v4 = vadd.f32 1.0, %v16226_v10  ;;  %16247 = vpow2.f32 %v13001_v12  ;;  %24055 = vst [vmem:[#allocation36_spill] sm:$0xff] %v22339_v58  ;;  %v22344_v12 = vpop.f32.mrb[202].mxu1 }
 0x38e   :  { %v16230_v9 = vpop.eup %16229  ;;  %16249 = vrcp.f32 %v8195_v34  ;;  %v8198_v27 = vadd.f32 1.0, %v16228_v6  ;;  %v22337_v62 = vpop.permute.xlu0 %8798  ;;  %24056 = vst [vmem:[#allocation50_spill] sm:$0xff] %v22344_v12  ;;  %v9377_v34 = vadd.f32 %v24057_v63, %v21863_v33  ;;  %v11514_v6 = vld [vmem:[%s22866_s4] sm:$0xff] }
 0x38f   :  { %v16232_v32 = vpop.eup %16231  ;;  %16251 = vrcp.f32 %v8197_v4  ;;  %v8200_v55 = vadd.f32 1.0, %v16230_v9  ;;  %v22342_v31 = vpop.permute.xlu1 %10032  ;;  %v24061_v63 = vld [vmem:[#allocation55_spill] sm:$0xff]  ;;  %11518 = vperm.xlu0 %14624, %v11514_v6  }
 0x390   :  { %v16234_v10 = vpop.eup %16233  ;;  %16253 = vrcp.f32 %v8198_v27  ;;  %v8199_v26 = vadd.f32 1.0, %v16232_v32  ;;  %v22351_v58 = vpop.f32.mrb[203].mxu1  ;;  %v9382_v61 = vadd.f32 %v24061_v63, %v21868_v7  ;;  %v24065_v7 = vld [vmem:[#allocation119_spill] sm:$0xff]  ;;  %v24066_v63 = vld [vmem:[#allocation21_spill] sm:$0xff] }
 0x391   :  { %24058 = vst [vmem:[#allocation49_spill] sm:$0xff] %v22351_v58  ;;  %v16236_v4 = vpop.eup %16235  ;;  %16255 = vrcp.f32 %v8200_v55  ;;  %v8619_v35 = vadd.f32 1.0, %v16234_v10  ;;  %v22353_v9 = vpop.f32.mrb[192].mxu0  ;;  %v8949_v6 = vadd.f32 %v24065_v7, %v21888_v45 }
 0x392   :  { %24059 = vst [vmem:[#allocation102_spill] sm:$0xff] %v22353_v9  ;;  %v16238_v25 = vpop.eup %16237  ;;  %16257 = vrcp.f32 %v8199_v26  ;;  %v8618_v12 = vadd.f32 1.0, %v16236_v4  ;;  %v22355_v27 = vpop.permute.xlu0 %10027  ;;  %v13040_v26 = vmul.f32 -1.442695, %v9377_v34  ;;  %v24063_v4 = vld [vmem:[#allocation121_spill] sm:$0xff] }
 0x393   :  { %v22357_v32 = vpop.f32.mrb[193].mxu0  ;;  %v16240_v33 = vpop.eup %16239  ;;  %16259 = vrcp.f32 %v8619_v35  ;;  %v8621_v51 = vadd.f32 1.0, %v16238_v25  ;;  %v8944_v52 = vadd.f32 %v24063_v4, %v21885_v19  ;;  %v13041_v19 = vmul.f32 -1.442695, %v9382_v61  ;;  %v24067_v4 = vld [vmem:[#allocation82_spill] sm:$0xff] }
 0x394   :  { %24060 = vst [vmem:[#allocation51_spill] sm:$0xff] %v22357_v32  ;;  %v22361_v58 = vpop.permute.xlu1 %9599  ;;  %v22363_v55 = vpop.f32.mrb[194].mxu0  ;;  %16261 = vrcp.f32 %v8618_v12  ;;  %v8620_v9 = vadd.f32 1.0, %v16240_v33 }
 0x395   :  { %24062 = vst [vmem:[#allocation80_spill] sm:$0xff] %v22363_v55  ;;  %v16242_v10 = vpop.eup %16241  ;;  %v22367_v44 = vpop.f32.mrb[195].mxu0  ;;  %16263 = vrcp.f32 %v8621_v51  ;;  %v9385_v55 = vadd.f32 %v24066_v63, %v21901_v53  ;;  %v13002_v45 = vmul.f32 -1.442695, %v8944_v52  ;;  %v13003_v63 = vmul.f32 -1.442695, %v8949_v6 }
 0x396   :  { %24064 = vst [vmem:[#allocation100_spill] sm:$0xff] %v22367_v44  ;;  %v22369_v32 = vpop.eup %16243  ;;  %v8622_v25 = vadd.f32 1.0, %v16242_v10  ;;  %16265 = vrcp.f32 %v8620_v9  ;;  %v22375_v12 = vpop.permute.xlu0 %9594  ;;  %v8527_v44 = vadd.f32 %v24067_v4, %v21908_v23  ;;  %v24069_v9 = vld [vmem:[#allocation118_spill] sm:$0xff]  ;;  %v24075_v6 = vld [vmem:[#allocation132_spill] sm:$0xff] }
 0x397   :  { %v16246_v35 = vpop.eup %16245  ;;  %v8952_v7 = vadd.f32 %v24069_v9, %v21921_v18  ;;  %v13042_v4 = vmul.f32 -1.442695, %v9385_v55  ;;  %v8957_v9 = vadd.f32 %v24075_v6, %v21981_v40  ;;  %v24080_v6 = vld [vmem:[#allocation83_spill] sm:$0xff] }
 0x398   :  { %v16248_v34 = vpop.eup %16247  ;;  %16267 = vrcp.f32 %v8622_v25  ;;  %v9484_v33 = vadd.f32 1.0, %v16246_v35  ;;  %v22379_v47 = vpop.permute.xlu1 %10898  ;;  %v24071_v25 = vld [vmem:[#allocation127_spill] sm:$0xff] }
 0x399   :  { %24068 = vst [vmem:[#allocation86_spill] sm:$0xff] %v22379_v47  ;;  %v22381_v51 = vpop.eup %16249  ;;  %v9051_v10 = vadd.f32 1.0, %v16248_v34  ;;  %16269 = vpow2.f32 %v13040_v26  ;;  %v9390_v61 = vadd.f32 %v24071_v25, %v21952_v29  ;;  %v24073_v26 = vld [vmem:[#allocation4_spill] sm:$0xff]  ;;  %v13004_v55 = vmul.f32 -1.442695, %v8952_v7  ;;  %v24081_v29 = vld [vmem:[#allocation3_spill] sm:$0xff] }
 0x39a   :  { %v22385_v53 = vpop.eup %16251  ;;  %16271 = vrcp.f32 %v9484_v33  ;;  %v9393_v52 = vadd.f32 %v24073_v26, %v21928_v5  ;;  %v22395_v34 = vpop.permute.xlu0 %10893  ;;  %v12968_v33 = vmul.f32 -1.442695, %v8527_v44  ;;  %v24079_v5 = vld [vmem:[#allocation14_spill] sm:$0xff]  ;;  %v13005_v7 = vmul.f32 -1.442695, %v8957_v9 }
 0x39b   :  { %24070 = vst [vmem:[#allocation109_spill] sm:$0xff] %v22385_v53  ;;  %v22391_v35 = vpop.eup %16253  ;;  %16273 = vrcp.f32 %v9051_v10  ;;  %v24078_v10 = vld [vmem:[#allocation72_spill] sm:$0xff]  ;;  %v13043_v47 = vmul.f32 -1.442695, %v9390_v61  ;;  %v8535_v53 = vadd.f32 %v24081_v29, %v24080_v6 }
 0x39c   :  { %24072 = vst [vmem:[#allocation103_spill] sm:$0xff] %v22391_v35  ;;  %v22397_v18 = vpop.eup %16255  ;;  %16275 = vpow2.f32 %v13041_v19  ;;  %v22403_v25 = vpop.permute.xlu1 %10465  ;;  %v8960_v26 = vadd.f32 %v24079_v5, %v24078_v10  ;;  %v13044_v40 = vmul.f32 -1.442695, %v9393_v52  ;;  %v24083_v10 = vld [vmem:[#allocation140_spill] sm:$0xff] }
 0x39d   :  { %24074 = vst [vmem:[#allocation29_spill] sm:$0xff] %v22397_v18  ;;  %24076 = vst [vmem:[#allocation74_spill] sm:$0xff] %v22403_v25  ;;  %v22405_v23 = vpop.eup %16257  ;;  %16277 = vpow2.f32 %v13002_v45  ;;  %v8532_v5 = vadd.f32 %v24083_v10, %v24082_v16  ;;  %v24107_v18 = vld [vmem:[#allocation59_spill] sm:$0xff] }
 0x39e   :  { %24077 = vst [vmem:[#allocation19_spill] sm:$0xff] %v22405_v23  ;;  %v16260_v54 = vpop.eup %16259  ;;  %16279 = vpow2.f32 %v13003_v63  ;;  %v22413_v35 = vpop.permute.xlu0 %10460  ;;  %v13006_v44 = vmul.f32 -1.442695, %v8960_v26 }
 0x39f   :  { %v16262_v19 = vpop.eup %16261  ;;  %16281 = vpow2.f32 %v13042_v4 }
 0x3a0   :  { %v16264_v25 = vpop.eup %16263  ;;  %16283 = vpow2.f32 %v12968_v33  ;;  %v8666_v45 = vpack.c.bf16 %v16260_v54, %v16262_v19  ;;  %v22417_v63 = vpop.permute.xlu1 %10042  ;;  %v24084_v33 = vpack.c.bf16 %v22269_v48, %v22256_v46  ;;  %v12970_v54 = vmul.f32 -1.442695, %v8535_v53 }
 0x3a1   :  { %v16266_v61 = vpop.eup %16265  ;;  %16285 = vpow2.f32 %v13004_v55  ;;  %v12969_v55 = vmul.f32 -1.442695, %v8532_v5  ;;  %v24085_v46 = vpack.c.bf16 %v22273_v11, %v22281_v57 }
 0x3a2   :  { %v22419_v23 = vpop.eup %16267  ;;  %16287 = vpow2.f32 %v13043_v47  ;;  %13795 = vmatprep.subr.bf16.mxu1 %v8666_v45  ;;  %v8667_v4 = vpack.c.bf16 %v16264_v25, %v16266_v61  ;;  %v22424_v9 = vpop.permute.xlu0 %10037 }
 0x3a3   :  { %v16270_v52 = vpop.eup %16269  ;;  %16289 = vpow2.f32 %v13044_v40  ;;  %13796 = vmatpush3.bf16.msra.mxu1 %v24084_v33  ;;  %v24089_v33 = vld [vmem:[#allocation134_spill] sm:$0xff] }
 0x3a4   :  { %v22426_v16 = vpop.eup %16271  ;;  %v9485_v29 = vadd.f32 1.0, %v16270_v52  ;;  %16291 = vpow2.f32 %v13005_v7  ;;  %13797 = vmatprep.subr.bf16.mxu1 %v8667_v4  ;;  %v22428_v26 = vpop.permute.xlu1 %9609  ;;  %v24088_v52 = vld [vmem:[#allocation73_spill] sm:$0xff] }
 0x3a5   :  { %v22430_v47 = vpop.eup %16273  ;;  %16293 = vpow2.f32 %v13006_v44  ;;  %v9401_v11 = vadd.f32 %v24089_v33, %v24088_v52 }
 0x3a6   :  { %v16276_v25 = vpop.eup %16275  ;;  %16295 = vrcp.f32 %v9485_v29  ;;  %v22435_v48 = vpop.permute.xlu0 %9604 }
 0x3a7   :  { %v16278_v19 = vpop.eup %16277  ;;  %v9486_v40 = vadd.f32 1.0, %v16276_v25  ;;  %16297 = vpow2.f32 %v12970_v54  ;;  %13798 = vmatpush3.bf16.msra.mxu1 %v24085_v46  ;;  %24086 = vst [vmem:[#allocation68_spill] sm:$0xff] %v22435_v48  ;;  %v13046_v33 = vmul.f32 -1.442695, %v9401_v11 }
 0x3a8   :  { %v16280_v53 = vpop.eup %16279  ;;  %v9052_v6 = vadd.f32 1.0, %v16278_v19  ;;  %16299 = vpow2.f32 %v12969_v55  ;;  %v22437_v45 = vpop.permute.xlu1 %10908 }
 0x3a9   :  { %24087 = vst [vmem:[#allocation30_spill] sm:$0xff] %v22437_v45  ;;  %v16282_v7 = vpop.eup %16281  ;;  %16301 = vrcp.f32 %v9486_v40  ;;  %v9053_v10 = vadd.f32 1.0, %v16280_v53  ;;  %v24092_v53 = vld [vmem:[#allocation13_spill] sm:$0xff] }
 0x3aa   :  { %v16284_v44 = vpop.eup %16283  ;;  %16303 = vrcp.f32 %v9052_v6  ;;  %v9487_v5 = vadd.f32 1.0, %v16282_v7  ;;  %v22441_v57 = vpop.permute.xlu0 %10903  ;;  %v24093_v6 = vld [vmem:[#allocation46_spill] sm:$0xff] }
 0x3ab   :  { %v16286_v61 = vpop.eup %16285  ;;  %16305 = vrcp.f32 %v9053_v10  ;;  %v8623_v4 = vadd.f32 1.0, %v16284_v44  ;;  %24090 = vst [vmem:[#allocation7_spill] sm:$0xff] %v22441_v57  ;;  %v9398_v7 = vadd.f32 %v24093_v6, %v24092_v53  ;;  %v22447_v10 = vpop.f32.mrb[204].mxu1  ;;  %v24095_v57 = vld [vmem:[#allocation78_spill] sm:$0xff] }
 0x3ac   :  { %v16288_v54 = vpop.eup %16287  ;;  %16307 = vrcp.f32 %v9487_v5  ;;  %v9054_v29 = vadd.f32 1.0, %v16286_v61  ;;  %v22443_v55 = vpop.permute.xlu1 %10475  ;;  %24094 = vst [vmem:[#allocation106_spill] sm:$0xff] %v22447_v10  ;;  %v24096_v5 = vld [vmem:[#allocation92_spill] sm:$0xff] }
 0x3ad   :  { %24091 = vst [vmem:[#allocation120_spill] sm:$0xff] %v22443_v55  ;;  %v16290_v25 = vpop.eup %16289  ;;  %16309 = vrcp.f32 %v8623_v4  ;;  %v9488_v19 = vadd.f32 1.0, %v16288_v54  ;;  %v8968_v61 = vadd.f32 %v24096_v5, %v24095_v57  ;;  %v22453_v55 = vpop.f32.mrb[205].mxu1  ;;  %v24104_v57 = vld [vmem:[#allocation28_spill] sm:$0xff] }
 0x3ae   :  { %v16292_v40 = vpop.eup %16291  ;;  %16311 = vrcp.f32 %v9054_v29  ;;  %v9489_v46 = vadd.f32 1.0, %v16290_v25  ;;  %v22451_v45 = vpop.permute.xlu0 %10470  ;;  %24098 = vst [vmem:[#allocation18_spill] sm:$0xff] %v22453_v55  ;;  %v24099_v29 = vld [vmem:[#allocation39_spill] sm:$0xff]  ;;  %v24100_v25 = vld [vmem:[#allocation130_spill] sm:$0xff] }
 0x3af   :  { %v16294_v44 = vpop.eup %16293  ;;  %16313 = vrcp.f32 %v9488_v19  ;;  %v9055_v52 = vadd.f32 1.0, %v16292_v40  ;;  %24097 = vst [vmem:[#allocation113_spill] sm:$0xff] %v22451_v45  ;;  %v8965_v48 = vadd.f32 %v24100_v25, %v24099_v29  ;;  %v22459_v6 = vpop.f32.mrb[206].mxu1  ;;  %v24103_v40 = vld [vmem:[#allocation64_spill] sm:$0xff]  ;;  %v24106_v45 = vld [vmem:[#allocation85_spill] sm:$0xff] }
 0x3b0   :  { %v16296_v4 = vpop.eup %16295  ;;  %16315 = vrcp.f32 %v9489_v46  ;;  %v9056_v54 = vadd.f32 1.0, %v16294_v44  ;;  %v22457_v53 = vpop.permute.xlu1 %10052  ;;  %24102 = vst [vmem:[#allocation88_spill] sm:$0xff] %v22459_v6  ;;  %v8543_v5 = vadd.f32 %v24104_v57, %v24103_v40  ;;  %v13045_v44 = vmul.f32 -1.442695, %v9398_v7 }
 0x3b1   :  { %24101 = vst [vmem:[#allocation25_spill] sm:$0xff] %v22457_v53  ;;  %v16298_v19 = vpop.eup %16297  ;;  %16317 = vrcp.f32 %v9055_v52  ;;  %v9532_v11 = vpack.c.bf16 %v16296_v4, %v22426_v16  ;;  %v22464_v10 = vpop.f32.mrb[207].mxu1  ;;  %v8540_v29 = vadd.f32 %v24107_v18, %v24106_v45  ;;  %v13008_v52 = vmul.f32 -1.442695, %v8968_v61  ;;  %v24109_v16 = vld [vmem:[#allocation133_spill] sm:$0xff] }
 0x3b2   :  { %24105 = vst [vmem:[#allocation11_spill] sm:$0xff] %v22464_v10  ;;  %v16300_v55 = vpop.eup %16299  ;;  %16319 = vrcp.f32 %v9056_v54  ;;  %v8625_v46 = vadd.f32 1.0, %v16298_v19  ;;  %v22468_v25 = vpop.f32.mrb[196].mxu0  ;;  %v9406_v4 = vadd.f32 %v24109_v16, %v22087_v14  ;;  %v13007_v7 = vmul.f32 -1.442695, %v8965_v48  ;;  %v24111_v19 = vld [vmem:[#allocation37_spill] sm:$0xff] }
 0x3b3   :  { %24108 = vst [vmem:[#allocation101_spill] sm:$0xff] %v22468_v25  ;;  %v16302_v53 = vpop.eup %16301  ;;  %v8624_v6 = vadd.f32 1.0, %v16300_v55  ;;  %16321 = vpow2.f32 %v13046_v33  ;;  %13817 = vmatprep.subr.bf16.mxu0 %v9532_v11  ;;  %v22472_v40 = vpop.permute.xlu0 %10047  ;;  %v24112_v10 = vld [vmem:[#allocation47_spill] sm:$0xff]  ;;  %v12972_v61 = vmul.f32 -1.442695, %v8543_v5 }
 0x3b4   :  { %v22474_v57 = vpop.f32.mrb[197].mxu0  ;;  %v16304_v54 = vpop.eup %16303  ;;  %16323 = vrcp.f32 %v8625_v46  ;;  %v9409_v18 = vadd.f32 %v24112_v10, %v24111_v19  ;;  %v24115_v14 = vld [vmem:[#allocation139_spill] sm:$0xff]  ;;  %v12971_v48 = vmul.f32 -1.442695, %v8540_v29  ;;  %v24116_v46 = vld [vmem:[#allocation40_spill] sm:$0xff] }
 0x3b5   :  { %24110 = vst [vmem:[#allocation90_spill] sm:$0xff] %v22474_v57  ;;  %v22478_v45 = vpop.permute.xlu1 %9619  ;;  %v22480_v25 = vpop.f32.mrb[198].mxu0  ;;  %16325 = vrcp.f32 %v8624_v6  ;;  %v9099_v33 = vpack.c.bf16 %v16304_v54, %v22430_v47  ;;  %v8973_v11 = vadd.f32 %v24115_v14, %v22114_v20  ;;  %v8976_v10 = vadd.f32 %v24116_v46, %v22094_v43  ;;  %v24117_v6 = vld [vmem:[#allocation94_spill] sm:$0xff] }
 0x3b6   :  { %24113 = vst [vmem:[#allocation108_spill] sm:$0xff] %v22478_v45  ;;  %24114 = vst [vmem:[#allocation138_spill] sm:$0xff] %v22480_v25  ;;  %v16306_v55 = vpop.eup %16305  ;;  %v22485_v16 = vpop.f32.mrb[199].mxu0  ;;  %16327 = vpow2.f32 %v13045_v44  ;;  %v13047_v45 = vmul.f32 -1.442695, %v9406_v4  ;;  %v8551_v47 = vadd.f32 %v24117_v6, %v22123_v50 }
 0x3b7   :  { %v16308_v57 = vpop.eup %16307  ;;  %16329 = vpow2.f32 %v13008_v52  ;;  %13818 = vmatpush3.bf16.msra.mxu0 %v9099_v33  ;;  %v22491_v5 = vpop.permute.xlu0 %9614  ;;  %v13048_v20 = vmul.f32 -1.442695, %v9409_v18  ;;  %v13009_v52 = vmul.f32 -1.442695, %v8973_v11  ;;  %v13010_v50 = vmul.f32 -1.442695, %v8976_v10 }
 0x3b8   :  { %v16310_v19 = vpop.eup %16309  ;;  %v9533_v25 = vpack.c.bf16 %v16308_v57, %v16302_v53  ;;  %16331 = vpow2.f32 %v13007_v7  ;;  %v24118_v53 = vld [vmem:[#allocation66_spill] sm:$0xff]  ;;  %v24119_v33 = vld [vmem:[#allocation75_spill] sm:$0xff] }
 0x3b9   :  { %v16312_v54 = vpop.eup %16311  ;;  %v8668_v14 = vpack.c.bf16 %v16310_v19, %v22419_v23  ;;  %v22494_v44 = vpop.permute.xlu1 %10918  ;;  %16333 = vpow2.f32 %v12972_v61  ;;  %v8548_v4 = vadd.f32 %v24118_v53, %v22147_v28  ;;  %v9417_v7 = vadd.f32 %v24119_v33, %v22154_v21 }
 0x3ba   :  { %v16314_v29 = vpop.eup %16313  ;;  %13819 = vmatprep.subr.bf16.mxu0 %v9533_v25  ;;  %v9100_v43 = vpack.c.bf16 %v16312_v54, %v16306_v55  ;;  %16335 = vpow2.f32 %v12971_v48  ;;  %v24120_v23 = vpack.c.bf16 %v22302_v1, %v22289_v13  ;;  %v12974_v55 = vmul.f32 -1.442695, %v8551_v47 }
 0x3bb   :  { %v16316_v57 = vpop.eup %16315  ;;  %13799 = vmatprep.subr.bf16.mxu1 %v8668_v14  ;;  %16337 = vpow2.f32 %v13047_v45  ;;  %v22503_v61 = vpop.permute.xlu0 %10913  ;;  %v12973_v46 = vmul.f32 -1.442695, %v8548_v4  ;;  %v13050_v19 = vmul.f32 -1.442695, %v9417_v7  ;;  %v24121_v4 = vpack.c.bf16 %v22306_v42, %v22312_v60 }
 0x3bc   :  { %v16318_v18 = vpop.eup %16317  ;;  %13820 = vmatpush3.bf16.msra.mxu0 %v9100_v43  ;;  %13800 = vmatpush3.bf16.msra.mxu1 %v24120_v23  ;;  %v9534_v25 = vpack.c.bf16 %v16316_v57, %v16314_v29  ;;  %16339 = vpow2.f32 %v13048_v20 }
 0x3bd   :  { %v16320_v11 = vpop.eup %16319  ;;  %v22505_v28 = vpop.permute.xlu1 %10485  ;;  %16341 = vpow2.f32 %v13009_v52 }
 0x3be   :  { %v16322_v48 = vpop.eup %16321  ;;  %13821 = vmatprep.subr.bf16.mxu0 %v9534_v25  ;;  %v9101_v21 = vpack.c.bf16 %v16320_v11, %v16318_v18  ;;  %16343 = vpow2.f32 %v13010_v50  ;;  %v24122_v25 = vld [vmem:[#allocation98_spill] sm:$0xff] }
 0x3bf   :  { %v16324_v10 = vpop.eup %16323  ;;  %v9491_v45 = vadd.f32 1.0, %v16322_v48  ;;  %16345 = vpow2.f32 %v12974_v55  ;;  %v22507_v13 = vpop.permute.xlu0 %10480  ;;  %v9414_v55 = vadd.f32 %v24122_v25, %v22179_v49 }
 0x3c0   :  { %v16326_v6 = vpop.eup %16325  ;;  %13822 = vmatpush3.bf16.msra.mxu0 %v9101_v21 }
 0x3c1   :  { %v16328_v1 = vpop.eup %16327  ;;  %16347 = vrcp.f32 %v9491_v45  ;;  %v8669_v47 = vpack.c.bf16 %v16324_v10, %v16326_v6  ;;  %v22509_v54 = vpop.permute.xlu1 %10062  ;;  %v24123_v45 = vld [vmem:[#allocation84_spill] sm:$0xff]  ;;  %v13049_v49 = vmul.f32 -1.442695, %v9414_v55  ;;  %v24127_v55 = vld [vmem:[#allocation141_spill] sm:$0xff] }
 0x3c2   :  { %v16330_v20 = vpop.eup %16329  ;;  %v9490_v14 = vadd.f32 1.0, %v16328_v1  ;;  %16349 = vpow2.f32 %v12973_v46 }
 0x3c3   :  { %v16332_v29 = vpop.eup %16331  ;;  %v9058_v43 = vadd.f32 1.0, %v16330_v20  ;;  %16351 = vpow2.f32 %v13050_v19  ;;  %13801 = vmatprep.subr.bf16.mxu1 %v8669_v47  ;;  %v22514_v57 = vpop.permute.xlu0 %10057  ;;  %v8984_v19 = vadd.f32 %v24123_v45, %v22184_v59  ;;  %v24124_v20 = vld [vmem:[#allocation60_spill] sm:$0xff] }
 0x3c4   :  { %v16334_v52 = vpop.eup %16333  ;;  %16353 = vrcp.f32 %v9490_v14  ;;  %v9057_v53 = vadd.f32 1.0, %v16332_v29  ;;  %13802 = vmatpush3.bf16.msra.mxu1 %v24121_v4  ;;  %v8981_v14 = vadd.f32 %v24124_v20, %v22202_v2  ;;  %v9422_v2 = vadd.f32 %v24127_v55, %v22249_v39 }
 0x3c5   :  { %v16336_v50 = vpop.eup %16335  ;;  %16355 = vrcp.f32 %v9058_v43  ;;  %v8627_v33 = vadd.f32 1.0, %v16334_v52  ;;  %v22516_v7 = vpop.permute.xlu1 %9629  ;;  %v24125_v52 = vld [vmem:[#allocation135_spill] sm:$0xff]  ;;  %v13012_v25 = vmul.f32 -1.442695, %v8984_v19 }
 0x3c6   :  { %v16338_v18 = vpop.eup %16337  ;;  %16357 = vrcp.f32 %v9057_v53  ;;  %v8626_v23 = vadd.f32 1.0, %v16336_v50  ;;  %v8559_v53 = vadd.f32 %v24125_v52, %v22207_v15  ;;  %v24126_v50 = vld [vmem:[#allocation114_spill] sm:$0xff]  ;;  %v13011_v15 = vmul.f32 -1.442695, %v8981_v14  ;;  %v22542_v19 = vpop.f32.mrb[208].mxu1 }
 0x3c7   :  { %v16340_v11 = vpop.eup %16339  ;;  %16359 = vrcp.f32 %v8627_v33  ;;  %v9492_v48 = vadd.f32 1.0, %v16338_v18  ;;  %v22520_v60 = vpop.permute.xlu0 %9624  ;;  %v8556_v59 = vadd.f32 %v24126_v50, %v22223_v56  ;;  %24130 = vst [vmem:[#allocation20_spill] sm:$0xff] %v22542_v19 }
 0x3c8   :  { %v16342_v46 = vpop.eup %16341  ;;  %16361 = vrcp.f32 %v8626_v23  ;;  %v9493_v42 = vadd.f32 1.0, %v16340_v11  ;;  %v12976_v45 = vmul.f32 -1.442695, %v8559_v53  ;;  %v22548_v14 = vpop.f32.mrb[209].mxu1  ;;  %v13051_v53 = vmul.f32 -1.442695, %v9422_v2 }
 0x3c9   :  { %v16344_v21 = vpop.eup %16343  ;;  %16363 = vrcp.f32 %v9492_v48  ;;  %v9059_v10 = vadd.f32 1.0, %v16342_v46  ;;  %v22524_v6 = vpop.permute.xlu1 %10928  ;;  %v12975_v39 = vmul.f32 -1.442695, %v8556_v59  ;;  %24132 = vst [vmem:[#allocation115_spill] sm:$0xff] %v22548_v14 }
 0x3ca   :  { %v16346_v1 = vpop.eup %16345  ;;  %16365 = vrcp.f32 %v9493_v42  ;;  %v9060_v47 = vadd.f32 1.0, %v16344_v21  ;;  %v24128_v42 = vld [vmem:[#allocation67_spill] sm:$0xff] }
 0x3cb   :  { %v16348_v29 = vpop.eup %16347  ;;  %16367 = vrcp.f32 %v9059_v10  ;;  %v8629_v43 = vadd.f32 1.0, %v16346_v1  ;;  %v22532_v33 = vpop.permute.xlu0 %10923  ;;  %v9425_v21 = vadd.f32 %v24128_v42, %v22228_v24  ;;  %v24129_v1 = vld [vmem:[#allocation81_spill] sm:$0xff] }
 0x3cc   :  { %v16350_v4 = vpop.eup %16349  ;;  %16369 = vrcp.f32 %v9060_v47  ;;  %v8989_v47 = vadd.f32 %v24129_v1, %v22279_v17  ;;  %v22560_v42 = vpop.f32.mrb[200].mxu0 }
 0x3cd   :  { %v16352_v18 = vpop.eup %16351  ;;  %16371 = vrcp.f32 %v8629_v43  ;;  %v8628_v23 = vadd.f32 1.0, %v16350_v4  ;;  %v22536_v11 = vpop.permute.xlu1 %10495  ;;  %v24131_v43 = vld [vmem:[#allocation15_spill] sm:$0xff]  ;;  %v24133_v4 = vld [vmem:[#allocation62_spill] sm:$0xff]  ;;  %24137 = vst [vmem:[#allocation128_spill] sm:$0xff] %v22560_v42 }
 0x3ce   :  { %v16354_v48 = vpop.eup %16353  ;;  %v9495_v46 = vadd.f32 1.0, %v16352_v18  ;;  %16373 = vpow2.f32 %v13049_v49  ;;  %v8992_v52 = vadd.f32 %v24131_v43, %v22254_v37  ;;  %v8567_v17 = vadd.f32 %v24133_v4, %v22287_v8  ;;  %v22554_v18 = vpop.f32.mrb[210].mxu1  ;;  %v24135_v37 = vld [vmem:[#allocation23_spill] sm:$0xff] }
 0x3cf   :  { %v16356_v10 = vpop.eup %16355  ;;  %16375 = vrcp.f32 %v8628_v23  ;;  %v9535_v56 = vpack.c.bf16 %v16348_v29, %v16354_v48  ;;  %v22546_v49 = vpop.permute.xlu0 %10490  ;;  %24134 = vst [vmem:[#allocation112_spill] sm:$0xff] %v22554_v18  ;;  %v13052_v23 = vmul.f32 -1.442695, %v9425_v21  ;;  %v8564_v55 = vadd.f32 %v24135_v37, %v22310_v36  ;;  %v24140_v43 = vld [vmem:[#allocation35_spill] sm:$0xff] }
 0x3d0   :  { %v16358_v20 = vpop.eup %16357  ;;  %16377 = vrcp.f32 %v9495_v46  ;;  %v22558_v48 = vpop.f32.mrb[211].mxu1  ;;  %v13013_v2 = vmul.f32 -1.442695, %v8989_v47  ;;  %v9430_v47 = vadd.f32 %v24140_v43, %v22324_v3 }
 0x3d1   :  { %v16360_v24 = vpop.eup %16359  ;;  %16379 = vpow2.f32 %v13012_v25  ;;  %13823 = vmatprep.subr.bf16.mxu0 %v9535_v56  ;;  %v9102_v29 = vpack.c.bf16 %v16356_v10, %v16358_v20  ;;  %v22552_v50 = vpop.permute.xlu1 %10072  ;;  %24136 = vst [vmem:[#allocation57_spill] sm:$0xff] %v22558_v48  ;;  %v13014_v10 = vmul.f32 -1.442695, %v8992_v52  ;;  %v24138_v56 = vld [vmem:[#allocation71_spill] sm:$0xff]  ;;  %v12977_v52 = vmul.f32 -1.442695, %v8564_v55 }
 0x3d2   :  { %v16362_v59 = vpop.eup %16361  ;;  %16381 = vpow2.f32 %v13011_v15  ;;  %v9433_v1 = vadd.f32 %v24138_v56, %v22315_v41  ;;  %v22566_v21 = vpop.f32.mrb[201].mxu0  ;;  %v24142_v41 = vpack.c.bf16 %v22322_v22, %v22320_v30 }
 0x3d3   :  { %v16364_v46 = vpop.eup %16363  ;;  %16383 = vpow2.f32 %v12976_v45  ;;  %13824 = vmatpush3.bf16.msra.mxu0 %v9102_v29  ;;  %v8670_v25 = vpack.c.bf16 %v16360_v24, %v16362_v59  ;;  %v22564_v15 = vpop.permute.xlu0 %10067  ;;  %24139 = vst [vmem:[#allocation137_spill] sm:$0xff] %v22566_v21  ;;  %v12978_v45 = vmul.f32 -1.442695, %v8567_v17 }
 0x3d4   :  { %v16366_v8 = vpop.eup %16365  ;;  %16385 = vpow2.f32 %v12975_v39  ;;  %v22572_v29 = vpop.f32.mrb[202].mxu0  ;;  %v13054_v3 = vmul.f32 -1.442695, %v9433_v1 }
 0x3d5   :  { %v16368_v36 = vpop.eup %16367  ;;  %16387 = vpow2.f32 %v13051_v53  ;;  %13803 = vmatprep.subr.bf16.mxu1 %v8670_v25  ;;  %v9536_v20 = vpack.c.bf16 %v16366_v8, %v16364_v46  ;;  %v22570_v24 = vpop.permute.xlu1 %9639  ;;  %24141 = vst [vmem:[#allocation96_spill] sm:$0xff] %v22572_v29  ;;  %v24155_v29 = vld [vmem:[#allocation74_spill] sm:$0xff] }
 0x3d6   :  { %v16370_v39 = vpop.eup %16369  ;;  %16389 = vpow2.f32 %v13052_v23  ;;  %13804 = vmatpush3.bf16.msra.mxu1 %v24142_v41  ;;  %v22577_v4 = vpop.f32.mrb[203].mxu0  ;;  %v13053_v23 = vmul.f32 -1.442695, %v9430_v47 }
 0x3d7   :  { %24143 = vst [vmem:[#allocation131_spill] sm:$0xff] %v22577_v4  ;;  %v16372_v53 = vpop.eup %16371  ;;  %16391 = vpow2.f32 %v13013_v2  ;;  %13825 = vmatprep.subr.bf16.mxu0 %v9536_v20  ;;  %v9103_v17 = vpack.c.bf16 %v16370_v39, %v16368_v36  ;;  %v22579_v37 = vpop.permute.xlu0 %9634  ;;  %v24144_v20 = vpack.c.bf16 %v22369_v32, %v22381_v51  ;;  %v24146_v51 = vld [vmem:[#allocation16_spill] sm:$0xff] }
 0x3d8   :  { %v16374_v59 = vpop.eup %16373  ;;  %16393 = vpow2.f32 %v13014_v10 }
 0x3d9   :  { %v16376_v46 = vpop.eup %16375  ;;  %v9494_v25 = vadd.f32 1.0, %v16374_v59  ;;  %16395 = vpow2.f32 %v12978_v45  ;;  %13826 = vmatpush3.bf16.msra.mxu0 %v9103_v17  ;;  %v22581_v8 = vpop.permute.xlu1 %10938  ;;  %v24145_v17 = vld [vmem:[#allocation9_spill] sm:$0xff] }
 0x3da   :  { %v22583_v30 = vpop.eup %16377  ;;  %16397 = vpow2.f32 %v12977_v52  ;;  %v8671_v22 = vpack.c.bf16 %v16372_v53, %v16376_v46  ;;  %v9000_v59 = vadd.f32 %v24145_v17, %v22329_v0 }
 0x3db   :  { %v16380_v55 = vpop.eup %16379  ;;  %16399 = vrcp.f32 %v9494_v25  ;;  %v22585_v10 = vpop.permute.xlu0 %10933  ;;  %v8997_v25 = vadd.f32 %v24146_v51, %v22337_v62 }
 0x3dc   :  { %v16382_v2 = vpop.eup %16381  ;;  %v9062_v56 = vadd.f32 1.0, %v16380_v55  ;;  %16401 = vpow2.f32 %v13054_v3  ;;  %13805 = vmatprep.subr.bf16.mxu1 %v8671_v22 }
 0x3dd   :  { %v16384_v1 = vpop.eup %16383  ;;  %v9061_v36 = vadd.f32 1.0, %v16382_v2  ;;  %16403 = vpow2.f32 %v13053_v23  ;;  %13806 = vmatpush3.bf16.msra.mxu1 %v24144_v20  ;;  %v22590_v45 = vpop.permute.xlu1 %10505  ;;  %v24147_v2 = vld [vmem:[#allocation87_spill] sm:$0xff] }
 0x3de   :  { %v16386_v43 = vpop.eup %16385  ;;  %16405 = vrcp.f32 %v9062_v56  ;;  %v8631_v47 = vadd.f32 1.0, %v16384_v1  ;;  %v10243_v56 = vadd.f32 %v24147_v2, %v22342_v31  ;;  %v24150_v2 = vld [vmem:[#allocation38_spill] sm:$0xff] }
 0x3df   :  { %v16388_v39 = vpop.eup %16387  ;;  %16407 = vrcp.f32 %v9061_v36  ;;  %v8630_v41 = vadd.f32 1.0, %v16386_v43  ;;  %v22594_v3 = vpop.permute.xlu0 %10500  ;;  %v13016_v43 = vmul.f32 -1.442695, %v9000_v59  ;;  %v9810_v59 = vadd.f32 %v22081_v38, %v22361_v58 }
 0x3e0   :  { %v16390_v52 = vpop.eup %16389  ;;  %16409 = vrcp.f32 %v8631_v47  ;;  %v9496_v53 = vadd.f32 1.0, %v16388_v39  ;;  %v24148_v47 = vld [vmem:[#allocation48_spill] sm:$0xff]  ;;  %v13116_v51 = vmul.f32 -1.442695, %v10243_v56  ;;  %v24152_v56 = vld [vmem:[#allocation86_spill] sm:$0xff] }
 0x3e1   :  { %v16392_v46 = vpop.eup %16391  ;;  %16411 = vrcp.f32 %v8630_v41  ;;  %v9497_v32 = vadd.f32 1.0, %v16390_v52  ;;  %v22598_v23 = vpop.permute.xlu1 %10082  ;;  %v10240_v39 = vadd.f32 %v24148_v47, %v22355_v27 }
 0x3e2   :  { %v16394_v22 = vpop.eup %16393  ;;  %16413 = vrcp.f32 %v9496_v53  ;;  %v9063_v55 = vadd.f32 1.0, %v16392_v46  ;;  %v13015_v53 = vmul.f32 -1.442695, %v8997_v25  ;;  %v13613_v46 = vpop.f32.mrb[204].mxu0  ;;  %v24151_v25 = vld [vmem:[#allocation97_spill] sm:$0xff] }
 0x3e3   :  { %v16396_v1 = vpop.eup %16395  ;;  %16415 = vrcp.f32 %v9497_v32  ;;  %v9064_v36 = vadd.f32 1.0, %v16394_v22  ;;  %v22604_v41 = vpop.permute.xlu0 %10077 }
 0x3e4   :  { %v16398_v0 = vpop.eup %16397  ;;  %16417 = vrcp.f32 %v9063_v55  ;;  %v8633_v20 = vadd.f32 1.0, %v16396_v1  ;;  %v13614_v22 = vpop.f32.mrb[205].mxu0  ;;  %v9807_v1 = vadd.f32 %v24150_v2, %v22375_v12  ;;  %v24156_v12 = vld [vmem:[#allocation79_spill] sm:$0xff] }
 0x3e5   :  { %v16400_v62 = vpop.eup %16399  ;;  %16419 = vrcp.f32 %v9064_v36  ;;  %v8632_v52 = vadd.f32 1.0, %v16398_v0  ;;  %v22606_v17 = vpop.permute.xlu1 %9649  ;;  %v11106_v36 = vadd.f32 %v24151_v25, %v22395_v34  ;;  %v10676_v2 = vadd.f32 %v24156_v12, %v24155_v29 }
 0x3e6   :  { %24149 = vst [vmem:[#allocation117_spill] sm:$0xff] %v22606_v17  ;;  %v16402_v31 = vpop.eup %16401  ;;  %16421 = vrcp.f32 %v8633_v20  ;;  %v9537_v32 = vpack.c.bf16 %v22583_v30, %v16400_v62  ;;  %v13616_v0 = vpop.f32.mrb[206].mxu0  ;;  %v13115_v30 = vmul.f32 -1.442695, %v10240_v39  ;;  %v24153_v62 = vld [vmem:[#allocation24_spill] sm:$0xff]  ;;  %v22623_v34 = vadd.f32 %v13614_v22, %v13613_v46 }
 0x3e7   :  { %v16404_v55 = vpop.eup %16403  ;;  %16423 = vrcp.f32 %v8632_v52  ;;  %v9499_v27 = vadd.f32 1.0, %v16402_v31  ;;  %v13635_v47 = vpop.f32.mrb[212].mxu1  ;;  %v11109_v38 = vadd.f32 %v24153_v62, %v24152_v56  ;;  %v24158_v56 = vld [vmem:[#allocation76_spill] sm:$0xff]  ;;  %v13077_v21 = vmul.f32 -1.442695, %v9807_v1 }
 0x3e8   :  { %v16406_v42 = vpop.eup %16405  ;;  %v9498_v20 = vadd.f32 1.0, %v16404_v55  ;;  %16425 = vpow2.f32 %v13016_v43  ;;  %13827 = vmatprep.subr.bf16.mxu0 %v9537_v32  ;;  %v22617_v58 = vpop.permute.xlu0 %9644  ;;  %v13078_v55 = vmul.f32 -1.442695, %v9810_v59  ;;  %v10673_v62 = vadd.f32 %v24158_v56, %v22413_v35 }
 0x3e9   :  { %24154 = vst [vmem:[#allocation44_spill] sm:$0xff] %v22617_v58  ;;  %v13617_v52 = vpop.f32.mrb[207].mxu0  ;;  %v16408_v31 = vpop.eup %16407  ;;  %16427 = vrcp.f32 %v9499_v27  ;;  %v13191_v29 = vmul.f32 -1.442695, %v11106_v36  ;;  %v13154_v1 = vmul.f32 -1.442695, %v10676_v2 }
 0x3ea   :  { %v22621_v19 = vpop.permute.xlu1 %10948  ;;  %v22625_v25 = vadd.f32 %v13617_v52, %v13616_v0  ;;  %v13636_v43 = vpop.f32.mrb[213].mxu1  ;;  %16429 = vrcp.f32 %v9498_v20  ;;  %v9104_v39 = vpack.c.bf16 %v16406_v42, %v16408_v31  ;;  %v24159_v42 = vld [vmem:[#allocation142_spill] sm:$0xff] }
 0x3eb   :  { %24157 = vst [vmem:[#allocation124_spill] sm:$0xff] %v22621_v19  ;;  %v16410_v32 = vpop.eup %16409  ;;  %v13638_v18 = vpop.f32.mrb[214].mxu1  ;;  %16431 = vpow2.f32 %v13015_v53  ;;  %v22629_v12 = vadd.f32 %v13636_v43, %v13635_v47  ;;  %v10251_v59 = vadd.f32 %v24159_v42, %v22417_v63  ;;  %v13192_v53 = vmul.f32 -1.442695, %v11109_v38  ;;  %v24162_v63 = vld [vmem:[#allocation136_spill] sm:$0xff]  ;;  %v24164_v38 = vld [vmem:[#allocation109_spill] sm:$0xff] }
 0x3ec   :  { %v13657_v4 = vpop.f32.mrb[208].mxu0  ;;  %v16412_v27 = vpop.eup %16411  ;;  %16433 = vpow2.f32 %v13116_v51  ;;  %13828 = vmatpush3.bf16.msra.mxu0 %v9104_v39  ;;  %v13153_v39 = vmul.f32 -1.442695, %v10673_v62  ;;  %v24190_v19 = vld [vmem:[#allocation54_spill] sm:$0xff] }
 0x3ed   :  { %v13639_v46 = vpop.f32.mrb[215].mxu1  ;;  %v13658_v22 = vpop.f32.mrb[209].mxu0  ;;  %v8672_v52 = vpack.c.bf16 %v16410_v32, %v16412_v27  ;;  %16435 = vpow2.f32 %v13115_v30  ;;  %v10248_v27 = vadd.f32 %v24162_v63, %v22424_v9  ;;  %v24163_v30 = vld [vmem:[#allocation103_spill] sm:$0xff] }
 0x3ee   :  { %v16414_v0 = vpop.eup %16413  ;;  %v22633_v20 = vpop.permute.xlu0 %10943  ;;  %v22635_v35 = vadd.f32 %v13639_v46, %v13638_v18  ;;  %v22639_v47 = vadd.f32 %v13658_v22, %v13657_v4  ;;  %16437 = vpow2.f32 %v13078_v55  ;;  %v24165_v2 = vpack.c.bf16 %v24163_v30, %v24164_v38  ;;  %v24166_v4 = vld [vmem:[#allocation93_spill] sm:$0xff] }
 0x3ef   :  { %24160 = vst [vmem:[#allocation33_spill] sm:$0xff] %v22633_v20  ;;  %v13660_v31 = vpop.f32.mrb[210].mxu0  ;;  %v16416_v56 = vpop.eup %16415  ;;  %13807 = vmatprep.subr.bf16.mxu1 %v8672_v52  ;;  %16439 = vpow2.f32 %v13077_v21  ;;  %v9818_v22 = vadd.f32 %v24166_v4, %v22428_v26  ;;  %v24187_v20 = vld [vmem:[#allocation58_spill] sm:$0xff] }
 0x3f0   :  { %v22637_v36 = vpop.permute.xlu1 %10515  ;;  %v13679_v43 = vpop.f32.mrb[216].mxu1  ;;  %v9538_v32 = vpack.c.bf16 %v16416_v56, %v16414_v0  ;;  %13808 = vmatpush3.bf16.msra.mxu1 %v24165_v2  ;;  %16441 = vpow2.f32 %v13191_v29  ;;  %v13118_v56 = vmul.f32 -1.442695, %v10251_v59 }
 0x3f1   :  { %24161 = vst [vmem:[#allocation125_spill] sm:$0xff] %v22637_v36  ;;  %v16418_v51 = vpop.eup %16417  ;;  %v13661_v18 = vpop.f32.mrb[211].mxu0  ;;  %16443 = vpow2.f32 %v13192_v53 }
 0x3f2   :  { %v13680_v46 = vpop.f32.mrb[217].mxu1  ;;  %v16420_v42 = vpop.eup %16419  ;;  %v22648_v48 = vadd.f32 %v13661_v18, %v13660_v31  ;;  %13829 = vmatprep.subr.bf16.mxu0 %v9538_v32  ;;  %16445 = vpow2.f32 %v13153_v39  ;;  %v15017_v39 = vld [vmem:[%s22865_s3 + $0x48] ss:$104 sps:$4 sm:$0xff]  }
 0x3f3   :  { %v22650_v55 = vadd.f32 %v13680_v46, %v13679_v43  ;;  %v13682_v0 = vpop.f32.mrb[218].mxu1  ;;  %v13701_v62 = vpop.f32.mrb[212].mxu0  ;;  %v9105_v9 = vpack.c.bf16 %v16420_v42, %v16418_v51  ;;  %v13117_v43 = vmul.f32 -1.442695, %v10248_v27  ;;  %16447 = vpow2.f32 %v13154_v1  ;;  %v24170_v1 = vld [vmem:[#allocation29_spill] sm:$0xff] }
 0x3f4   :  { %v16422_v52 = vpop.eup %16421  ;;  %v22652_v63 = vpop.permute.xlu0 %10510  ;;  %v13080_v42 = vmul.f32 -1.442695, %v9818_v22  ;;  %16449 = vpow2.f32 %v13118_v56  ;;  %v24171_v22 = vld [vmem:[#allocation19_spill] sm:$0xff] }
 0x3f5   :  { %24167 = vst [vmem:[#allocation110_spill] sm:$0xff] %v22652_v63  ;;  %v13683_v21 = vpop.f32.mrb[219].mxu1  ;;  %v16424_v14 = vpop.eup %16423  ;;  %13830 = vmatpush3.bf16.msra.mxu0 %v9105_v9  ;;  %v24172_v9 = vpack.c.bf16 %v24170_v1, %v24171_v22 }
 0x3f6   :  { %v22654_v30 = vpop.permute.xlu1 %10092  ;;  %v22656_v38 = vadd.f32 %v13683_v21, %v13682_v0  ;;  %v13702_v26 = vpop.f32.mrb[213].mxu0  ;;  %v8673_v18 = vpack.c.bf16 %v16422_v52, %v16424_v14 }
 0x3f7   :  { %24168 = vst [vmem:[#allocation17_spill] sm:$0xff] %v22654_v30  ;;  %v16426_v31 = vpop.eup %16425  ;;  %v22658_v46 = vadd.f32 %v13702_v26, %v13701_v62  ;;  %v13704_v29 = vpop.f32.mrb[214].mxu0 }
 0x3f8   :  { %v13723_v51 = vpop.f32.mrb[220].mxu1  ;;  %v16428_v59 = vpop.eup %16427  ;;  %v9066_v32 = vadd.f32 1.0, %v16426_v31  ;;  %13809 = vmatprep.subr.bf16.mxu1 %v8673_v18 }
 0x3f9   :  { %v13705_v2 = vpop.f32.mrb[215].mxu0  ;;  %v13724_v53 = vpop.f32.mrb[221].mxu1  ;;  %13810 = vmatpush3.bf16.msra.mxu1 %v24172_v9 }
 0x3fa   :  { %v16430_v4 = vpop.eup %16429  ;;  %v22663_v0 = vpop.permute.xlu0 %10087  ;;  %v22665_v14 = vadd.f32 %v13705_v2, %v13704_v29  ;;  %v22667_v27 = vadd.f32 %v13724_v53, %v13723_v51  ;;  %16451 = vrcp.f32 %v9066_v32 }
 0x3fb   :  { %24169 = vst [vmem:[#allocation53_spill] sm:$0xff] %v22663_v0  ;;  %v13726_v62 = vpop.f32.mrb[222].mxu1  ;;  %v16432_v52 = vpop.eup %16431  ;;  %v9539_v21 = vpack.c.bf16 %v16428_v59, %v16430_v4  ;;  %16453 = vpow2.f32 %v13117_v43  ;;  %v15025_v43 = vld [vmem:[%s22865_s3 + $0x5c] ss:$104 sps:$4 sm:$0xff]  }
 0x3fc   :  { %v22672_v56 = vpop.permute.xlu1 %9659  ;;  %v13745_v26 = vpop.f32.mrb[216].mxu0  ;;  %v9065_v18 = vadd.f32 1.0, %v16432_v52  ;;  %16455 = vpow2.f32 %v13080_v42  ;;  %12058 = vmatmul.mubr.bf16.vlgmr.msra.gmra.mrb[228].mxu1 %v15017_v39  ;;  %v24176_v39 = vld [vmem:[#allocation68_spill] sm:$0xff] }
 0x3fd   :  { %24173 = vst [vmem:[#allocation52_spill] sm:$0xff] %v22672_v56  ;;  %v16434_v31 = vpop.eup %16433  ;;  %v13727_v30 = vpop.f32.mrb[223].mxu1  ;;  %13831 = vmatprep.subr.bf16.mxu0 %v9539_v21  ;;  %12139 = vmatprep.mubr.bf16.mxu1 %v15025_v43 }
 0x3fe   :  { %v13746_v0 = vpop.f32.mrb[217].mxu0  ;;  %v16436_v29 = vpop.eup %16435  ;;  %v10351_v2 = vadd.f32 1.0, %v16434_v31  ;;  %v22674_v51 = vadd.f32 %v13727_v30, %v13726_v62  ;;  %16457 = vrcp.f32 %v9065_v18  ;;  %v24177_v31 = vld [vmem:[#allocation95_spill] sm:$0xff] }
 0x3ff   :  { %v13748_v32 = vpop.f32.mrb[218].mxu0  ;;  %v16438_v53 = vpop.eup %16437  ;;  %v10350_v1 = vadd.f32 1.0, %v16436_v29  ;;  %v22678_v4 = vadd.f32 %v13746_v0, %v13745_v26  ;;  %v9815_v18 = vadd.f32 %v24177_v31, %v24176_v39  ;;  %v24182_v31 = vld [vmem:[#allocation7_spill] sm:$0xff] }
 0x400   :  { %v22676_v59 = vpop.permute.xlu0 %9654  ;;  %v13749_v22 = vpop.f32.mrb[219].mxu0  ;;  %16459 = vrcp.f32 %v10351_v2  ;;  %v9918_v42 = vadd.f32 1.0, %v16438_v53 }
 0x401   :  { %24174 = vst [vmem:[#allocation123_spill] sm:$0xff] %v22676_v59  ;;  %v16440_v52 = vpop.eup %16439  ;;  %v22683_v9 = vpop.permute.xlu1 %10958  ;;  %v22685_v30 = vadd.f32 %v13749_v22, %v13748_v32  ;;  %16461 = vrcp.f32 %v10350_v1  ;;  %v24179_v32 = vld [vmem:[#allocation30_spill] sm:$0xff]  ;;  %v24180_v22 = vld [vmem:[#allocation91_spill] sm:$0xff]  ;;  %v13079_v43 = vmul.f32 -1.442695, %v9815_v18 }
 0x402   :  { %24175 = vst [vmem:[#allocation107_spill] sm:$0xff] %v22683_v9  ;;  %v16442_v62 = vpop.eup %16441  ;;  %v9917_v21 = vadd.f32 1.0, %v16440_v52  ;;  %16463 = vrcp.f32 %v9918_v42  ;;  %v11117_v9 = vadd.f32 %v24180_v22, %v24179_v32  ;;  %v24183_v42 = vld [vmem:[#allocation56_spill] sm:$0xff] }
 0x403   :  { %v16444_v0 = vpop.eup %16443  ;;  %v11216_v26 = vadd.f32 1.0, %v16442_v62  ;;  %v11114_v62 = vadd.f32 %v24183_v42, %v24182_v31 }
 0x404   :  { %v16446_v29 = vpop.eup %16445  ;;  %16465 = vrcp.f32 %v9917_v21  ;;  %v11217_v59 = vadd.f32 1.0, %v16444_v0  ;;  %v22689_v56 = vpop.permute.xlu0 %10953  ;;  %v24184_v0 = vld [vmem:[#allocation120_spill] sm:$0xff]  ;;  %v13194_v18 = vmul.f32 -1.442695, %v11117_v9 }
 0x405   :  { %24178 = vst [vmem:[#allocation105_spill] sm:$0xff] %v22689_v56  ;;  %v16448_v2 = vpop.eup %16447  ;;  %16467 = vrcp.f32 %v11216_v26  ;;  %v10783_v53 = vadd.f32 1.0, %v16446_v29  ;;  %v22693_v1 = vpop.permute.xlu1 %10525  ;;  %v24185_v56 = vld [vmem:[#allocation22_spill] sm:$0xff]  ;;  %v24186_v29 = vld [vmem:[#allocation113_spill] sm:$0xff] }
 0x406   :  { %24181 = vst [vmem:[#allocation116_spill] sm:$0xff] %v22693_v1  ;;  %v16450_v52 = vpop.eup %16449  ;;  %16469 = vrcp.f32 %v11217_v59  ;;  %v10784_v39 = vadd.f32 1.0, %v16448_v2  ;;  %v10684_v36 = vadd.f32 %v24185_v56, %v24184_v0  ;;  %v10681_v32 = vadd.f32 %v24187_v20, %v24186_v29  ;;  %v24189_v2 = vld [vmem:[#allocation25_spill] sm:$0xff] }
 0x407   :  { %v16452_v63 = vpop.eup %16451  ;;  %16471 = vrcp.f32 %v10783_v53  ;;  %v10353_v21 = vadd.f32 1.0, %v16450_v52  ;;  %v10259_v31 = vadd.f32 %v24190_v19, %v24189_v2  ;;  %v13193_v56 = vmul.f32 -1.442695, %v11114_v62  ;;  %v15020_v19 = vld [vmem:[%s22865_s3 + $0x50] ss:$104 sps:$4 sm:$0xff]  }
 0x408   :  { %v16454_v26 = vpop.eup %16453  ;;  %16473 = vrcp.f32 %v10784_v39  ;;  %v22701_v22 = vpop.permute.xlu0 %10520  ;;  %v24191_v39 = vld [vmem:[#allocation63_spill] sm:$0xff]  ;;  %v13156_v29 = vmul.f32 -1.442695, %v10684_v36  ;;  %v13155_v17 = vmul.f32 -1.442695, %v10681_v32 }
 0x409   :  { %24188 = vst [vmem:[#allocation122_spill] sm:$0xff] %v22701_v22  ;;  %v16456_v1 = vpop.eup %16455  ;;  %16475 = vrcp.f32 %v10353_v21  ;;  %v10352_v59 = vadd.f32 1.0, %v16454_v26  ;;  %v22705_v42 = vpop.permute.xlu1 %10102  ;;  %v10256_v0 = vadd.f32 %v24191_v39, %v22472_v40  ;;  %v24192_v22 = vld [vmem:[#allocation108_spill] sm:$0xff]  ;;  %v24193_v21 = vld [vmem:[#allocation65_spill] sm:$0xff]  ;;  %v13120_v36 = vmul.f32 -1.442695, %v10259_v31 }
 0x40a   :  { %v16458_v53 = vpop.eup %16457  ;;  %v9920_v52 = vadd.f32 1.0, %v16456_v1  ;;  %16477 = vpow2.f32 %v13079_v43  ;;  %v9826_v26 = vadd.f32 %v24193_v21, %v24192_v22  ;;  %v24194_v1 = vld [vmem:[#allocation10_spill] sm:$0xff]  ;;  %v15028_v32 = vld [vmem:[%s22865_s3 + $0x64] ss:$104 sps:$4 sm:$0xff]  }
 0x40b   :  { %v16460_v58 = vpop.eup %16459  ;;  %16479 = vrcp.f32 %v10352_v59  ;;  %v9106_v20 = vpack.c.bf16 %v16452_v63, %v16458_v53  ;;  %v9823_v43 = vadd.f32 %v24194_v1, %v22491_v5  ;;  %v24195_v59 = vld [vmem:[#allocation36_spill] sm:$0xff]  ;;  %v24196_v5 = vld [vmem:[#allocation49_spill] sm:$0xff] }
 0x40c   :  { %v16462_v9 = vpop.eup %16461  ;;  %16481 = vrcp.f32 %v9920_v52  ;;  %v22716_v62 = vpop.permute.xlu0 %10097  ;;  %v11122_v22 = vadd.f32 %v24195_v59, %v22503_v61  ;;  %v13119_v52 = vmul.f32 -1.442695, %v10256_v0  ;;  %v11125_v39 = vadd.f32 %v24196_v5, %v22494_v44  ;;  %v24198_v44 = vld [vmem:[#allocation100_spill] sm:$0xff] }
 0x40d   :  { %v16464_v40 = vpop.eup %16463  ;;  %16483 = vpow2.f32 %v13194_v18  ;;  %13832 = vmatpush3.bf16.msra.mxu0 %v9106_v20  ;;  %v10398_v63 = vpack.c.bf16 %v16460_v58, %v16462_v9  ;;  %v22720_v2 = vpop.permute.xlu1 %9669  ;;  %v13082_v18 = vmul.f32 -1.442695, %v9826_v26  ;;  %v13081_v61 = vmul.f32 -1.442695, %v9823_v43  ;;  %v24197_v20 = vld [vmem:[#allocation51_spill] sm:$0xff] }
 0x40e   :  { %v16466_v53 = vpop.eup %16465  ;;  %16485 = vpow2.f32 %v13193_v56  ;;  %v10689_v9 = vadd.f32 %v24197_v20, %v22507_v13  ;;  %v13195_v0 = vmul.f32 -1.442695, %v11122_v22 }
 0x40f   :  { %v16468_v21 = vpop.eup %16467  ;;  %16487 = vpow2.f32 %v13156_v29  ;;  %13839 = vmatprep.subr.bf16.mxu1 %v10398_v63  ;;  %v9965_v58 = vpack.c.bf16 %v16464_v40, %v16466_v53  ;;  %v10692_v29 = vadd.f32 %v24198_v44, %v22505_v28 }
 0x410   :  { %v16470_v31 = vpop.eup %16469  ;;  %16489 = vpow2.f32 %v13155_v17  ;;  %12099 = vmatmul.mubr.bf16.vlgmr.msra.gmra.mrb[224].mxu0 %v15020_v19  ;;  %v22729_v1 = vpop.permute.xlu0 %9664  ;;  %v13196_v17 = vmul.f32 -1.442695, %v11125_v39  ;;  %v13157_v40 = vmul.f32 -1.442695, %v10689_v9 }
 0x411   :  { %v16472_v59 = vpop.eup %16471  ;;  %16491 = vpow2.f32 %v13120_v36  ;;  %13840 = vmatpush3.bf16.msra.mxu1 %v9965_v58  ;;  %v11264_v56 = vpack.c.bf16 %v16470_v31, %v16468_v21  ;;  %v22733_v63 = vpop.permute.xlu1 %10968  ;;  %12180 = vmatprep.mubr.bf16.mxu0 %v15028_v32  ;;  %v13158_v28 = vmul.f32 -1.442695, %v10692_v29  ;;  %v24199_v21 = vld [vmem:[#allocation69_spill] sm:$0xff] }
 0x412   :  { %v16474_v26 = vpop.eup %16473  ;;  %16493 = vpow2.f32 %v13119_v52  ;;  %v10267_v58 = vadd.f32 %v24199_v21, %v22509_v54  ;;  %v24202_v21 = vld [vmem:[#allocation34_spill] sm:$0xff] }
 0x413   :  { %v16476_v19 = vpop.eup %16475  ;;  %16495 = vpow2.f32 %v13082_v18  ;;  %13861 = vmatprep.subr.bf16.mxu0 %v11264_v56  ;;  %v10831_v13 = vpack.c.bf16 %v16474_v26, %v16472_v59 }
 0x414   :  { %v16478_v43 = vpop.eup %16477  ;;  %16497 = vpow2.f32 %v13081_v61  ;;  %v22735_v36 = vpop.permute.xlu0 %10963  ;;  %v24200_v61 = vld [vmem:[#allocation32_spill] sm:$0xff] }
 0x415   :  { %v16480_v53 = vpop.eup %16479  ;;  %v9919_v22 = vadd.f32 1.0, %v16478_v43  ;;  %16499 = vpow2.f32 %v13195_v0  ;;  %13862 = vmatpush3.bf16.msra.mxu0 %v10831_v13  ;;  %v22737_v5 = vpop.permute.xlu1 %10535  ;;  %v10264_v20 = vadd.f32 %v24200_v61, %v22514_v57  ;;  %v24201_v13 = vld [vmem:[#allocation104_spill] sm:$0xff] }
 0x416   :  { %v22739_v32 = vpop.eup %16481  ;;  %16501 = vpow2.f32 %v13196_v17  ;;  %v10399_v52 = vpack.c.bf16 %v16476_v19, %v16480_v53  ;;  %v13122_v19 = vmul.f32 -1.442695, %v10267_v58  ;;  %v9834_v43 = vadd.f32 %v24201_v13, %v22516_v7  ;;  %v24203_v7 = vld [vmem:[#allocation50_spill] sm:$0xff] }
 0x417   :  { %v16484_v39 = vpop.eup %16483  ;;  %16503 = vrcp.f32 %v9919_v22  ;;  %v13121_v53 = vmul.f32 -1.442695, %v10264_v20  ;;  %v11133_v61 = vadd.f32 %v24203_v7, %v22524_v6 }
 0x418   :  { %v16486_v18 = vpop.eup %16485  ;;  %v11219_v31 = vadd.f32 1.0, %v16484_v39  ;;  %16505 = vpow2.f32 %v13157_v40  ;;  %13841 = vmatprep.subr.bf16.mxu1 %v10399_v52  ;;  %v22745_v9 = vpop.permute.xlu0 %10530 }
 0x419   :  { %v16488_v59 = vpop.eup %16487  ;;  %v11218_v56 = vadd.f32 1.0, %v16486_v18  ;;  %16507 = vpow2.f32 %v13158_v28  ;;  %v11524_v0 = vpop.permute.xlu1 %11523 }
 0x41a   :  { %v16490_v44 = vpop.eup %16489  ;;  %16509 = vrcp.f32 %v11219_v31  ;;  %v10786_v29 = vadd.f32 1.0, %v16488_v59  ;;  %v11694_v26 = vadd.f32 %v22625_v25, %v11524_v0  ;;  %v9831_v25 = vadd.f32 %v24202_v21, %v22520_v60  ;;  %v24204_v60 = vld [vmem:[#allocation42_spill] sm:$0xff] }
 0x41b   :  { %v16492_v17 = vpop.eup %16491  ;;  %16511 = vrcp.f32 %v11218_v56  ;;  %v10785_v54 = vadd.f32 1.0, %v16490_v44 }
 0x41c   :  { %v16494_v40 = vpop.eup %16493  ;;  %16513 = vrcp.f32 %v10786_v29  ;;  %v10355_v57 = vadd.f32 1.0, %v16492_v17  ;;  %v11519_v22 = vpop.permute.xlu0 %11518  ;;  %v11735_v28 = vadd.f32 %v22635_v35, %v11694_v26  ;;  %v13084_v35 = vmul.f32 -1.442695, %v9834_v43 }
 0x41d   :  { %v16496_v52 = vpop.eup %16495  ;;  %16515 = vrcp.f32 %v10785_v54  ;;  %v10354_v39 = vadd.f32 1.0, %v16494_v40  ;;  %v11691_v18 = vadd.f32 %v22623_v34, %v11519_v22  ;;  %v11130_v34 = vadd.f32 %v24204_v60, %v22532_v33  ;;  %v24205_v33 = vld [vmem:[#allocation80_spill] sm:$0xff]  ;;  %v24209_v60 = vld [vmem:[#allocation5_spill] sm:$0xff] }
 0x41e   :  { %v16498_v31 = vpop.eup %16497  ;;  %16517 = vrcp.f32 %v10355_v57  ;;  %v9922_v58 = vadd.f32 1.0, %v16496_v52  ;;  %v11776_v59 = vadd.f32 %v22648_v48, %v11735_v28  ;;  %v13083_v6 = vmul.f32 -1.442695, %v9831_v25  ;;  %v13767_v25 = vpop.f32.mrb[224].mxu1 }
 0x41f   :  { %v16500_v20 = vpop.eup %16499  ;;  %16519 = vrcp.f32 %v10354_v39  ;;  %v9921_v56 = vadd.f32 1.0, %v16498_v31  ;;  %v11732_v0 = vadd.f32 %v22629_v12, %v11691_v18  ;;  %v13198_v40 = vmul.f32 -1.442695, %v11133_v61  ;;  %v24207_v31 = vld [vmem:[#allocation31_spill] sm:$0xff]  ;;  %v13768_v7 = vpop.f32.mrb[225].mxu1 }
 0x420   :  { %v16502_v44 = vpop.eup %16501  ;;  %16521 = vrcp.f32 %v9922_v58  ;;  %v11220_v29 = vadd.f32 1.0, %v16500_v20  ;;  %v11817_v26 = vadd.f32 %v22656_v38, %v11776_v59  ;;  %v10700_v28 = vadd.f32 %v24205_v33, %v22536_v11  ;;  %v13770_v20 = vpop.f32.mrb[226].mxu1 }
 0x421   :  { %v16504_v17 = vpop.eup %16503  ;;  %16523 = vrcp.f32 %v9921_v56  ;;  %v11221_v54 = vadd.f32 1.0, %v16502_v44  ;;  %v11773_v48 = vadd.f32 %v22639_v47, %v11732_v0  ;;  %v13197_v47 = vmul.f32 -1.442695, %v11130_v34  ;;  %v24208_v0 = vld [vmem:[#allocation70_spill] sm:$0xff] }
 0x422   :  { %v16506_v13 = vpop.eup %16505  ;;  %16525 = vrcp.f32 %v11220_v29  ;;  %v9966_v43 = vpack.c.bf16 %v22739_v32, %v16504_v17  ;;  %v11858_v12 = vadd.f32 %v22665_v14, %v11817_v26  ;;  %v24206_v14 = vld [vmem:[#allocation102_spill] sm:$0xff]  ;;  %v10275_v58 = vadd.f32 %v24207_v31, %v22552_v50  ;;  %v13771_v29 = vpop.f32.mrb[227].mxu1 }
 0x423   :  { %v16508_v57 = vpop.eup %16507  ;;  %16527 = vrcp.f32 %v11221_v54  ;;  %v10787_v22 = vadd.f32 1.0, %v16506_v13  ;;  %v11814_v38 = vadd.f32 %v22650_v55, %v11773_v48  ;;  %v10697_v18 = vadd.f32 %v24206_v14, %v22546_v49 }
 0x424   :  { %v16510_v52 = vpop.eup %16509  ;;  %v10788_v39 = vadd.f32 1.0, %v16508_v57  ;;  %16529 = vpow2.f32 %v13122_v19  ;;  %13842 = vmatpush3.bf16.msra.mxu1 %v9966_v43  ;;  %v11899_v21 = vadd.f32 %v22674_v51, %v11858_v12  ;;  %v13769_v59 = vadd.f32 %v13768_v7, %v13767_v25 }
 0x425   :  { %v16512_v32 = vpop.eup %16511  ;;  %16531 = vrcp.f32 %v10787_v22  ;;  %v11855_v11 = vadd.f32 %v22658_v46, %v11814_v38  ;;  %v13160_v56 = vmul.f32 -1.442695, %v10700_v28  ;;  %v10272_v44 = vadd.f32 %v24208_v0, %v22564_v15 }
 0x426   :  { %v16514_v55 = vpop.eup %16513  ;;  %16533 = vrcp.f32 %v10788_v39  ;;  %v11265_v61 = vpack.c.bf16 %v16510_v52, %v16512_v32  ;;  %v11940_v19 = vadd.f32 %v22685_v30, %v11899_v21  ;;  %v9842_v34 = vadd.f32 %v24209_v60, %v22570_v24  ;;  %v24211_v24 = vld [vmem:[#allocation18_spill] sm:$0xff] }
 0x427   :  { %v16516_v51 = vpop.eup %16515  ;;  %16535 = vpow2.f32 %v13121_v53  ;;  %v11896_v49 = vadd.f32 %v22667_v27, %v11855_v11  ;;  %v13772_v26 = vadd.f32 %v13771_v29, %v13770_v20  ;;  %v13159_v17 = vmul.f32 -1.442695, %v10697_v18  ;;  %v24210_v27 = vld [vmem:[#allocation12_spill] sm:$0xff] }
 0x428   :  { %v16518_v50 = vpop.eup %16517  ;;  %16537 = vpow2.f32 %v13084_v35  ;;  %13863 = vmatprep.subr.bf16.mxu0 %v11265_v61  ;;  %v10832_v46 = vpack.c.bf16 %v16514_v55, %v16516_v51  ;;  %v13124_v54 = vmul.f32 -1.442695, %v10275_v58  ;;  %v9839_v13 = vadd.f32 %v24210_v27, %v22579_v37 }
 0x429   :  { %v16520_v30 = vpop.eup %16519  ;;  %16539 = vpow2.f32 %v13083_v6  ;;  %v11937_v53 = vadd.f32 %v22678_v4, %v11896_v49  ;;  %v22782_v35 = vadd.f32 %v13772_v26, %v11940_v19  ;;  %v13123_v12 = vmul.f32 -1.442695, %v10272_v44 }
 0x42a   :  { %v16522_v48 = vpop.eup %16521  ;;  %16541 = vpow2.f32 %v13198_v40  ;;  %13864 = vmatpush3.bf16.msra.mxu0 %v10832_v46  ;;  %v10400_v15 = vpack.c.bf16 %v16518_v50, %v16520_v30  ;;  %v11138_v57 = vadd.f32 %v24211_v24, %v22585_v10  ;;  %v13086_v40 = vmul.f32 -1.442695, %v9842_v34  ;;  %v24213_v50 = vld [vmem:[#allocation90_spill] sm:$0xff]  ;;  %v24217_v24 = vld [vmem:[#allocation41_spill] sm:$0xff] }
 0x42b   :  { %v16524_v43 = vpop.eup %16523  ;;  %16543 = vpow2.f32 %v13197_v47  ;;  %v22786_v6 = vadd.f32 %v13769_v59, %v11937_v53  ;;  %v13085_v37 = vmul.f32 -1.442695, %v9839_v13  ;;  %v24212_v59 = vld [vmem:[#allocation11_spill] sm:$0xff]  ;;  %v10705_v46 = vadd.f32 %v24213_v50, %v22594_v3 }
 0x42c   :  { %v16526_v22 = vpop.eup %16525  ;;  %16545 = vpow2.f32 %v13160_v56  ;;  %13843 = vmatprep.subr.bf16.mxu1 %v10400_v15  ;;  %v9967_v4 = vpack.c.bf16 %v16522_v48, %v16524_v43  ;;  %v13199_v47 = vmul.f32 -1.442695, %v11138_v57  ;;  %v11141_v20 = vadd.f32 %v24212_v59, %v22581_v8  ;;  %v24215_v15 = vld [vmem:[#allocation45_spill] sm:$0xff] }
 0x42d   :  { %v16528_v33 = vpop.eup %16527  ;;  %16547 = vpow2.f32 %v13159_v17  ;;  %v10708_v30 = vadd.f32 %v22485_v16, %v22590_v45  ;;  %v10280_v27 = vadd.f32 %v24215_v15, %v22604_v41  ;;  %v13161_v43 = vmul.f32 -1.442695, %v10705_v46  ;;  %v24221_v41 = vld [vmem:[#allocation88_spill] sm:$0xff] }
 0x42e   :  { %v16530_v28 = vpop.eup %16529  ;;  %16549 = vpow2.f32 %v13124_v54  ;;  %13844 = vmatpush3.bf16.msra.mxu1 %v9967_v4  ;;  %v11266_v38 = vpack.c.bf16 %v16528_v33, %v16526_v22  ;;  %v13200_v26 = vmul.f32 -1.442695, %v11141_v20  ;;  %v24214_v54 = vld [vmem:[#allocation89_spill] sm:$0xff]  ;;  %v24218_v4 = vld [vmem:[#allocation44_spill] sm:$0xff] }
 0x42f   :  { %v16532_v52 = vpop.eup %16531  ;;  %v10357_v39 = vadd.f32 1.0, %v16530_v28  ;;  %16551 = vpow2.f32 %v13123_v12  ;;  %v10283_v53 = vadd.f32 %v24214_v54, %v22598_v23  ;;  %v24216_v12 = vld [vmem:[#allocation117_spill] sm:$0xff]  ;;  %v13162_v45 = vmul.f32 -1.442695, %v10708_v30  ;;  %v24231_v30 = vld [vmem:[#allocation43_spill] sm:$0xff] }
 0x430   :  { %v16534_v21 = vpop.eup %16533  ;;  %16553 = vpow2.f32 %v13086_v40  ;;  %13865 = vmatprep.subr.bf16.mxu0 %v11266_v38  ;;  %v9850_v57 = vadd.f32 %v24217_v24, %v24216_v12  ;;  %v24219_v40 = vld [vmem:[#allocation129_spill] sm:$0xff]  ;;  %v24220_v38 = vld [vmem:[#allocation124_spill] sm:$0xff] }
 0x431   :  { %v16536_v10 = vpop.eup %16535  ;;  %16555 = vrcp.f32 %v10357_v39  ;;  %v10833_v25 = vpack.c.bf16 %v16534_v21, %v16532_v52  ;;  %v9847_v33 = vadd.f32 %v24219_v40, %v24218_v4  ;;  %v11149_v52 = vadd.f32 %v24221_v41, %v24220_v38  ;;  %v24222_v21 = vld [vmem:[#allocation33_spill] sm:$0xff]  ;;  %v24232_v41 = vld [vmem:[#allocation52_spill] sm:$0xff] }
 0x432   :  { %v16538_v32 = vpop.eup %16537  ;;  %v10356_v14 = vadd.f32 1.0, %v16536_v10  ;;  %16557 = vpow2.f32 %v13085_v37  ;;  %v13126_v37 = vmul.f32 -1.442695, %v10283_v53  ;;  %v24223_v10 = vld [vmem:[#allocation106_spill] sm:$0xff] }
 0x433   :  { %v16540_v18 = vpop.eup %16539  ;;  %v9924_v31 = vadd.f32 1.0, %v16538_v32  ;;  %16559 = vpow2.f32 %v13199_v47  ;;  %13866 = vmatpush3.bf16.msra.mxu0 %v10833_v25  ;;  %v13125_v47 = vmul.f32 -1.442695, %v10280_v27  ;;  %v11146_v25 = vadd.f32 %v24223_v10, %v24222_v21 }
 0x434   :  { %v16542_v58 = vpop.eup %16541  ;;  %16561 = vrcp.f32 %v10356_v14  ;;  %v9923_v11 = vadd.f32 1.0, %v16540_v18  ;;  %v13088_v18 = vmul.f32 -1.442695, %v9850_v57 }
 0x435   :  { %v16544_v7 = vpop.eup %16543  ;;  %16563 = vrcp.f32 %v9924_v31  ;;  %v11223_v55 = vadd.f32 1.0, %v16542_v58  ;;  %v24224_v31 = vld [vmem:[#allocation125_spill] sm:$0xff]  ;;  %v24225_v58 = vld [vmem:[#allocation138_spill] sm:$0xff] }
 0x436   :  { %v16546_v61 = vpop.eup %16545  ;;  %16565 = vrcp.f32 %v9923_v11  ;;  %v11222_v19 = vadd.f32 1.0, %v16544_v7  ;;  %v10716_v11 = vadd.f32 %v24225_v58, %v24224_v31  ;;  %v24235_v31 = vld [vmem:[#allocation111_spill] sm:$0xff] }
 0x437   :  { %v16548_v51 = vpop.eup %16547  ;;  %16567 = vrcp.f32 %v11223_v55  ;;  %v10790_v56 = vadd.f32 1.0, %v16546_v61  ;;  %v13087_v55 = vmul.f32 -1.442695, %v9847_v33  ;;  %v24226_v61 = vld [vmem:[#allocation110_spill] sm:$0xff] }
 0x438   :  { %v16550_v0 = vpop.eup %16549  ;;  %16569 = vrcp.f32 %v11222_v19  ;;  %v10789_v44 = vadd.f32 1.0, %v16548_v51  ;;  %v24227_v19 = vld [vmem:[#allocation101_spill] sm:$0xff] }
 0x439   :  { %v16552_v49 = vpop.eup %16551  ;;  %16571 = vrcp.f32 %v10790_v56  ;;  %v10359_v29 = vadd.f32 1.0, %v16550_v0  ;;  %v10713_v59 = vadd.f32 %v24227_v19, %v24226_v61  ;;  %v13202_v56 = vmul.f32 -1.442695, %v11149_v52  ;;  %v24233_v52 = vld [vmem:[#allocation77_spill] sm:$0xff]  ;;  %v24237_v19 = vld [vmem:[#allocation115_spill] sm:$0xff] }
 0x43a   :  { %v16554_v60 = vpop.eup %16553  ;;  %16573 = vrcp.f32 %v10789_v44  ;;  %v10358_v34 = vadd.f32 1.0, %v16552_v49  ;;  %v13201_v44 = vmul.f32 -1.442695, %v11146_v25  ;;  %v24228_v49 = vld [vmem:[#allocation17_spill] sm:$0xff] }
 0x43b   :  { %v16556_v8 = vpop.eup %16555  ;;  %16575 = vrcp.f32 %v10359_v29  ;;  %v9926_v17 = vadd.f32 1.0, %v16554_v60  ;;  %v24229_v29 = vld [vmem:[#allocation26_spill] sm:$0xff]  ;;  %v13163_v54 = vmul.f32 -1.442695, %v10713_v59  ;;  %v24236_v61 = vld [vmem:[#allocation105_spill] sm:$0xff] }
 0x43c   :  { %v16558_v48 = vpop.eup %16557  ;;  %16577 = vrcp.f32 %v10358_v34  ;;  %v10291_v50 = vadd.f32 %v24229_v29, %v24228_v49  ;;  %v13164_v34 = vmul.f32 -1.442695, %v10716_v11  ;;  %v11154_v59 = vadd.f32 %v24237_v19, %v24236_v61 }
 0x43d   :  { %v16560_v13 = vpop.eup %16559  ;;  %16579 = vrcp.f32 %v9926_v17  ;;  %v9925_v3 = vadd.f32 1.0, %v16558_v48 }
 0x43e   :  { %v16562_v22 = vpop.eup %16561  ;;  %v11224_v16 = vadd.f32 1.0, %v16560_v13  ;;  %16581 = vpow2.f32 %v13200_v26  ;;  %v24230_v26 = vld [vmem:[#allocation53_spill] sm:$0xff]  ;;  %v13128_v27 = vmul.f32 -1.442695, %v10291_v50  ;;  %v24240_v50 = vld [vmem:[#allocation122_spill] sm:$0xff] }
 0x43f   :  { %v16564_v23 = vpop.eup %16563  ;;  %16583 = vrcp.f32 %v9925_v3  ;;  %v10401_v28 = vpack.c.bf16 %v16556_v8, %v16562_v22  ;;  %v10288_v8 = vadd.f32 %v24231_v30, %v24230_v26 }
 0x440   :  { %v16566_v39 = vpop.eup %16565  ;;  %16585 = vrcp.f32 %v11224_v16 }
 0x441   :  { %v16568_v32 = vpop.eup %16567  ;;  %16587 = vpow2.f32 %v13161_v43  ;;  %13845 = vmatprep.subr.bf16.mxu1 %v10401_v28  ;;  %v9968_v14 = vpack.c.bf16 %v16564_v23, %v16566_v39  ;;  %v13127_v43 = vmul.f32 -1.442695, %v10288_v8  ;;  %v9858_v39 = vadd.f32 %v24233_v52, %v24232_v41  ;;  %v24242_v8 = vld [vmem:[#allocation116_spill] sm:$0xff] }
 0x442   :  { %v16570_v7 = vpop.eup %16569  ;;  %16589 = vpow2.f32 %v13162_v45 }
 0x443   :  { %v16572_v20 = vpop.eup %16571  ;;  %16591 = vpow2.f32 %v13126_v37  ;;  %13846 = vmatpush3.bf16.msra.mxu1 %v9968_v14  ;;  %v11267_v51 = vpack.c.bf16 %v16568_v32, %v16570_v7 }
 0x444   :  { %v16574_v0 = vpop.eup %16573  ;;  %16593 = vpow2.f32 %v13125_v47 }
 0x445   :  { %v16576_v46 = vpop.eup %16575  ;;  %16595 = vpow2.f32 %v13088_v18  ;;  %13867 = vmatprep.subr.bf16.mxu0 %v11267_v51  ;;  %v10834_v60 = vpack.c.bf16 %v16572_v20, %v16574_v0  ;;  %v24234_v18 = vld [vmem:[#allocation123_spill] sm:$0xff]  ;;  %v24239_v0 = vld [vmem:[#allocation57_spill] sm:$0xff] }
 0x446   :  { %v16578_v17 = vpop.eup %16577  ;;  %16597 = vpow2.f32 %v13087_v55  ;;  %v9855_v58 = vadd.f32 %v24235_v31, %v24234_v18  ;;  %v13090_v55 = vmul.f32 -1.442695, %v9858_v39 }
 0x447   :  { %v16580_v53 = vpop.eup %16579  ;;  %16599 = vpow2.f32 %v13202_v56  ;;  %13868 = vmatpush3.bf16.msra.mxu0 %v10834_v60  ;;  %v10402_v48 = vpack.c.bf16 %v16576_v46, %v16578_v17  ;;  %v24238_v56 = vld [vmem:[#allocation107_spill] sm:$0xff]  ;;  %v24241_v46 = vld [vmem:[#allocation137_spill] sm:$0xff] }
 0x448   :  { %v16582_v15 = vpop.eup %16581  ;;  %16601 = vpow2.f32 %v13201_v44  ;;  %v11157_v44 = vadd.f32 %v24239_v0, %v24238_v56  ;;  %v10721_v60 = vadd.f32 %v24241_v46, %v24240_v50  ;;  %v13089_v30 = vmul.f32 -1.442695, %v9855_v58  ;;  %v24243_v17 = vld [vmem:[#allocation131_spill] sm:$0xff] }
 0x449   :  { %v16584_v13 = vpop.eup %16583  ;;  %v11225_v3 = vadd.f32 1.0, %v16582_v15  ;;  %16603 = vpow2.f32 %v13164_v34  ;;  %13847 = vmatprep.subr.bf16.mxu1 %v10402_v48  ;;  %v13203_v15 = vmul.f32 -1.442695, %v11154_v59 }
 0x44a   :  { %v16586_v12 = vpop.eup %16585  ;;  %16605 = vpow2.f32 %v13163_v54  ;;  %v9969_v24 = vpack.c.bf16 %v16580_v53, %v16584_v13  ;;  %v10724_v54 = vadd.f32 %v24243_v17, %v24242_v8 }
 0x44b   :  { %v16588_v57 = vpop.eup %16587  ;;  %16607 = vrcp.f32 %v11225_v3 }
 0x44c   :  { %v16590_v22 = vpop.eup %16589  ;;  %v10791_v16 = vadd.f32 1.0, %v16588_v57  ;;  %16609 = vpow2.f32 %v13128_v27  ;;  %13848 = vmatpush3.bf16.msra.mxu1 %v9969_v24  ;;  %v24244_v27 = vld [vmem:[#allocation8_spill] sm:$0xff] }
 0x44d   :  { %v16592_v45 = vpop.eup %16591  ;;  %v10792_v4 = vadd.f32 1.0, %v16590_v22  ;;  %16611 = vpow2.f32 %v13127_v43  ;;  %v10299_v13 = vadd.f32 %v24244_v27, %v22705_v42  ;;  %v13204_v43 = vmul.f32 -1.442695, %v11157_v44  ;;  %v24251_v27 = vld [vmem:[#allocation128_spill] sm:$0xff] }
 0x44e   :  { %v16594_v40 = vpop.eup %16593  ;;  %16613 = vrcp.f32 %v10791_v16  ;;  %v10361_v33 = vadd.f32 1.0, %v16592_v45  ;;  %v13165_v16 = vmul.f32 -1.442695, %v10721_v60  ;;  %v24246_v45 = vld [vmem:[#allocation99_spill] sm:$0xff] }
 0x44f   :  { %v16596_v23 = vpop.eup %16595  ;;  %16615 = vrcp.f32 %v10792_v4  ;;  %v10360_v28 = vadd.f32 1.0, %v16594_v40  ;;  %v9866_v4 = vadd.f32 %v24246_v45, %v22720_v2 }
 0x450   :  { %v16598_v37 = vpop.eup %16597  ;;  %16617 = vrcp.f32 %v10361_v33  ;;  %v9928_v38 = vadd.f32 1.0, %v16596_v23  ;;  %v13166_v33 = vmul.f32 -1.442695, %v10724_v54  ;;  %v24247_v23 = vld [vmem:[#allocation126_spill] sm:$0xff] }
 0x451   :  { %v16600_v47 = vpop.eup %16599  ;;  %16619 = vrcp.f32 %v10360_v28  ;;  %v9927_v21 = vadd.f32 1.0, %v16598_v37  ;;  %v9863_v28 = vadd.f32 %v24247_v23, %v22729_v1 }
 0x452   :  { %v16602_v10 = vpop.eup %16601  ;;  %16621 = vrcp.f32 %v9928_v38  ;;  %v11227_v25 = vadd.f32 1.0, %v16600_v47  ;;  %v13130_v38 = vmul.f32 -1.442695, %v10299_v13  ;;  %v10729_v13 = vadd.f32 %v24251_v27, %v22745_v9 }
 0x453   :  { %v16604_v32 = vpop.eup %16603  ;;  %16623 = vrcp.f32 %v9927_v21  ;;  %v11226_v14 = vadd.f32 1.0, %v16602_v10  ;;  %v13092_v21 = vmul.f32 -1.442695, %v9866_v4  ;;  %v24249_v10 = vld [vmem:[#allocation20_spill] sm:$0xff] }
 0x454   :  { %v16606_v11 = vpop.eup %16605  ;;  %16625 = vrcp.f32 %v11227_v25  ;;  %v10794_v7 = vadd.f32 1.0, %v16604_v32  ;;  %v11162_v25 = vadd.f32 %v24249_v10, %v22735_v36  ;;  %v13091_v32 = vmul.f32 -1.442695, %v9863_v28 }
 0x455   :  { %v16608_v20 = vpop.eup %16607  ;;  %16627 = vrcp.f32 %v11226_v14  ;;  %v10793_v51 = vadd.f32 1.0, %v16606_v11  ;;  %v24250_v14 = vld [vmem:[#allocation96_spill] sm:$0xff]  ;;  %v13167_v4 = vmul.f32 -1.442695, %v10729_v13 }
 0x456   :  { %v16610_v49 = vpop.eup %16609  ;;  %16629 = vrcp.f32 %v10794_v7  ;;  %v11268_v29 = vpack.c.bf16 %v16608_v20, %v16586_v12  ;;  %v24245_v12 = vld [vmem:[#allocation6_spill] sm:$0xff]  ;;  %v10732_v18 = vadd.f32 %v24250_v14, %v22737_v5 }
 0x457   :  { %v16612_v34 = vpop.eup %16611  ;;  %16631 = vrcp.f32 %v10793_v51  ;;  %v10363_v26 = vadd.f32 1.0, %v16610_v49  ;;  %v10296_v24 = vadd.f32 %v24245_v12, %v22716_v62  ;;  %v24248_v62 = vld [vmem:[#allocation112_spill] sm:$0xff] }
 0x458   :  { %v16614_v53 = vpop.eup %16613  ;;  %v10362_v48 = vadd.f32 1.0, %v16612_v34  ;;  %16633 = vpow2.f32 %v13090_v55  ;;  %13869 = vmatprep.subr.bf16.mxu0 %v11268_v29  ;;  %v11165_v41 = vadd.f32 %v24248_v62, %v22733_v63  ;;  %v13205_v55 = vmul.f32 -1.442695, %v11162_v25 }
 0x459   :  { %v16616_v3 = vpop.eup %16615  ;;  %16635 = vrcp.f32 %v10363_v26  ;;  %v13129_v39 = vmul.f32 -1.442695, %v10296_v24  ;;  %v13168_v59 = vmul.f32 -1.442695, %v10732_v18 }
 0x45a   :  { %v16618_v57 = vpop.eup %16617  ;;  %16637 = vrcp.f32 %v10362_v48  ;;  %v10835_v22 = vpack.c.bf16 %v16616_v3, %v16614_v53  ;;  %v13206_v58 = vmul.f32 -1.442695, %v11165_v41  ;;  %v13789_v5 = vpop.f32.mrb[220].mxu0 }
 0x45b   :  { %v16620_v40 = vpop.eup %16619  ;;  %16639 = vpow2.f32 %v13089_v30  ;;  %v13790_v0 = vpop.f32.mrb[221].mxu0 }
 0x45c   :  { %v16622_v42 = vpop.eup %16621  ;;  %16641 = vpow2.f32 %v13203_v15  ;;  %13870 = vmatpush3.bf16.msra.mxu0 %v10835_v22  ;;  %v10403_v37 = vpack.c.bf16 %v16618_v57, %v16620_v40  ;;  %v13791_v29 = vadd.f32 %v13790_v0, %v13789_v5  ;;  %v13792_v50 = vpop.f32.mrb[222].mxu0 }
 0x45d   :  { %v16624_v52 = vpop.eup %16623  ;;  %16643 = vpow2.f32 %v13204_v43  ;;  %v13793_v34 = vpop.f32.mrb[223].mxu0 }
 0x45e   :  { %v16626_v47 = vpop.eup %16625  ;;  %16645 = vpow2.f32 %v13165_v16  ;;  %13849 = vmatprep.subr.bf16.mxu1 %v10403_v37  ;;  %v9970_v2 = vpack.c.bf16 %v16622_v42, %v16624_v52  ;;  %v22841_v8 = vadd.f32 %v13791_v29, %v22786_v6  ;;  %v13794_v17 = vadd.f32 %v13793_v34, %v13792_v50 }
 0x45f   :  { %v16628_v1 = vpop.eup %16627  ;;  %16647 = vpow2.f32 %v13166_v33 }
 0x460   :  { %v16630_v31 = vpop.eup %16629  ;;  %16649 = vpow2.f32 %v13130_v38  ;;  %13850 = vmatpush3.bf16.msra.mxu1 %v9970_v2  ;;  %v11269_v63 = vpack.c.bf16 %v16626_v47, %v16628_v1  ;;  %v22846_v3 = vadd.f32 %v13794_v17, %v22782_v35 }
 0x461   :  { %v16632_v11 = vpop.eup %16631  ;;  %16651 = vpow2.f32 %v13129_v39 }
 0x462   :  { %v16634_v7 = vpop.eup %16633  ;;  %16653 = vpow2.f32 %v13092_v21  ;;  %13871 = vmatprep.subr.bf16.mxu0 %v11269_v63  ;;  %v10836_v61 = vpack.c.bf16 %v16630_v31, %v16632_v11  ;;  %v15023_v31 = vld [vmem:[%s22865_s3 + $0x58] ss:$104 sps:$4 sm:$0xff]  }
 0x463   :  { %v16636_v19 = vpop.eup %16635  ;;  %v9930_v36 = vadd.f32 1.0, %v16634_v7  ;;  %16655 = vpow2.f32 %v13091_v32 }
 0x464   :  { %v16638_v20 = vpop.eup %16637  ;;  %16657 = vpow2.f32 %v13206_v58  ;;  %13872 = vmatpush3.bf16.msra.mxu0 %v10836_v61 }
 0x465   :  { %v16640_v51 = vpop.eup %16639  ;;  %16659 = vrcp.f32 %v9930_v36  ;;  %v10404_v56 = vpack.c.bf16 %v16636_v19, %v16638_v20  ;;  %v15026_v19 = vld [vmem:[%s22865_s3 + $0x60] ss:$104 sps:$4 sm:$0xff]  }
 0x466   :  { %v16642_v44 = vpop.eup %16641  ;;  %v9929_v49 = vadd.f32 1.0, %v16640_v51  ;;  %16661 = vpow2.f32 %v13205_v55 }
 0x467   :  { %v16644_v46 = vpop.eup %16643  ;;  %v11228_v60 = vadd.f32 1.0, %v16642_v44  ;;  %16663 = vpow2.f32 %v13168_v59  ;;  %13851 = vmatprep.subr.bf16.mxu1 %v10404_v56 }
 0x468   :  { %v16646_v26 = vpop.eup %16645  ;;  %16665 = vrcp.f32 %v9929_v49  ;;  %v11229_v30 = vadd.f32 1.0, %v16644_v46 }
 0x469   :  { %v16648_v54 = vpop.eup %16647  ;;  %16667 = vrcp.f32 %v11228_v60  ;;  %v10795_v53 = vadd.f32 1.0, %v16646_v26 }
 0x46a   :  { %v16650_v48 = vpop.eup %16649  ;;  %16669 = vrcp.f32 %v11229_v30  ;;  %v10796_v15 = vadd.f32 1.0, %v16648_v54 }
 0x46b   :  { %v16652_v43 = vpop.eup %16651  ;;  %16671 = vrcp.f32 %v10795_v53  ;;  %v10365_v12 = vadd.f32 1.0, %v16650_v48 }
 0x46c   :  { %v16654_v24 = vpop.eup %16653  ;;  %16673 = vrcp.f32 %v10796_v15  ;;  %v10364_v6 = vadd.f32 1.0, %v16652_v43 }
 0x46d   :  { %v16656_v57 = vpop.eup %16655  ;;  %16675 = vrcp.f32 %v10365_v12  ;;  %v9932_v22 = vadd.f32 1.0, %v16654_v24 }
 0x46e   :  { %v16658_v16 = vpop.eup %16657  ;;  %16677 = vrcp.f32 %v10364_v6  ;;  %v9931_v45 = vadd.f32 1.0, %v16656_v57 }
 0x46f   :  { %v16660_v40 = vpop.eup %16659  ;;  %16679 = vrcp.f32 %v9932_v22  ;;  %v11231_v33 = vadd.f32 1.0, %v16658_v16 }
 0x470   :  { %v16662_v9 = vpop.eup %16661  ;;  %16681 = vrcp.f32 %v9931_v45 }
 0x471   :  { %v16664_v35 = vpop.eup %16663  ;;  %16683 = vrcp.f32 %v11231_v33  ;;  %v11230_v23 = vadd.f32 1.0, %v16662_v9 }
 0x472   :  { %v16666_v28 = vpop.eup %16665  ;;  %16685 = vpow2.f32 %v13167_v4  ;;  %v10798_v10 = vadd.f32 1.0, %v16664_v35 }
 0x473   :  { %v16668_v42 = vpop.eup %16667  ;;  %16687 = vrcp.f32 %v11230_v23  ;;  %v9971_v37 = vpack.c.bf16 %v16660_v40, %v16666_v28 }
 0x474   :  { %v16670_v38 = vpop.eup %16669  ;;  %16689 = vrcp.f32 %v10798_v10 }
 0x475   :  { %v16672_v62 = vpop.eup %16671  ;;  %13852 = vmatpush3.bf16.msra.mxu1 %v9971_v37  ;;  %v11270_v41 = vpack.c.bf16 %v16670_v38, %v16668_v42 }
 0x476   :  { %v16674_v52 = vpop.eup %16673 }
 0x477   :  { %v16676_v39 = vpop.eup %16675  ;;  %13873 = vmatprep.subr.bf16.mxu0 %v11270_v41  ;;  %v10837_v47 = vpack.c.bf16 %v16674_v52, %v16672_v62 }
 0x478   :  { %v16678_v2 = vpop.eup %16677 }
 0x479   :  { %v16680_v21 = vpop.eup %16679  ;;  %13874 = vmatpush3.bf16.msra.mxu0 %v10837_v47  ;;  %v10405_v25 = vpack.c.bf16 %v16676_v39, %v16678_v2 }
 0x47a   :  { %v16682_v1 = vpop.eup %16681 }
 0x47b   :  { %v16684_v32 = vpop.eup %16683  ;;  %13853 = vmatprep.subr.bf16.mxu1 %v10405_v25  ;;  %v9972_v14 = vpack.c.bf16 %v16680_v21, %v16682_v1 }
 0x47c   :  { %v16686_v18 = vpop.eup %16685 }
 0x47d   :  { %v16688_v63 = vpop.eup %16687  ;;  %v10797_v58 = vadd.f32 1.0, %v16686_v18  ;;  %13854 = vmatpush3.bf16.msra.mxu1 %v9972_v14 }
 0x47e   :  { %v11271_v11 = vpack.c.bf16 %v16684_v32, %v16688_v63  ;;  %v16690_v7 = vpop.eup %16689 }
 0x47f   :  { %16691 = vrcp.f32 %v10797_v58 }
 0x480   :  { %12140 = vmatmul.mubr.bf16.vlgmr.msra.gmra.mrb[232].mxu1 %v15023_v31  ;;  %13875 = vmatprep.subr.bf16.mxu0 %v11271_v11 }
 0x489   :  { %v16692_v55 = vpop.eup %16691 }
 0x48a   :  { %v10838_v61 = vpack.c.bf16 %v16690_v7, %v16692_v55 }
 0x48c   :  { %13876 = vmatpush3.bf16.msra.mxu0 %v10838_v61 }
 0x48f   :  { %12181 = vmatmul.mubr.bf16.vlgmr.msra.gmra.mrb[228].mxu0 %v15026_v19 }
 0x4cf   :  { %v13811_v36 = vpop.f32.mrb[228].mxu1 }
 0x4d0   :  { %v13812_v59 = vpop.f32.mrb[229].mxu1 }
 0x4d1   :  { %v13813_v20 = vadd.f32 %v13812_v59, %v13811_v36  ;;  %v13814_v5 = vpop.f32.mrb[230].mxu1 }
 0x4d2   :  { %v13815_v51 = vpop.f32.mrb[231].mxu1 }
 0x4d3   :  { %v12060_v56 = vadd.f32 %v13813_v20, %v22841_v8  ;;  %v13816_v0 = vadd.f32 %v13815_v51, %v13814_v5 }
 0x4d5   :  { %v12063_v44 = vadd.f32 %v13816_v0, %v22846_v3 }
 0x4e3   :  { %v13833_v49 = vpop.f32.mrb[224].mxu0 }
 0x4e4   :  { %v13834_v29 = vpop.f32.mrb[225].mxu0 }
 0x4e5   :  { %v13835_v50 = vadd.f32 %v13834_v29, %v13833_v49  ;;  %v13836_v46 = vpop.f32.mrb[226].mxu0 }
 0x4e6   :  { %v13837_v60 = vpop.f32.mrb[227].mxu0 }
 0x4e7   :  { %v12101_v34 = vadd.f32 %v13835_v50, %v12060_v56  ;;  %v13838_v26 = vadd.f32 %v13837_v60, %v13836_v46 }
 0x4e9   :  { %v12104_v30 = vadd.f32 %v13838_v26, %v12063_v44 }
 0x553   :  { %v13855_v17 = vpop.f32.mrb[232].mxu1 }
 0x554   :  { %v13856_v54 = vpop.f32.mrb[233].mxu1 }
 0x555   :  { %v13857_v53 = vadd.f32 %v13856_v54, %v13855_v17  ;;  %v13858_v48 = vpop.f32.mrb[234].mxu1 }
 0x556   :  { %v13859_v15 = vpop.f32.mrb[235].mxu1 }
 0x557   :  { %v12142_v27 = vadd.f32 %v13857_v53, %v12101_v34  ;;  %v13860_v13 = vadd.f32 %v13859_v15, %v13858_v48 }
 0x559   :  { %v12145_v43 = vadd.f32 %v13860_v13, %v12104_v30 }
 0x562   :  { %v13877_v8 = vpop.f32.mrb[228].mxu0 }
 0x563   :  { %v13878_v12 = vpop.f32.mrb[229].mxu0 }
 0x564   :  { %v13879_v24 = vadd.f32 %v13878_v12, %v13877_v8  ;;  %v13880_v3 = vpop.f32.mrb[230].mxu0 }
 0x565   :  { %v13881_v6 = vpop.f32.mrb[231].mxu0 }
 0x566   :  { %v12183_v57 = vadd.f32 %v13879_v24, %v12142_v27  ;;  %v13882_v22 = vadd.f32 %v13881_v6, %v13880_v3 }
 0x568   :  { %v12186_v16 = vadd.f32 %v13882_v22, %v12145_v43 }
 0x56a   :  { %v12189_v45 = vmax.f32 %v12183_v57, %v12186_v16 }
 0x56c   :  { %v12190_v4 = vrot.slane %v12189_v45, 4 }
 0x56e   :  { %v12191_v40 = vmax.f32 %v12189_v45, %v12190_v4 }
 0x570   :  { %v12192_v33 = vrot.slane %v12191_v40, 2 }
 0x572   :  { %v12193_v9 = vmax.f32 %v12191_v40, %v12192_v33 }
 0x574   :  { %v12194_v35 = vrot.slane %v12193_v9, 1 }
 0x576   :  { %v12195_v23 = vmax.f32 %v12193_v9, %v12194_v35 }
 0x578   :  { %v12196_v28 = vsub.f32 %v12183_v57, %v12195_v23  ;;  %v12197_v42 = vsub.f32 %v12186_v16, %v12195_v23 }
 0x57a   :  { %v12198_v37 = vmul.f32 1.442695, %v12196_v28  ;;  %v12200_v38 = vmul.f32 1.442695, %v12197_v42 }
 0x57c   :  { %16693 = vpow2.f32 %v12198_v37 }
 0x57d   :  { %16695 = vpow2.f32 %v12200_v38 }
 0x586   :  { %v16694_v62 = vpop.eup %16693 }
 0x587   :  { %v16696_v41 = vpop.eup %16695 }
 0x588   :  { %v12202_v52 = vadd.f32 %v16696_v41, %v16694_v62 }
 0x58a   :  { %v12203_v39 = vrot.slane %v12202_v52, 4 }
 0x58c   :  { %v12204_v47 = vadd.f32 %v12203_v39, %v12202_v52 }
 0x58e   :  { %v12205_v2 = vrot.slane %v12204_v47, 2 }
 0x590   :  { %v12206_v21 = vadd.f32 %v12205_v2, %v12204_v47 }
 0x592   :  { %v12207_v10 = vrot.slane %v12206_v21, 1 }
 0x594   :  { %v12208_v25 = vadd.f32 %v12207_v10, %v12206_v21 }
 0x596   :  { %16697 = vlog2.f32 %v12208_v25 }
 0x5a0   :  { %v16698_v1 = vpop.eup %16697 }
 0x5a1   :  { %v12210_v32 = vmul.f32 0.6931472, %v16698_v1 }
 0x5a3   :  { %v12211_v14 = vsub.f32 %v12196_v28, %v12210_v32  ;;  %v12212_v18 = vsub.f32 %v12197_v42, %v12210_v32 }
 0x5a5   :  { %12213 = vst [vmem:[%s22867_s5] sm:$0xff] %v12211_v14  ;;  %12214 = vst [vmem:[%s22867_s5 + $0x8] sm:$0xff] %v12212_v18 }

</bundles_post_ra>
